<compile_context>
chip_gen: v7x
topology: tpu7x:2x2x1
jax: 0.10.0
libtpu: 0.0.40
codegen_flags: <defaults>
</compile_context>

<pallas_src>
import functools

import jax
import jax.numpy as jnp
from jax import lax
from jax.experimental import pallas as pl
from jax.experimental.pallas import tpu as pltpu

LANE = 128


def _round_up(x, m):
    return (x + m - 1) // m * m


# -----------------------------------------------------------------------------
# Pallas kernel 1 (fused): per-frame 2-D conv features AND per-clip 3-D conv
# features from the SAME patch block, read from HBM once per batch item.
# -----------------------------------------------------------------------------
def _conv_feat_kernel(p_ref, wcat_ref, b2_ref, b3_ref, o2_ref, o3_ref, ycat_ref):
    # p_ref:    (T, P, Kp)  bf16   one batch item's per-frame im2col patches
    # wcat_ref: (Kp, Fcat)  bf16   [w2d | w3d[0] | ... | w3d[L-1]]  (resident)
    # b2_ref:   (1, F2p)    f32    2-D conv bias
    # b3_ref:   (1, F3p)    f32    3-D conv bias
    # o2_ref:   (T, F2p)    bf16   per-frame pooled 2-D features
    # o3_ref:   (Nc, F3p)   bf16   per-clip pooled 3-D features
    # ycat_ref: (T*P, Fcat) f32    VMEM scratch holding the raw conv maps
    T, P, Kp = p_ref.shape
    F2p = o2_ref.shape[-1]
    Nc, F3p = o3_ref.shape
    Fcat = wcat_ref.shape[-1]
    L = (Fcat - F2p) // F3p
    inv_p = 1.0 / float(P)
    NB = 256                       # >= 256 output lanes per MXU pass (v6e/v7x)

    # 1) One wide matmul stream per frame into the f32 scratch.  For frame t
    #    only the temporal slices l with l <= t <= l + Nc - 1 feed a valid
    #    clip, so only those (static) column ranges are computed.
    for t in range(T):
        pt = p_ref[t]                                  # (P, Kp) bf16
        l_lo = max(0, t - (Nc - 1))
        l_hi = min(L - 1, t)
        if l_lo == 0:                                  # 2-D block adjacent to l=0
            ranges = [(0, F2p + (l_hi + 1) * F3p)]
        else:
            ranges = [(0, F2p), (F2p + l_lo * F3p, F2p + (l_hi + 1) * F3p)]
        for c0, c1 in ranges:
            for j0 in range(c0, c1, NB):               # 128-lane aligned chunks
                j1 = min(j0 + NB, c1)
                ycat_ref[t * P:(t + 1) * P, j0:j1] = jnp.dot(
                    pt, wcat_ref[:, j0:j1], preferred_element_type=jnp.float32)

    # 2) 2-D path: bias + ReLU + global average pool per frame; one dense
    #    (T, F2p) bf16 store instead of T single-row masked stores.
    b2 = b2_ref[...]
    rows2 = []
    for t in range(T):
        y = jnp.maximum(ycat_ref[t * P:(t + 1) * P, 0:F2p] + b2, 0.0)
        rows2.append(jnp.sum(y, axis=0, keepdims=True) * inv_p)
    o2_ref[...] = jnp.concatenate(rows2, axis=0).astype(o2_ref.dtype)

    # 3) 3-D path: temporal sum of lane/sublane-aligned scratch slabs, then
    #    bias + ReLU + GAP; one dense (Nc, F3p) bf16 store.
    b3 = b3_ref[...]
    rows3 = []
    for n in range(Nc):
        acc = ycat_ref[n * P:(n + 1) * P, F2p:F2p + F3p]
        for l in range(1, L):
            acc = acc + ycat_ref[(n + l) * P:(n + l + 1) * P,
                                 F2p + l * F3p:F2p + (l + 1) * F3p]
        y = jnp.maximum(acc + b3, 0.0)
        rows3.append(jnp.sum(y, axis=0, keepdims=True) * inv_p)
    o3_ref[...] = jnp.concatenate(rows3, axis=0).astype(o3_ref.dtype)


def conv_features(patches, wcat, b2, b3, *, clip_len):
    # patches: (B, T, P, Kp) bf16 -> ((B, T, F2p) bf16, (B, Nc, F3p) bf16)
    B, T, P, Kp = patches.shape
    F2p = b2.shape[1]
    F3p = b3.shape[1]
    Fcat = wcat.shape[1]
    Nc = T - clip_len + 1
    return pl.pallas_call(
        _conv_feat_kernel,
        out_shape=(jax.ShapeDtypeStruct((B, T, F2p), jnp.bfloat16),
                   jax.ShapeDtypeStruct((B, Nc, F3p), jnp.bfloat16)),
        grid_spec=pltpu.PrefetchScalarGridSpec(
            num_scalar_prefetch=0,
            grid=(B,),
            in_specs=[pl.BlockSpec((None, T, P, Kp), lambda b: (b, 0, 0, 0)),
                      pl.BlockSpec((Kp, Fcat), lambda b: (0, 0)),     # resident
                      pl.BlockSpec((1, F2p), lambda b: (0, 0)),       # resident
                      pl.BlockSpec((1, F3p), lambda b: (0, 0))],      # resident
            out_specs=[pl.BlockSpec((None, T, F2p), lambda b: (b, 0, 0)),
                       pl.BlockSpec((None, Nc, F3p), lambda b: (b, 0, 0))],
            scratch_shapes=[pltpu.VMEM((T * P, Fcat), jnp.float32)],
        ),
        compiler_params=pltpu.CompilerParams(
            dimension_semantics=("parallel",),
            # explicit budget: 2x patch block (bf16) + resident weights +
            # (T*P, Fcat) f32 scratch ~= 8 MiB at these shapes.
            vmem_limit_bytes=32 * 1024 * 1024),
    )(patches, wcat, b2, b3)


# -----------------------------------------------------------------------------
# Pallas kernel 2: BOTH LSTMs in one call, grid=(2,) "parallel".
# Program 0 = frame LSTM (T real steps), program 1 = clip LSTM (Nc real steps,
# inputs zero-padded to T; extra steps are masked out of the carried state).
# PyTorch gate order (i, f, g, o); zero initial (h, c); single summed bias
# (PyTorch's b_ih + b_hh must be pre-summed when importing real weights).
# -----------------------------------------------------------------------------
def _make_dual_lstm_kernel(steps_frame, steps_clip):
    def kernel(x_ref, wih_ref, whh_ref, b_ref, y_ref, hn_ref, cn_ref):
        # x_ref:   (B*T, Ip)   bf16  batch-major rows (row = b*T + t)
        # wih_ref: (Ip, 4*Hp)  bf16  lane-aligned gate slabs
        # whh_ref: (Hp, 4*Hp)  bf16
        # b_ref:   (1, 4*Hp)   f32
        # y_ref:   (T*B, Hp)   bf16  time-major rows (row = t*B + b)
        # hn_ref:  (B, Hp)     f32 ; cn_ref: (B, Hp) f32
        B, Hp = hn_ref.shape
        BT = x_ref.shape[0]
        Tm = BT // B
        n_valid = jnp.where(pl.program_id(0) == 0, steps_frame, steps_clip)

        # All input projections in a single MXU pass; bias folded in once.
        xg = jnp.dot(x_ref[...], wih_ref[...],
                     preferred_element_type=jnp.float32) + b_ref[...]

        whh = whh_ref[...]                    # recurrent weights stay resident
        h = jnp.zeros((B, Hp), jnp.float32)
        c = jnp.zeros((B, Hp), jnp.float32)
        hs = []
        for t in range(Tm):                   # short static sequence: unrolled
            # batch-major gather of step t's rows (b*Tm + t); equivalent to a
            # strided xg[pl.ds(t, B, stride=Tm)] — kept as static row slices
            # since B is tiny.
            gx = jnp.concatenate(
                [xg[b * Tm + t:b * Tm + t + 1, :] for b in range(B)], axis=0)
            gates = gx + jnp.dot(h.astype(whh.dtype), whh,
                                 preferred_element_type=jnp.float32)
            i = jax.nn.sigmoid(gates[:, 0 * Hp:1 * Hp])
            f = jax.nn.sigmoid(gates[:, 1 * Hp:2 * Hp])
            g = jnp.tanh(gates[:, 2 * Hp:3 * Hp])
            o = jax.nn.sigmoid(gates[:, 3 * Hp:4 * Hp])
            c_new = f * c + i * g
            h_new = o * jnp.tanh(c_new)
            keep = t < n_valid                # clip program runs fewer real steps
            h = jnp.where(keep, h_new, h)
            c = jnp.where(keep, c_new, c)
            hs.append(h)
        # ONE dense, full-tile, bf16 write of every hidden state (time-major).
        y_ref[...] = jnp.concatenate(hs, axis=0).astype(y_ref.dtype)
        hn_ref[...] = h
        cn_ref[...] = c
    return kernel


def dual_lstm(x_all, wih_all, whh_all, b_all, *, batch, steps_frame, steps_clip):
    # x_all: (2, B*T, Ip) bf16 -> (y (2, T*B, Hp) bf16, hn/cn (2, B, Hp) f32)
    S, BT, Ipm = x_all.shape
    Hp = whh_all.shape[1]
    kern = _make_dual_lstm_kernel(steps_frame, steps_clip)
    return pl.pallas_call(
        kern,
        out_shape=(jax.ShapeDtypeStruct((S, BT, Hp), jnp.bfloat16),
                   jax.ShapeDtypeStruct((S, batch, Hp), jnp.float32),
                   jax.ShapeDtypeStruct((S, batch, Hp), jnp.float32)),
        grid_spec=pltpu.PrefetchScalarGridSpec(
            num_scalar_prefetch=0,
            grid=(S,),
            in_specs=[pl.BlockSpec((None, BT, Ipm), lambda s: (s, 0, 0)),
                      pl.BlockSpec((None, Ipm, 4 * Hp), lambda s: (s, 0, 0)),
                      pl.BlockSpec((None, Hp, 4 * Hp), lambda s: (s, 0, 0)),
                      pl.BlockSpec((None, 1, 4 * Hp), lambda s: (s, 0, 0))],
            out_specs=[pl.BlockSpec((None, BT, Hp), lambda s: (s, 0, 0)),
                       pl.BlockSpec((None, batch, Hp), lambda s: (s, 0, 0)),
                       pl.BlockSpec((None, batch, Hp), lambda s: (s, 0, 0))],
        ),
        compiler_params=pltpu.CompilerParams(
            dimension_semantics=("parallel",)),   # v7x: one LSTM per TensorCore
    )(x_all, wih_all, whh_all, b_all)


# -----------------------------------------------------------------------------
# Parameter padding helpers (trace-time, run under jit)
# -----------------------------------------------------------------------------
def _pad_conv2d_params(w, b, kp, fp):
    K, F = w.shape
    wp = jnp.zeros((kp, fp), jnp.float32).at[:K, :F].set(w)
    bp = jnp.zeros((1, fp), jnp.float32).at[:, :F].set(b)
    return wp.astype(jnp.bfloat16), bp


def _pad_conv3d_params(w, b, kp, fp):
    L, K, F = w.shape
    wp = jnp.zeros((L, kp, fp), jnp.float32).at[:, :K, :F].set(w)
    bp = jnp.zeros((1, fp), jnp.float32).at[:, :F].set(b)
    return wp.astype(jnp.bfloat16), bp


def _pad_lstm_params(wih, whh, b, ip, hp):
    # Re-lay out PyTorch-style (i|f|g|o) gate blocks so each gate occupies its
    # own lane-aligned slab of width hp.  Padded columns get zero weight AND
    # zero bias, so padded hidden/cell lanes remain exactly 0 forever.
    I, _ = wih.shape
    H = whh.shape[0]
    wih_p = jnp.zeros((ip, 4 * hp), jnp.float32)
    whh_p = jnp.zeros((hp, 4 * hp), jnp.float32)
    b_p = jnp.zeros((1, 4 * hp), jnp.float32)
    for k in range(4):
        wih_p = wih_p.at[:I, k * hp:k * hp + H].set(wih[:, k * H:(k + 1) * H])
        whh_p = whh_p.at[:H, k * hp:k * hp + H].set(whh[:, k * H:(k + 1) * H])
        b_p = b_p.at[:, k * hp:k * hp + H].set(b[:, k * H:(k + 1) * H])
    return wih_p.astype(jnp.bfloat16), whh_p.astype(jnp.bfloat16), b_p


# -----------------------------------------------------------------------------
# Parameters + full forward (mirrors EncoderPlus.forward)
# -----------------------------------------------------------------------------
def init_params(key, C=3, clip_len=5, feat2d=64, feat3d=64, hidden=32):
    ks = jax.random.split(key, 10)
    return {
        "w2d": jax.random.normal(ks[0], (C * 9, feat2d), jnp.float32) * 0.1,
        "b2d": jax.random.normal(ks[1], (1, feat2d), jnp.float32) * 0.1,
        # 3-D conv kernel stored as temporal slices: (L, C*3*3, feat3d)
        "w3d": jax.random.normal(ks[2], (clip_len, C * 9, feat3d), jnp.float32) * 0.05,
        "b3d": jax.random.normal(ks[3], (1, feat3d), jnp.float32) * 0.1,
        "wih_f": jax.random.normal(ks[4], (feat2d, 4 * hidden), jnp.float32) * 0.1,
        "whh_f": jax.random.normal(ks[5], (hidden, 4 * hidden), jnp.float32) * 0.1,
        "b_f": jax.random.normal(ks[6], (1, 4 * hidden), jnp.float32) * 0.1,
        "wih_c": jax.random.normal(ks[7], (feat3d, 4 * hidden), jnp.float32) * 0.1,
        "whh_c": jax.random.normal(ks[8], (hidden, 4 * hidden), jnp.float32) * 0.1,
        "b_c": jax.random.normal(ks[9], (1, 4 * hidden), jnp.float32) * 0.1,
    }


@functools.partial(jax.jit, static_argnames=("clip_len",))
def encoder_plus_forward(x, params, clip_len=5):
    # x: (B, C, T, H, W) float32
    B, C, T, H, W = x.shape
    P = H * W
    L = clip_len
    Nc = T - L + 1
    F2 = params["w2d"].shape[1]
    F3 = params["w3d"].shape[2]
    Hh = params["whh_f"].shape[0]

    K2 = C * 9
    K2p = _round_up(K2, LANE)
    F2p = _round_up(F2, LANE)
    F3p = _round_up(F3, LANE)
    Hp = _round_up(Hh, LANE)
    Ipm = max(F2p, F3p)

    # ---- shared per-frame 2-D im2col patches, read ONCE by the fused kernel ----
    # TODO(synk): build the patches inside the kernel from raw frame tiles
    # (shifted slices / pltpu.roll) to remove this 9x im2col HBM expansion.
    x2d = jnp.transpose(x, (0, 2, 1, 3, 4)).reshape(B * T, C, H, W)
    p2d = lax.conv_general_dilated_patches(
        x2d, filter_shape=(3, 3), window_strides=(1, 1),
        padding=((1, 1), (1, 1)))                                # (B*T, C*9, H, W)
    p2d = jnp.transpose(p2d, (0, 2, 3, 1)).reshape(B, T, P, K2)
    p2d = jnp.pad(p2d, ((0, 0), (0, 0), (0, 0), (0, K2p - K2))).astype(jnp.bfloat16)

    # ---- concatenated conv weights: one wide MXU RHS shared by both paths ----
    w2p, b2p = _pad_conv2d_params(params["w2d"], params["b2d"], K2p, F2p)
    w3p, b3p = _pad_conv3d_params(params["w3d"], params["b3d"], K2p, F3p)
    wcat = jnp.concatenate([w2p] + [w3p[l] for l in range(L)], axis=1)

    feat2d, feat3d = conv_features(p2d, wcat, b2p, b3p, clip_len=L)
    # feat2d: (B, T, F2p) bf16 ; feat3d: (B, Nc, F3p) bf16  (no transpose/cast)

    # ---- both LSTMs in ONE pallas_call (grid=(2,) "parallel") ----
    wih_f, whh_f, b_f = _pad_lstm_params(params["wih_f"], params["whh_f"],
                                         params["b_f"], Ipm, Hp)
    wih_c, whh_c, b_c = _pad_lstm_params(params["wih_c"], params["whh_c"],
                                         params["b_c"], Ipm, Hp)
    x_f = feat2d
    x_c = jnp.pad(feat3d, ((0, 0), (0, T - Nc), (0, 0)))         # time-pad to T
    if F2p < Ipm:
        x_f = jnp.pad(x_f, ((0, 0), (0, 0), (0, Ipm - F2p)))
    if F3p < Ipm:
        x_c = jnp.pad(x_c, ((0, 0), (0, 0), (0, Ipm - F3p)))
    x_all = jnp.stack([x_f.reshape(B * T, Ipm), x_c.reshape(B * T, Ipm)], axis=0)
    wih_all = jnp.stack([wih_f, wih_c], axis=0)
    whh_all = jnp.stack([whh_f, whh_c], axis=0)
    b_all = jnp.stack([b_f, b_c], axis=0)

    y_all, hn_all, cn_all = dual_lstm(x_all, wih_all, whh_all, b_all,
                                      batch=B, steps_frame=T, steps_clip=Nc)

    # y is time-major (row = t*B + b); the remaining reorders are over tiny
    # (T*B, 128) bf16 slabs (the heavy feature transposes/casts are gone).
    y_f = y_all[0].reshape(T, B, Hp)
    y_c = y_all[1].reshape(T, B, Hp)[:Nc]
    frame_out = jnp.transpose(y_f, (1, 0, 2))[:, :, :Hh].astype(jnp.float32)
    clip_out = jnp.transpose(y_c, (1, 0, 2))[:, :, :Hh].astype(jnp.float32)
    frame_h_n = hn_all[0, :, :Hh]
    frame_c_n = cn_all[0, :, :Hh]
    clip_h_n = hn_all[1, :, :Hh]
    clip_c_n = cn_all[1, :, :Hh]
    return frame_out, (frame_h_n, frame_c_n), clip_out, (clip_h_n, clip_c_n)


# -----------------------------------------------------------------------------
# Pure-JAX f32 reference of the full forward (for correctness checks)
# -----------------------------------------------------------------------------
def _reference_forward(x, params, clip_len):
    B, C, T, H, W = x.shape
    P = H * W
    L = clip_len
    Nc = T - L + 1

    x2d = jnp.transpose(x, (0, 2, 1, 3, 4)).reshape(B * T, C, H, W)
    p2d = lax.conv_general_dilated_patches(
        x2d, (3, 3), (1, 1), ((1, 1), (1, 1)))
    p2d = jnp.transpose(p2d, (0, 2, 3, 1)).reshape(B * T, P, C * 9)

    feat2d = jnp.mean(jnp.maximum(
        jnp.einsum('npk,kf->npf', p2d, params["w2d"]) + params["b2d"], 0.0),
        axis=1).reshape(B, T, -1)

    def lstm(xs, wih, whh, b):
        Hn = whh.shape[0]
        Bn = xs.shape[1]

        def step(carry, xt):
            h, c = carry
            g = xt @ wih + h @ whh + b[0]
            i = jax.nn.sigmoid(g[:, :Hn])
            f = jax.nn.sigmoid(g[:, Hn:2 * Hn])
            gg = jnp.tanh(g[:, 2 * Hn:3 * Hn])
            o = jax.nn.sigmoid(g[:, 3 * Hn:])
            c = f * c + i * gg
            h = o * jnp.tanh(c)
            return (h, c), h

        (h, c), ys = lax.scan(step, (jnp.zeros((Bn, Hn)), jnp.zeros((Bn, Hn))), xs)
        return jnp.transpose(ys, (1, 0, 2)), h, c

    frame_out, fh, fc = lstm(jnp.transpose(feat2d, (1, 0, 2)),
                             params["wih_f"], params["whh_f"], params["b_f"])

    p2d_bt = p2d.reshape(B, T, P, C * 9)
    clip_feats = []
    for n in range(Nc):
        acc = sum(jnp.einsum('bpk,kf->bpf', p2d_bt[:, n + l], params["w3d"][l])
                  for l in range(L))
        clip_feats.append(jnp.mean(jnp.maximum(acc + params["b3d"], 0.0), axis=1))
    feat3d = jnp.stack(clip_feats, axis=1)                       # (B, Nc, F3)

    clip_out, ch, cc = lstm(jnp.transpose(feat3d, (1, 0, 2)),
                            params["wih_c"], params["whh_c"], params["b_c"])
    return frame_out, (fh, fc), clip_out, (ch, cc)


if __name__ == "__main__":
    B, C, T, H, W = 2, 3, 8, 16, 16
    clip_len = 5
    hidden = 32

    key = jax.random.PRNGKey(0)
    k_x, k_p = jax.random.split(key)
    x = jax.random.normal(k_x, (B, C, T, H, W), jnp.float32)
    params = init_params(k_p, C=C, clip_len=clip_len, hidden=hidden)

    outs = encoder_plus_forward(x, params, clip_len=clip_len)
    outs = jax.block_until_ready(outs)
    frame_out, (frame_h, frame_c), clip_out, (clip_h, clip_c) = outs

    # shape / sanity checks
    assert frame_out.shape == (B, T, hidden)
    assert frame_h.shape == (B, hidden) and frame_c.shape == (B, hidden)
    assert clip_out.shape == (B, T - clip_len + 1, hidden)
    assert clip_h.shape == (B, hidden) and clip_c.shape == (B, hidden)
    for a in (frame_out, frame_h, frame_c, clip_out, clip_h, clip_c):
        assert bool(jnp.all(jnp.isfinite(a)))

    # correctness vs a pure-JAX f32 reference (Pallas path uses bf16 matmuls
    # and bf16 feature/hidden-state stores, so tolerances are a bit looser)
    r_frame, (r_fh, r_fc), r_clip, (r_ch, r_cc) = _reference_forward(
        x, params, clip_len)
    tol = dict(atol=3e-2, rtol=3e-2)
    assert jnp.allclose(frame_out, r_frame, **tol)
    assert jnp.allclose(frame_h, r_fh, **tol)
    assert jnp.allclose(frame_c, r_fc, **tol)
    assert jnp.allclose(clip_out, r_clip, **tol)
    assert jnp.allclose(clip_h, r_ch, **tol)
    assert jnp.allclose(clip_c, r_cc, **tol)

    print("KERNEL_OK")
</pallas_src>

<mosaic_0001>
module attributes {stable_mosaic.version = 11 : i64} {
  func.func @_conv_feat_kernel(%arg0: i32, %arg1: memref<1x8x256x128xbf16, #tpu.memory_space<vmem>>, %arg2: memref<128x768xbf16, #tpu.memory_space<vmem>>, %arg3: memref<1x128xf32, #tpu.memory_space<vmem>>, %arg4: memref<1x128xf32, #tpu.memory_space<vmem>>, %arg5: memref<1x8x128xbf16, #tpu.memory_space<vmem>>, %arg6: memref<1x4x128xbf16, #tpu.memory_space<vmem>>, %arg7: memref<2048x768xf32, #tpu.memory_space<vmem>>) attributes {dimension_semantics = [#tpu.dimension_semantics<parallel>], iteration_bounds = array<i64: 2>, scalar_prefetch = 0 : i64, scratch_operands = 1 : i64, tpu.core_type = #tpu.core_type<tc>, window_params = [{transform_indices = @transform_0, window_bounds = array<i64: 1, 8, 256, 128>}, {pipeline_mode = #tpu.pipeline_mode<synchronous>, transform_indices = @transform_1, window_bounds = array<i64: 128, 768>}, {pipeline_mode = #tpu.pipeline_mode<synchronous>, transform_indices = @transform_2, window_bounds = array<i64: 1, 128>}, {pipeline_mode = #tpu.pipeline_mode<synchronous>, transform_indices = @transform_3, window_bounds = array<i64: 1, 128>}, {transform_indices = @transform_4, window_bounds = array<i64: 1, 8, 128>}, {transform_indices = @transform_5, window_bounds = array<i64: 1, 4, 128>}]} {
    %c0 = arith.constant 0 : index
    %c0_0 = arith.constant 0 : index
    %c0_1 = arith.constant 0 : index
    %c0_2 = arith.constant 0 : index
    %0 = vector.load %arg1[%c0, %c0_0, %c0_1, %c0_2] : memref<1x8x256x128xbf16, #tpu.memory_space<vmem>>, vector<1x1x256x128xbf16>
    %1 = vector.shape_cast %0 : vector<1x1x256x128xbf16> to vector<256x128xbf16>
    %c0_3 = arith.constant 0 : index
    %c0_4 = arith.constant 0 : index
    %2 = vector.load %arg2[%c0_3, %c0_4] : memref<128x768xbf16, #tpu.memory_space<vmem>>, vector<128x256xbf16>
    %cst = arith.constant dense<0.000000e+00> : vector<256x256xf32>
    %3 = tpu.matmul %1, %2, %cst {dimension_numbers = #tpu.dot_dimension_numbers<[1], [0], [0], [1], [0, 0, 1, 1], [], []>} : vector<256x128xbf16>, vector<128x256xbf16>, vector<256x256xf32> -> vector<256x256xf32>
    %c0_5 = arith.constant 0 : index
    %c0_6 = arith.constant 0 : index
    %4 = vector.load %arg7[%c0_5, %c0_6] : memref<2048x768xf32, #tpu.memory_space<vmem>>, vector<256x256xf32>
    tpu.vector_store %arg7[%c0_5, %c0_6], %3 {strides = array<i32>} : memref<2048x768xf32, #tpu.memory_space<vmem>>, vector<256x256xf32>,
    %c0_7 = arith.constant 0 : index
    %c1 = arith.constant 1 : index
    %c0_8 = arith.constant 0 : index
    %c0_9 = arith.constant 0 : index
    %5 = vector.load %arg1[%c0_7, %c1, %c0_8, %c0_9] : memref<1x8x256x128xbf16, #tpu.memory_space<vmem>>, vector<1x1x256x128xbf16>
    %6 = vector.shape_cast %5 : vector<1x1x256x128xbf16> to vector<256x128xbf16>
    %c0_10 = arith.constant 0 : index
    %c0_11 = arith.constant 0 : index
    %7 = vector.load %arg2[%c0_10, %c0_11] : memref<128x768xbf16, #tpu.memory_space<vmem>>, vector<128x256xbf16>
    %cst_12 = arith.constant dense<0.000000e+00> : vector<256x256xf32>
    %8 = tpu.matmul %6, %7, %cst_12 {dimension_numbers = #tpu.dot_dimension_numbers<[1], [0], [0], [1], [0, 0, 1, 1], [], []>} : vector<256x128xbf16>, vector<128x256xbf16>, vector<256x256xf32> -> vector<256x256xf32>
    %c256 = arith.constant 256 : index
    %c0_13 = arith.constant 0 : index
    %9 = vector.load %arg7[%c256, %c0_13] : memref<2048x768xf32, #tpu.memory_space<vmem>>, vector<256x256xf32>
    tpu.vector_store %arg7[%c256, %c0_13], %8 {strides = array<i32>} : memref<2048x768xf32, #tpu.memory_space<vmem>>, vector<256x256xf32>,
    %c0_14 = arith.constant 0 : index
    %c256_15 = arith.constant 256 : index
    %10 = vector.load %arg2[%c0_14, %c256_15] : memref<128x768xbf16, #tpu.memory_space<vmem>>, vector<128x128xbf16>
    %cst_16 = arith.constant dense<0.000000e+00> : vector<256x128xf32>
    %11 = tpu.matmul %6, %10, %cst_16 {dimension_numbers = #tpu.dot_dimension_numbers<[1], [0], [0], [1], [0, 0, 1, 1], [], []>} : vector<256x128xbf16>, vector<128x128xbf16>, vector<256x128xf32> -> vector<256x128xf32>
    %c256_17 = arith.constant 256 : index
    %c256_18 = arith.constant 256 : index
    %12 = vector.load %arg7[%c256_17, %c256_18] : memref<2048x768xf32, #tpu.memory_space<vmem>>, vector<256x128xf32>
    tpu.vector_store %arg7[%c256_17, %c256_18], %11 {strides = array<i32>} : memref<2048x768xf32, #tpu.memory_space<vmem>>, vector<256x128xf32>,
    %c0_19 = arith.constant 0 : index
    %c2 = arith.constant 2 : index
    %c0_20 = arith.constant 0 : index
    %c0_21 = arith.constant 0 : index
    %13 = vector.load %arg1[%c0_19, %c2, %c0_20, %c0_21] : memref<1x8x256x128xbf16, #tpu.memory_space<vmem>>, vector<1x1x256x128xbf16>
    %14 = vector.shape_cast %13 : vector<1x1x256x128xbf16> to vector<256x128xbf16>
    %c0_22 = arith.constant 0 : index
    %c0_23 = arith.constant 0 : index
    %15 = vector.load %arg2[%c0_22, %c0_23] : memref<128x768xbf16, #tpu.memory_space<vmem>>, vector<128x256xbf16>
    %cst_24 = arith.constant dense<0.000000e+00> : vector<256x256xf32>
    %16 = tpu.matmul %14, %15, %cst_24 {dimension_numbers = #tpu.dot_dimension_numbers<[1], [0], [0], [1], [0, 0, 1, 1], [], []>} : vector<256x128xbf16>, vector<128x256xbf16>, vector<256x256xf32> -> vector<256x256xf32>
    %c512 = arith.constant 512 : index
    %c0_25 = arith.constant 0 : index
    %17 = vector.load %arg7[%c512, %c0_25] : memref<2048x768xf32, #tpu.memory_space<vmem>>, vector<256x256xf32>
    tpu.vector_store %arg7[%c512, %c0_25], %16 {strides = array<i32>} : memref<2048x768xf32, #tpu.memory_space<vmem>>, vector<256x256xf32>,
    %c0_26 = arith.constant 0 : index
    %c256_27 = arith.constant 256 : index
    %18 = vector.load %arg2[%c0_26, %c256_27] : memref<128x768xbf16, #tpu.memory_space<vmem>>, vector<128x256xbf16>
    %cst_28 = arith.constant dense<0.000000e+00> : vector<256x256xf32>
    %19 = tpu.matmul %14, %18, %cst_28 {dimension_numbers = #tpu.dot_dimension_numbers<[1], [0], [0], [1], [0, 0, 1, 1], [], []>} : vector<256x128xbf16>, vector<128x256xbf16>, vector<256x256xf32> -> vector<256x256xf32>
    %c512_29 = arith.constant 512 : index
    %c256_30 = arith.constant 256 : index
    %20 = vector.load %arg7[%c512_29, %c256_30] : memref<2048x768xf32, #tpu.memory_space<vmem>>, vector<256x256xf32>
    tpu.vector_store %arg7[%c512_29, %c256_30], %19 {strides = array<i32>} : memref<2048x768xf32, #tpu.memory_space<vmem>>, vector<256x256xf32>,
    %c0_31 = arith.constant 0 : index
    %c3 = arith.constant 3 : index
    %c0_32 = arith.constant 0 : index
    %c0_33 = arith.constant 0 : index
    %21 = vector.load %arg1[%c0_31, %c3, %c0_32, %c0_33] : memref<1x8x256x128xbf16, #tpu.memory_space<vmem>>, vector<1x1x256x128xbf16>
    %22 = vector.shape_cast %21 : vector<1x1x256x128xbf16> to vector<256x128xbf16>
    %c0_34 = arith.constant 0 : index
    %c0_35 = arith.constant 0 : index
    %23 = vector.load %arg2[%c0_34, %c0_35] : memref<128x768xbf16, #tpu.memory_space<vmem>>, vector<128x256xbf16>
    %cst_36 = arith.constant dense<0.000000e+00> : vector<256x256xf32>
    %24 = tpu.matmul %22, %23, %cst_36 {dimension_numbers = #tpu.dot_dimension_numbers<[1], [0], [0], [1], [0, 0, 1, 1], [], []>} : vector<256x128xbf16>, vector<128x256xbf16>, vector<256x256xf32> -> vector<256x256xf32>
    %c768 = arith.constant 768 : index
    %c0_37 = arith.constant 0 : index
    %25 = vector.load %arg7[%c768, %c0_37] : memref<2048x768xf32, #tpu.memory_space<vmem>>, vector<256x256xf32>
    tpu.vector_store %arg7[%c768, %c0_37], %24 {strides = array<i32>} : memref<2048x768xf32, #tpu.memory_space<vmem>>, vector<256x256xf32>,
    %c0_38 = arith.constant 0 : index
    %c256_39 = arith.constant 256 : index
    %26 = vector.load %arg2[%c0_38, %c256_39] : memref<128x768xbf16, #tpu.memory_space<vmem>>, vector<128x256xbf16>
    %cst_40 = arith.constant dense<0.000000e+00> : vector<256x256xf32>
    %27 = tpu.matmul %22, %26, %cst_40 {dimension_numbers = #tpu.dot_dimension_numbers<[1], [0], [0], [1], [0, 0, 1, 1], [], []>} : vector<256x128xbf16>, vector<128x256xbf16>, vector<256x256xf32> -> vector<256x256xf32>
    %c768_41 = arith.constant 768 : index
    %c256_42 = arith.constant 256 : index
    %28 = vector.load %arg7[%c768_41, %c256_42] : memref<2048x768xf32, #tpu.memory_space<vmem>>, vector<256x256xf32>
    tpu.vector_store %arg7[%c768_41, %c256_42], %27 {strides = array<i32>} : memref<2048x768xf32, #tpu.memory_space<vmem>>, vector<256x256xf32>,
    %c0_43 = arith.constant 0 : index
    %c512_44 = arith.constant 512 : index
    %29 = vector.load %arg2[%c0_43, %c512_44] : memref<128x768xbf16, #tpu.memory_space<vmem>>, vector<128x128xbf16>
    %cst_45 = arith.constant dense<0.000000e+00> : vector<256x128xf32>
    %30 = tpu.matmul %22, %29, %cst_45 {dimension_numbers = #tpu.dot_dimension_numbers<[1], [0], [0], [1], [0, 0, 1, 1], [], []>} : vector<256x128xbf16>, vector<128x128xbf16>, vector<256x128xf32> -> vector<256x128xf32>
    %c768_46 = arith.constant 768 : index
    %c512_47 = arith.constant 512 : index
    %31 = vector.load %arg7[%c768_46, %c512_47] : memref<2048x768xf32, #tpu.memory_space<vmem>>, vector<256x128xf32>
    tpu.vector_store %arg7[%c768_46, %c512_47], %30 {strides = array<i32>} : memref<2048x768xf32, #tpu.memory_space<vmem>>, vector<256x128xf32>,
    %c0_48 = arith.constant 0 : index
    %c4 = arith.constant 4 : index
    %c0_49 = arith.constant 0 : index
    %c0_50 = arith.constant 0 : index
    %32 = vector.load %arg1[%c0_48, %c4, %c0_49, %c0_50] : memref<1x8x256x128xbf16, #tpu.memory_space<vmem>>, vector<1x1x256x128xbf16>
    %33 = vector.shape_cast %32 : vector<1x1x256x128xbf16> to vector<256x128xbf16>
    %c0_51 = arith.constant 0 : index
    %c0_52 = arith.constant 0 : index
    %34 = vector.load %arg2[%c0_51, %c0_52] : memref<128x768xbf16, #tpu.memory_space<vmem>>, vector<128x128xbf16>
    %cst_53 = arith.constant dense<0.000000e+00> : vector<256x128xf32>
    %35 = tpu.matmul %33, %34, %cst_53 {dimension_numbers = #tpu.dot_dimension_numbers<[1], [0], [0], [1], [0, 0, 1, 1], [], []>} : vector<256x128xbf16>, vector<128x128xbf16>, vector<256x128xf32> -> vector<256x128xf32>
    %c1024 = arith.constant 1024 : index
    %c0_54 = arith.constant 0 : index
    %36 = vector.load %arg7[%c1024, %c0_54] : memref<2048x768xf32, #tpu.memory_space<vmem>>, vector<256x128xf32>
    tpu.vector_store %arg7[%c1024, %c0_54], %35 {strides = array<i32>} : memref<2048x768xf32, #tpu.memory_space<vmem>>, vector<256x128xf32>,
    %c0_55 = arith.constant 0 : index
    %c256_56 = arith.constant 256 : index
    %37 = vector.load %arg2[%c0_55, %c256_56] : memref<128x768xbf16, #tpu.memory_space<vmem>>, vector<128x256xbf16>
    %cst_57 = arith.constant dense<0.000000e+00> : vector<256x256xf32>
    %38 = tpu.matmul %33, %37, %cst_57 {dimension_numbers = #tpu.dot_dimension_numbers<[1], [0], [0], [1], [0, 0, 1, 1], [], []>} : vector<256x128xbf16>, vector<128x256xbf16>, vector<256x256xf32> -> vector<256x256xf32>
    %c1024_58 = arith.constant 1024 : index
    %c256_59 = arith.constant 256 : index
    %39 = vector.load %arg7[%c1024_58, %c256_59] : memref<2048x768xf32, #tpu.memory_space<vmem>>, vector<256x256xf32>
    tpu.vector_store %arg7[%c1024_58, %c256_59], %38 {strides = array<i32>} : memref<2048x768xf32, #tpu.memory_space<vmem>>, vector<256x256xf32>,
    %c0_60 = arith.constant 0 : index
    %c512_61 = arith.constant 512 : index
    %40 = vector.load %arg2[%c0_60, %c512_61] : memref<128x768xbf16, #tpu.memory_space<vmem>>, vector<128x256xbf16>
    %cst_62 = arith.constant dense<0.000000e+00> : vector<256x256xf32>
    %41 = tpu.matmul %33, %40, %cst_62 {dimension_numbers = #tpu.dot_dimension_numbers<[1], [0], [0], [1], [0, 0, 1, 1], [], []>} : vector<256x128xbf16>, vector<128x256xbf16>, vector<256x256xf32> -> vector<256x256xf32>
    %c1024_63 = arith.constant 1024 : index
    %c512_64 = arith.constant 512 : index
    %42 = vector.load %arg7[%c1024_63, %c512_64] : memref<2048x768xf32, #tpu.memory_space<vmem>>, vector<256x256xf32>
    tpu.vector_store %arg7[%c1024_63, %c512_64], %41 {strides = array<i32>} : memref<2048x768xf32, #tpu.memory_space<vmem>>, vector<256x256xf32>,
    %c0_65 = arith.constant 0 : index
    %c5 = arith.constant 5 : index
    %c0_66 = arith.constant 0 : index
    %c0_67 = arith.constant 0 : index
    %43 = vector.load %arg1[%c0_65, %c5, %c0_66, %c0_67] : memref<1x8x256x128xbf16, #tpu.memory_space<vmem>>, vector<1x1x256x128xbf16>
    %44 = vector.shape_cast %43 : vector<1x1x256x128xbf16> to vector<256x128xbf16>
    %c0_68 = arith.constant 0 : index
    %c0_69 = arith.constant 0 : index
    %45 = vector.load %arg2[%c0_68, %c0_69] : memref<128x768xbf16, #tpu.memory_space<vmem>>, vector<128x128xbf16>
    %cst_70 = arith.constant dense<0.000000e+00> : vector<256x128xf32>
    %46 = tpu.matmul %44, %45, %cst_70 {dimension_numbers = #tpu.dot_dimension_numbers<[1], [0], [0], [1], [0, 0, 1, 1], [], []>} : vector<256x128xbf16>, vector<128x128xbf16>, vector<256x128xf32> -> vector<256x128xf32>
    %c1280 = arith.constant 1280 : index
    %c0_71 = arith.constant 0 : index
    %47 = vector.load %arg7[%c1280, %c0_71] : memref<2048x768xf32, #tpu.memory_space<vmem>>, vector<256x128xf32>
    tpu.vector_store %arg7[%c1280, %c0_71], %46 {strides = array<i32>} : memref<2048x768xf32, #tpu.memory_space<vmem>>, vector<256x128xf32>,
    %c0_72 = arith.constant 0 : index
    %c384 = arith.constant 384 : index
    %48 = vector.load %arg2[%c0_72, %c384] : memref<128x768xbf16, #tpu.memory_space<vmem>>, vector<128x256xbf16>
    %cst_73 = arith.constant dense<0.000000e+00> : vector<256x256xf32>
    %49 = tpu.matmul %44, %48, %cst_73 {dimension_numbers = #tpu.dot_dimension_numbers<[1], [0], [0], [1], [0, 0, 1, 1], [], []>} : vector<256x128xbf16>, vector<128x256xbf16>, vector<256x256xf32> -> vector<256x256xf32>
    %c1280_74 = arith.constant 1280 : index
    %c384_75 = arith.constant 384 : index
    %50 = vector.load %arg7[%c1280_74, %c384_75] : memref<2048x768xf32, #tpu.memory_space<vmem>>, vector<256x256xf32>
    tpu.vector_store %arg7[%c1280_74, %c384_75], %49 {strides = array<i32>} : memref<2048x768xf32, #tpu.memory_space<vmem>>, vector<256x256xf32>,
    %c0_76 = arith.constant 0 : index
    %c640 = arith.constant 640 : index
    %51 = vector.load %arg2[%c0_76, %c640] : memref<128x768xbf16, #tpu.memory_space<vmem>>, vector<128x128xbf16>
    %cst_77 = arith.constant dense<0.000000e+00> : vector<256x128xf32>
    %52 = tpu.matmul %44, %51, %cst_77 {dimension_numbers = #tpu.dot_dimension_numbers<[1], [0], [0], [1], [0, 0, 1, 1], [], []>} : vector<256x128xbf16>, vector<128x128xbf16>, vector<256x128xf32> -> vector<256x128xf32>
    %c1280_78 = arith.constant 1280 : index
    %c640_79 = arith.constant 640 : index
    %53 = vector.load %arg7[%c1280_78, %c640_79] : memref<2048x768xf32, #tpu.memory_space<vmem>>, vector<256x128xf32>
    tpu.vector_store %arg7[%c1280_78, %c640_79], %52 {strides = array<i32>} : memref<2048x768xf32, #tpu.memory_space<vmem>>, vector<256x128xf32>,
    %c0_80 = arith.constant 0 : index
    %c6 = arith.constant 6 : index
    %c0_81 = arith.constant 0 : index
    %c0_82 = arith.constant 0 : index
    %54 = vector.load %arg1[%c0_80, %c6, %c0_81, %c0_82] : memref<1x8x256x128xbf16, #tpu.memory_space<vmem>>, vector<1x1x256x128xbf16>
    %55 = vector.shape_cast %54 : vector<1x1x256x128xbf16> to vector<256x128xbf16>
    %c0_83 = arith.constant 0 : index
    %c0_84 = arith.constant 0 : index
    %56 = vector.load %arg2[%c0_83, %c0_84] : memref<128x768xbf16, #tpu.memory_space<vmem>>, vector<128x128xbf16>
    %cst_85 = arith.constant dense<0.000000e+00> : vector<256x128xf32>
    %57 = tpu.matmul %55, %56, %cst_85 {dimension_numbers = #tpu.dot_dimension_numbers<[1], [0], [0], [1], [0, 0, 1, 1], [], []>} : vector<256x128xbf16>, vector<128x128xbf16>, vector<256x128xf32> -> vector<256x128xf32>
    %c1536 = arith.constant 1536 : index
    %c0_86 = arith.constant 0 : index
    %58 = vector.load %arg7[%c1536, %c0_86] : memref<2048x768xf32, #tpu.memory_space<vmem>>, vector<256x128xf32>
    tpu.vector_store %arg7[%c1536, %c0_86], %57 {strides = array<i32>} : memref<2048x768xf32, #tpu.memory_space<vmem>>, vector<256x128xf32>,
    %c0_87 = arith.constant 0 : index
    %c512_88 = arith.constant 512 : index
    %59 = vector.load %arg2[%c0_87, %c512_88] : memref<128x768xbf16, #tpu.memory_space<vmem>>, vector<128x256xbf16>
    %cst_89 = arith.constant dense<0.000000e+00> : vector<256x256xf32>
    %60 = tpu.matmul %55, %59, %cst_89 {dimension_numbers = #tpu.dot_dimension_numbers<[1], [0], [0], [1], [0, 0, 1, 1], [], []>} : vector<256x128xbf16>, vector<128x256xbf16>, vector<256x256xf32> -> vector<256x256xf32>
    %c1536_90 = arith.constant 1536 : index
    %c512_91 = arith.constant 512 : index
    %61 = vector.load %arg7[%c1536_90, %c512_91] : memref<2048x768xf32, #tpu.memory_space<vmem>>, vector<256x256xf32>
    tpu.vector_store %arg7[%c1536_90, %c512_91], %60 {strides = array<i32>} : memref<2048x768xf32, #tpu.memory_space<vmem>>, vector<256x256xf32>,
    %c0_92 = arith.constant 0 : index
    %c7 = arith.constant 7 : index
    %c0_93 = arith.constant 0 : index
    %c0_94 = arith.constant 0 : index
    %62 = vector.load %arg1[%c0_92, %c7, %c0_93, %c0_94] : memref<1x8x256x128xbf16, #tpu.memory_space<vmem>>, vector<1x1x256x128xbf16>
    %63 = vector.shape_cast %62 : vector<1x1x256x128xbf16> to vector<256x128xbf16>
    %c0_95 = arith.constant 0 : index
    %c0_96 = arith.constant 0 : index
    %64 = vector.load %arg2[%c0_95, %c0_96] : memref<128x768xbf16, #tpu.memory_space<vmem>>, vector<128x128xbf16>
    %cst_97 = arith.constant dense<0.000000e+00> : vector<256x128xf32>
    %65 = tpu.matmul %63, %64, %cst_97 {dimension_numbers = #tpu.dot_dimension_numbers<[1], [0], [0], [1], [0, 0, 1, 1], [], []>} : vector<256x128xbf16>, vector<128x128xbf16>, vector<256x128xf32> -> vector<256x128xf32>
    %c1792 = arith.constant 1792 : index
    %c0_98 = arith.constant 0 : index
    %66 = vector.load %arg7[%c1792, %c0_98] : memref<2048x768xf32, #tpu.memory_space<vmem>>, vector<256x128xf32>
    tpu.vector_store %arg7[%c1792, %c0_98], %65 {strides = array<i32>} : memref<2048x768xf32, #tpu.memory_space<vmem>>, vector<256x128xf32>,
    %c0_99 = arith.constant 0 : index
    %c640_100 = arith.constant 640 : index
    %67 = vector.load %arg2[%c0_99, %c640_100] : memref<128x768xbf16, #tpu.memory_space<vmem>>, vector<128x128xbf16>
    %cst_101 = arith.constant dense<0.000000e+00> : vector<256x128xf32>
    %68 = tpu.matmul %63, %67, %cst_101 {dimension_numbers = #tpu.dot_dimension_numbers<[1], [0], [0], [1], [0, 0, 1, 1], [], []>} : vector<256x128xbf16>, vector<128x128xbf16>, vector<256x128xf32> -> vector<256x128xf32>
    %c1792_102 = arith.constant 1792 : index
    %c640_103 = arith.constant 640 : index
    %69 = vector.load %arg7[%c1792_102, %c640_103] : memref<2048x768xf32, #tpu.memory_space<vmem>>, vector<256x128xf32>
    tpu.vector_store %arg7[%c1792_102, %c640_103], %68 {strides = array<i32>} : memref<2048x768xf32, #tpu.memory_space<vmem>>, vector<256x128xf32>,
    %c0_104 = arith.constant 0 : index
    %c0_105 = arith.constant 0 : index
    %70 = vector.load %arg3[%c0_104, %c0_105] : memref<1x128xf32, #tpu.memory_space<vmem>>, vector<1x128xf32>
    %c0_106 = arith.constant 0 : index
    %c0_107 = arith.constant 0 : index
    %71 = vector.load %arg7[%c0_106, %c0_107] : memref<2048x768xf32, #tpu.memory_space<vmem>>, vector<256x128xf32>
    %72 = vector.broadcast %70 : vector<1x128xf32> to vector<256x128xf32>
    %73 = arith.addf %71, %72 : vector<256x128xf32>
    %cst_108 = arith.constant 0.000000e+00 : f32
    %74 = vector.broadcast %cst_108 : f32 to vector<256x128xf32>
    %75 = arith.maximumf %73, %74 : vector<256x128xf32>
    %cst_109 = arith.constant dense<0.000000e+00> : vector<128xf32>
    %76 = vector.multi_reduction <add>, %75, %cst_109 [0] : vector<256x128xf32> to vector<128xf32>
    %77 = vector.shape_cast %76 : vector<128xf32> to vector<1x128xf32>
    %cst_110 = arith.constant 3.906250e-03 : f32
    %78 = vector.broadcast %cst_110 : f32 to vector<1x128xf32>
    %79 = arith.mulf %77, %78 : vector<1x128xf32>
    %c256_111 = arith.constant 256 : index
    %c0_112 = arith.constant 0 : index
    %80 = vector.load %arg7[%c256_111, %c0_112] : memref<2048x768xf32, #tpu.memory_space<vmem>>, vector<256x128xf32>
    %81 = vector.broadcast %70 : vector<1x128xf32> to vector<256x128xf32>
    %82 = arith.addf %80, %81 : vector<256x128xf32>
    %cst_113 = arith.constant 0.000000e+00 : f32
    %83 = vector.broadcast %cst_113 : f32 to vector<256x128xf32>
    %84 = arith.maximumf %82, %83 : vector<256x128xf32>
    %cst_114 = arith.constant dense<0.000000e+00> : vector<128xf32>
    %85 = vector.multi_reduction <add>, %84, %cst_114 [0] : vector<256x128xf32> to vector<128xf32>
    %86 = vector.shape_cast %85 : vector<128xf32> to vector<1x128xf32>
    %cst_115 = arith.constant 3.906250e-03 : f32
    %87 = vector.broadcast %cst_115 : f32 to vector<1x128xf32>
    %88 = arith.mulf %86, %87 : vector<1x128xf32>
    %c512_116 = arith.constant 512 : index
    %c0_117 = arith.constant 0 : index
    %89 = vector.load %arg7[%c512_116, %c0_117] : memref<2048x768xf32, #tpu.memory_space<vmem>>, vector<256x128xf32>
    %90 = vector.broadcast %70 : vector<1x128xf32> to vector<256x128xf32>
    %91 = arith.addf %89, %90 : vector<256x128xf32>
    %cst_118 = arith.constant 0.000000e+00 : f32
    %92 = vector.broadcast %cst_118 : f32 to vector<256x128xf32>
    %93 = arith.maximumf %91, %92 : vector<256x128xf32>
    %cst_119 = arith.constant dense<0.000000e+00> : vector<128xf32>
    %94 = vector.multi_reduction <add>, %93, %cst_119 [0] : vector<256x128xf32> to vector<128xf32>
    %95 = vector.shape_cast %94 : vector<128xf32> to vector<1x128xf32>
    %cst_120 = arith.constant 3.906250e-03 : f32
    %96 = vector.broadcast %cst_120 : f32 to vector<1x128xf32>
    %97 = arith.mulf %95, %96 : vector<1x128xf32>
    %c768_121 = arith.constant 768 : index
    %c0_122 = arith.constant 0 : index
    %98 = vector.load %arg7[%c768_121, %c0_122] : memref<2048x768xf32, #tpu.memory_space<vmem>>, vector<256x128xf32>
    %99 = vector.broadcast %70 : vector<1x128xf32> to vector<256x128xf32>
    %100 = arith.addf %98, %99 : vector<256x128xf32>
    %cst_123 = arith.constant 0.000000e+00 : f32
    %101 = vector.broadcast %cst_123 : f32 to vector<256x128xf32>
    %102 = arith.maximumf %100, %101 : vector<256x128xf32>
    %cst_124 = arith.constant dense<0.000000e+00> : vector<128xf32>
    %103 = vector.multi_reduction <add>, %102, %cst_124 [0] : vector<256x128xf32> to vector<128xf32>
    %104 = vector.shape_cast %103 : vector<128xf32> to vector<1x128xf32>
    %cst_125 = arith.constant 3.906250e-03 : f32
    %105 = vector.broadcast %cst_125 : f32 to vector<1x128xf32>
    %106 = arith.mulf %104, %105 : vector<1x128xf32>
    %c1024_126 = arith.constant 1024 : index
    %c0_127 = arith.constant 0 : index
    %107 = vector.load %arg7[%c1024_126, %c0_127] : memref<2048x768xf32, #tpu.memory_space<vmem>>, vector<256x128xf32>
    %108 = vector.broadcast %70 : vector<1x128xf32> to vector<256x128xf32>
    %109 = arith.addf %107, %108 : vector<256x128xf32>
    %cst_128 = arith.constant 0.000000e+00 : f32
    %110 = vector.broadcast %cst_128 : f32 to vector<256x128xf32>
    %111 = arith.maximumf %109, %110 : vector<256x128xf32>
    %cst_129 = arith.constant dense<0.000000e+00> : vector<128xf32>
    %112 = vector.multi_reduction <add>, %111, %cst_129 [0] : vector<256x128xf32> to vector<128xf32>
    %113 = vector.shape_cast %112 : vector<128xf32> to vector<1x128xf32>
    %cst_130 = arith.constant 3.906250e-03 : f32
    %114 = vector.broadcast %cst_130 : f32 to vector<1x128xf32>
    %115 = arith.mulf %113, %114 : vector<1x128xf32>
    %c1280_131 = arith.constant 1280 : index
    %c0_132 = arith.constant 0 : index
    %116 = vector.load %arg7[%c1280_131, %c0_132] : memref<2048x768xf32, #tpu.memory_space<vmem>>, vector<256x128xf32>
    %117 = vector.broadcast %70 : vector<1x128xf32> to vector<256x128xf32>
    %118 = arith.addf %116, %117 : vector<256x128xf32>
    %cst_133 = arith.constant 0.000000e+00 : f32
    %119 = vector.broadcast %cst_133 : f32 to vector<256x128xf32>
    %120 = arith.maximumf %118, %119 : vector<256x128xf32>
    %cst_134 = arith.constant dense<0.000000e+00> : vector<128xf32>
    %121 = vector.multi_reduction <add>, %120, %cst_134 [0] : vector<256x128xf32> to vector<128xf32>
    %122 = vector.shape_cast %121 : vector<128xf32> to vector<1x128xf32>
    %cst_135 = arith.constant 3.906250e-03 : f32
    %123 = vector.broadcast %cst_135 : f32 to vector<1x128xf32>
    %124 = arith.mulf %122, %123 : vector<1x128xf32>
    %c1536_136 = arith.constant 1536 : index
    %c0_137 = arith.constant 0 : index
    %125 = vector.load %arg7[%c1536_136, %c0_137] : memref<2048x768xf32, #tpu.memory_space<vmem>>, vector<256x128xf32>
    %126 = vector.broadcast %70 : vector<1x128xf32> to vector<256x128xf32>
    %127 = arith.addf %125, %126 : vector<256x128xf32>
    %cst_138 = arith.constant 0.000000e+00 : f32
    %128 = vector.broadcast %cst_138 : f32 to vector<256x128xf32>
    %129 = arith.maximumf %127, %128 : vector<256x128xf32>
    %cst_139 = arith.constant dense<0.000000e+00> : vector<128xf32>
    %130 = vector.multi_reduction <add>, %129, %cst_139 [0] : vector<256x128xf32> to vector<128xf32>
    %131 = vector.shape_cast %130 : vector<128xf32> to vector<1x128xf32>
    %cst_140 = arith.constant 3.906250e-03 : f32
    %132 = vector.broadcast %cst_140 : f32 to vector<1x128xf32>
    %133 = arith.mulf %131, %132 : vector<1x128xf32>
    %c1792_141 = arith.constant 1792 : index
    %c0_142 = arith.constant 0 : index
    %134 = vector.load %arg7[%c1792_141, %c0_142] : memref<2048x768xf32, #tpu.memory_space<vmem>>, vector<256x128xf32>
    %135 = vector.broadcast %70 : vector<1x128xf32> to vector<256x128xf32>
    %136 = arith.addf %134, %135 : vector<256x128xf32>
    %cst_143 = arith.constant 0.000000e+00 : f32
    %137 = vector.broadcast %cst_143 : f32 to vector<256x128xf32>
    %138 = arith.maximumf %136, %137 : vector<256x128xf32>
    %cst_144 = arith.constant dense<0.000000e+00> : vector<128xf32>
    %139 = vector.multi_reduction <add>, %138, %cst_144 [0] : vector<256x128xf32> to vector<128xf32>
    %140 = vector.shape_cast %139 : vector<128xf32> to vector<1x128xf32>
    %cst_145 = arith.constant 3.906250e-03 : f32
    %141 = vector.broadcast %cst_145 : f32 to vector<1x128xf32>
    %142 = arith.mulf %140, %141 : vector<1x128xf32>
    %143 = tpu.concatenate %79, %88, %97, %106, %115, %124, %133, %142 in 0 : vector<1x128xf32>, vector<1x128xf32>, vector<1x128xf32>, vector<1x128xf32>, vector<1x128xf32>, vector<1x128xf32>, vector<1x128xf32>, vector<1x128xf32> -> vector<8x128xf32>
    %144 = arith.truncf %143 : vector<8x128xf32> to vector<8x128xbf16>
    %c0_146 = arith.constant 0 : index
    %c0_147 = arith.constant 0 : index
    %c0_148 = arith.constant 0 : index
    %145 = vector.load %arg5[%c0_146, %c0_147, %c0_148] : memref<1x8x128xbf16, #tpu.memory_space<vmem>>, vector<1x8x128xbf16>
    %146 = vector.shape_cast %145 : vector<1x8x128xbf16> to vector<8x128xbf16>
    %147 = vector.shape_cast %144 : vector<8x128xbf16> to vector<1x8x128xbf16>
    tpu.vector_store %arg5[%c0_146, %c0_147, %c0_148], %147 {strides = array<i32>} : memref<1x8x128xbf16, #tpu.memory_space<vmem>>, vector<1x8x128xbf16>,
    %c0_149 = arith.constant 0 : index
    %c0_150 = arith.constant 0 : index
    %148 = vector.load %arg4[%c0_149, %c0_150] : memref<1x128xf32, #tpu.memory_space<vmem>>, vector<1x128xf32>
    %c0_151 = arith.constant 0 : index
    %c128 = arith.constant 128 : index
    %149 = vector.load %arg7[%c0_151, %c128] : memref<2048x768xf32, #tpu.memory_space<vmem>>, vector<256x128xf32>
    %c256_152 = arith.constant 256 : index
    %c256_153 = arith.constant 256 : index
    %150 = vector.load %arg7[%c256_152, %c256_153] : memref<2048x768xf32, #tpu.memory_space<vmem>>, vector<256x128xf32>
    %151 = arith.addf %149, %150 : vector<256x128xf32>
    %c512_154 = arith.constant 512 : index
    %c384_155 = arith.constant 384 : index
    %152 = vector.load %arg7[%c512_154, %c384_155] : memref<2048x768xf32, #tpu.memory_space<vmem>>, vector<256x128xf32>
    %153 = arith.addf %151, %152 : vector<256x128xf32>
    %c768_156 = arith.constant 768 : index
    %c512_157 = arith.constant 512 : index
    %154 = vector.load %arg7[%c768_156, %c512_157] : memref<2048x768xf32, #tpu.memory_space<vmem>>, vector<256x128xf32>
    %155 = arith.addf %153, %154 : vector<256x128xf32>
    %c1024_158 = arith.constant 1024 : index
    %c640_159 = arith.constant 640 : index
    %156 = vector.load %arg7[%c1024_158, %c640_159] : memref<2048x768xf32, #tpu.memory_space<vmem>>, vector<256x128xf32>
    %157 = arith.addf %155, %156 : vector<256x128xf32>
    %158 = vector.broadcast %148 : vector<1x128xf32> to vector<256x128xf32>
    %159 = arith.addf %157, %158 : vector<256x128xf32>
    %cst_160 = arith.constant 0.000000e+00 : f32
    %160 = vector.broadcast %cst_160 : f32 to vector<256x128xf32>
    %161 = arith.maximumf %159, %160 : vector<256x128xf32>
    %cst_161 = arith.constant dense<0.000000e+00> : vector<128xf32>
    %162 = vector.multi_reduction <add>, %161, %cst_161 [0] : vector<256x128xf32> to vector<128xf32>
    %163 = vector.shape_cast %162 : vector<128xf32> to vector<1x128xf32>
    %cst_162 = arith.constant 3.906250e-03 : f32
    %164 = vector.broadcast %cst_162 : f32 to vector<1x128xf32>
    %165 = arith.mulf %163, %164 : vector<1x128xf32>
    %c256_163 = arith.constant 256 : index
    %c128_164 = arith.constant 128 : index
    %166 = vector.load %arg7[%c256_163, %c128_164] : memref<2048x768xf32, #tpu.memory_space<vmem>>, vector<256x128xf32>
    %c512_165 = arith.constant 512 : index
    %c256_166 = arith.constant 256 : index
    %167 = vector.load %arg7[%c512_165, %c256_166] : memref<2048x768xf32, #tpu.memory_space<vmem>>, vector<256x128xf32>
    %168 = arith.addf %166, %167 : vector<256x128xf32>
    %c768_167 = arith.constant 768 : index
    %c384_168 = arith.constant 384 : index
    %169 = vector.load %arg7[%c768_167, %c384_168] : memref<2048x768xf32, #tpu.memory_space<vmem>>, vector<256x128xf32>
    %170 = arith.addf %168, %169 : vector<256x128xf32>
    %c1024_169 = arith.constant 1024 : index
    %c512_170 = arith.constant 512 : index
    %171 = vector.load %arg7[%c1024_169, %c512_170] : memref<2048x768xf32, #tpu.memory_space<vmem>>, vector<256x128xf32>
    %172 = arith.addf %170, %171 : vector<256x128xf32>
    %c1280_171 = arith.constant 1280 : index
    %c640_172 = arith.constant 640 : index
    %173 = vector.load %arg7[%c1280_171, %c640_172] : memref<2048x768xf32, #tpu.memory_space<vmem>>, vector<256x128xf32>
    %174 = arith.addf %172, %173 : vector<256x128xf32>
    %175 = vector.broadcast %148 : vector<1x128xf32> to vector<256x128xf32>
    %176 = arith.addf %174, %175 : vector<256x128xf32>
    %cst_173 = arith.constant 0.000000e+00 : f32
    %177 = vector.broadcast %cst_173 : f32 to vector<256x128xf32>
    %178 = arith.maximumf %176, %177 : vector<256x128xf32>
    %cst_174 = arith.constant dense<0.000000e+00> : vector<128xf32>
    %179 = vector.multi_reduction <add>, %178, %cst_174 [0] : vector<256x128xf32> to vector<128xf32>
    %180 = vector.shape_cast %179 : vector<128xf32> to vector<1x128xf32>
    %cst_175 = arith.constant 3.906250e-03 : f32
    %181 = vector.broadcast %cst_175 : f32 to vector<1x128xf32>
    %182 = arith.mulf %180, %181 : vector<1x128xf32>
    %c512_176 = arith.constant 512 : index
    %c128_177 = arith.constant 128 : index
    %183 = vector.load %arg7[%c512_176, %c128_177] : memref<2048x768xf32, #tpu.memory_space<vmem>>, vector<256x128xf32>
    %c768_178 = arith.constant 768 : index
    %c256_179 = arith.constant 256 : index
    %184 = vector.load %arg7[%c768_178, %c256_179] : memref<2048x768xf32, #tpu.memory_space<vmem>>, vector<256x128xf32>
    %185 = arith.addf %183, %184 : vector<256x128xf32>
    %c1024_180 = arith.constant 1024 : index
    %c384_181 = arith.constant 384 : index
    %186 = vector.load %arg7[%c1024_180, %c384_181] : memref<2048x768xf32, #tpu.memory_space<vmem>>, vector<256x128xf32>
    %187 = arith.addf %185, %186 : vector<256x128xf32>
    %c1280_182 = arith.constant 1280 : index
    %c512_183 = arith.constant 512 : index
    %188 = vector.load %arg7[%c1280_182, %c512_183] : memref<2048x768xf32, #tpu.memory_space<vmem>>, vector<256x128xf32>
    %189 = arith.addf %187, %188 : vector<256x128xf32>
    %c1536_184 = arith.constant 1536 : index
    %c640_185 = arith.constant 640 : index
    %190 = vector.load %arg7[%c1536_184, %c640_185] : memref<2048x768xf32, #tpu.memory_space<vmem>>, vector<256x128xf32>
    %191 = arith.addf %189, %190 : vector<256x128xf32>
    %192 = vector.broadcast %148 : vector<1x128xf32> to vector<256x128xf32>
    %193 = arith.addf %191, %192 : vector<256x128xf32>
    %cst_186 = arith.constant 0.000000e+00 : f32
    %194 = vector.broadcast %cst_186 : f32 to vector<256x128xf32>
    %195 = arith.maximumf %193, %194 : vector<256x128xf32>
    %cst_187 = arith.constant dense<0.000000e+00> : vector<128xf32>
    %196 = vector.multi_reduction <add>, %195, %cst_187 [0] : vector<256x128xf32> to vector<128xf32>
    %197 = vector.shape_cast %196 : vector<128xf32> to vector<1x128xf32>
    %cst_188 = arith.constant 3.906250e-03 : f32
    %198 = vector.broadcast %cst_188 : f32 to vector<1x128xf32>
    %199 = arith.mulf %197, %198 : vector<1x128xf32>
    %c768_189 = arith.constant 768 : index
    %c128_190 = arith.constant 128 : index
    %200 = vector.load %arg7[%c768_189, %c128_190] : memref<2048x768xf32, #tpu.memory_space<vmem>>, vector<256x128xf32>
    %c1024_191 = arith.constant 1024 : index
    %c256_192 = arith.constant 256 : index
    %201 = vector.load %arg7[%c1024_191, %c256_192] : memref<2048x768xf32, #tpu.memory_space<vmem>>, vector<256x128xf32>
    %202 = arith.addf %200, %201 : vector<256x128xf32>
    %c1280_193 = arith.constant 1280 : index
    %c384_194 = arith.constant 384 : index
    %203 = vector.load %arg7[%c1280_193, %c384_194] : memref<2048x768xf32, #tpu.memory_space<vmem>>, vector<256x128xf32>
    %204 = arith.addf %202, %203 : vector<256x128xf32>
    %c1536_195 = arith.constant 1536 : index
    %c512_196 = arith.constant 512 : index
    %205 = vector.load %arg7[%c1536_195, %c512_196] : memref<2048x768xf32, #tpu.memory_space<vmem>>, vector<256x128xf32>
    %206 = arith.addf %204, %205 : vector<256x128xf32>
    %c1792_197 = arith.constant 1792 : index
    %c640_198 = arith.constant 640 : index
    %207 = vector.load %arg7[%c1792_197, %c640_198] : memref<2048x768xf32, #tpu.memory_space<vmem>>, vector<256x128xf32>
    %208 = arith.addf %206, %207 : vector<256x128xf32>
    %209 = vector.broadcast %148 : vector<1x128xf32> to vector<256x128xf32>
    %210 = arith.addf %208, %209 : vector<256x128xf32>
    %cst_199 = arith.constant 0.000000e+00 : f32
    %211 = vector.broadcast %cst_199 : f32 to vector<256x128xf32>
    %212 = arith.maximumf %210, %211 : vector<256x128xf32>
    %cst_200 = arith.constant dense<0.000000e+00> : vector<128xf32>
    %213 = vector.multi_reduction <add>, %212, %cst_200 [0] : vector<256x128xf32> to vector<128xf32>
    %214 = vector.shape_cast %213 : vector<128xf32> to vector<1x128xf32>
    %cst_201 = arith.constant 3.906250e-03 : f32
    %215 = vector.broadcast %cst_201 : f32 to vector<1x128xf32>
    %216 = arith.mulf %214, %215 : vector<1x128xf32>
    %217 = tpu.concatenate %165, %182, %199, %216 in 0 : vector<1x128xf32>, vector<1x128xf32>, vector<1x128xf32>, vector<1x128xf32> -> vector<4x128xf32>
    %218 = arith.truncf %217 : vector<4x128xf32> to vector<4x128xbf16>
    %c0_202 = arith.constant 0 : index
    %c0_203 = arith.constant 0 : index
    %c0_204 = arith.constant 0 : index
    %219 = vector.load %arg6[%c0_202, %c0_203, %c0_204] : memref<1x4x128xbf16, #tpu.memory_space<vmem>>, vector<1x4x128xbf16>
    %220 = vector.shape_cast %219 : vector<1x4x128xbf16> to vector<4x128xbf16>
    %221 = vector.shape_cast %218 : vector<4x128xbf16> to vector<1x4x128xbf16>
    tpu.vector_store %arg6[%c0_202, %c0_203, %c0_204], %221 {strides = array<i32>} : memref<1x4x128xbf16, #tpu.memory_space<vmem>>, vector<1x4x128xbf16>,
    return
  }
  func.func @transform_0(%arg0: i32) -> (i32, i32, i32, i32) {
    %c0_i32 = arith.constant 0 : i32
    %c0_i32_0 = arith.constant 0 : i32
    %c0_i32_1 = arith.constant 0 : i32
    %c0_i32_2 = arith.constant 0 : i32
    return %arg0, %c0_i32, %c0_i32_0, %c0_i32_1 : i32, i32, i32, i32
  }
  func.func @transform_1(%arg0: i32) -> (i32, i32) {
    %c0_i32 = arith.constant 0 : i32
    %c0_i32_0 = arith.constant 0 : i32
    %c0_i32_1 = arith.constant 0 : i32
    return %c0_i32, %c0_i32_0 : i32, i32
  }
  func.func @transform_2(%arg0: i32) -> (i32, i32) {
    %c0_i32 = arith.constant 0 : i32
    %c0_i32_0 = arith.constant 0 : i32
    %c0_i32_1 = arith.constant 0 : i32
    return %c0_i32, %c0_i32_0 : i32, i32
  }
  func.func @transform_3(%arg0: i32) -> (i32, i32) {
    %c0_i32 = arith.constant 0 : i32
    %c0_i32_0 = arith.constant 0 : i32
    %c0_i32_1 = arith.constant 0 : i32
    return %c0_i32, %c0_i32_0 : i32, i32
  }
  func.func @transform_4(%arg0: i32) -> (i32, i32, i32) {
    %c0_i32 = arith.constant 0 : i32
    %c0_i32_0 = arith.constant 0 : i32
    %c0_i32_1 = arith.constant 0 : i32
    return %arg0, %c0_i32, %c0_i32_0 : i32, i32, i32
  }
  func.func @transform_5(%arg0: i32) -> (i32, i32, i32) {
    %c0_i32 = arith.constant 0 : i32
    %c0_i32_0 = arith.constant 0 : i32
    %c0_i32_1 = arith.constant 0 : i32
    return %arg0, %c0_i32, %c0_i32_0 : i32, i32, i32
  }
}

module attributes {stable_mosaic.version = 11 : i64} {
  func.func @kernel(%arg0: i32, %arg1: memref<1x16x128xbf16, #tpu.memory_space<vmem>>, %arg2: memref<1x128x512xbf16, #tpu.memory_space<vmem>>, %arg3: memref<1x128x512xbf16, #tpu.memory_space<vmem>>, %arg4: memref<1x1x512xf32, #tpu.memory_space<vmem>>, %arg5: memref<1x16x128xbf16, #tpu.memory_space<vmem>>, %arg6: memref<1x2x128xf32, #tpu.memory_space<vmem>>, %arg7: memref<1x2x128xf32, #tpu.memory_space<vmem>>) attributes {dimension_semantics = [#tpu.dimension_semantics<parallel>], iteration_bounds = array<i64: 2>, scalar_prefetch = 0 : i64, scratch_operands = 0 : i64, tpu.core_type = #tpu.core_type<tc>, window_params = [{transform_indices = @transform_0, window_bounds = array<i64: 1, 16, 128>}, {transform_indices = @transform_1, window_bounds = array<i64: 1, 128, 512>}, {transform_indices = @transform_2, window_bounds = array<i64: 1, 128, 512>}, {transform_indices = @transform_3, window_bounds = array<i64: 1, 1, 512>}, {transform_indices = @transform_4, window_bounds = array<i64: 1, 16, 128>}, {transform_indices = @transform_5, window_bounds = array<i64: 1, 2, 128>}, {transform_indices = @transform_6, window_bounds = array<i64: 1, 2, 128>}]} {
    %c0_i32 = arith.constant 0 : i32
    %0 = arith.cmpi eq, %arg0, %c0_i32 : i32
    %c8_i32 = arith.constant 8 : i32
    %c4_i32 = arith.constant 4 : i32
    %1 = arith.select %0, %c8_i32, %c4_i32 : i32
    %c0 = arith.constant 0 : index
    %c0_0 = arith.constant 0 : index
    %c0_1 = arith.constant 0 : index
    %2 = vector.load %arg1[%c0, %c0_0, %c0_1] : memref<1x16x128xbf16, #tpu.memory_space<vmem>>, vector<1x16x128xbf16>
    %3 = vector.shape_cast %2 : vector<1x16x128xbf16> to vector<16x128xbf16>
    %c0_2 = arith.constant 0 : index
    %c0_3 = arith.constant 0 : index
    %c0_4 = arith.constant 0 : index
    %4 = vector.load %arg2[%c0_2, %c0_3, %c0_4] : memref<1x128x512xbf16, #tpu.memory_space<vmem>>, vector<1x128x512xbf16>
    %5 = vector.shape_cast %4 : vector<1x128x512xbf16> to vector<128x512xbf16>
    %cst = arith.constant dense<0.000000e+00> : vector<16x512xf32>
    %6 = tpu.matmul %3, %5, %cst {dimension_numbers = #tpu.dot_dimension_numbers<[1], [0], [0], [1], [0, 0, 1, 1], [], []>} : vector<16x128xbf16>, vector<128x512xbf16>, vector<16x512xf32> -> vector<16x512xf32>
    %c0_5 = arith.constant 0 : index
    %c0_6 = arith.constant 0 : index
    %c0_7 = arith.constant 0 : index
    %7 = vector.load %arg4[%c0_5, %c0_6, %c0_7] : memref<1x1x512xf32, #tpu.memory_space<vmem>>, vector<1x1x512xf32>
    %8 = vector.shape_cast %7 : vector<1x1x512xf32> to vector<1x512xf32>
    %9 = vector.broadcast %8 : vector<1x512xf32> to vector<16x512xf32>
    %10 = arith.addf %6, %9 : vector<16x512xf32>
    %c0_8 = arith.constant 0 : index
    %c0_9 = arith.constant 0 : index
    %c0_10 = arith.constant 0 : index
    %11 = vector.load %arg3[%c0_8, %c0_9, %c0_10] : memref<1x128x512xbf16, #tpu.memory_space<vmem>>, vector<1x128x512xbf16>
    %12 = vector.shape_cast %11 : vector<1x128x512xbf16> to vector<128x512xbf16>
    %cst_11 = arith.constant 0.000000e+00 : f32
    %13 = vector.broadcast %cst_11 : f32 to vector<2x128xf32>
    %cst_12 = arith.constant 0.000000e+00 : f32
    %14 = vector.broadcast %cst_12 : f32 to vector<2x128xf32>
    %15 = vector.extract_strided_slice %10 {offsets = [0, 0], sizes = [1, 512], strides = [1, 1]} : vector<16x512xf32> to vector<1x512xf32>
    %16 = vector.extract_strided_slice %10 {offsets = [8, 0], sizes = [1, 512], strides = [1, 1]} : vector<16x512xf32> to vector<1x512xf32>
    %17 = tpu.concatenate %15, %16 in 0 : vector<1x512xf32>, vector<1x512xf32> -> vector<2x512xf32>
    %18 = arith.truncf %13 : vector<2x128xf32> to vector<2x128xbf16>
    %cst_13 = arith.constant dense<0.000000e+00> : vector<2x512xf32>
    %19 = tpu.matmul %18, %12, %cst_13 {dimension_numbers = #tpu.dot_dimension_numbers<[1], [0], [0], [1], [0, 0, 1, 1], [], []>} : vector<2x128xbf16>, vector<128x512xbf16>, vector<2x512xf32> -> vector<2x512xf32>
    %20 = arith.addf %17, %19 : vector<2x512xf32>
    %21 = vector.extract_strided_slice %20 {offsets = [0, 0], sizes = [2, 128], strides = [1, 1]} : vector<2x512xf32> to vector<2x128xf32>
    %22 = arith.negf %21 : vector<2x128xf32>
    %23 = math.exp %22 : vector<2x128xf32>
    %cst_14 = arith.constant 1.000000e+00 : f32
    %24 = vector.broadcast %cst_14 : f32 to vector<2x128xf32>
    %25 = arith.addf %24, %23 : vector<2x128xf32>
    %26 = arith.divf %24, %25 : vector<2x128xf32>
    %27 = vector.extract_strided_slice %20 {offsets = [0, 128], sizes = [2, 128], strides = [1, 1]} : vector<2x512xf32> to vector<2x128xf32>
    %28 = arith.negf %27 : vector<2x128xf32>
    %29 = math.exp %28 : vector<2x128xf32>
    %cst_15 = arith.constant 1.000000e+00 : f32
    %30 = vector.broadcast %cst_15 : f32 to vector<2x128xf32>
    %31 = arith.addf %30, %29 : vector<2x128xf32>
    %32 = arith.divf %30, %31 : vector<2x128xf32>
    %33 = vector.extract_strided_slice %20 {offsets = [0, 256], sizes = [2, 128], strides = [1, 1]} : vector<2x512xf32> to vector<2x128xf32>
    %34 = math.tanh %33 : vector<2x128xf32>
    %35 = vector.extract_strided_slice %20 {offsets = [0, 384], sizes = [2, 128], strides = [1, 1]} : vector<2x512xf32> to vector<2x128xf32>
    %36 = arith.negf %35 : vector<2x128xf32>
    %37 = math.exp %36 : vector<2x128xf32>
    %cst_16 = arith.constant 1.000000e+00 : f32
    %38 = vector.broadcast %cst_16 : f32 to vector<2x128xf32>
    %39 = arith.addf %38, %37 : vector<2x128xf32>
    %40 = arith.divf %38, %39 : vector<2x128xf32>
    %41 = arith.mulf %32, %14 : vector<2x128xf32>
    %42 = arith.mulf %26, %34 : vector<2x128xf32>
    %43 = arith.addf %41, %42 : vector<2x128xf32>
    %44 = math.tanh %43 : vector<2x128xf32>
    %45 = arith.mulf %40, %44 : vector<2x128xf32>
    %c0_i32_17 = arith.constant 0 : i32
    %46 = arith.cmpi sgt, %1, %c0_i32_17 : i32
    %47 = arith.select %46, %45, %13 : vector<2x128xf32>
    %48 = arith.select %46, %43, %14 : vector<2x128xf32>
    %49 = vector.extract_strided_slice %10 {offsets = [1, 0], sizes = [1, 512], strides = [1, 1]} : vector<16x512xf32> to vector<1x512xf32>
    %50 = vector.extract_strided_slice %10 {offsets = [9, 0], sizes = [1, 512], strides = [1, 1]} : vector<16x512xf32> to vector<1x512xf32>
    %51 = tpu.concatenate %49, %50 in 0 : vector<1x512xf32>, vector<1x512xf32> -> vector<2x512xf32>
    %52 = arith.truncf %47 : vector<2x128xf32> to vector<2x128xbf16>
    %cst_18 = arith.constant dense<0.000000e+00> : vector<2x512xf32>
    %53 = tpu.matmul %52, %12, %cst_18 {dimension_numbers = #tpu.dot_dimension_numbers<[1], [0], [0], [1], [0, 0, 1, 1], [], []>} : vector<2x128xbf16>, vector<128x512xbf16>, vector<2x512xf32> -> vector<2x512xf32>
    %54 = arith.addf %51, %53 : vector<2x512xf32>
    %55 = vector.extract_strided_slice %54 {offsets = [0, 0], sizes = [2, 128], strides = [1, 1]} : vector<2x512xf32> to vector<2x128xf32>
    %56 = arith.negf %55 : vector<2x128xf32>
    %57 = math.exp %56 : vector<2x128xf32>
    %cst_19 = arith.constant 1.000000e+00 : f32
    %58 = vector.broadcast %cst_19 : f32 to vector<2x128xf32>
    %59 = arith.addf %58, %57 : vector<2x128xf32>
    %60 = arith.divf %58, %59 : vector<2x128xf32>
    %61 = vector.extract_strided_slice %54 {offsets = [0, 128], sizes = [2, 128], strides = [1, 1]} : vector<2x512xf32> to vector<2x128xf32>
    %62 = arith.negf %61 : vector<2x128xf32>
    %63 = math.exp %62 : vector<2x128xf32>
    %cst_20 = arith.constant 1.000000e+00 : f32
    %64 = vector.broadcast %cst_20 : f32 to vector<2x128xf32>
    %65 = arith.addf %64, %63 : vector<2x128xf32>
    %66 = arith.divf %64, %65 : vector<2x128xf32>
    %67 = vector.extract_strided_slice %54 {offsets = [0, 256], sizes = [2, 128], strides = [1, 1]} : vector<2x512xf32> to vector<2x128xf32>
    %68 = math.tanh %67 : vector<2x128xf32>
    %69 = vector.extract_strided_slice %54 {offsets = [0, 384], sizes = [2, 128], strides = [1, 1]} : vector<2x512xf32> to vector<2x128xf32>
    %70 = arith.negf %69 : vector<2x128xf32>
    %71 = math.exp %70 : vector<2x128xf32>
    %cst_21 = arith.constant 1.000000e+00 : f32
    %72 = vector.broadcast %cst_21 : f32 to vector<2x128xf32>
    %73 = arith.addf %72, %71 : vector<2x128xf32>
    %74 = arith.divf %72, %73 : vector<2x128xf32>
    %75 = arith.mulf %66, %48 : vector<2x128xf32>
    %76 = arith.mulf %60, %68 : vector<2x128xf32>
    %77 = arith.addf %75, %76 : vector<2x128xf32>
    %78 = math.tanh %77 : vector<2x128xf32>
    %79 = arith.mulf %74, %78 : vector<2x128xf32>
    %c1_i32 = arith.constant 1 : i32
    %80 = arith.cmpi sgt, %1, %c1_i32 : i32
    %81 = arith.select %80, %79, %47 : vector<2x128xf32>
    %82 = arith.select %80, %77, %48 : vector<2x128xf32>
    %83 = vector.extract_strided_slice %10 {offsets = [2, 0], sizes = [1, 512], strides = [1, 1]} : vector<16x512xf32> to vector<1x512xf32>
    %84 = vector.extract_strided_slice %10 {offsets = [10, 0], sizes = [1, 512], strides = [1, 1]} : vector<16x512xf32> to vector<1x512xf32>
    %85 = tpu.concatenate %83, %84 in 0 : vector<1x512xf32>, vector<1x512xf32> -> vector<2x512xf32>
    %86 = arith.truncf %81 : vector<2x128xf32> to vector<2x128xbf16>
    %cst_22 = arith.constant dense<0.000000e+00> : vector<2x512xf32>
    %87 = tpu.matmul %86, %12, %cst_22 {dimension_numbers = #tpu.dot_dimension_numbers<[1], [0], [0], [1], [0, 0, 1, 1], [], []>} : vector<2x128xbf16>, vector<128x512xbf16>, vector<2x512xf32> -> vector<2x512xf32>
    %88 = arith.addf %85, %87 : vector<2x512xf32>
    %89 = vector.extract_strided_slice %88 {offsets = [0, 0], sizes = [2, 128], strides = [1, 1]} : vector<2x512xf32> to vector<2x128xf32>
    %90 = arith.negf %89 : vector<2x128xf32>
    %91 = math.exp %90 : vector<2x128xf32>
    %cst_23 = arith.constant 1.000000e+00 : f32
    %92 = vector.broadcast %cst_23 : f32 to vector<2x128xf32>
    %93 = arith.addf %92, %91 : vector<2x128xf32>
    %94 = arith.divf %92, %93 : vector<2x128xf32>
    %95 = vector.extract_strided_slice %88 {offsets = [0, 128], sizes = [2, 128], strides = [1, 1]} : vector<2x512xf32> to vector<2x128xf32>
    %96 = arith.negf %95 : vector<2x128xf32>
    %97 = math.exp %96 : vector<2x128xf32>
    %cst_24 = arith.constant 1.000000e+00 : f32
    %98 = vector.broadcast %cst_24 : f32 to vector<2x128xf32>
    %99 = arith.addf %98, %97 : vector<2x128xf32>
    %100 = arith.divf %98, %99 : vector<2x128xf32>
    %101 = vector.extract_strided_slice %88 {offsets = [0, 256], sizes = [2, 128], strides = [1, 1]} : vector<2x512xf32> to vector<2x128xf32>
    %102 = math.tanh %101 : vector<2x128xf32>
    %103 = vector.extract_strided_slice %88 {offsets = [0, 384], sizes = [2, 128], strides = [1, 1]} : vector<2x512xf32> to vector<2x128xf32>
    %104 = arith.negf %103 : vector<2x128xf32>
    %105 = math.exp %104 : vector<2x128xf32>
    %cst_25 = arith.constant 1.000000e+00 : f32
    %106 = vector.broadcast %cst_25 : f32 to vector<2x128xf32>
    %107 = arith.addf %106, %105 : vector<2x128xf32>
    %108 = arith.divf %106, %107 : vector<2x128xf32>
    %109 = arith.mulf %100, %82 : vector<2x128xf32>
    %110 = arith.mulf %94, %102 : vector<2x128xf32>
    %111 = arith.addf %109, %110 : vector<2x128xf32>
    %112 = math.tanh %111 : vector<2x128xf32>
    %113 = arith.mulf %108, %112 : vector<2x128xf32>
    %c2_i32 = arith.constant 2 : i32
    %114 = arith.cmpi sgt, %1, %c2_i32 : i32
    %115 = arith.select %114, %113, %81 : vector<2x128xf32>
    %116 = arith.select %114, %111, %82 : vector<2x128xf32>
    %117 = vector.extract_strided_slice %10 {offsets = [3, 0], sizes = [1, 512], strides = [1, 1]} : vector<16x512xf32> to vector<1x512xf32>
    %118 = vector.extract_strided_slice %10 {offsets = [11, 0], sizes = [1, 512], strides = [1, 1]} : vector<16x512xf32> to vector<1x512xf32>
    %119 = tpu.concatenate %117, %118 in 0 : vector<1x512xf32>, vector<1x512xf32> -> vector<2x512xf32>
    %120 = arith.truncf %115 : vector<2x128xf32> to vector<2x128xbf16>
    %cst_26 = arith.constant dense<0.000000e+00> : vector<2x512xf32>
    %121 = tpu.matmul %120, %12, %cst_26 {dimension_numbers = #tpu.dot_dimension_numbers<[1], [0], [0], [1], [0, 0, 1, 1], [], []>} : vector<2x128xbf16>, vector<128x512xbf16>, vector<2x512xf32> -> vector<2x512xf32>
    %122 = arith.addf %119, %121 : vector<2x512xf32>
    %123 = vector.extract_strided_slice %122 {offsets = [0, 0], sizes = [2, 128], strides = [1, 1]} : vector<2x512xf32> to vector<2x128xf32>
    %124 = arith.negf %123 : vector<2x128xf32>
    %125 = math.exp %124 : vector<2x128xf32>
    %cst_27 = arith.constant 1.000000e+00 : f32
    %126 = vector.broadcast %cst_27 : f32 to vector<2x128xf32>
    %127 = arith.addf %126, %125 : vector<2x128xf32>
    %128 = arith.divf %126, %127 : vector<2x128xf32>
    %129 = vector.extract_strided_slice %122 {offsets = [0, 128], sizes = [2, 128], strides = [1, 1]} : vector<2x512xf32> to vector<2x128xf32>
    %130 = arith.negf %129 : vector<2x128xf32>
    %131 = math.exp %130 : vector<2x128xf32>
    %cst_28 = arith.constant 1.000000e+00 : f32
    %132 = vector.broadcast %cst_28 : f32 to vector<2x128xf32>
    %133 = arith.addf %132, %131 : vector<2x128xf32>
    %134 = arith.divf %132, %133 : vector<2x128xf32>
    %135 = vector.extract_strided_slice %122 {offsets = [0, 256], sizes = [2, 128], strides = [1, 1]} : vector<2x512xf32> to vector<2x128xf32>
    %136 = math.tanh %135 : vector<2x128xf32>
    %137 = vector.extract_strided_slice %122 {offsets = [0, 384], sizes = [2, 128], strides = [1, 1]} : vector<2x512xf32> to vector<2x128xf32>
    %138 = arith.negf %137 : vector<2x128xf32>
    %139 = math.exp %138 : vector<2x128xf32>
    %cst_29 = arith.constant 1.000000e+00 : f32
    %140 = vector.broadcast %cst_29 : f32 to vector<2x128xf32>
    %141 = arith.addf %140, %139 : vector<2x128xf32>
    %142 = arith.divf %140, %141 : vector<2x128xf32>
    %143 = arith.mulf %134, %116 : vector<2x128xf32>
    %144 = arith.mulf %128, %136 : vector<2x128xf32>
    %145 = arith.addf %143, %144 : vector<2x128xf32>
    %146 = math.tanh %145 : vector<2x128xf32>
    %147 = arith.mulf %142, %146 : vector<2x128xf32>
    %c3_i32 = arith.constant 3 : i32
    %148 = arith.cmpi sgt, %1, %c3_i32 : i32
    %149 = arith.select %148, %147, %115 : vector<2x128xf32>
    %150 = arith.select %148, %145, %116 : vector<2x128xf32>
    %151 = vector.extract_strided_slice %10 {offsets = [4, 0], sizes = [1, 512], strides = [1, 1]} : vector<16x512xf32> to vector<1x512xf32>
    %152 = vector.extract_strided_slice %10 {offsets = [12, 0], sizes = [1, 512], strides = [1, 1]} : vector<16x512xf32> to vector<1x512xf32>
    %153 = tpu.concatenate %151, %152 in 0 : vector<1x512xf32>, vector<1x512xf32> -> vector<2x512xf32>
    %154 = arith.truncf %149 : vector<2x128xf32> to vector<2x128xbf16>
    %cst_30 = arith.constant dense<0.000000e+00> : vector<2x512xf32>
    %155 = tpu.matmul %154, %12, %cst_30 {dimension_numbers = #tpu.dot_dimension_numbers<[1], [0], [0], [1], [0, 0, 1, 1], [], []>} : vector<2x128xbf16>, vector<128x512xbf16>, vector<2x512xf32> -> vector<2x512xf32>
    %156 = arith.addf %153, %155 : vector<2x512xf32>
    %157 = vector.extract_strided_slice %156 {offsets = [0, 0], sizes = [2, 128], strides = [1, 1]} : vector<2x512xf32> to vector<2x128xf32>
    %158 = arith.negf %157 : vector<2x128xf32>
    %159 = math.exp %158 : vector<2x128xf32>
    %cst_31 = arith.constant 1.000000e+00 : f32
    %160 = vector.broadcast %cst_31 : f32 to vector<2x128xf32>
    %161 = arith.addf %160, %159 : vector<2x128xf32>
    %162 = arith.divf %160, %161 : vector<2x128xf32>
    %163 = vector.extract_strided_slice %156 {offsets = [0, 128], sizes = [2, 128], strides = [1, 1]} : vector<2x512xf32> to vector<2x128xf32>
    %164 = arith.negf %163 : vector<2x128xf32>
    %165 = math.exp %164 : vector<2x128xf32>
    %cst_32 = arith.constant 1.000000e+00 : f32
    %166 = vector.broadcast %cst_32 : f32 to vector<2x128xf32>
    %167 = arith.addf %166, %165 : vector<2x128xf32>
    %168 = arith.divf %166, %167 : vector<2x128xf32>
    %169 = vector.extract_strided_slice %156 {offsets = [0, 256], sizes = [2, 128], strides = [1, 1]} : vector<2x512xf32> to vector<2x128xf32>
    %170 = math.tanh %169 : vector<2x128xf32>
    %171 = vector.extract_strided_slice %156 {offsets = [0, 384], sizes = [2, 128], strides = [1, 1]} : vector<2x512xf32> to vector<2x128xf32>
    %172 = arith.negf %171 : vector<2x128xf32>
    %173 = math.exp %172 : vector<2x128xf32>
    %cst_33 = arith.constant 1.000000e+00 : f32
    %174 = vector.broadcast %cst_33 : f32 to vector<2x128xf32>
    %175 = arith.addf %174, %173 : vector<2x128xf32>
    %176 = arith.divf %174, %175 : vector<2x128xf32>
    %177 = arith.mulf %168, %150 : vector<2x128xf32>
    %178 = arith.mulf %162, %170 : vector<2x128xf32>
    %179 = arith.addf %177, %178 : vector<2x128xf32>
    %180 = math.tanh %179 : vector<2x128xf32>
    %181 = arith.mulf %176, %180 : vector<2x128xf32>
    %c4_i32_34 = arith.constant 4 : i32
    %182 = arith.cmpi sgt, %1, %c4_i32_34 : i32
    %183 = arith.select %182, %181, %149 : vector<2x128xf32>
    %184 = arith.select %182, %179, %150 : vector<2x128xf32>
    %185 = vector.extract_strided_slice %10 {offsets = [5, 0], sizes = [1, 512], strides = [1, 1]} : vector<16x512xf32> to vector<1x512xf32>
    %186 = vector.extract_strided_slice %10 {offsets = [13, 0], sizes = [1, 512], strides = [1, 1]} : vector<16x512xf32> to vector<1x512xf32>
    %187 = tpu.concatenate %185, %186 in 0 : vector<1x512xf32>, vector<1x512xf32> -> vector<2x512xf32>
    %188 = arith.truncf %183 : vector<2x128xf32> to vector<2x128xbf16>
    %cst_35 = arith.constant dense<0.000000e+00> : vector<2x512xf32>
    %189 = tpu.matmul %188, %12, %cst_35 {dimension_numbers = #tpu.dot_dimension_numbers<[1], [0], [0], [1], [0, 0, 1, 1], [], []>} : vector<2x128xbf16>, vector<128x512xbf16>, vector<2x512xf32> -> vector<2x512xf32>
    %190 = arith.addf %187, %189 : vector<2x512xf32>
    %191 = vector.extract_strided_slice %190 {offsets = [0, 0], sizes = [2, 128], strides = [1, 1]} : vector<2x512xf32> to vector<2x128xf32>
    %192 = arith.negf %191 : vector<2x128xf32>
    %193 = math.exp %192 : vector<2x128xf32>
    %cst_36 = arith.constant 1.000000e+00 : f32
    %194 = vector.broadcast %cst_36 : f32 to vector<2x128xf32>
    %195 = arith.addf %194, %193 : vector<2x128xf32>
    %196 = arith.divf %194, %195 : vector<2x128xf32>
    %197 = vector.extract_strided_slice %190 {offsets = [0, 128], sizes = [2, 128], strides = [1, 1]} : vector<2x512xf32> to vector<2x128xf32>
    %198 = arith.negf %197 : vector<2x128xf32>
    %199 = math.exp %198 : vector<2x128xf32>
    %cst_37 = arith.constant 1.000000e+00 : f32
    %200 = vector.broadcast %cst_37 : f32 to vector<2x128xf32>
    %201 = arith.addf %200, %199 : vector<2x128xf32>
    %202 = arith.divf %200, %201 : vector<2x128xf32>
    %203 = vector.extract_strided_slice %190 {offsets = [0, 256], sizes = [2, 128], strides = [1, 1]} : vector<2x512xf32> to vector<2x128xf32>
    %204 = math.tanh %203 : vector<2x128xf32>
    %205 = vector.extract_strided_slice %190 {offsets = [0, 384], sizes = [2, 128], strides = [1, 1]} : vector<2x512xf32> to vector<2x128xf32>
    %206 = arith.negf %205 : vector<2x128xf32>
    %207 = math.exp %206 : vector<2x128xf32>
    %cst_38 = arith.constant 1.000000e+00 : f32
    %208 = vector.broadcast %cst_38 : f32 to vector<2x128xf32>
    %209 = arith.addf %208, %207 : vector<2x128xf32>
    %210 = arith.divf %208, %209 : vector<2x128xf32>
    %211 = arith.mulf %202, %184 : vector<2x128xf32>
    %212 = arith.mulf %196, %204 : vector<2x128xf32>
    %213 = arith.addf %211, %212 : vector<2x128xf32>
    %214 = math.tanh %213 : vector<2x128xf32>
    %215 = arith.mulf %210, %214 : vector<2x128xf32>
    %c5_i32 = arith.constant 5 : i32
    %216 = arith.cmpi sgt, %1, %c5_i32 : i32
    %217 = arith.select %216, %215, %183 : vector<2x128xf32>
    %218 = arith.select %216, %213, %184 : vector<2x128xf32>
    %219 = vector.extract_strided_slice %10 {offsets = [6, 0], sizes = [1, 512], strides = [1, 1]} : vector<16x512xf32> to vector<1x512xf32>
    %220 = vector.extract_strided_slice %10 {offsets = [14, 0], sizes = [1, 512], strides = [1, 1]} : vector<16x512xf32> to vector<1x512xf32>
    %221 = tpu.concatenate %219, %220 in 0 : vector<1x512xf32>, vector<1x512xf32> -> vector<2x512xf32>
    %222 = arith.truncf %217 : vector<2x128xf32> to vector<2x128xbf16>
    %cst_39 = arith.constant dense<0.000000e+00> : vector<2x512xf32>
    %223 = tpu.matmul %222, %12, %cst_39 {dimension_numbers = #tpu.dot_dimension_numbers<[1], [0], [0], [1], [0, 0, 1, 1], [], []>} : vector<2x128xbf16>, vector<128x512xbf16>, vector<2x512xf32> -> vector<2x512xf32>
    %224 = arith.addf %221, %223 : vector<2x512xf32>
    %225 = vector.extract_strided_slice %224 {offsets = [0, 0], sizes = [2, 128], strides = [1, 1]} : vector<2x512xf32> to vector<2x128xf32>
    %226 = arith.negf %225 : vector<2x128xf32>
    %227 = math.exp %226 : vector<2x128xf32>
    %cst_40 = arith.constant 1.000000e+00 : f32
    %228 = vector.broadcast %cst_40 : f32 to vector<2x128xf32>
    %229 = arith.addf %228, %227 : vector<2x128xf32>
    %230 = arith.divf %228, %229 : vector<2x128xf32>
    %231 = vector.extract_strided_slice %224 {offsets = [0, 128], sizes = [2, 128], strides = [1, 1]} : vector<2x512xf32> to vector<2x128xf32>
    %232 = arith.negf %231 : vector<2x128xf32>
    %233 = math.exp %232 : vector<2x128xf32>
    %cst_41 = arith.constant 1.000000e+00 : f32
    %234 = vector.broadcast %cst_41 : f32 to vector<2x128xf32>
    %235 = arith.addf %234, %233 : vector<2x128xf32>
    %236 = arith.divf %234, %235 : vector<2x128xf32>
    %237 = vector.extract_strided_slice %224 {offsets = [0, 256], sizes = [2, 128], strides = [1, 1]} : vector<2x512xf32> to vector<2x128xf32>
    %238 = math.tanh %237 : vector<2x128xf32>
    %239 = vector.extract_strided_slice %224 {offsets = [0, 384], sizes = [2, 128], strides = [1, 1]} : vector<2x512xf32> to vector<2x128xf32>
    %240 = arith.negf %239 : vector<2x128xf32>
    %241 = math.exp %240 : vector<2x128xf32>
    %cst_42 = arith.constant 1.000000e+00 : f32
    %242 = vector.broadcast %cst_42 : f32 to vector<2x128xf32>
    %243 = arith.addf %242, %241 : vector<2x128xf32>
    %244 = arith.divf %242, %243 : vector<2x128xf32>
    %245 = arith.mulf %236, %218 : vector<2x128xf32>
    %246 = arith.mulf %230, %238 : vector<2x128xf32>
    %247 = arith.addf %245, %246 : vector<2x128xf32>
    %248 = math.tanh %247 : vector<2x128xf32>
    %249 = arith.mulf %244, %248 : vector<2x128xf32>
    %c6_i32 = arith.constant 6 : i32
    %250 = arith.cmpi sgt, %1, %c6_i32 : i32
    %251 = arith.select %250, %249, %217 : vector<2x128xf32>
    %252 = arith.select %250, %247, %218 : vector<2x128xf32>
    %253 = vector.extract_strided_slice %10 {offsets = [7, 0], sizes = [1, 512], strides = [1, 1]} : vector<16x512xf32> to vector<1x512xf32>
    %254 = vector.extract_strided_slice %10 {offsets = [15, 0], sizes = [1, 512], strides = [1, 1]} : vector<16x512xf32> to vector<1x512xf32>
    %255 = tpu.concatenate %253, %254 in 0 : vector<1x512xf32>, vector<1x512xf32> -> vector<2x512xf32>
    %256 = arith.truncf %251 : vector<2x128xf32> to vector<2x128xbf16>
    %cst_43 = arith.constant dense<0.000000e+00> : vector<2x512xf32>
    %257 = tpu.matmul %256, %12, %cst_43 {dimension_numbers = #tpu.dot_dimension_numbers<[1], [0], [0], [1], [0, 0, 1, 1], [], []>} : vector<2x128xbf16>, vector<128x512xbf16>, vector<2x512xf32> -> vector<2x512xf32>
    %258 = arith.addf %255, %257 : vector<2x512xf32>
    %259 = vector.extract_strided_slice %258 {offsets = [0, 0], sizes = [2, 128], strides = [1, 1]} : vector<2x512xf32> to vector<2x128xf32>
    %260 = arith.negf %259 : vector<2x128xf32>
    %261 = math.exp %260 : vector<2x128xf32>
    %cst_44 = arith.constant 1.000000e+00 : f32
    %262 = vector.broadcast %cst_44 : f32 to vector<2x128xf32>
    %263 = arith.addf %262, %261 : vector<2x128xf32>
    %264 = arith.divf %262, %263 : vector<2x128xf32>
    %265 = vector.extract_strided_slice %258 {offsets = [0, 128], sizes = [2, 128], strides = [1, 1]} : vector<2x512xf32> to vector<2x128xf32>
    %266 = arith.negf %265 : vector<2x128xf32>
    %267 = math.exp %266 : vector<2x128xf32>
    %cst_45 = arith.constant 1.000000e+00 : f32
    %268 = vector.broadcast %cst_45 : f32 to vector<2x128xf32>
    %269 = arith.addf %268, %267 : vector<2x128xf32>
    %270 = arith.divf %268, %269 : vector<2x128xf32>
    %271 = vector.extract_strided_slice %258 {offsets = [0, 256], sizes = [2, 128], strides = [1, 1]} : vector<2x512xf32> to vector<2x128xf32>
    %272 = math.tanh %271 : vector<2x128xf32>
    %273 = vector.extract_strided_slice %258 {offsets = [0, 384], sizes = [2, 128], strides = [1, 1]} : vector<2x512xf32> to vector<2x128xf32>
    %274 = arith.negf %273 : vector<2x128xf32>
    %275 = math.exp %274 : vector<2x128xf32>
    %cst_46 = arith.constant 1.000000e+00 : f32
    %276 = vector.broadcast %cst_46 : f32 to vector<2x128xf32>
    %277 = arith.addf %276, %275 : vector<2x128xf32>
    %278 = arith.divf %276, %277 : vector<2x128xf32>
    %279 = arith.mulf %270, %252 : vector<2x128xf32>
    %280 = arith.mulf %264, %272 : vector<2x128xf32>
    %281 = arith.addf %279, %280 : vector<2x128xf32>
    %282 = math.tanh %281 : vector<2x128xf32>
    %283 = arith.mulf %278, %282 : vector<2x128xf32>
    %c7_i32 = arith.constant 7 : i32
    %284 = arith.cmpi sgt, %1, %c7_i32 : i32
    %285 = arith.select %284, %283, %251 : vector<2x128xf32>
    %286 = arith.select %284, %281, %252 : vector<2x128xf32>
    %287 = tpu.concatenate %47, %81, %115, %149, %183, %217, %251, %285 in 0 : vector<2x128xf32>, vector<2x128xf32>, vector<2x128xf32>, vector<2x128xf32>, vector<2x128xf32>, vector<2x128xf32>, vector<2x128xf32>, vector<2x128xf32> -> vector<16x128xf32>
    %288 = arith.truncf %287 : vector<16x128xf32> to vector<16x128xbf16>
    %c0_47 = arith.constant 0 : index
    %c0_48 = arith.constant 0 : index
    %c0_49 = arith.constant 0 : index
    %289 = vector.load %arg5[%c0_47, %c0_48, %c0_49] : memref<1x16x128xbf16, #tpu.memory_space<vmem>>, vector<1x16x128xbf16>
    %290 = vector.shape_cast %289 : vector<1x16x128xbf16> to vector<16x128xbf16>
    %291 = vector.shape_cast %288 : vector<16x128xbf16> to vector<1x16x128xbf16>
    tpu.vector_store %arg5[%c0_47, %c0_48, %c0_49], %291 {strides = array<i32>} : memref<1x16x128xbf16, #tpu.memory_space<vmem>>, vector<1x16x128xbf16>,
    %c0_50 = arith.constant 0 : index
    %c0_51 = arith.constant 0 : index
    %c0_52 = arith.constant 0 : index
    %292 = vector.load %arg6[%c0_50, %c0_51, %c0_52] : memref<1x2x128xf32, #tpu.memory_space<vmem>>, vector<1x2x128xf32>
    %293 = vector.shape_cast %292 : vector<1x2x128xf32> to vector<2x128xf32>
    %294 = vector.shape_cast %285 : vector<2x128xf32> to vector<1x2x128xf32>
    tpu.vector_store %arg6[%c0_50, %c0_51, %c0_52], %294 {strides = array<i32>} : memref<1x2x128xf32, #tpu.memory_space<vmem>>, vector<1x2x128xf32>,
    %c0_53 = arith.constant 0 : index
    %c0_54 = arith.constant 0 : index
    %c0_55 = arith.constant 0 : index
    %295 = vector.load %arg7[%c0_53, %c0_54, %c0_55] : memref<1x2x128xf32, #tpu.memory_space<vmem>>, vector<1x2x128xf32>
    %296 = vector.shape_cast %295 : vector<1x2x128xf32> to vector<2x128xf32>
    %297 = vector.shape_cast %286 : vector<2x128xf32> to vector<1x2x128xf32>
    tpu.vector_store %arg7[%c0_53, %c0_54, %c0_55], %297 {strides = array<i32>} : memref<1x2x128xf32, #tpu.memory_space<vmem>>, vector<1x2x128xf32>,
    return
  }
  func.func @transform_0(%arg0: i32) -> (i32, i32, i32) {
    %c0_i32 = arith.constant 0 : i32
    %c0_i32_0 = arith.constant 0 : i32
    %c0_i32_1 = arith.constant 0 : i32
    return %arg0, %c0_i32, %c0_i32_0 : i32, i32, i32
  }
  func.func @transform_1(%arg0: i32) -> (i32, i32, i32) {
    %c0_i32 = arith.constant 0 : i32
    %c0_i32_0 = arith.constant 0 : i32
    %c0_i32_1 = arith.constant 0 : i32
    return %arg0, %c0_i32, %c0_i32_0 : i32, i32, i32
  }
  func.func @transform_2(%arg0: i32) -> (i32, i32, i32) {
    %c0_i32 = arith.constant 0 : i32
    %c0_i32_0 = arith.constant 0 : i32
    %c0_i32_1 = arith.constant 0 : i32
    return %arg0, %c0_i32, %c0_i32_0 : i32, i32, i32
  }
  func.func @transform_3(%arg0: i32) -> (i32, i32, i32) {
    %c0_i32 = arith.constant 0 : i32
    %c0_i32_0 = arith.constant 0 : i32
    %c0_i32_1 = arith.constant 0 : i32
    return %arg0, %c0_i32, %c0_i32_0 : i32, i32, i32
  }
  func.func @transform_4(%arg0: i32) -> (i32, i32, i32) {
    %c0_i32 = arith.constant 0 : i32
    %c0_i32_0 = arith.constant 0 : i32
    %c0_i32_1 = arith.constant 0 : i32
    return %arg0, %c0_i32, %c0_i32_0 : i32, i32, i32
  }
  func.func @transform_5(%arg0: i32) -> (i32, i32, i32) {
    %c0_i32 = arith.constant 0 : i32
    %c0_i32_0 = arith.constant 0 : i32
    %c0_i32_1 = arith.constant 0 : i32
    return %arg0, %c0_i32, %c0_i32_0 : i32, i32, i32
  }
  func.func @transform_6(%arg0: i32) -> (i32, i32, i32) {
    %c0_i32 = arith.constant 0 : i32
    %c0_i32_0 = arith.constant 0 : i32
    %c0_i32_1 = arith.constant 0 : i32
    return %arg0, %c0_i32, %c0_i32_0 : i32, i32, i32
  }
}

</mosaic_0001>

<bundles_post_ra>
// kernel: encoder_plus_forward.3
= control target key start
LH: loop header
LB: loop body
LE: loop exit
PB: predicated region body
PF: predicated region fallthrough
CT: control target
= control target key end

     0   :  { %s2550_s21 = smov 0   ;;  %s3399_s0 = inlined_call_operand.vmem [shape: bf16[2,16,128], index: 0, kind: input, shape index: {}]   ;;  %s3400_s1 = inlined_call_operand.vmem [shape: bf16[2,128,512], index: 1, kind: input, shape index: {}]   ;;  %s3401_s2 = inlined_call_operand.vmem [shape: bf16[2,128,512], index: 2, kind: input, shape index: {}]   ;;  %s3402_s3 = inlined_call_operand.vmem [shape: f32[2,1,512], index: 3, kind: input, shape index: {}]   ;;  %s3403_s4 = inlined_call_operand.vmem [shape: bf16[2,16,128], index: 4, kind: output, shape index: {0}]   ;;  %s3404_s5 = inlined_call_operand.vmem [shape: f32[2,2,128], index: 5, kind: output, shape index: {1}]   ;;  %s3405_s6 = inlined_call_operand.vmem [shape: f32[2,2,128], index: 6, kind: output, shape index: {2}]  }
   0x1 LB: > { %s2556_s22 = sadd.s32 4294967295, %s2511_s21   ;;  %p2117_p0 = scmp.ge.s32.totalorder %s2511_s21, 1  ;;  %s2511_s21 = sphi %s2550_s21, %s17_s21  }
   0x2   : > { %p246_p1 = scmp.lt.s32.totalorder %s2511_s21, 3 }
   0x4   : > { %p247_p2 = pnand %p2117_p0, %p246_p1 }
   0x6   : > { %250 = sbr.rel (%p247_p2) target bundleno = 2172 (0x87c), region = 36 }
   0xd   : > { %p298_p3 = scmp.lt.s32.totalorder %s2556_s22, 1  ;;  %v3406_v0 = vmov 0   ;;  %vm685_vm0 = vcmask 1040384   ;;  %vm2514_vm1 = vmmov 1   ;;  %p331_p4 = scmp.eq.s32.totalorder %s2556_s22, 0  ;;  %vm1939_vm4 = vcmask 1041408  }
   0xe   : > { %587 = vmatprep.mubr.bf16.mxu0 %v3406_v0  ;;  %630 = vmatprep.mubr.bf16.mxu1 %v3406_v0  ;;  %vm2197_vm2 = vmpackc.low %vm2514_vm1, %vm2514_vm1  ;;  %vm1941_vm5 = vcmask 1043456   ;;  %vm1943_vm6 = vcmask 1045504  }
   0xf   : > { %s2564_s23 = scalar_select %p298_p3, %s2556_s22, 1 }
  0x10   : > { %s1505_s15 = scalar_select %p331_p4, 1, 0 }
  0x11   : > { %s2229_s24 = sshll.u32 %s2564_s23, 8  ;;  %s2228_s28 = sshll.u32 %s2564_s23, 3 }
  0x12   : > { %s2572_s27 = scalar_lea.vmem %s3400_s1, %s2229_s24  ;;  %s302_s7 = scalar_lea.vmem %s3399_s0, %s2228_s28 }
  0x13   : > { %v2248_v1 = vld [vmem:[%s2572_s27 + $0x4] ss:$16 sps:$4 sm:$0xff]   ;;  %v2250_v2 = vld [vmem:[%s2572_s27 + $0xc] ss:$16 sps:$4 sm:$0xff]   ;;  %v2252_v3 = vld [vmem:[%s2572_s27] ss:$16 sps:$4 sm:$0xff]   ;;  %s2610_s10 = scalar_lea.vmem %s3401_s2, %s2229_s24 }
  0x14   : > { %555 = vmatprep.subr.bf16.mxu0 %v2248_v1  ;;  %v2253_v4 = vld [vmem:[%s2572_s27 + $0x8] ss:$16 sps:$4 sm:$0xff]   ;;  %598 = vmatprep.subr.bf16.mxu1 %v2250_v2  ;;  %v2254_v5 = vld [vmem:[%s2572_s27 + $0x24] ss:$16 sps:$4 sm:$0xff]   ;;  %v2256_v6 = vld [vmem:[%s2572_s27 + $0x2c] ss:$16 sps:$4 sm:$0xff]  }
  0x15   : > { %556 = vmatpush1.bf16.msra.mxu0 %v2252_v3  ;;  %599 = vmatpush1.bf16.msra.mxu1 %v2253_v4  ;;  %v2258_v7 = vld [vmem:[%s2572_s27 + $0x20] ss:$16 sps:$4 sm:$0xff]   ;;  %v2259_v8 = vld [vmem:[%s2572_s27 + $0x28] ss:$16 sps:$4 sm:$0xff]   ;;  %v2260_v9 = vld [vmem:[%s2572_s27 + $0x44] ss:$16 sps:$4 sm:$0xff]   ;;  %v369_v3 = vlaneseq }
  0x16   : > { %557 = vmatprep.subr.bf16.mxu0 %v2254_v5  ;;  %600 = vmatprep.subr.bf16.mxu1 %v2256_v6  ;;  %v2262_v10 = vld [vmem:[%s2572_s27 + $0x4c] ss:$16 sps:$4 sm:$0xff]   ;;  %v2264_v11 = vld [vmem:[%s2572_s27 + $0x40] ss:$16 sps:$4 sm:$0xff]   ;;  %v2265_v12 = vld [vmem:[%s2572_s27 + $0x48] ss:$16 sps:$4 sm:$0xff]  }
  0x17   : > { %v2266_v13 = vld [vmem:[%s2572_s27 + $0x64] ss:$16 sps:$4 sm:$0xff]   ;;  %v2268_v14 = vld [vmem:[%s2572_s27 + $0x6c] ss:$16 sps:$4 sm:$0xff]   ;;  %v2270_v15 = vld [vmem:[%s2572_s27 + $0x60] ss:$16 sps:$4 sm:$0xff]  }
  0x18   : > { %v2271_v16 = vld [vmem:[%s2572_s27 + $0x68] ss:$16 sps:$4 sm:$0xff]   ;;  %v2272_v17 = vld [vmem:[%s2572_s27 + $0x84] ss:$16 sps:$4 sm:$0xff]   ;;  %v2274_v18 = vld [vmem:[%s2572_s27 + $0x8c] ss:$16 sps:$4 sm:$0xff]  }
  0x19   : > { %558 = vmatpush1.bf16.msra.mxu0 %v2258_v7  ;;  %601 = vmatpush1.bf16.msra.mxu1 %v2259_v8  ;;  %v2276_v19 = vld [vmem:[%s2572_s27 + $0x80] ss:$16 sps:$4 sm:$0xff]   ;;  %v2277_v20 = vld [vmem:[%s2572_s27 + $0x88] ss:$16 sps:$4 sm:$0xff]   ;;  %v2278_v21 = vld [vmem:[%s2572_s27 + $0xa4] ss:$16 sps:$4 sm:$0xff]  }
  0x1a   : > { %559 = vmatprep.subr.bf16.mxu0 %v2260_v9  ;;  %602 = vmatprep.subr.bf16.mxu1 %v2262_v10  ;;  %v2280_v22 = vld [vmem:[%s2572_s27 + $0xac] ss:$16 sps:$4 sm:$0xff]   ;;  %v2282_v23 = vld [vmem:[%s2572_s27 + $0xa0] ss:$16 sps:$4 sm:$0xff]   ;;  %v2283_v24 = vld [vmem:[%s2572_s27 + $0xa8] ss:$16 sps:$4 sm:$0xff]  }
  0x1b   : > { %v2284_v25 = vld [vmem:[%s2572_s27 + $0xc4] ss:$16 sps:$4 sm:$0xff]   ;;  %v2286_v26 = vld [vmem:[%s2572_s27 + $0xcc] ss:$16 sps:$4 sm:$0xff]   ;;  %v2288_v27 = vld [vmem:[%s2572_s27 + $0xc0] ss:$16 sps:$4 sm:$0xff]  }
  0x1c   : > { %v2289_v28 = vld [vmem:[%s2572_s27 + $0xc8] ss:$16 sps:$4 sm:$0xff]   ;;  %v2290_v29 = vld [vmem:[%s2572_s27 + $0xe4] ss:$16 sps:$4 sm:$0xff]   ;;  %v2292_v30 = vld [vmem:[%s2572_s27 + $0xec] ss:$16 sps:$4 sm:$0xff]  }
  0x1d   : > { %560 = vmatpush1.bf16.msra.mxu0 %v2264_v11  ;;  %603 = vmatpush1.bf16.msra.mxu1 %v2265_v12  ;;  %v2294_v31 = vld [vmem:[%s2572_s27 + $0xe0] ss:$16 sps:$4 sm:$0xff]   ;;  %v2295_v32 = vld [vmem:[%s2572_s27 + $0xe8] ss:$16 sps:$4 sm:$0xff]   ;;  %v2620_v33 = vld [vmem:[%s2610_s10 + $0x4] ss:$16 sps:$4 sm:$0xff]   ;;  %s321_s27 = scalar_lea.vmem %s3403_s4, %s2228_s28 }
  0x1e   : > { %561 = vmatprep.subr.bf16.mxu0 %v2266_v13  ;;  %604 = vmatprep.subr.bf16.mxu1 %v2268_v14  ;;  %v2623_v34 = vld [vmem:[%s2610_s10 + $0xc] ss:$16 sps:$4 sm:$0xff]   ;;  %v2296_v35 = vld [vmem:[%s302_s7] sm:$0xff]   ;;  %v2629_v37 = vld [vmem:[%s2610_s10 + $0x8] ss:$16 sps:$4 sm:$0xff]   ;;  %s2124_s11 = sshll.u32 %s2564_s23, 2 }
  0x1f   : > { %v2626_v36 = vld [vmem:[%s2610_s10] ss:$16 sps:$4 sm:$0xff]   ;;  %v2632_v38 = vld [vmem:[%s2610_s10 + $0x24] ss:$16 sps:$4 sm:$0xff]   ;;  %v2637_v39 = vld [vmem:[%s2610_s10 + $0x2c] ss:$16 sps:$4 sm:$0xff]   ;;  %s316_s14 = scalar_lea.vmem %s3402_s3, %s2124_s11 }
  0x20   : > { %v2640_v40 = vld [vmem:[%s2610_s10 + $0x20] ss:$16 sps:$4 sm:$0xff]   ;;  %v2645_v41 = vld [vmem:[%s2610_s10 + $0x28] ss:$16 sps:$4 sm:$0xff]   ;;  %v2650_v42 = vld [vmem:[%s2610_s10 + $0x44] ss:$16 sps:$4 sm:$0xff]  }
  0x21   : > { %562 = vmatpush1.bf16.msra.mxu0 %v2270_v15  ;;  %605 = vmatpush1.bf16.msra.mxu1 %v2271_v16  ;;  %v2653_v43 = vld [vmem:[%s2610_s10 + $0x4c] ss:$16 sps:$4 sm:$0xff]   ;;  %v2660_v44 = vld [vmem:[%s2610_s10 + $0x40] ss:$16 sps:$4 sm:$0xff]   ;;  %v2663_v45 = vld [vmem:[%s2610_s10 + $0x48] ss:$16 sps:$4 sm:$0xff]  }
  0x22   : > { %563 = vmatprep.subr.bf16.mxu0 %v2272_v17  ;;  %606 = vmatprep.subr.bf16.mxu1 %v2274_v18  ;;  %v2666_v46 = vld [vmem:[%s2610_s10 + $0x64] ss:$16 sps:$4 sm:$0xff]   ;;  %v2671_v47 = vld [vmem:[%s2610_s10 + $0x6c] ss:$16 sps:$4 sm:$0xff]   ;;  %v2676_v48 = vld [vmem:[%s2610_s10 + $0x60] ss:$16 sps:$4 sm:$0xff]  }
  0x23   : > { %v2679_v49 = vld [vmem:[%s2610_s10 + $0x68] ss:$16 sps:$4 sm:$0xff]   ;;  %v2684_v50 = vld [vmem:[%s2610_s10 + $0x84] ss:$16 sps:$4 sm:$0xff]   ;;  %v2687_v51 = vld [vmem:[%s2610_s10 + $0x8c] ss:$16 sps:$4 sm:$0xff]  }
  0x24   : > { %v2692_v52 = vld [vmem:[%s2610_s10 + $0x80] ss:$16 sps:$4 sm:$0xff]   ;;  %v2695_v53 = vld [vmem:[%s2610_s10 + $0x88] ss:$16 sps:$4 sm:$0xff]   ;;  %v2700_v54 = vld [vmem:[%s2610_s10 + $0xa4] ss:$16 sps:$4 sm:$0xff]  }
  0x25   : > { %564 = vmatpush1.bf16.msra.mxu0 %v2276_v19  ;;  %607 = vmatpush1.bf16.msra.mxu1 %v2277_v20  ;;  %v2703_v55 = vld [vmem:[%s2610_s10 + $0xac] ss:$16 sps:$4 sm:$0xff]   ;;  %v2708_v56 = vld [vmem:[%s2610_s10 + $0xa0] ss:$16 sps:$4 sm:$0xff]   ;;  %v2711_v57 = vld [vmem:[%s2610_s10 + $0xa8] ss:$16 sps:$4 sm:$0xff]  }
  0x26   : > { %565 = vmatprep.subr.bf16.mxu0 %v2278_v21  ;;  %608 = vmatprep.subr.bf16.mxu1 %v2280_v22  ;;  %v2716_v58 = vld [vmem:[%s2610_s10 + $0xc4] ss:$16 sps:$4 sm:$0xff]   ;;  %v2719_v59 = vld [vmem:[%s2610_s10 + $0xcc] ss:$16 sps:$4 sm:$0xff]   ;;  %v2724_v60 = vld [vmem:[%s2610_s10 + $0xc0] ss:$16 sps:$4 sm:$0xff]  }
  0x27   : > { %v2727_v61 = vld [vmem:[%s2610_s10 + $0xc8] ss:$16 sps:$4 sm:$0xff]   ;;  %v2732_v62 = vld [vmem:[%s2610_s10 + $0xe4] ss:$16 sps:$4 sm:$0xff]   ;;  %v2735_v63 = vld [vmem:[%s2610_s10 + $0xec] ss:$16 sps:$4 sm:$0xff]  }
  0x28   : > { %v2740_v1 = vld [vmem:[%s2610_s10 + $0xe0] ss:$16 sps:$4 sm:$0xff]   ;;  %v2743_v2 = vld [vmem:[%s2610_s10 + $0xe8] ss:$16 sps:$4 sm:$0xff]   ;;  %v370_v4 = vshrl.u32 %v369_v3, 7  ;;  %s2127_s16 = sshll.u32 %s2564_s23, 1 }
  0x29   : > { %566 = vmatpush1.bf16.msra.mxu0 %v2282_v23  ;;  %609 = vmatpush1.bf16.msra.mxu1 %v2283_v24  ;;  %v367_v7 = vld [vmem:[%s316_s14] sm:$0xf]  ;;  %s329_s19 = scalar_lea.vmem %s3405_s6, %s2127_s16  ;;  %s325_s24 = scalar_lea.vmem %s3404_s5, %s2127_s16 }
  0x2a   : > { %567 = vmatprep.subr.bf16.mxu0 %v2284_v25  ;;  %610 = vmatprep.subr.bf16.mxu1 %v2286_v26  ;;  %v371_v5 = vsub.s32 0, %v370_v4  ;;  %v379_v6 = vsub.s32 2, %v370_v4  ;;  %v375_v8 = vsub.s32 1, %v370_v4  ;;  %v383_v9 = vsub.s32 3, %v370_v4 }
  0x2c   : > { %v372_v10 = vrot.slane %v367_v7, %v371_v5  ;;  %v380_v11 = vrot.slane %v367_v7, %v379_v6  ;;  %v376_v12 = vrot.slane %v367_v7, %v375_v8  ;;  %v384_v13 = vrot.slane %v367_v7, %v383_v9 }
  0x2d   : > { %568 = vmatpush1.bf16.msra.mxu0 %v2288_v27  ;;  %611 = vmatpush1.bf16.msra.mxu1 %v2289_v28 }
  0x2e   : > { %569 = vmatprep.subr.bf16.mxu0 %v2290_v29  ;;  %612 = vmatprep.subr.bf16.mxu1 %v2292_v30 }
  0x31   : > { %570 = vmatpush1.bf16.msra.mxu0 %v2294_v31  ;;  %613 = vmatpush1.bf16.msra.mxu1 %v2295_v32 }
  0x32   : > { %850 = vmatprep.subr.bf16.mxu0 %v2620_v33  ;;  %891 = vmatprep.subr.bf16.mxu1 %v2623_v34 }
  0x34   : > { %588 = vmatmul.mubr.bf16.vlgmr.msra.gmra.mrb[0].mxu0 %v2296_v35  ;;  %631 = vmatmul.mubr.bf16.vlgmr.msra.gmra.mrb[0].mxu1 %v2296_v35 }
  0x35   : > { %851 = vmatpush1.bf16.msra.mxu0 %v2626_v36  ;;  %892 = vmatpush1.bf16.msra.mxu1 %v2629_v37 }
  0x36   : > { %852 = vmatprep.subr.bf16.mxu0 %v2632_v38  ;;  %893 = vmatprep.subr.bf16.mxu1 %v2637_v39 }
  0x37   : > { %882 = vmatprep.mubr.bf16.mxu0 %v3406_v0  ;;  %923 = vmatprep.mubr.bf16.mxu1 %v3406_v0 }
  0x39   : > { %853 = vmatpush1.bf16.msra.mxu0 %v2640_v40  ;;  %894 = vmatpush1.bf16.msra.mxu1 %v2645_v41 }
  0x3a   : > { %854 = vmatprep.subr.bf16.mxu0 %v2650_v42  ;;  %895 = vmatprep.subr.bf16.mxu1 %v2653_v43 }
  0x3d   : > { %855 = vmatpush1.bf16.msra.mxu0 %v2660_v44  ;;  %896 = vmatpush1.bf16.msra.mxu1 %v2663_v45 }
  0x3e   : > { %856 = vmatprep.subr.bf16.mxu0 %v2666_v46  ;;  %897 = vmatprep.subr.bf16.mxu1 %v2671_v47 }
  0x41   : > { %857 = vmatpush1.bf16.msra.mxu0 %v2676_v48  ;;  %898 = vmatpush1.bf16.msra.mxu1 %v2679_v49 }
  0x42   : > { %858 = vmatprep.subr.bf16.mxu0 %v2684_v50  ;;  %899 = vmatprep.subr.bf16.mxu1 %v2687_v51 }
  0x45   : > { %859 = vmatpush1.bf16.msra.mxu0 %v2692_v52  ;;  %900 = vmatpush1.bf16.msra.mxu1 %v2695_v53 }
  0x46   : > { %860 = vmatprep.subr.bf16.mxu0 %v2700_v54  ;;  %901 = vmatprep.subr.bf16.mxu1 %v2703_v55 }
  0x49   : > { %861 = vmatpush1.bf16.msra.mxu0 %v2708_v56  ;;  %902 = vmatpush1.bf16.msra.mxu1 %v2711_v57 }
  0x4a   : > { %862 = vmatprep.subr.bf16.mxu0 %v2716_v58  ;;  %903 = vmatprep.subr.bf16.mxu1 %v2719_v59 }
  0x4d   : > { %863 = vmatpush1.bf16.msra.mxu0 %v2724_v60  ;;  %904 = vmatpush1.bf16.msra.mxu1 %v2727_v61 }
  0x4e   : > { %864 = vmatprep.subr.bf16.mxu0 %v2732_v62  ;;  %905 = vmatprep.subr.bf16.mxu1 %v2735_v63 }
  0x51   : > { %865 = vmatpush1.bf16.msra.mxu0 %v2740_v1  ;;  %906 = vmatpush1.bf16.msra.mxu1 %v2743_v2 }
  0x52   : > { %983 = vmatprep.subr.bf16.mxu0 %v2620_v33  ;;  %1024 = vmatprep.subr.bf16.mxu1 %v2623_v34 }
  0x54   : > { %883 = vmatmul.mubr.bf16.vlgmr.msra.gmra.mrb[4].mxu0 %v3406_v0  ;;  %924 = vmatmul.mubr.bf16.vlgmr.msra.gmra.mrb[4].mxu1 %v3406_v0 }
  0x55   : > { %984 = vmatpush1.bf16.msra.mxu0 %v2626_v36  ;;  %1025 = vmatpush1.bf16.msra.mxu1 %v2629_v37 }
  0x56   : > { %985 = vmatprep.subr.bf16.mxu0 %v2632_v38  ;;  %1026 = vmatprep.subr.bf16.mxu1 %v2637_v39 }
  0x57   : > { %1015 = vmatprep.mubr.bf16.mxu0 %v3406_v0  ;;  %1056 = vmatprep.mubr.bf16.mxu1 %v3406_v0 }
  0x59   : > { %986 = vmatpush1.bf16.msra.mxu0 %v2640_v40  ;;  %1027 = vmatpush1.bf16.msra.mxu1 %v2645_v41 }
  0x5a   : > { %987 = vmatprep.subr.bf16.mxu0 %v2650_v42  ;;  %1028 = vmatprep.subr.bf16.mxu1 %v2653_v43 }
  0x5d   : > { %988 = vmatpush1.bf16.msra.mxu0 %v2660_v44  ;;  %1029 = vmatpush1.bf16.msra.mxu1 %v2663_v45 }
  0x5e   : > { %989 = vmatprep.subr.bf16.mxu0 %v2666_v46  ;;  %1030 = vmatprep.subr.bf16.mxu1 %v2671_v47 }
  0x61   : > { %990 = vmatpush1.bf16.msra.mxu0 %v2676_v48  ;;  %1031 = vmatpush1.bf16.msra.mxu1 %v2679_v49 }
  0x62   : > { %991 = vmatprep.subr.bf16.mxu0 %v2684_v50  ;;  %1032 = vmatprep.subr.bf16.mxu1 %v2687_v51 }
  0x65   : > { %992 = vmatpush1.bf16.msra.mxu0 %v2692_v52  ;;  %1033 = vmatpush1.bf16.msra.mxu1 %v2695_v53 }
  0x66   : > { %993 = vmatprep.subr.bf16.mxu0 %v2700_v54  ;;  %1034 = vmatprep.subr.bf16.mxu1 %v2703_v55 }
  0x69   : > { %994 = vmatpush1.bf16.msra.mxu0 %v2708_v56  ;;  %1035 = vmatpush1.bf16.msra.mxu1 %v2711_v57 }
  0x6a   : > { %995 = vmatprep.subr.bf16.mxu0 %v2716_v58  ;;  %1036 = vmatprep.subr.bf16.mxu1 %v2719_v59 }
  0x6d   : > { %996 = vmatpush1.bf16.msra.mxu0 %v2724_v60  ;;  %1037 = vmatpush1.bf16.msra.mxu1 %v2727_v61 }
  0x6e   : > { %997 = vmatprep.subr.bf16.mxu0 %v2732_v62  ;;  %1038 = vmatprep.subr.bf16.mxu1 %v2735_v63 }
  0x71   : > { %998 = vmatpush1.bf16.msra.mxu0 %v2740_v1  ;;  %1039 = vmatpush1.bf16.msra.mxu1 %v2743_v2 }
  0x72   : > { %1120 = vmatprep.subr.bf16.mxu0 %v2620_v33  ;;  %1161 = vmatprep.subr.bf16.mxu1 %v2623_v34 }
 0x107   : > { %v589_v14 = vpop.f32.mrb[0].mxu0  ;;  %v632_v15 = vpop.f32.mrb[0].mxu1 }
 0x108   : > { %v2791_v16 = vadd.f32 %v589_v14, %v372_v10  ;;  %v591_v17 = vpop.f32.mrb[1].mxu0  ;;  %v2793_v18 = vadd.f32 %v632_v15, %v380_v11  ;;  %v634_v19 = vpop.f32.mrb[1].mxu1 }
 0x109   : > { %v2795_v20 = vadd.f32 %v591_v17, %v376_v12  ;;  %v593_v21 = vpop.f32.mrb[2].mxu0  ;;  %v2797_v22 = vadd.f32 %v634_v19, %v384_v13  ;;  %v636_v23 = vpop.f32.mrb[2].mxu1 }
 0x10a   : > { %v2799_v24 = vadd.f32 %v593_v21, %v372_v10  ;;  %v595_v25 = vpop.f32.mrb[3].mxu0  ;;  %v2801_v26 = vadd.f32 %v636_v23, %v380_v11  ;;  %v638_v27 = vpop.f32.mrb[3].mxu1  ;;  %v970_v28 = vrot.slane %v2791_v16, 1  ;;  %v972_v29 = vrot.slane %v2793_v18, 1 }
 0x10b   : > { %v2805_v30 = vadd.f32 %v595_v25, %v376_v12  ;;  %v2807_v31 = vadd.f32 %v638_v27, %v384_v13  ;;  %v971_v32 = vrot.slane %v2795_v20, 1  ;;  %v973_v35 = vrot.slane %v2797_v22, 1 }
 0x10c   : > { %v677_v3 = vrot.slane %v2799_v24, 7  ;;  %v679_v4 = vrot.slane %v2801_v26, 7  ;;  %v2815_v5 = vsel %vm685_vm0, %v970_v28, %v2799_v24  ;;  %v2819_v6 = vsel %vm685_vm0, %v972_v29, %v2801_v26 }
 0x10d   : > { %v678_v7 = vrot.slane %v2805_v30, 7  ;;  %v680_v8 = vrot.slane %v2807_v31, 7  ;;  %v2825_v9 = vsel %vm685_vm0, %v971_v32, %v2805_v30  ;;  %v2829_v10 = vsel %vm685_vm0, %v973_v35, %v2807_v31 }
 0x10e   : > { %v2833_v11 = vsel %vm685_vm0, %v2791_v16, %v677_v3  ;;  %v2837_v12 = vsel %vm685_vm0, %v2793_v18, %v679_v4  ;;  %v1099_v13 = vrot.slane %v2791_v16, 2  ;;  %v1107_v14 = vrot.slane %v2799_v24, 1 }
 0x10f   : > { %v2843_v15 = vsel %vm685_vm0, %v2795_v20, %v678_v7  ;;  %v2847_v17 = vsel %vm685_vm0, %v2797_v22, %v680_v8  ;;  %v1101_v19 = vrot.slane %v2793_v18, 2  ;;  %v1109_v21 = vrot.slane %v2801_v26, 1 }
 0x110   : > { %v2852_v23 = vsel %vm685_vm0, %v1099_v13, %v1107_v14  ;;  %v1100_v25 = vrot.slane %v2795_v20, 2  ;;  %v1108_v27 = vrot.slane %v2805_v30, 1  ;;  %v1102_v28 = vrot.slane %v2797_v22, 2 }
 0x111   : > { %3409 = vst [vmem:[#allocation2_spill] sm:$0xff] %v2852_v23  ;;  %v2858_v29 = vsel %vm685_vm0, %v1101_v19, %v1109_v21  ;;  %v1110_v32 = vrot.slane %v2807_v31, 1  ;;  %v1236_v35 = vrot.slane %v2791_v16, 3  ;;  %v1244_v3 = vrot.slane %v2799_v24, 2 }
 0x112   : > { %3410 = vst [vmem:[#allocation3_spill] sm:$0xff] %v2858_v29  ;;  %v2864_v4 = vsel %vm685_vm0, %v1100_v25, %v1108_v27  ;;  %v1238_v7 = vrot.slane %v2793_v18, 3  ;;  %v1246_v8 = vrot.slane %v2801_v26, 2  ;;  %v1237_v13 = vrot.slane %v2795_v20, 3 }
 0x113   : > { %3411 = vst [vmem:[#allocation4_spill] sm:$0xff] %v2864_v4  ;;  %v2870_v14 = vsel %vm685_vm0, %v1102_v28, %v1110_v32  ;;  %v2873_v19 = vsel %vm685_vm0, %v1236_v35, %v1244_v3  ;;  %v1245_v21 = vrot.slane %v2805_v30, 2  ;;  %v1239_v0 = vrot.slane %v2797_v22, 3 }
 0x114   : > { %3412 = vst [vmem:[#allocation5_spill] sm:$0xff] %v2870_v14  ;;  %3413 = vst [vmem:[#allocation6_spill] sm:$0xff] %v2873_v19  ;;  %v2878_v29 = vsel %vm685_vm0, %v1238_v7, %v1246_v8  ;;  %v1247_v25 = vrot.slane %v2807_v31, 2  ;;  %v1373_v27 = vrot.slane %v2791_v16, 4  ;;  %v1381_v4 = vrot.slane %v2799_v24, 3 }
 0x115   : > { %3414 = vst [vmem:[#allocation7_spill] sm:$0xff] %v2878_v29  ;;  %v2884_v23 = vsel %vm685_vm0, %v1237_v13, %v1245_v21  ;;  %v1375_v28 = vrot.slane %v2793_v18, 4  ;;  %v1383_v32 = vrot.slane %v2801_v26, 3  ;;  %v1374_v35 = vrot.slane %v2795_v20, 4 }
 0x116   : > { %3415 = vst [vmem:[#allocation8_spill] sm:$0xff] %v2884_v23  ;;  %v2890_v3 = vsel %vm685_vm0, %v1239_v0, %v1247_v25  ;;  %v2893_v7 = vsel %vm685_vm0, %v1373_v27, %v1381_v4  ;;  %v1382_v8 = vrot.slane %v2805_v30, 3  ;;  %v1376_v29 = vrot.slane %v2797_v22, 4 }
 0x117   : > { %3416 = vst [vmem:[#allocation9_spill] sm:$0xff] %v2890_v3  ;;  %3417 = vst [vmem:[#allocation10_spill] sm:$0xff] %v2893_v7  ;;  %v2898_v19 = vsel %vm685_vm0, %v1375_v28, %v1383_v32  ;;  %v1384_v13 = vrot.slane %v2807_v31, 3  ;;  %v1510_v21 = vrot.slane %v2791_v16, 5  ;;  %v1518_v23 = vrot.slane %v2799_v24, 4 }
 0x118   : > { %3418 = vst [vmem:[#allocation11_spill] sm:$0xff] %v2898_v19  ;;  %v2904_v14 = vsel %vm685_vm0, %v1374_v35, %v1382_v8  ;;  %v1512_v0 = vrot.slane %v2793_v18, 5  ;;  %v1520_v4 = vrot.slane %v2801_v26, 4  ;;  %v1511_v25 = vrot.slane %v2795_v20, 5 }
 0x119   : > { %3419 = vst [vmem:[#allocation12_spill] sm:$0xff] %v2904_v14  ;;  %v2910_v27 = vsel %vm685_vm0, %v1376_v29, %v1384_v13  ;;  %v2913_v28 = vsel %vm685_vm0, %v1510_v21, %v1518_v23  ;;  %v1519_v32 = vrot.slane %v2805_v30, 4  ;;  %v1513_v19 = vrot.slane %v2797_v22, 5 }
 0x11a   : > { %3420 = vst [vmem:[#allocation13_spill] sm:$0xff] %v2910_v27  ;;  %3421 = vst [vmem:[#allocation14_spill] sm:$0xff] %v2913_v28  ;;  %v2918_v7 = vsel %vm685_vm0, %v1512_v0, %v1520_v4  ;;  %v1521_v35 = vrot.slane %v2807_v31, 4  ;;  %v1647_v8 = vrot.slane %v2791_v16, 6  ;;  %v1655_v14 = vrot.slane %v2799_v24, 5 }
 0x11b   : > { %3422 = vst [vmem:[#allocation15_spill] sm:$0xff] %v2918_v7  ;;  %v2924_v3 = vsel %vm685_vm0, %v1511_v25, %v1519_v32  ;;  %v1649_v29 = vrot.slane %v2793_v18, 6  ;;  %v1657_v23 = vrot.slane %v2801_v26, 5  ;;  %v1648_v13 = vrot.slane %v2795_v20, 6 }
 0x11c   : > { %3423 = vst [vmem:[#allocation16_spill] sm:$0xff] %v2924_v3  ;;  %v2930_v21 = vsel %vm685_vm0, %v1513_v19, %v1521_v35  ;;  %v2933_v0 = vsel %vm685_vm0, %v1647_v8, %v1655_v14  ;;  %v1656_v4 = vrot.slane %v2805_v30, 5  ;;  %v1650_v7 = vrot.slane %v2797_v22, 6 }
 0x11d   : > { %v2938_v28 = vsel %vm685_vm0, %v1649_v29, %v1657_v23  ;;  %v1658_v25 = vrot.slane %v2807_v31, 5  ;;  %v1784_v32 = vrot.slane %v2791_v16, 7  ;;  %v1792_v3 = vrot.slane %v2799_v24, 6 }
 0x11e   : > { %v2944_v27 = vsel %vm685_vm0, %v1648_v13, %v1656_v4  ;;  %v1786_v19 = vrot.slane %v2793_v18, 7  ;;  %v1794_v14 = vrot.slane %v2801_v26, 6  ;;  %v1785_v35 = vrot.slane %v2795_v20, 7 }
 0x11f   : > { %v2950_v8 = vsel %vm685_vm0, %v1650_v7, %v1658_v25  ;;  %v2953_v29 = vsel %vm685_vm0, %v1784_v32, %v1792_v3  ;;  %v1793_v23 = vrot.slane %v2805_v30, 6  ;;  %v1787_v16 = vrot.slane %v2797_v22, 7 }
 0x120   : > { %v2958_v24 = vsel %vm685_vm0, %v1786_v19, %v1794_v14  ;;  %v1795_v13 = vrot.slane %v2807_v31, 6 }
 0x121   : > { %v2962_v18 = vsel %vm685_vm0, %v1785_v35, %v1793_v23 }
 0x122   : > { %3424 = vst [vmem:[#allocation17_spill] sm:$0xff] %v2962_v18  ;;  %v2965_v20 = vsel %vm685_vm0, %v1787_v16, %v1795_v13 }
 0x123   : > { %3425 = vst [vmem:[#allocation18_spill] sm:$0xff] %v2965_v20 }
 0x127   : > { %v884_v26 = vpop.f32.mrb[4].mxu0  ;;  %v925_v7 = vpop.f32.mrb[4].mxu1 }
 0x128   : > { %v932_v3 = vadd.f32 %v884_v26, %v2833_v11  ;;  %v934_v4 = vadd.f32 %v925_v7, %v2837_v12  ;;  %v886_v30 = vpop.f32.mrb[5].mxu0  ;;  %v927_v25 = vpop.f32.mrb[5].mxu1 }
 0x129   : > { %v933_v22 = vadd.f32 %v886_v30, %v2843_v15  ;;  %v935_v32 = vadd.f32 %v927_v25, %v2847_v17  ;;  %v888_v19 = vpop.f32.mrb[6].mxu0  ;;  %v929_v31 = vpop.f32.mrb[6].mxu1 }
 0x12a   : > { %v2194_v14 = vmul.f32 -1.442695, %v932_v3  ;;  %v889_v35 = vpop.f32.mrb[7].mxu0  ;;  %v930_v23 = vpop.f32.mrb[7].mxu1 }
 0x12b   : > { %v2195_v18 = vmul.f32 -1.442695, %v933_v22  ;;  %v2196_v16 = vmul.f32 -1.442695, %v935_v32 }
 0x12c   : > { %2345 = vpow2.f32 %v2194_v14 }
 0x12d   : > { %2347 = vpow2.f32 %v2195_v18 }
 0x12e   : > { %2349 = vpow2.f32 %v2196_v16 }
 0x12f   : > { %2351 = vtanh.f32 %v934_v4  ;;  %v3427_v4 = vmov 0  }
 0x136   : > { %v2346_v13 = vpop.eup %2345 }
 0x137   : > { %v2348_v20 = vpop.eup %2347  ;;  %v939_v11 = vadd.f32 1.0, %v2346_v13 }
 0x138   : > { %v945_v12 = vadd.f32 1.0, %v2348_v20  ;;  %v2350_v15 = vpop.eup %2349 }
 0x139   : > { %2353 = vrcp.f32 %v939_v11  ;;  %v2352_v26 = vpop.eup %2351  ;;  %v952_v3 = vadd.f32 1.0, %v2350_v15 }
 0x13a   : > { %2355 = vrcp.f32 %v945_v12 }
 0x13b   : > { %2357 = vrcp.f32 %v952_v3 }
 0x143   : > { %v2354_v17 = vpop.eup %2353 }
 0x144   : > { %v2356_v7 = vpop.eup %2355  ;;  %v956_v30 = vmul.f32 %v2354_v17, %v2352_v26 }
 0x145   : > { %v955_v25 = vmul.f32 0.0, %v2356_v7  ;;  %v2358_v18 = vpop.eup %2357 }
 0x147   : > { %v2971_v19 = vadd.f32 %v956_v30, %v955_v25 }
 0x149   : > { %2359 = vtanh.f32 %v2971_v19 }
 0x153   : > { %v2360_v22 = vpop.eup %2359 }
 0x154   : > { %v2974_v32 = vmul.f32 %v2360_v22, %v2358_v18 }
 0x156   : > { %3426 = vst [vmem:[#allocation19_spill] sm:$0xff] %v2974_v32  ;;  %v2198_v20 = vpack.c.bf16 %v2974_v32, %v2974_v32 }
 0x158   : > { %2199 = vmatmul.mubr.msk.bf16.vlgmr.msra.gmra.mrb[8].mxu0 %vm2197_vm2, %v2198_v20  ;;  %2202 = vmatmul.mubr.msk.bf16.vlgmr.msra.gmra.mrb[8].mxu1 %vm2197_vm2, %v2198_v20 }
 0x159   : > { %1121 = vmatpush1.bf16.msra.mxu0 %v2626_v36  ;;  %1162 = vmatpush1.bf16.msra.mxu1 %v2629_v37 }
 0x15a   : > { %1122 = vmatprep.subr.bf16.mxu0 %v2632_v38  ;;  %1163 = vmatprep.subr.bf16.mxu1 %v2637_v39 }
 0x15b   : > { %1152 = vmatprep.mubr.bf16.mxu0 %v3427_v4  ;;  %1193 = vmatprep.mubr.bf16.mxu1 %v3427_v4 }
 0x15d   : > { %1123 = vmatpush1.bf16.msra.mxu0 %v2640_v40  ;;  %1164 = vmatpush1.bf16.msra.mxu1 %v2645_v41 }
 0x15e   : > { %1124 = vmatprep.subr.bf16.mxu0 %v2650_v42  ;;  %1165 = vmatprep.subr.bf16.mxu1 %v2653_v43 }
 0x161   : > { %1125 = vmatpush1.bf16.msra.mxu0 %v2660_v44  ;;  %1166 = vmatpush1.bf16.msra.mxu1 %v2663_v45 }
 0x162   : > { %1126 = vmatprep.subr.bf16.mxu0 %v2666_v46  ;;  %1167 = vmatprep.subr.bf16.mxu1 %v2671_v47 }
 0x165   : > { %1127 = vmatpush1.bf16.msra.mxu0 %v2676_v48  ;;  %1168 = vmatpush1.bf16.msra.mxu1 %v2679_v49 }
 0x166   : > { %1128 = vmatprep.subr.bf16.mxu0 %v2684_v50  ;;  %1169 = vmatprep.subr.bf16.mxu1 %v2687_v51 }
 0x169   : > { %1129 = vmatpush1.bf16.msra.mxu0 %v2692_v52  ;;  %1170 = vmatpush1.bf16.msra.mxu1 %v2695_v53 }
 0x16a   : > { %1130 = vmatprep.subr.bf16.mxu0 %v2700_v54  ;;  %1171 = vmatprep.subr.bf16.mxu1 %v2703_v55 }
 0x16d   : > { %1131 = vmatpush1.bf16.msra.mxu0 %v2708_v56  ;;  %1172 = vmatpush1.bf16.msra.mxu1 %v2711_v57 }
 0x16e   : > { %1132 = vmatprep.subr.bf16.mxu0 %v2716_v58  ;;  %1173 = vmatprep.subr.bf16.mxu1 %v2719_v59 }
 0x171   : > { %1133 = vmatpush1.bf16.msra.mxu0 %v2724_v60  ;;  %1174 = vmatpush1.bf16.msra.mxu1 %v2727_v61 }
 0x172   : > { %1134 = vmatprep.subr.bf16.mxu0 %v2732_v62  ;;  %1175 = vmatprep.subr.bf16.mxu1 %v2735_v63 }
 0x175   : > { %1135 = vmatpush1.bf16.msra.mxu0 %v2740_v1  ;;  %1176 = vmatpush1.bf16.msra.mxu1 %v2743_v2 }
 0x176   : > { %1257 = vmatprep.subr.bf16.mxu0 %v2620_v33  ;;  %1298 = vmatprep.subr.bf16.mxu1 %v2623_v34 }
 0x22b   : > { %v1017_v31 = vpop.f32.mrb[8].mxu0  ;;  %v1058_v14 = vpop.f32.mrb[8].mxu1 }
 0x22c   : > { %v1065_v35 = vadd.f32 %v1017_v31, %v2815_v5  ;;  %v1067_v23 = vadd.f32 %v1058_v14, %v2819_v6  ;;  %v1019_v16 = vpop.f32.mrb[9].mxu0  ;;  %v1060_v13 = vpop.f32.mrb[9].mxu1 }
 0x22d   : > { %v1066_v11 = vadd.f32 %v1019_v16, %v2825_v9  ;;  %v1068_v12 = vadd.f32 %v1060_v13, %v2829_v10  ;;  %v1021_v15 = vpop.f32.mrb[10].mxu0  ;;  %v1062_v26 = vpop.f32.mrb[10].mxu1 }
 0x22e   : > { %v2203_v17 = vmul.f32 -1.442695, %v1065_v35  ;;  %v1022_v7 = vpop.f32.mrb[11].mxu0  ;;  %v1063_v30 = vpop.f32.mrb[11].mxu1 }
 0x22f   : > { %v2204_v3 = vmul.f32 -1.442695, %v1066_v11  ;;  %v2205_v25 = vmul.f32 -1.442695, %v1068_v12  ;;  %v3429_v30 = vld [vmem:[#allocation3_spill] sm:$0xff] }
 0x230   : > { %2361 = vpow2.f32 %v2203_v17  ;;  %v3428_v17 = vld [vmem:[#allocation2_spill] sm:$0xff] }
 0x231   : > { %2363 = vpow2.f32 %v2204_v3 }
 0x232   : > { %2365 = vpow2.f32 %v2205_v25 }
 0x233   : > { %2367 = vtanh.f32 %v1067_v23 }
 0x23a   : > { %v2362_v18 = vpop.eup %2361 }
 0x23b   : > { %v2364_v22 = vpop.eup %2363  ;;  %v1072_v5 = vadd.f32 1.0, %v2362_v18 }
 0x23c   : > { %v1078_v6 = vadd.f32 1.0, %v2364_v22  ;;  %v2366_v9 = vpop.eup %2365  ;;  %v3430_v22 = vld [vmem:[#allocation4_spill] sm:$0xff] }
 0x23d   : > { %2369 = vrcp.f32 %v1072_v5  ;;  %v2368_v20 = vpop.eup %2367  ;;  %v1085_v35 = vadd.f32 1.0, %v2366_v9 }
 0x23e   : > { %2371 = vrcp.f32 %v1078_v6  ;;  %v3431_v6 = vld [vmem:[#allocation5_spill] sm:$0xff] }
 0x23f   : > { %2373 = vrcp.f32 %v1085_v35 }
 0x247   : > { %v2370_v10 = vpop.eup %2369 }
 0x248   : > { %v2372_v31 = vpop.eup %2371  ;;  %v1089_v14 = vmul.f32 %v2370_v10, %v2368_v20 }
 0x249   : > { %v1088_v16 = vmul.f32 %v2372_v31, %v2971_v19  ;;  %v2374_v11 = vpop.eup %2373 }
 0x24b   : > { %v3017_v13 = vadd.f32 %v1089_v14, %v1088_v16 }
 0x24d   : > { %2375 = vtanh.f32 %v3017_v13 }
 0x257   : > { %v2376_v12 = vpop.eup %2375 }
 0x258   : > { %v3020_v15 = vmul.f32 %v2376_v12, %v2374_v11 }
 0x25a   : > { %v1119_v23 = vpack.c.bf16 %v3020_v15, %v3020_v15 }
 0x25c   : > { %1153 = vmatmul.mubr.bf16.vlgmr.msra.gmra.mrb[12].mxu0 %v1119_v23  ;;  %1194 = vmatmul.mubr.bf16.vlgmr.msra.gmra.mrb[12].mxu1 %v1119_v23 }
 0x25d   : > { %1258 = vmatpush1.bf16.msra.mxu0 %v2626_v36  ;;  %1299 = vmatpush1.bf16.msra.mxu1 %v2629_v37 }
 0x25e   : > { %1259 = vmatprep.subr.bf16.mxu0 %v2632_v38  ;;  %1300 = vmatprep.subr.bf16.mxu1 %v2637_v39 }
 0x25f   : > { %1289 = vmatprep.mubr.bf16.mxu0 %v3427_v4  ;;  %1330 = vmatprep.mubr.bf16.mxu1 %v3427_v4 }
 0x261   : > { %1260 = vmatpush1.bf16.msra.mxu0 %v2640_v40  ;;  %1301 = vmatpush1.bf16.msra.mxu1 %v2645_v41 }
 0x262   : > { %1261 = vmatprep.subr.bf16.mxu0 %v2650_v42  ;;  %1302 = vmatprep.subr.bf16.mxu1 %v2653_v43 }
 0x265   : > { %1262 = vmatpush1.bf16.msra.mxu0 %v2660_v44  ;;  %1303 = vmatpush1.bf16.msra.mxu1 %v2663_v45 }
 0x266   : > { %1263 = vmatprep.subr.bf16.mxu0 %v2666_v46  ;;  %1304 = vmatprep.subr.bf16.mxu1 %v2671_v47 }
 0x269   : > { %1264 = vmatpush1.bf16.msra.mxu0 %v2676_v48  ;;  %1305 = vmatpush1.bf16.msra.mxu1 %v2679_v49 }
 0x26a   : > { %1265 = vmatprep.subr.bf16.mxu0 %v2684_v50  ;;  %1306 = vmatprep.subr.bf16.mxu1 %v2687_v51 }
 0x26d   : > { %1266 = vmatpush1.bf16.msra.mxu0 %v2692_v52  ;;  %1307 = vmatpush1.bf16.msra.mxu1 %v2695_v53 }
 0x26e   : > { %1267 = vmatprep.subr.bf16.mxu0 %v2700_v54  ;;  %1308 = vmatprep.subr.bf16.mxu1 %v2703_v55 }
 0x271   : > { %1268 = vmatpush1.bf16.msra.mxu0 %v2708_v56  ;;  %1309 = vmatpush1.bf16.msra.mxu1 %v2711_v57 }
 0x272   : > { %1269 = vmatprep.subr.bf16.mxu0 %v2716_v58  ;;  %1310 = vmatprep.subr.bf16.mxu1 %v2719_v59 }
 0x275   : > { %1270 = vmatpush1.bf16.msra.mxu0 %v2724_v60  ;;  %1311 = vmatpush1.bf16.msra.mxu1 %v2727_v61 }
 0x276   : > { %1271 = vmatprep.subr.bf16.mxu0 %v2732_v62  ;;  %1312 = vmatprep.subr.bf16.mxu1 %v2735_v63 }
 0x279   : > { %1272 = vmatpush1.bf16.msra.mxu0 %v2740_v1  ;;  %1313 = vmatpush1.bf16.msra.mxu1 %v2743_v2 }
 0x27a   : > { %1394 = vmatprep.subr.bf16.mxu0 %v2620_v33  ;;  %1435 = vmatprep.subr.bf16.mxu1 %v2623_v34 }
 0x32f   : > { %v1154_v19 = vpop.f32.mrb[12].mxu0  ;;  %v1195_v26 = vpop.f32.mrb[12].mxu1 }
 0x330   : > { %v1202_v7 = vadd.f32 %v1154_v19, %v3428_v17  ;;  %v1204_v3 = vadd.f32 %v1195_v26, %v3429_v30  ;;  %v1156_v25 = vpop.f32.mrb[13].mxu0  ;;  %v1197_v18 = vpop.f32.mrb[13].mxu1 }
 0x331   : > { %v1203_v5 = vadd.f32 %v1156_v25, %v3430_v22  ;;  %v1205_v9 = vadd.f32 %v1197_v18, %v3431_v6  ;;  %v1158_v20 = vpop.f32.mrb[14].mxu0  ;;  %v1199_v10 = vpop.f32.mrb[14].mxu1 }
 0x332   : > { %v2206_v31 = vmul.f32 -1.442695, %v1202_v7  ;;  %v1159_v14 = vpop.f32.mrb[15].mxu0  ;;  %v1200_v35 = vpop.f32.mrb[15].mxu1 }
 0x333   : > { %v2207_v16 = vmul.f32 -1.442695, %v1203_v5  ;;  %v2208_v11 = vmul.f32 -1.442695, %v1205_v9  ;;  %v3435_v14 = vld [vmem:[#allocation9_spill] sm:$0xff] }
 0x334   : > { %2377 = vpow2.f32 %v2206_v31 }
 0x335   : > { %2379 = vpow2.f32 %v2207_v16 }
 0x336   : > { %2381 = vpow2.f32 %v2208_v11 }
 0x337   : > { %2383 = vtanh.f32 %v1204_v3 }
 0x33e   : > { %v2378_v12 = vpop.eup %2377 }
 0x33f   : > { %v2380_v23 = vpop.eup %2379  ;;  %v1209_v19 = vadd.f32 1.0, %v2378_v12 }
 0x340   : > { %v1215_v26 = vadd.f32 1.0, %v2380_v23  ;;  %v2382_v17 = vpop.eup %2381 }
 0x341   : > { %2385 = vrcp.f32 %v1209_v19  ;;  %v2384_v30 = vpop.eup %2383  ;;  %v1222_v7 = vadd.f32 1.0, %v2382_v17 }
 0x342   : > { %2387 = vrcp.f32 %v1215_v26 }
 0x343   : > { %2389 = vrcp.f32 %v1222_v7 }
 0x34b   : > { %v2386_v25 = vpop.eup %2385 }
 0x34c   : > { %v2388_v18 = vpop.eup %2387  ;;  %v1226_v22 = vmul.f32 %v2386_v25, %v2384_v30 }
 0x34d   : > { %v1225_v6 = vmul.f32 %v2388_v18, %v3017_v13  ;;  %v2390_v9 = vpop.eup %2389  ;;  %v3434_v13 = vld [vmem:[#allocation8_spill] sm:$0xff] }
 0x34f   : > { %v3063_v5 = vadd.f32 %v1226_v22, %v1225_v6 }
 0x351   : > { %2391 = vtanh.f32 %v3063_v5 }
 0x35b   : > { %v2392_v20 = vpop.eup %2391 }
 0x35c   : > { %v3066_v10 = vmul.f32 %v2392_v20, %v2390_v9 }
 0x35e   : > { %v1256_v3 = vpack.c.bf16 %v3066_v10, %v3066_v10 }
 0x360   : > { %1290 = vmatmul.mubr.bf16.vlgmr.msra.gmra.mrb[16].mxu0 %v1256_v3  ;;  %1331 = vmatmul.mubr.bf16.vlgmr.msra.gmra.mrb[16].mxu1 %v1256_v3 }
 0x361   : > { %1395 = vmatpush1.bf16.msra.mxu0 %v2626_v36  ;;  %1436 = vmatpush1.bf16.msra.mxu1 %v2629_v37 }
 0x362   : > { %1396 = vmatprep.subr.bf16.mxu0 %v2632_v38  ;;  %1437 = vmatprep.subr.bf16.mxu1 %v2637_v39  ;;  %v3432_v38 = vld [vmem:[#allocation6_spill] sm:$0xff] }
 0x363   : > { %1426 = vmatprep.mubr.bf16.mxu0 %v3427_v4  ;;  %1467 = vmatprep.mubr.bf16.mxu1 %v3427_v4 }
 0x365   : > { %1397 = vmatpush1.bf16.msra.mxu0 %v2640_v40  ;;  %1438 = vmatpush1.bf16.msra.mxu1 %v2645_v41  ;;  %v3433_v40 = vld [vmem:[#allocation7_spill] sm:$0xff] }
 0x366   : > { %1398 = vmatprep.subr.bf16.mxu0 %v2650_v42  ;;  %1439 = vmatprep.subr.bf16.mxu1 %v2653_v43 }
 0x369   : > { %1399 = vmatpush1.bf16.msra.mxu0 %v2660_v44  ;;  %1440 = vmatpush1.bf16.msra.mxu1 %v2663_v45 }
 0x36a   : > { %1400 = vmatprep.subr.bf16.mxu0 %v2666_v46  ;;  %1441 = vmatprep.subr.bf16.mxu1 %v2671_v47 }
 0x36d   : > { %1401 = vmatpush1.bf16.msra.mxu0 %v2676_v48  ;;  %1442 = vmatpush1.bf16.msra.mxu1 %v2679_v49 }
 0x36e   : > { %1402 = vmatprep.subr.bf16.mxu0 %v2684_v50  ;;  %1443 = vmatprep.subr.bf16.mxu1 %v2687_v51 }
 0x371   : > { %1403 = vmatpush1.bf16.msra.mxu0 %v2692_v52  ;;  %1444 = vmatpush1.bf16.msra.mxu1 %v2695_v53 }
 0x372   : > { %1404 = vmatprep.subr.bf16.mxu0 %v2700_v54  ;;  %1445 = vmatprep.subr.bf16.mxu1 %v2703_v55 }
 0x375   : > { %1405 = vmatpush1.bf16.msra.mxu0 %v2708_v56  ;;  %1446 = vmatpush1.bf16.msra.mxu1 %v2711_v57 }
 0x376   : > { %1406 = vmatprep.subr.bf16.mxu0 %v2716_v58  ;;  %1447 = vmatprep.subr.bf16.mxu1 %v2719_v59 }
 0x379   : > { %1407 = vmatpush1.bf16.msra.mxu0 %v2724_v60  ;;  %1448 = vmatpush1.bf16.msra.mxu1 %v2727_v61 }
 0x37a   : > { %1408 = vmatprep.subr.bf16.mxu0 %v2732_v62  ;;  %1449 = vmatprep.subr.bf16.mxu1 %v2735_v63 }
 0x37d   : > { %1409 = vmatpush1.bf16.msra.mxu0 %v2740_v1  ;;  %1450 = vmatpush1.bf16.msra.mxu1 %v2743_v2 }
 0x37e   : > { %1531 = vmatprep.subr.bf16.mxu0 %v2620_v33  ;;  %1572 = vmatprep.subr.bf16.mxu1 %v2623_v34 }
 0x433   : > { %v1291_v36 = vpop.f32.mrb[16].mxu0  ;;  %v1332_v37 = vpop.f32.mrb[16].mxu1 }
 0x434   : > { %v1339_v39 = vadd.f32 %v1291_v36, %v3432_v38  ;;  %v1341_v41 = vadd.f32 %v1332_v37, %v3433_v40  ;;  %v1293_v42 = vpop.f32.mrb[17].mxu0  ;;  %v1334_v43 = vpop.f32.mrb[17].mxu1 }
 0x435   : > { %v1340_v31 = vadd.f32 %v1293_v42, %v3434_v13  ;;  %v1342_v35 = vadd.f32 %v1334_v43, %v3435_v14  ;;  %v1295_v16 = vpop.f32.mrb[18].mxu0  ;;  %v1336_v11 = vpop.f32.mrb[18].mxu1  ;;  %v3125_v42 = vld [vmem:[%s2610_s10 + $0x24] ss:$16 sps:$4 sm:$0xff]   ;;  %v3129_v43 = vld [vmem:[%s2610_s10 + $0x2c] ss:$16 sps:$4 sm:$0xff]  }
 0x436   : > { %v2209_v12 = vmul.f32 -1.442695, %v1339_v39  ;;  %v1296_v23 = vpop.f32.mrb[19].mxu0  ;;  %v1337_v19 = vpop.f32.mrb[19].mxu1  ;;  %v3135_v13 = vld [vmem:[%s2610_s10 + $0x20] ss:$16 sps:$4 sm:$0xff]  }
 0x437   : > { %v2210_v33 = vmul.f32 -1.442695, %v1340_v31  ;;  %v2211_v34 = vmul.f32 -1.442695, %v1342_v35  ;;  %v3139_v31 = vld [vmem:[%s2610_s10 + $0x28] ss:$16 sps:$4 sm:$0xff]  }
 0x438   : > { %2393 = vpow2.f32 %v2209_v12  ;;  %v3143_v14 = vld [vmem:[%s2610_s10 + $0x44] ss:$16 sps:$4 sm:$0xff]   ;;  %v3147_v35 = vld [vmem:[%s2610_s10 + $0x4c] ss:$16 sps:$4 sm:$0xff]  }
 0x439   : > { %2395 = vpow2.f32 %v2210_v33 }
 0x43a   : > { %2397 = vpow2.f32 %v2211_v34  ;;  %v1506_v34 = vstv %s1505_s15 }
 0x43b   : > { %2399 = vtanh.f32 %v1341_v41  ;;  %v3117_v41 = vld [vmem:[%s2610_s10] ss:$16 sps:$4 sm:$0xff]   ;;  %vm3188_vm3 = vcmp.eq.s32.totalorder %v1506_v34, 1 }
 0x442   : > { %v2394_v26 = vpop.eup %2393 }
 0x443   : > { %v2396_v17 = vpop.eup %2395  ;;  %v1346_v30 = vadd.f32 1.0, %v2394_v26 }
 0x444   : > { %v1352_v25 = vadd.f32 1.0, %v2396_v17  ;;  %v2398_v18 = vpop.eup %2397 }
 0x445   : > { %2401 = vrcp.f32 %v1346_v30  ;;  %v2400_v22 = vpop.eup %2399  ;;  %v1359_v20 = vadd.f32 1.0, %v2398_v18 }
 0x446   : > { %2403 = vrcp.f32 %v1352_v25 }
 0x447   : > { %2405 = vrcp.f32 %v1359_v20 }
 0x44f   : > { %v2402_v7 = vpop.eup %2401 }
 0x450   : > { %v2404_v6 = vpop.eup %2403  ;;  %v1363_v9 = vmul.f32 %v2402_v7, %v2400_v22 }
 0x451   : > { %v1362_v3 = vmul.f32 %v2404_v6, %v3063_v5  ;;  %v2406_v37 = vpop.eup %2405  ;;  %v3121_v5 = vld [vmem:[%s2610_s10 + $0x8] ss:$16 sps:$4 sm:$0xff]  }
 0x453   : > { %v3109_v36 = vadd.f32 %v1363_v9, %v1362_v3 }
 0x455   : > { %2407 = vtanh.f32 %v3109_v36 }
 0x45f   : > { %v2408_v38 = vpop.eup %2407 }
 0x460   : > { %v3112_v39 = vmul.f32 %v2408_v38, %v2406_v37  ;;  %v3219_v38 = vld [vmem:[%s2610_s10 + $0x48] ss:$16 sps:$4 sm:$0xff]  }
 0x462   : > { %v1393_v40 = vpack.c.bf16 %v3112_v39, %v3112_v39 }
 0x464   : > { %1427 = vmatmul.mubr.bf16.vlgmr.msra.gmra.mrb[20].mxu0 %v1393_v40  ;;  %1468 = vmatmul.mubr.bf16.vlgmr.msra.gmra.mrb[20].mxu1 %v1393_v40  ;;  %v3223_v40 = vld [vmem:[%s2610_s10 + $0x64] ss:$16 sps:$4 sm:$0xff]  }
 0x465   : > { %1532 = vmatpush1.bf16.msra.mxu0 %v3117_v41  ;;  %1573 = vmatpush1.bf16.msra.mxu1 %v3121_v5 }
 0x466   : > { %1533 = vmatprep.subr.bf16.mxu0 %v3125_v42  ;;  %1574 = vmatprep.subr.bf16.mxu1 %v3129_v43 }
 0x467   : > { %1563 = vmatprep.mubr.bf16.mxu0 %v3427_v4  ;;  %1604 = vmatprep.mubr.bf16.mxu1 %v3427_v4 }
 0x469   : > { %1534 = vmatpush1.bf16.msra.mxu0 %v3135_v13  ;;  %1575 = vmatpush1.bf16.msra.mxu1 %v3139_v31 }
 0x46a   : > { %1535 = vmatprep.subr.bf16.mxu0 %v3143_v14  ;;  %1576 = vmatprep.subr.bf16.mxu1 %v3147_v35 }
 0x46d   : > { %1536 = vmatpush1.bf16.msra.mxu0 %v2660_v44  ;;  %1577 = vmatpush1.bf16.msra.mxu1 %v2663_v45  ;;  %v3173_v44 = vld [vmem:[%s2610_s10 + $0x4] ss:$16 sps:$4 sm:$0xff]   ;;  %v3177_v45 = vld [vmem:[%s2610_s10 + $0xc] ss:$16 sps:$4 sm:$0xff]  }
 0x46e   : > { %1537 = vmatprep.subr.bf16.mxu0 %v2666_v46  ;;  %1578 = vmatprep.subr.bf16.mxu1 %v2671_v47 }
 0x471   : > { %1538 = vmatpush1.bf16.msra.mxu0 %v2676_v48  ;;  %1579 = vmatpush1.bf16.msra.mxu1 %v2679_v49  ;;  %v3436_v48 = vld [vmem:[#allocation10_spill] sm:$0xff] }
 0x472   : > { %1539 = vmatprep.subr.bf16.mxu0 %v2684_v50  ;;  %1580 = vmatprep.subr.bf16.mxu1 %v2687_v51  ;;  %v3437_v50 = vld [vmem:[#allocation11_spill] sm:$0xff] }
 0x475   : > { %1540 = vmatpush1.bf16.msra.mxu0 %v2692_v52  ;;  %1581 = vmatpush1.bf16.msra.mxu1 %v2695_v53 }
 0x476   : > { %1541 = vmatprep.subr.bf16.mxu0 %v2700_v54  ;;  %1582 = vmatprep.subr.bf16.mxu1 %v2703_v55  ;;  %v3438_v54 = vld [vmem:[#allocation12_spill] sm:$0xff] }
 0x479   : > { %1542 = vmatpush1.bf16.msra.mxu0 %v2708_v56  ;;  %1583 = vmatpush1.bf16.msra.mxu1 %v2711_v57  ;;  %v3439_v56 = vld [vmem:[#allocation13_spill] sm:$0xff] }
 0x47a   : > { %1543 = vmatprep.subr.bf16.mxu0 %v2716_v58  ;;  %1584 = vmatprep.subr.bf16.mxu1 %v2719_v59 }
 0x47d   : > { %1544 = vmatpush1.bf16.msra.mxu0 %v2724_v60  ;;  %1585 = vmatpush1.bf16.msra.mxu1 %v2727_v61 }
 0x47e   : > { %1545 = vmatprep.subr.bf16.mxu0 %v2732_v62  ;;  %1586 = vmatprep.subr.bf16.mxu1 %v2735_v63 }
 0x481   : > { %1546 = vmatpush1.bf16.msra.mxu0 %v2740_v1  ;;  %1587 = vmatpush1.bf16.msra.mxu1 %v2743_v2 }
 0x482   : > { %1668 = vmatprep.subr.bf16.mxu0 %v3173_v44  ;;  %1709 = vmatprep.subr.bf16.mxu1 %v3177_v45 }
 0x537   : > { %v1428_v46 = vpop.f32.mrb[20].mxu0  ;;  %v1469_v47 = vpop.f32.mrb[20].mxu1 }
 0x538   : > { %v1476_v49 = vadd.f32 %v1428_v46, %v3436_v48  ;;  %v1478_v51 = vadd.f32 %v1469_v47, %v3437_v50  ;;  %v1430_v52 = vpop.f32.mrb[21].mxu0  ;;  %v1471_v53 = vpop.f32.mrb[21].mxu1  ;;  %v3227_v46 = vld [vmem:[%s2610_s10 + $0x6c] ss:$16 sps:$4 sm:$0xff]   ;;  %v3231_v47 = vld [vmem:[%s2610_s10 + $0x60] ss:$16 sps:$4 sm:$0xff]  }
 0x539   : > { %v1477_v55 = vadd.f32 %v1430_v52, %v3438_v54  ;;  %v1479_v57 = vadd.f32 %v1471_v53, %v3439_v56  ;;  %v1432_v58 = vpop.f32.mrb[22].mxu0  ;;  %v1473_v59 = vpop.f32.mrb[22].mxu1  ;;  %v3235_v48 = vld [vmem:[%s2610_s10 + $0x68] ss:$16 sps:$4 sm:$0xff]   ;;  %v3243_v50 = vld [vmem:[%s2610_s10 + $0x8c] ss:$16 sps:$4 sm:$0xff]  }
 0x53a   : > { %v2212_v60 = vmul.f32 -1.442695, %v1476_v49  ;;  %v1433_v61 = vpop.f32.mrb[23].mxu0  ;;  %v1474_v62 = vpop.f32.mrb[23].mxu1  ;;  %v3239_v49 = vld [vmem:[%s2610_s10 + $0x84] ss:$16 sps:$4 sm:$0xff]  }
 0x53b   : > { %v2213_v63 = vmul.f32 -1.442695, %v1477_v55  ;;  %v2214_v1 = vmul.f32 -1.442695, %v1479_v57  ;;  %v3251_v52 = vld [vmem:[%s2610_s10 + $0x88] ss:$16 sps:$4 sm:$0xff]  }
 0x53c   : > { %2409 = vpow2.f32 %v2212_v60  ;;  %v3255_v53 = vld [vmem:[%s2610_s10 + $0xa4] ss:$16 sps:$4 sm:$0xff]   ;;  %v3259_v54 = vld [vmem:[%s2610_s10 + $0xac] ss:$16 sps:$4 sm:$0xff]   ;;  %v3263_v55 = vld [vmem:[%s2610_s10 + $0xa0] ss:$16 sps:$4 sm:$0xff]  }
 0x53d   : > { %2411 = vpow2.f32 %v2213_v63  ;;  %v3267_v56 = vld [vmem:[%s2610_s10 + $0xa8] ss:$16 sps:$4 sm:$0xff]   ;;  %v3271_v57 = vld [vmem:[%s2610_s10 + $0xc4] ss:$16 sps:$4 sm:$0xff]   ;;  %v3275_v58 = vld [vmem:[%s2610_s10 + $0xcc] ss:$16 sps:$4 sm:$0xff]  }
 0x53e   : > { %2413 = vpow2.f32 %v2214_v1  ;;  %v3279_v59 = vld [vmem:[%s2610_s10 + $0xc0] ss:$16 sps:$4 sm:$0xff]   ;;  %v3283_v60 = vld [vmem:[%s2610_s10 + $0xc8] ss:$16 sps:$4 sm:$0xff]   ;;  %v3287_v61 = vld [vmem:[%s2610_s10 + $0xe4] ss:$16 sps:$4 sm:$0xff]  }
 0x53f   : > { %2415 = vtanh.f32 %v1478_v51  ;;  %v3247_v51 = vld [vmem:[%s2610_s10 + $0x80] ss:$16 sps:$4 sm:$0xff]   ;;  %v3291_v62 = vld [vmem:[%s2610_s10 + $0xec] ss:$16 sps:$4 sm:$0xff]   ;;  %v3299_v1 = vld [vmem:[%s2610_s10 + $0xe8] ss:$16 sps:$4 sm:$0xff]  }
 0x540   : > { %v3295_v63 = vld [vmem:[%s2610_s10 + $0xe0] ss:$16 sps:$4 sm:$0xff]  }
 0x546   : > { %v2410_v2 = vpop.eup %2409 }
 0x547   : > { %v2412_v16 = vpop.eup %2411  ;;  %v1483_v11 = vadd.f32 1.0, %v2410_v2 }
 0x548   : > { %v1489_v12 = vadd.f32 1.0, %v2412_v16  ;;  %v2414_v23 = vpop.eup %2413 }
 0x549   : > { %2417 = vrcp.f32 %v1483_v11  ;;  %v2416_v19 = vpop.eup %2415  ;;  %v1496_v30 = vadd.f32 1.0, %v2414_v23  ;;  %v3442_v11 = vld [vmem:[#allocation14_spill] sm:$0xff]  ;;  %v3443_v23 = vld [vmem:[#allocation15_spill] sm:$0xff] }
 0x54a   : > { %2419 = vrcp.f32 %v1489_v12 }
 0x54b   : > { %2421 = vrcp.f32 %v1496_v30 }
 0x553   : > { %v2418_v33 = vpop.eup %2417 }
 0x554   : > { %v2420_v26 = vpop.eup %2419  ;;  %v1500_v17 = vmul.f32 %v2418_v33, %v2416_v19 }
 0x555   : > { %v1499_v25 = vmul.f32 %v2420_v26, %v3109_v36  ;;  %v2422_v6 = vpop.eup %2421  ;;  %v3444_v26 = vld [vmem:[#allocation16_spill] sm:$0xff] }
 0x557   : > { %v1501_v22 = vadd.f32 %v1500_v17, %v1499_v25 }
 0x559   : > { %2423 = vtanh.f32 %v1501_v22  ;;  %v3195_v7 = vsel %vm3188_vm3, %v1501_v22, %v3109_v36  ;;  %v3215_v36 = vld [vmem:[%s2610_s10 + $0x40] ss:$16 sps:$4 sm:$0xff]  }
 0x563   : > { %v2424_v9 = vpop.eup %2423 }
 0x564   : > { %v1503_v20 = vmul.f32 %v2424_v9, %v2422_v6 }
 0x566   : > { %v3200_v3 = vsel %vm3188_vm3, %v1503_v20, %v3112_v39 }
 0x567   : > { %v1530_v37 = vpack.c.bf16 %v3200_v3, %v3200_v3 }
 0x569   : > { %1564 = vmatmul.mubr.bf16.vlgmr.msra.gmra.mrb[24].mxu0 %v1530_v37  ;;  %1605 = vmatmul.mubr.bf16.vlgmr.msra.gmra.mrb[24].mxu1 %v1530_v37 }
 0x56a   : > { %1669 = vmatpush1.bf16.msra.mxu0 %v3117_v41  ;;  %1710 = vmatpush1.bf16.msra.mxu1 %v3121_v5 }
 0x56b   : > { %1670 = vmatprep.subr.bf16.mxu0 %v3125_v42  ;;  %1711 = vmatprep.subr.bf16.mxu1 %v3129_v43 }
 0x56c   : > { %1700 = vmatprep.mubr.bf16.mxu0 %v3427_v4  ;;  %1741 = vmatprep.mubr.bf16.mxu1 %v3427_v4 }
 0x56e   : > { %1671 = vmatpush1.bf16.msra.mxu0 %v3135_v13  ;;  %1712 = vmatpush1.bf16.msra.mxu1 %v3139_v31 }
 0x56f   : > { %1672 = vmatprep.subr.bf16.mxu0 %v3143_v14  ;;  %1713 = vmatprep.subr.bf16.mxu1 %v3147_v35 }
 0x572   : > { %1673 = vmatpush1.bf16.msra.mxu0 %v3215_v36  ;;  %1714 = vmatpush1.bf16.msra.mxu1 %v3219_v38 }
 0x573   : > { %1674 = vmatprep.subr.bf16.mxu0 %v3223_v40  ;;  %1715 = vmatprep.subr.bf16.mxu1 %v3227_v46 }
 0x576   : > { %1675 = vmatpush1.bf16.msra.mxu0 %v3231_v47  ;;  %1716 = vmatpush1.bf16.msra.mxu1 %v3235_v48 }
 0x577   : > { %1676 = vmatprep.subr.bf16.mxu0 %v3239_v49  ;;  %1717 = vmatprep.subr.bf16.mxu1 %v3243_v50 }
 0x57a   : > { %1677 = vmatpush1.bf16.msra.mxu0 %v3247_v51  ;;  %1718 = vmatpush1.bf16.msra.mxu1 %v3251_v52 }
 0x57b   : > { %1678 = vmatprep.subr.bf16.mxu0 %v3255_v53  ;;  %1719 = vmatprep.subr.bf16.mxu1 %v3259_v54 }
 0x57e   : > { %1679 = vmatpush1.bf16.msra.mxu0 %v3263_v55  ;;  %1720 = vmatpush1.bf16.msra.mxu1 %v3267_v56 }
 0x57f   : > { %1680 = vmatprep.subr.bf16.mxu0 %v3271_v57  ;;  %1721 = vmatprep.subr.bf16.mxu1 %v3275_v58 }
 0x582   : > { %1681 = vmatpush1.bf16.msra.mxu0 %v3279_v59  ;;  %1722 = vmatpush1.bf16.msra.mxu1 %v3283_v60 }
 0x583   : > { %1682 = vmatprep.subr.bf16.mxu0 %v3287_v61  ;;  %1723 = vmatprep.subr.bf16.mxu1 %v3291_v62 }
 0x586   : > { %1683 = vmatpush1.bf16.msra.mxu0 %v3295_v63  ;;  %1724 = vmatpush1.bf16.msra.mxu1 %v3299_v1 }
 0x587   : > { %1805 = vmatprep.subr.bf16.mxu0 %v3173_v44  ;;  %1846 = vmatprep.subr.bf16.mxu1 %v3177_v45 }
 0x63c   : > { %v1565_v2 = vpop.f32.mrb[24].mxu0  ;;  %v1606_v16 = vpop.f32.mrb[24].mxu1 }
 0x63d   : > { %v1613_v12 = vadd.f32 %v1565_v2, %v3442_v11  ;;  %v1615_v19 = vadd.f32 %v1606_v16, %v3443_v23  ;;  %v1567_v33 = vpop.f32.mrb[25].mxu0  ;;  %v1608_v34 = vpop.f32.mrb[25].mxu1 }
 0x63e   : > { %v1614_v17 = vadd.f32 %v1567_v33, %v3444_v26  ;;  %v1616_v30 = vadd.f32 %v1608_v34, %v2930_v21  ;;  %v1569_v25 = vpop.f32.mrb[26].mxu0  ;;  %v1610_v22 = vpop.f32.mrb[26].mxu1 }
 0x63f   : > { %v2215_v6 = vmul.f32 -1.442695, %v1613_v12  ;;  %v1570_v9 = vpop.f32.mrb[27].mxu0  ;;  %v1611_v20 = vpop.f32.mrb[27].mxu1 }
 0x640   : > { %v2216_v44 = vmul.f32 -1.442695, %v1614_v17  ;;  %v2217_v45 = vmul.f32 -1.442695, %v1616_v30 }
 0x641   : > { %2425 = vpow2.f32 %v2215_v6 }
 0x642   : > { %2427 = vpow2.f32 %v2216_v44 }
 0x643   : > { %2429 = vpow2.f32 %v2217_v45  ;;  %v3445_v45 = vld [vmem:[#allocation17_spill] sm:$0xff] }
 0x644   : > { %2431 = vtanh.f32 %v1615_v19 }
 0x64b   : > { %v2426_v37 = vpop.eup %2425 }
 0x64c   : > { %v2428_v32 = vpop.eup %2427  ;;  %v1620_v2 = vadd.f32 1.0, %v2426_v37 }
 0x64d   : > { %v1626_v16 = vadd.f32 1.0, %v2428_v32  ;;  %v2430_v11 = vpop.eup %2429 }
 0x64e   : > { %2433 = vrcp.f32 %v1620_v2  ;;  %v2432_v23 = vpop.eup %2431  ;;  %v1633_v12 = vadd.f32 1.0, %v2430_v11  ;;  %v3446_v2 = vld [vmem:[#allocation18_spill] sm:$0xff] }
 0x64f   : > { %2435 = vrcp.f32 %v1626_v16 }
 0x650   : > { %2437 = vrcp.f32 %v1633_v12 }
 0x658   : > { %v2434_v21 = vpop.eup %2433 }
 0x659   : > { %v2436_v33 = vpop.eup %2435  ;;  %v1637_v34 = vmul.f32 %v2434_v21, %v2432_v23 }
 0x65a   : > { %v1636_v26 = vmul.f32 %v2436_v33, %v3195_v7  ;;  %v2438_v19 = vpop.eup %2437 }
 0x65c   : > { %v1638_v17 = vadd.f32 %v1637_v34, %v1636_v26 }
 0x65e   : > { %2439 = vtanh.f32 %v1638_v17  ;;  %v3312_v30 = vsel %vm3188_vm3, %v1638_v17, %v3195_v7 }
 0x668   : > { %v2440_v32 = vpop.eup %2439 }
 0x669   : > { %v1640_v25 = vmul.f32 %v2440_v32, %v2438_v19 }
 0x66b   : > { %v3317_v22 = vsel %vm3188_vm3, %v1640_v25, %v3200_v3 }
 0x66c   : > { %v1667_v6 = vpack.c.bf16 %v3317_v22, %v3317_v22 }
 0x66e   : > { %1701 = vmatmul.mubr.bf16.vlgmr.msra.gmra.mrb[28].mxu0 %v1667_v6  ;;  %1742 = vmatmul.mubr.bf16.vlgmr.msra.gmra.mrb[28].mxu1 %v1667_v6 }
 0x66f   : > { %1806 = vmatpush1.bf16.msra.mxu0 %v3117_v41  ;;  %1847 = vmatpush1.bf16.msra.mxu1 %v3121_v5 }
 0x670   : > { %1807 = vmatprep.subr.bf16.mxu0 %v3125_v42  ;;  %1848 = vmatprep.subr.bf16.mxu1 %v3129_v43 }
 0x671   : > { %1837 = vmatprep.mubr.bf16.mxu0 %v3427_v4  ;;  %1878 = vmatprep.mubr.bf16.mxu1 %v3427_v4 }
 0x673   : > { %1808 = vmatpush1.bf16.msra.mxu0 %v3135_v13  ;;  %1849 = vmatpush1.bf16.msra.mxu1 %v3139_v31 }
 0x674   : > { %1809 = vmatprep.subr.bf16.mxu0 %v3143_v14  ;;  %1850 = vmatprep.subr.bf16.mxu1 %v3147_v35 }
 0x677   : > { %1810 = vmatpush1.bf16.msra.mxu0 %v3215_v36  ;;  %1851 = vmatpush1.bf16.msra.mxu1 %v3219_v38 }
 0x678   : > { %1811 = vmatprep.subr.bf16.mxu0 %v3223_v40  ;;  %1852 = vmatprep.subr.bf16.mxu1 %v3227_v46 }
 0x67b   : > { %1812 = vmatpush1.bf16.msra.mxu0 %v3231_v47  ;;  %1853 = vmatpush1.bf16.msra.mxu1 %v3235_v48 }
 0x67c   : > { %1813 = vmatprep.subr.bf16.mxu0 %v3239_v49  ;;  %1854 = vmatprep.subr.bf16.mxu1 %v3243_v50 }
 0x67f   : > { %1814 = vmatpush1.bf16.msra.mxu0 %v3247_v51  ;;  %1855 = vmatpush1.bf16.msra.mxu1 %v3251_v52 }
 0x680   : > { %1815 = vmatprep.subr.bf16.mxu0 %v3255_v53  ;;  %1856 = vmatprep.subr.bf16.mxu1 %v3259_v54 }
 0x683   : > { %1816 = vmatpush1.bf16.msra.mxu0 %v3263_v55  ;;  %1857 = vmatpush1.bf16.msra.mxu1 %v3267_v56 }
 0x684   : > { %1817 = vmatprep.subr.bf16.mxu0 %v3271_v57  ;;  %1858 = vmatprep.subr.bf16.mxu1 %v3275_v58 }
 0x687   : > { %1818 = vmatpush1.bf16.msra.mxu0 %v3279_v59  ;;  %1859 = vmatpush1.bf16.msra.mxu1 %v3283_v60 }
 0x688   : > { %1819 = vmatprep.subr.bf16.mxu0 %v3287_v61  ;;  %1860 = vmatprep.subr.bf16.mxu1 %v3291_v62 }
 0x68b   : > { %1820 = vmatpush1.bf16.msra.mxu0 %v3295_v63  ;;  %1861 = vmatpush1.bf16.msra.mxu1 %v3299_v1 }
 0x741   : > { %v1702_v4 = vpop.f32.mrb[28].mxu0  ;;  %v1743_v41 = vpop.f32.mrb[28].mxu1 }
 0x742   : > { %v1750_v5 = vadd.f32 %v1702_v4, %v2933_v0  ;;  %v1752_v42 = vadd.f32 %v1743_v41, %v2938_v28  ;;  %v1704_v43 = vpop.f32.mrb[29].mxu0  ;;  %v1745_v13 = vpop.f32.mrb[29].mxu1 }
 0x743   : > { %v1751_v31 = vadd.f32 %v1704_v43, %v2944_v27  ;;  %v1753_v14 = vadd.f32 %v1745_v13, %v2950_v8  ;;  %v1706_v35 = vpop.f32.mrb[30].mxu0  ;;  %v1747_v7 = vpop.f32.mrb[30].mxu1 }
 0x744   : > { %v2218_v36 = vmul.f32 -1.442695, %v1750_v5  ;;  %v1707_v38 = vpop.f32.mrb[31].mxu0  ;;  %v1748_v40 = vpop.f32.mrb[31].mxu1  ;;  %v1931_v35 = vrot.slane %v3317_v22, 6  ;;  %v1925_v7 = vrot.slane %v3066_v10, 4 }
 0x745   : > { %v2219_v46 = vmul.f32 -1.442695, %v1751_v31  ;;  %v2220_v47 = vmul.f32 -1.442695, %v1753_v14  ;;  %v1922_v14 = vrot.slane %v3020_v15, 6  ;;  %v1928_v40 = vrot.slane %v3112_v39, 2 }
 0x746   : > { %2441 = vpow2.f32 %v2218_v36 }
 0x747   : > { %2443 = vpow2.f32 %v2219_v46 }
 0x748   : > { %2445 = vpow2.f32 %v2220_v47  ;;  %v1945_v47 = vsel %vm1939_vm4, %v3200_v3, %v1931_v35 }
 0x749   : > { %2447 = vtanh.f32 %v1752_v42 }
 0x750   : > { %v2442_v48 = vpop.eup %2441 }
 0x751   : > { %v2444_v49 = vpop.eup %2443  ;;  %v1757_v0 = vadd.f32 1.0, %v2442_v48 }
 0x752   : > { %v1763_v28 = vadd.f32 1.0, %v2444_v49  ;;  %v2446_v27 = vpop.eup %2445 }
 0x753   : > { %2449 = vrcp.f32 %v1757_v0  ;;  %v2448_v50 = vpop.eup %2447  ;;  %v1770_v53 = vadd.f32 1.0, %v2446_v27 }
 0x754   : > { %2451 = vrcp.f32 %v1763_v28 }
 0x755   : > { %2453 = vrcp.f32 %v1770_v53 }
 0x75d   : > { %v2450_v8 = vpop.eup %2449 }
 0x75e   : > { %v2452_v51 = vpop.eup %2451  ;;  %v1774_v52 = vmul.f32 %v2450_v8, %v2448_v50 }
 0x75f   : > { %v1773_v54 = vmul.f32 %v2452_v51, %v3312_v30  ;;  %v2454_v57 = vpop.eup %2453 }
 0x761   : > { %v1775_v55 = vadd.f32 %v1774_v52, %v1773_v54 }
 0x763   : > { %2455 = vtanh.f32 %v1775_v55  ;;  %v1783_v56 = vsel %vm3188_vm3, %v1775_v55, %v3312_v30 }
 0x76d   : > { %v2456_v58 = vpop.eup %2455 }
 0x76e   : > { %v1777_v59 = vmul.f32 %v2456_v58, %v2454_v57 }
 0x770   : > { %v3364_v60 = vsel %vm3188_vm3, %v1777_v59, %v3317_v22  ;;  %v3447_v22 = vld [vmem:[#allocation19_spill] sm:$0xff] }
 0x771   : > { %v1804_v61 = vpack.c.bf16 %v3364_v60, %v3364_v60  ;;  %v1934_v36 = vrot.slane %v3364_v60, 4  ;;  %v1940_v46 = vsel %vm1939_vm4, %v3447_v22, %v1922_v14 }
 0x772   : > { %v1942_v48 = vsel %vm1941_vm5, %v1940_v46, %v1925_v7 }
 0x773   : > { %1838 = vmatmul.mubr.bf16.vlgmr.msra.gmra.mrb[32].mxu0 %v1804_v61  ;;  %1879 = vmatmul.mubr.bf16.vlgmr.msra.gmra.mrb[32].mxu1 %v1804_v61  ;;  %v1946_v49 = vsel %vm1941_vm5, %v1945_v47, %v1934_v36  ;;  %v1944_v0 = vsel %vm1943_vm6, %v1942_v48, %v1928_v40 }
 0x846   : > { %v1839_v62 = vpop.f32.mrb[32].mxu0  ;;  %v1880_v63 = vpop.f32.mrb[32].mxu1 }
 0x847   : > { %v1887_v1 = vadd.f32 %v1839_v62, %v2953_v29  ;;  %v1889_v9 = vadd.f32 %v1880_v63, %v2958_v24  ;;  %v1841_v20 = vpop.f32.mrb[33].mxu0  ;;  %v1882_v44 = vpop.f32.mrb[33].mxu1 }
 0x848   : > { %v1888_v37 = vadd.f32 %v1841_v20, %v3445_v45  ;;  %v1890_v16 = vadd.f32 %v1882_v44, %v3446_v2  ;;  %v1843_v11 = vpop.f32.mrb[34].mxu0  ;;  %v1884_v23 = vpop.f32.mrb[34].mxu1 }
 0x849   : > { %v2221_v21 = vmul.f32 -1.442695, %v1887_v1  ;;  %v1844_v33 = vpop.f32.mrb[35].mxu0  ;;  %v1885_v34 = vpop.f32.mrb[35].mxu1 }
 0x84a   : > { %v2222_v12 = vmul.f32 -1.442695, %v1888_v37  ;;  %v2223_v26 = vmul.f32 -1.442695, %v1890_v16 }
 0x84b   : > { %2457 = vpow2.f32 %v2221_v21 }
 0x84c   : > { %2459 = vpow2.f32 %v2222_v12 }
 0x84d   : > { %2461 = vpow2.f32 %v2223_v26 }
 0x84e   : > { %2463 = vtanh.f32 %v1889_v9 }
 0x855   : > { %v2458_v17 = vpop.eup %2457 }
 0x856   : > { %v2460_v29 = vpop.eup %2459  ;;  %v1894_v30 = vadd.f32 1.0, %v2458_v17 }
 0x857   : > { %v1900_v24 = vadd.f32 1.0, %v2460_v29  ;;  %v2462_v19 = vpop.eup %2461 }
 0x858   : > { %2465 = vrcp.f32 %v1894_v30  ;;  %v2464_v32 = vpop.eup %2463  ;;  %v1907_v41 = vadd.f32 1.0, %v2462_v19 }
 0x859   : > { %2467 = vrcp.f32 %v1900_v24 }
 0x85a   : > { %2469 = vrcp.f32 %v1907_v41 }
 0x862   : > { %v2466_v25 = vpop.eup %2465 }
 0x863   : > { %v2468_v6 = vpop.eup %2467  ;;  %v1911_v4 = vmul.f32 %v2466_v25, %v2464_v32 }
 0x864   : > { %v1910_v5 = vmul.f32 %v2468_v6, %v1783_v56  ;;  %v2470_v13 = vpop.eup %2469 }
 0x866   : > { %v1912_v42 = vadd.f32 %v1911_v4, %v1910_v5 }
 0x868   : > { %2471 = vtanh.f32 %v1912_v42  ;;  %v1920_v43 = vsel %vm3188_vm3, %v1912_v42, %v1783_v56 }
 0x869   : > { %1959 = vst [vmem:[%s329_s19] sm:$0x3] %v1920_v43 }
 0x872   : > { %v2472_v31 = vpop.eup %2471 }
 0x873   : > { %v1914_v38 = vmul.f32 %v2472_v31, %v2470_v13 }
 0x875   : > { %v1919_v15 = vsel %vm3188_vm3, %v1914_v38, %v3364_v60 }
 0x876   : > { %v1937_v10 = vrot.slane %v1919_v15, 2  ;;  %1958 = vst [vmem:[%s325_s24] sm:$0x3] %v1919_v15 }
 0x878   : > { %v1947_v39 = vsel %vm1943_vm6, %v1946_v49, %v1937_v10 }
 0x879   : > { %v2237_v28 = vpack.c.bf16 %v1947_v39, %v1944_v0 }
 0x87b   : > { %2238 = vst [vmem:[%s321_s27] sm:$0xff] %v2237_v28  }
 0x87c PF: > { %s17_s21 = sadd.s32 1, %s2511_s21  }
 0x87d   : > { %p14_p5 = scmp.ge.s32.totalorder %s17_s21, 4  }
 0x87f   :  { %16 = sbr.rel (!%p14_p5) target bundleno = 1 (0x1), region = 99 }

// kernel: encoder_plus_forward.2
= control target key start
LH: loop header
LB: loop body
LE: loop exit
PB: predicated region body
PF: predicated region fallthrough
CT: control target
= control target key end

     0   :  { %s11182_s18 = smov 0   ;;  %s14622_s0 = inlined_call_operand.vmem [shape: bf16[2,8,256,128], index: 0, kind: input, shape index: {}]   ;;  %s14623_s1 = inlined_call_operand.vmem [shape: bf16[128,768], index: 1, kind: input, shape index: {}]   ;;  %s14624_s2 = inlined_call_operand.vmem [shape: f32[1,128], index: 2, kind: input, shape index: {}]   ;;  %s14625_s3 = inlined_call_operand.vmem [shape: f32[1,128], index: 3, kind: input, shape index: {}]   ;;  %s14626_s4 = inlined_call_operand.vmem [shape: bf16[2,8,128], index: 4, kind: output, shape index: {0}]   ;;  %s14627_s5 = inlined_call_operand.vmem [shape: bf16[2,4,128], index: 5, kind: output, shape index: {1}]  }
   0x1 LB: > { %s9603_s19 = sadd.s32 4294967295, %s11149_s18   ;;  %p9607_p0 = scmp.ge.s32.totalorder %s11149_s18, 1  ;;  %s11149_s18 = sphi %s11182_s18, %s16_s18  }
   0x2   : > { %p190_p1 = scmp.lt.s32.totalorder %s11149_s18, 3 }
   0x4   : > { %p191_p2 = pnand %p9607_p0, %p190_p1 }
   0x6   : > { %194 = sbr.rel (%p191_p2) target bundleno = 1181 (0x49d), region = 36 }
   0xd   : > { %v11193_v0 = vld [vmem:[%s14623_s1 + $0x4] ss:$24 sps:$4 sm:$0xff]   ;;  %p221_p3 = scmp.lt.s32.totalorder %s9603_s19, 1  ;;  %v10780_v1 = vld [vmem:[%s14623_s1] ss:$24 sps:$4 sm:$0xff]   ;;  %v14628_v2 = vmov 0  }
   0xe   : > { %491 = vmatprep.mubr.bf16.mxu0 %v14628_v2  ;;  %973 = vmatprep.mubr.bf16.mxu1 %v14628_v2  ;;  %v10781_v3 = vld [vmem:[%s14623_s1 + $0x34] ss:$24 sps:$4 sm:$0xff]   ;;  %v10783_v4 = vld [vmem:[%s14623_s1 + $0x30] ss:$24 sps:$4 sm:$0xff]   ;;  %v10784_v5 = vld [vmem:[%s14623_s1 + $0x64] ss:$24 sps:$4 sm:$0xff]  }
   0xf   : > { %459 = vmatprep.subr.bf16.mxu0 %v11193_v0  ;;  %941 = vmatprep.subr.bf16.mxu1 %v11193_v0  ;;  %s15241_s19 = smov (!%p221_p3, %s9603_s19), 1  ;;  %v10786_v6 = vld [vmem:[%s14623_s1 + $0x60] ss:$24 sps:$4 sm:$0xff]   ;;  %v10787_v7 = vld [vmem:[%s14623_s1 + $0x94] ss:$24 sps:$4 sm:$0xff]   ;;  %vm7931_vm0 = vcmask 1040384  }
  0x10   : > { %460 = vmatpush1.bf16.msra.mxu0 %v10780_v1  ;;  %942 = vmatpush1.bf16.msra.mxu1 %v10780_v1  ;;  %s10192_s30 = sshll.u32 %s15241_s19, 10  ;;  %v10789_v8 = vld [vmem:[%s14623_s1 + $0x90] ss:$24 sps:$4 sm:$0xff]   ;;  %v10790_v9 = vld [vmem:[%s14623_s1 + $0xc4] ss:$24 sps:$4 sm:$0xff]   ;;  %vm7933_vm1 = vcmask 1041408  }
  0x11   : > { %461 = vmatprep.subr.bf16.mxu0 %v10781_v3  ;;  %943 = vmatprep.subr.bf16.mxu1 %v10781_v3  ;;  %s11223_s12 = scalar_lea.vmem %s14622_s0, %s10192_s30  ;;  %v11234_v10 = vld [vmem:[%s14623_s1 + $0xc0] ss:$24 sps:$4 sm:$0xff]   ;;  %v11239_v11 = vld [vmem:[%s14623_s1 + $0xf4] ss:$24 sps:$4 sm:$0xff]   ;;  %v11246_v12 = vld [vmem:[%s14623_s1 + $0xf0] ss:$24 sps:$4 sm:$0xff]  }
  0x12   : > { %v11253_v13 = vld [vmem:[%s14623_s1 + $0x124] ss:$24 sps:$4 sm:$0xff]   ;;  %v11260_v14 = vld [vmem:[%s14623_s1 + $0x120] ss:$24 sps:$4 sm:$0xff]   ;;  %v11267_v15 = vld [vmem:[%s14623_s1 + $0x154] ss:$24 sps:$4 sm:$0xff]  }
  0x13   : > { %v11274_v16 = vld [vmem:[%s14623_s1 + $0x150] ss:$24 sps:$4 sm:$0xff]   ;;  %v10802_v18 = vld [vmem:[%s11223_s12] sm:$0xff]   ;;  %v10810_v29 = vld [vmem:[%s11223_s12 + $0x18] sm:$0xff]   ;;  %vm7935_vm2 = vcmask 1042432   ;;  %vm7937_vm3 = vcmask 1043456  }
  0x14   : > { %462 = vmatpush1.bf16.msra.mxu0 %v10783_v4  ;;  %944 = vmatpush1.bf16.msra.mxu1 %v10783_v4  ;;  %v10804_v17 = vld [vmem:[%s14623_s1 + $0x8] ss:$24 sps:$4 sm:$0xff]   ;;  %v10809_v20 = vld [vmem:[%s14623_s1 + $0x38] ss:$24 sps:$4 sm:$0xff]   ;;  %v10845_v33 = vld [vmem:[%s14623_s1 + $0xc] ss:$24 sps:$4 sm:$0xff]  }
  0x15   : > { %463 = vmatprep.subr.bf16.mxu0 %v10784_v5  ;;  %945 = vmatprep.subr.bf16.mxu1 %v10784_v5  ;;  %v11283_v19 = vld [vmem:[%s11223_s12 + $0x80] sm:$0xff]   ;;  %v10805_v22 = vld [vmem:[%s11223_s12 + $0x8] sm:$0xff]   ;;  %v10819_v24 = vld [vmem:[%s14623_s1 + $0x98] ss:$24 sps:$4 sm:$0xff]   ;;  %vm7939_vm4 = vcmask 1044480   ;;  %vm7941_vm5 = vcmask 1045504  }
  0x16   : > { %v10814_v21 = vld [vmem:[%s14623_s1 + $0x68] ss:$24 sps:$4 sm:$0xff]   ;;  %v10807_v25 = vld [vmem:[%s11223_s12 + $0x10] sm:$0xff]   ;;  %v11327_v31 = vld [vmem:[%s11223_s12 + $0x98] sm:$0xff]   ;;  %s9610_s16 = sshll.u32 %s15241_s19, 2  ;;  %vm7943_vm6 = vcmask 1046528  }
  0x17   : > { %v11299_v23 = vld [vmem:[%s11223_s12 + $0x88] sm:$0xff]   ;;  %v11312_v27 = vld [vmem:[%s11223_s12 + $0x90] sm:$0xff]   ;;  %v10812_v34 = vld [vmem:[%s11223_s12 + $0x20] sm:$0xff]   ;;  %s229_s21 = scalar_lea.vmem %s14626_s4, %s9610_s16  ;;  %s9611_s22 = sshll.u32 %s15241_s19, 1 }
  0x18   : > { %464 = vmatpush1.bf16.msra.mxu0 %v10786_v6  ;;  %946 = vmatpush1.bf16.msra.mxu1 %v10786_v6  ;;  %v10824_v26 = vld [vmem:[%s14623_s1 + $0xc8] ss:$24 sps:$4 sm:$0xff]   ;;  %v10829_v28 = vld [vmem:[%s14623_s1 + $0xf8] ss:$24 sps:$4 sm:$0xff]   ;;  %v11439_v60 = vld [vmem:[%s14623_s1 + $0x3c] ss:$24 sps:$4 sm:$0xff]   ;;  %s233_s25 = scalar_lea.vmem %s14627_s5, %s9611_s22 }
  0x19   : > { %465 = vmatprep.subr.bf16.mxu0 %v10787_v7  ;;  %947 = vmatprep.subr.bf16.mxu1 %v10787_v7  ;;  %v10834_v30 = vld [vmem:[%s14623_s1 + $0x128] ss:$24 sps:$4 sm:$0xff]   ;;  %v10839_v32 = vld [vmem:[%s14623_s1 + $0x158] ss:$24 sps:$4 sm:$0xff]  }
  0x1a   : > { %v11342_v35 = vld [vmem:[%s11223_s12 + $0xa0] sm:$0xff]   ;;  %v10815_v36 = vld [vmem:[%s11223_s12 + $0x28] sm:$0xff]   ;;  %v10817_v38 = vld [vmem:[%s11223_s12 + $0x30] sm:$0xff]  }
  0x1b   : > { %v11353_v37 = vld [vmem:[%s11223_s12 + $0xa8] sm:$0xff]   ;;  %v11360_v39 = vld [vmem:[%s11223_s12 + $0xb0] sm:$0xff]   ;;  %v10820_v40 = vld [vmem:[%s11223_s12 + $0x38] sm:$0xff]  }
  0x1c   : > { %466 = vmatpush1.bf16.msra.mxu0 %v10789_v8  ;;  %948 = vmatpush1.bf16.msra.mxu1 %v10789_v8  ;;  %v11367_v41 = vld [vmem:[%s11223_s12 + $0xb8] sm:$0xff]   ;;  %v10822_v42 = vld [vmem:[%s11223_s12 + $0x40] sm:$0xff]   ;;  %v10825_v44 = vld [vmem:[%s11223_s12 + $0x48] sm:$0xff]  }
  0x1d   : > { %467 = vmatprep.subr.bf16.mxu0 %v10790_v9  ;;  %949 = vmatprep.subr.bf16.mxu1 %v10790_v9  ;;  %v11374_v43 = vld [vmem:[%s11223_s12 + $0xc0] sm:$0xff]   ;;  %v11381_v45 = vld [vmem:[%s11223_s12 + $0xc8] sm:$0xff]   ;;  %v10827_v46 = vld [vmem:[%s11223_s12 + $0x50] sm:$0xff]  }
  0x1e   : > { %v11388_v47 = vld [vmem:[%s11223_s12 + $0xd0] sm:$0xff]   ;;  %v10830_v48 = vld [vmem:[%s11223_s12 + $0x58] sm:$0xff]   ;;  %v10832_v50 = vld [vmem:[%s11223_s12 + $0x60] sm:$0xff]  }
  0x1f   : > { %v11395_v49 = vld [vmem:[%s11223_s12 + $0xd8] sm:$0xff]   ;;  %v11402_v51 = vld [vmem:[%s11223_s12 + $0xe0] sm:$0xff]   ;;  %v10835_v52 = vld [vmem:[%s11223_s12 + $0x68] sm:$0xff]  }
  0x20   : > { %468 = vmatpush1.bf16.msra.mxu0 %v11234_v10  ;;  %950 = vmatpush1.bf16.msra.mxu1 %v11234_v10  ;;  %v11409_v53 = vld [vmem:[%s11223_s12 + $0xe8] sm:$0xff]   ;;  %v10837_v54 = vld [vmem:[%s11223_s12 + $0x70] sm:$0xff]   ;;  %v10840_v56 = vld [vmem:[%s11223_s12 + $0x78] sm:$0xff]  }
  0x21   : > { %469 = vmatprep.subr.bf16.mxu0 %v11239_v11  ;;  %951 = vmatprep.subr.bf16.mxu1 %v11239_v11  ;;  %v11416_v55 = vld [vmem:[%s11223_s12 + $0xf0] sm:$0xff]   ;;  %v11423_v57 = vld [vmem:[%s11223_s12 + $0xf8] sm:$0xff]   ;;  %v11429_v58 = vld [vmem:[%s11223_s12 + $0x100] sm:$0xff]  }
  0x22   : > { %v11434_v59 = vld [vmem:[%s14623_s1 + $0x8] ss:$24 sps:$4 sm:$0xff]   ;;  %v11444_v61 = vld [vmem:[%s14623_s1 + $0x38] ss:$24 sps:$4 sm:$0xff]  }
  0x23   : > { %v11117_v62 = vld [vmem:[%s14623_s1] ss:$24 sps:$4 sm:$0xff]   ;;  %v11455_v63 = vld [vmem:[%s11223_s12 + $0x108] sm:$0xff]  }
  0x24   : > { %470 = vmatpush1.bf16.msra.mxu0 %v11246_v12  ;;  %952 = vmatpush1.bf16.msra.mxu1 %v11246_v12 }
  0x25   : > { %471 = vmatprep.subr.bf16.mxu0 %v11253_v13  ;;  %953 = vmatprep.subr.bf16.mxu1 %v11253_v13 }
  0x28   : > { %472 = vmatpush1.bf16.msra.mxu0 %v11260_v14  ;;  %954 = vmatpush1.bf16.msra.mxu1 %v11260_v14 }
  0x29   : > { %473 = vmatprep.subr.bf16.mxu0 %v11267_v15  ;;  %955 = vmatprep.subr.bf16.mxu1 %v11267_v15 }
  0x2c   : > { %474 = vmatpush1.bf16.msra.mxu0 %v11274_v16  ;;  %956 = vmatpush1.bf16.msra.mxu1 %v11274_v16 }
  0x2d   : > { %1680 = vmatprep.subr.bf16.mxu1 %v11193_v0  ;;  %10385 = vmatprep.subr.bf16.mxu0 %v10804_v17 }
  0x2f   : > { %492 = vmatmul.mubr.bf16.vlgmr.msra.gmra.mrb[0].mxu0 %v10802_v18  ;;  %974 = vmatmul.mubr.bf16.vlgmr.msra.gmra.mrb[0].mxu1 %v11283_v19  ;;  %v11543_v18 = vld [vmem:[%s14623_s1 + $0x12c] ss:$24 sps:$4 sm:$0xff]  }
  0x30   : > { %1681 = vmatpush1.bf16.msra.mxu1 %v10780_v1  ;;  %10386 = vmatpush3.bf16.msra.mxu0 %v10804_v17  ;;  %v11118_v1 = vld [vmem:[%s14623_s1 + $0x34] ss:$24 sps:$4 sm:$0xff]   ;;  %v11537_v17 = vld [vmem:[%s11223_s12 + $0x118] sm:$0xff]  }
  0x31   : > { %501 = vmatprep.mubr.bf16.mxu0 %v14628_v2  ;;  %983 = vmatprep.mubr.bf16.mxu1 %v14628_v2 }
  0x32   : > { %1682 = vmatprep.subr.bf16.mxu1 %v10781_v3  ;;  %10387 = vmatprep.subr.bf16.mxu0 %v10809_v20  ;;  %v11469_v3 = vld [vmem:[%s14623_s1 + $0x68] ss:$24 sps:$4 sm:$0xff]  }
  0x34   : > { %1683 = vmatpush1.bf16.msra.mxu1 %v10783_v4  ;;  %10388 = vmatpush3.bf16.msra.mxu0 %v10809_v20  ;;  %v11119_v4 = vld [vmem:[%s14623_s1 + $0x30] ss:$24 sps:$4 sm:$0xff]   ;;  %v11126_v20 = vld [vmem:[%s14623_s1 + $0xf4] ss:$24 sps:$4 sm:$0xff]  }
  0x35   : > { %1684 = vmatprep.subr.bf16.mxu1 %v10784_v5  ;;  %10389 = vmatprep.subr.bf16.mxu0 %v10814_v21  ;;  %v11479_v5 = vld [vmem:[%s14623_s1 + $0x9c] ss:$24 sps:$4 sm:$0xff]  }
  0x37   : > { %502 = vmatmul.mubr.bf16.gmra.mrb[4].mxu0 %v10805_v22  ;;  %984 = vmatmul.mubr.bf16.gmra.mrb[4].mxu1 %v11299_v23  ;;  %v11560_v22 = vld [vmem:[%s14623_s1 + $0x15c] ss:$24 sps:$4 sm:$0xff]  }
  0x38   : > { %511 = vmatprep.mubr.bf16.mxu0 %v14628_v2  ;;  %993 = vmatprep.mubr.bf16.mxu1 %v14628_v2 }
  0x39   : > { %1685 = vmatpush1.bf16.msra.mxu1 %v10786_v6  ;;  %10390 = vmatpush3.bf16.msra.mxu0 %v10814_v21  ;;  %v11120_v6 = vld [vmem:[%s14623_s1 + $0x64] ss:$24 sps:$4 sm:$0xff]   ;;  %v11555_v21 = vld [vmem:[%s14623_s1 + $0x128] ss:$24 sps:$4 sm:$0xff]  }
  0x3a   : > { %1686 = vmatprep.subr.bf16.mxu1 %v10787_v7  ;;  %10391 = vmatprep.subr.bf16.mxu0 %v10819_v24  ;;  %v11489_v7 = vld [vmem:[%s14623_s1 + $0x98] ss:$24 sps:$4 sm:$0xff]  }
  0x3d   : > { %1687 = vmatpush1.bf16.msra.mxu1 %v10789_v8  ;;  %10392 = vmatpush3.bf16.msra.mxu0 %v10819_v24  ;;  %v11496_v8 = vld [vmem:[%s14623_s1 + $0xcc] ss:$24 sps:$4 sm:$0xff]  }
  0x3e   : > { %1688 = vmatprep.subr.bf16.mxu1 %v10790_v9  ;;  %10393 = vmatprep.subr.bf16.mxu0 %v10824_v26  ;;  %v11499_v9 = vld [vmem:[%s11223_s12 + $0x110] sm:$0xff]  }
  0x3f   : > { %512 = vmatmul.mubr.bf16.gmra.mrb[8].mxu0 %v10807_v25  ;;  %994 = vmatmul.mubr.bf16.gmra.mrb[8].mxu1 %v11312_v27  ;;  %v10883_v24 = vld [vmem:[%s14623_s1 + $0x154] ss:$24 sps:$4 sm:$0xff]   ;;  %v11128_v25 = vld [vmem:[%s14623_s1 + $0x124] ss:$24 sps:$4 sm:$0xff]  }
  0x40   : > { %521 = vmatprep.mubr.bf16.mxu0 %v14628_v2  ;;  %1003 = vmatprep.mubr.bf16.mxu1 %v14628_v2 }
  0x41   : > { %1689 = vmatpush1.bf16.msra.mxu1 %v11234_v10  ;;  %10394 = vmatpush3.bf16.msra.mxu0 %v10824_v26  ;;  %v11121_v10 = vld [vmem:[%s14623_s1 + $0x60] ss:$24 sps:$4 sm:$0xff]  }
  0x42   : > { %1690 = vmatprep.subr.bf16.mxu1 %v11239_v11  ;;  %10395 = vmatprep.subr.bf16.mxu0 %v10829_v28  ;;  %v11122_v11 = vld [vmem:[%s14623_s1 + $0x94] ss:$24 sps:$4 sm:$0xff]   ;;  %v11578_v26 = vld [vmem:[%s14623_s1 + $0x158] ss:$24 sps:$4 sm:$0xff]  }
  0x45   : > { %1691 = vmatpush1.bf16.msra.mxu1 %v11246_v12  ;;  %10396 = vmatpush3.bf16.msra.mxu0 %v10829_v28  ;;  %v11512_v12 = vld [vmem:[%s14623_s1 + $0xc8] ss:$24 sps:$4 sm:$0xff]  }
  0x46   : > { %1692 = vmatprep.subr.bf16.mxu1 %v11253_v13  ;;  %10397 = vmatprep.subr.bf16.mxu0 %v10834_v30  ;;  %v11518_v13 = vld [vmem:[%s14623_s1 + $0xfc] ss:$24 sps:$4 sm:$0xff]   ;;  %v11588_v28 = vld [vmem:[%s14623_s1 + $0x10] ss:$24 sps:$4 sm:$0xff]  }
  0x47   : > { %522 = vmatmul.mubr.bf16.gmra.mrb[12].mxu0 %v10810_v29  ;;  %1004 = vmatmul.mubr.bf16.gmra.mrb[12].mxu1 %v11327_v31  ;;  %v11591_v29 = vld [vmem:[%s11223_s12 + $0x120] sm:$0xff]  }
  0x48   : > { %531 = vmatprep.mubr.bf16.mxu0 %v14628_v2  ;;  %1013 = vmatprep.mubr.bf16.mxu1 %v14628_v2 }
  0x49   : > { %1693 = vmatpush1.bf16.msra.mxu1 %v11260_v14  ;;  %10398 = vmatpush3.bf16.msra.mxu0 %v10834_v30  ;;  %v11123_v14 = vld [vmem:[%s14623_s1 + $0x90] ss:$24 sps:$4 sm:$0xff]   ;;  %v11129_v30 = vld [vmem:[%s14623_s1 + $0x120] ss:$24 sps:$4 sm:$0xff]  }
  0x4a   : > { %1694 = vmatprep.subr.bf16.mxu1 %v11267_v15  ;;  %10399 = vmatprep.subr.bf16.mxu0 %v10839_v32  ;;  %v11124_v15 = vld [vmem:[%s14623_s1 + $0xc4] ss:$24 sps:$4 sm:$0xff]  }
  0x4d   : > { %1695 = vmatpush1.bf16.msra.mxu1 %v11274_v16  ;;  %10400 = vmatpush3.bf16.msra.mxu0 %v10839_v32  ;;  %v11532_v16 = vld [vmem:[%s14623_s1 + $0xf8] ss:$24 sps:$4 sm:$0xff]   ;;  %v11608_v32 = vld [vmem:[%s11223_s12 + $0x128] sm:$0xff]  }
  0x4e   : > { %2515 = vmatprep.subr.bf16.mxu1 %v11193_v0  ;;  %2033 = vmatprep.subr.bf16.mxu0 %v10845_v33  ;;  %v11460_v0 = vld [vmem:[%s14623_s1 + $0x6c] ss:$24 sps:$4 sm:$0xff]   ;;  %v11615_v33 = vld [vmem:[%s11223_s12 + $0x130] sm:$0xff]  }
  0x4f   : > { %532 = vmatmul.mubr.bf16.gmra.mrb[16].mxu0 %v10812_v34  ;;  %1014 = vmatmul.mubr.bf16.gmra.mrb[16].mxu1 %v11342_v35  ;;  %v11622_v34 = vld [vmem:[%s11223_s12 + $0x138] sm:$0xff]  }
  0x50   : > { %541 = vmatprep.mubr.bf16.mxu0 %v14628_v2  ;;  %1023 = vmatprep.mubr.bf16.mxu1 %v14628_v2 }
  0x57   : > { %542 = vmatmul.mubr.bf16.gmra.mrb[20].mxu0 %v10815_v36  ;;  %1024 = vmatmul.mubr.bf16.gmra.mrb[20].mxu1 %v11353_v37  ;;  %v11638_v36 = vld [vmem:[%s11223_s12 + $0x148] sm:$0xff]  }
  0x58   : > { %551 = vmatprep.mubr.bf16.mxu0 %v14628_v2  ;;  %1033 = vmatprep.mubr.bf16.mxu1 %v14628_v2 }
  0x5f   : > { %552 = vmatmul.mubr.bf16.gmra.mrb[24].mxu0 %v10817_v38  ;;  %1034 = vmatmul.mubr.bf16.gmra.mrb[24].mxu1 %v11360_v39  ;;  %v11658_v38 = vld [vmem:[%s14624_s2] ss:$0 sm:$0xff] }
  0x60   : > { %561 = vmatprep.mubr.bf16.mxu0 %v14628_v2  ;;  %1043 = vmatprep.mubr.bf16.mxu1 %v14628_v2 }
  0x67   : > { %562 = vmatmul.mubr.bf16.gmra.mrb[28].mxu0 %v10820_v40  ;;  %1044 = vmatmul.mubr.bf16.gmra.mrb[28].mxu1 %v11367_v41 }
  0x68   : > { %571 = vmatprep.mubr.bf16.mxu0 %v14628_v2  ;;  %1053 = vmatprep.mubr.bf16.mxu1 %v14628_v2 }
  0x6f   : > { %572 = vmatmul.mubr.bf16.gmra.mrb[32].mxu0 %v10822_v42  ;;  %1054 = vmatmul.mubr.bf16.gmra.mrb[32].mxu1 %v11374_v43 }
  0x70   : > { %581 = vmatprep.mubr.bf16.mxu0 %v14628_v2  ;;  %1063 = vmatprep.mubr.bf16.mxu1 %v14628_v2 }
  0x77   : > { %582 = vmatmul.mubr.bf16.gmra.mrb[36].mxu0 %v10825_v44  ;;  %1064 = vmatmul.mubr.bf16.gmra.mrb[36].mxu1 %v11381_v45 }
  0x78   : > { %591 = vmatprep.mubr.bf16.mxu0 %v14628_v2  ;;  %1073 = vmatprep.mubr.bf16.mxu1 %v14628_v2 }
  0x7f   : > { %592 = vmatmul.mubr.bf16.gmra.mrb[40].mxu0 %v10827_v46  ;;  %1074 = vmatmul.mubr.bf16.gmra.mrb[40].mxu1 %v11388_v47 }
  0x80   : > { %601 = vmatprep.mubr.bf16.mxu0 %v14628_v2  ;;  %1083 = vmatprep.mubr.bf16.mxu1 %v14628_v2 }
  0x87   : > { %602 = vmatmul.mubr.bf16.gmra.mrb[44].mxu0 %v10830_v48  ;;  %1084 = vmatmul.mubr.bf16.gmra.mrb[44].mxu1 %v11395_v49 }
  0x88   : > { %611 = vmatprep.mubr.bf16.mxu0 %v14628_v2  ;;  %1093 = vmatprep.mubr.bf16.mxu1 %v14628_v2 }
  0x8f   : > { %612 = vmatmul.mubr.bf16.gmra.mrb[48].mxu0 %v10832_v50  ;;  %1094 = vmatmul.mubr.bf16.gmra.mrb[48].mxu1 %v11402_v51 }
  0x90   : > { %621 = vmatprep.mubr.bf16.mxu0 %v14628_v2  ;;  %1103 = vmatprep.mubr.bf16.mxu1 %v14628_v2 }
  0x97   : > { %622 = vmatmul.mubr.bf16.gmra.mrb[52].mxu0 %v10835_v52  ;;  %1104 = vmatmul.mubr.bf16.gmra.mrb[52].mxu1 %v11409_v53 }
  0x98   : > { %631 = vmatprep.mubr.bf16.mxu0 %v14628_v2  ;;  %1113 = vmatprep.mubr.bf16.mxu1 %v14628_v2 }
  0x9f   : > { %632 = vmatmul.mubr.bf16.gmra.mrb[56].mxu0 %v10837_v54  ;;  %1114 = vmatmul.mubr.bf16.gmra.mrb[56].mxu1 %v11416_v55 }
  0xa0   : > { %641 = vmatprep.mubr.bf16.mxu0 %v14628_v2  ;;  %1123 = vmatprep.mubr.bf16.mxu1 %v14628_v2 }
  0xa7   : > { %642 = vmatmul.mubr.bf16.gmra.mrb[60].mxu0 %v10840_v56  ;;  %1124 = vmatmul.mubr.bf16.gmra.mrb[60].mxu1 %v11423_v57 }
  0xa8   : > { %10401 = vmatprep.mubr.bf16.mxu0 %v11283_v19  ;;  %1712 = vmatprep.mubr.bf16.mxu1 %v14628_v2  ;;  %v11125_v19 = vld [vmem:[%s14623_s1 + $0xc0] ss:$24 sps:$4 sm:$0xff]  }
  0xaf   : > { %10402 = vmatmul.mubr.bf16.vlgmr.msra.gmra.mrb[64].mxu0 %v11299_v23  ;;  %1713 = vmatmul.mubr.bf16.vlgmr.msra.gmra.mrb[64].mxu1 %v11429_v58  ;;  %v11127_v23 = vld [vmem:[%s14623_s1 + $0xf0] ss:$24 sps:$4 sm:$0xff]  }
  0xb0   : > { %2516 = vmatpush1.bf16.msra.mxu1 %v11117_v62  ;;  %2034 = vmatpush1.bf16.msra.mxu0 %v11434_v59 }
  0xb1   : > { %10405 = vmatprep.mubr.bf16.mxu0 %v11312_v27  ;;  %1722 = vmatprep.mubr.bf16.mxu1 %v14628_v2  ;;  %v10881_v27 = vld [vmem:[%s14623_s1 + $0x150] ss:$24 sps:$4 sm:$0xff]  }
  0xb2   : > { %2035 = vmatprep.subr.bf16.mxu0 %v11439_v60  ;;  %2517 = vmatprep.subr.bf16.mxu1 %v11118_v1  ;;  %v11699_v1 = vld [vmem:[%s11223_s12 + $0x160] sm:$0xff]  }
  0xb4   : > { %2036 = vmatpush1.bf16.msra.mxu0 %v11444_v61  ;;  %2518 = vmatpush1.bf16.msra.mxu1 %v11119_v4 }
  0xb5   : > { %2037 = vmatprep.subr.bf16.mxu0 %v11460_v0  ;;  %2519 = vmatprep.subr.bf16.mxu1 %v11120_v6 }
  0xb7   : > { %10406 = vmatmul.mubr.bf16.gmra.mrb[68].mxu0 %v11327_v31  ;;  %1723 = vmatmul.mubr.bf16.gmra.mrb[68].mxu1 %v11455_v63  ;;  %v11130_v31 = vld [vmem:[%s14623_s1 + $0xc] ss:$24 sps:$4 sm:$0xff]  }
  0xb8   : > { %10409 = vmatprep.mubr.bf16.mxu0 %v11342_v35  ;;  %1732 = vmatprep.mubr.bf16.mxu1 %v14628_v2  ;;  %v11629_v35 = vld [vmem:[%s11223_s12 + $0x140] sm:$0xff]  }
  0xb9   : > { %2038 = vmatpush1.bf16.msra.mxu0 %v11469_v3  ;;  %2520 = vmatpush1.bf16.msra.mxu1 %v11121_v10 }
  0xba   : > { %2039 = vmatprep.subr.bf16.mxu0 %v11479_v5  ;;  %2521 = vmatprep.subr.bf16.mxu1 %v11122_v11 }
  0xbd   : > { %2040 = vmatpush1.bf16.msra.mxu0 %v11489_v7  ;;  %2522 = vmatpush1.bf16.msra.mxu1 %v11123_v14 }
  0xbe   : > { %2041 = vmatprep.subr.bf16.mxu0 %v11496_v8  ;;  %2523 = vmatprep.subr.bf16.mxu1 %v11124_v15 }
  0xbf   : > { %10410 = vmatmul.mubr.bf16.gmra.mrb[72].mxu0 %v11353_v37  ;;  %1733 = vmatmul.mubr.bf16.gmra.mrb[72].mxu1 %v11499_v9  ;;  %v11649_v37 = vld [vmem:[%s11223_s12 + $0x150] sm:$0xff]  }
  0xc0   : > { %10413 = vmatprep.mubr.bf16.mxu0 %v11360_v39  ;;  %1742 = vmatprep.mubr.bf16.mxu1 %v14628_v2 }
  0xc1   : > { %2042 = vmatpush1.bf16.msra.mxu0 %v11512_v12  ;;  %2524 = vmatpush1.bf16.msra.mxu1 %v11125_v19 }
  0xc2   : > { %2043 = vmatprep.subr.bf16.mxu0 %v11518_v13  ;;  %2525 = vmatprep.subr.bf16.mxu1 %v11126_v20 }
  0xc5   : > { %2044 = vmatpush1.bf16.msra.mxu0 %v11532_v16  ;;  %2526 = vmatpush1.bf16.msra.mxu1 %v11127_v23  ;;  %v11720_v23 = vld [vmem:[%s11223_s12 + $0x168] sm:$0xff]  }
  0xc6   : > { %2045 = vmatprep.subr.bf16.mxu0 %v11543_v18  ;;  %2527 = vmatprep.subr.bf16.mxu1 %v11128_v25 }
  0xc7   : > { %10414 = vmatmul.mubr.bf16.gmra.mrb[76].mxu0 %v11367_v41  ;;  %1743 = vmatmul.mubr.bf16.gmra.mrb[76].mxu1 %v11537_v17 }
  0xc8   : > { %10417 = vmatprep.mubr.bf16.mxu0 %v11374_v43  ;;  %1752 = vmatprep.mubr.bf16.mxu1 %v14628_v2 }
  0xc9   : > { %2046 = vmatpush1.bf16.msra.mxu0 %v11555_v21  ;;  %2528 = vmatpush1.bf16.msra.mxu1 %v11129_v30 }
  0xca   : > { %2047 = vmatprep.subr.bf16.mxu0 %v11560_v22  ;;  %2529 = vmatprep.subr.bf16.mxu1 %v10883_v24 }
  0xcd   : > { %2048 = vmatpush1.bf16.msra.mxu0 %v11578_v26  ;;  %2530 = vmatpush1.bf16.msra.mxu1 %v10881_v27 }
  0xce   : > { %2868 = vmatprep.subr.bf16.mxu0 %v11130_v31  ;;  %10433 = vmatprep.subr.bf16.mxu1 %v11588_v28 }
  0xcf   : > { %10418 = vmatmul.mubr.bf16.gmra.mrb[80].mxu0 %v11381_v45  ;;  %1753 = vmatmul.mubr.bf16.gmra.mrb[80].mxu1 %v11591_v29  ;;  %v11671_v45 = vld [vmem:[%s11223_s12 + $0x158] sm:$0xff]  }
  0xd0   : > { %10421 = vmatprep.mubr.bf16.mxu0 %v11388_v47  ;;  %1762 = vmatprep.mubr.bf16.mxu1 %v14628_v2 }
  0xd7   : > { %10422 = vmatmul.mubr.bf16.gmra.mrb[84].mxu0 %v11395_v49  ;;  %1763 = vmatmul.mubr.bf16.gmra.mrb[84].mxu1 %v11608_v32 }
  0xd8   : > { %10425 = vmatprep.mubr.bf16.mxu0 %v11402_v51  ;;  %1772 = vmatprep.mubr.bf16.mxu1 %v14628_v2 }
  0xdf   : > { %10426 = vmatmul.mubr.bf16.gmra.mrb[88].mxu0 %v11409_v53  ;;  %1773 = vmatmul.mubr.bf16.gmra.mrb[88].mxu1 %v11615_v33 }
  0xe0   : > { %10429 = vmatprep.mubr.bf16.mxu0 %v11416_v55  ;;  %1782 = vmatprep.mubr.bf16.mxu1 %v14628_v2 }
  0xe7   : > { %10430 = vmatmul.mubr.bf16.gmra.mrb[92].mxu0 %v11423_v57  ;;  %1783 = vmatmul.mubr.bf16.gmra.mrb[92].mxu1 %v11622_v34 }
  0xe8   : > { %1792 = vmatprep.mubr.bf16.mxu1 %v14628_v2  ;;  %2065 = vmatprep.mubr.bf16.mxu0 %v14628_v2 }
  0xef   : > { %1793 = vmatmul.mubr.bf16.gmra.mrb[96].mxu1 %v11629_v35  ;;  %2066 = vmatmul.mubr.bf16.vlgmr.msra.gmra.mrb[96].mxu0 %v11429_v58 }
  0xf0   : > { %2869 = vmatpush1.bf16.msra.mxu0 %v11434_v59  ;;  %1802 = vmatprep.mubr.bf16.mxu1 %v14628_v2 }
  0xf1   : > { %2075 = vmatprep.mubr.bf16.mxu0 %v14628_v2  ;;  %2870 = vmatprep.subr.bf16.mxu0 %v11439_v60  ;;  %v11690_v60 = vld [vmem:[%s14623_s1] ss:$24 sps:$4 sm:$0xff]  }
  0xf4   : > { %2871 = vmatpush1.bf16.msra.mxu0 %v11444_v61 }
  0xf5   : > { %2872 = vmatprep.subr.bf16.mxu0 %v11460_v0 }
  0xf7   : > { %1803 = vmatmul.mubr.bf16.gmra.mrb[100].mxu1 %v11638_v36  ;;  %2076 = vmatmul.mubr.bf16.gmra.mrb[100].mxu0 %v11455_v63 }
  0xf8   : > { %1812 = vmatprep.mubr.bf16.mxu1 %v14628_v2  ;;  %2085 = vmatprep.mubr.bf16.mxu0 %v14628_v2 }
  0xf9   : > { %2873 = vmatpush1.bf16.msra.mxu0 %v11469_v3 }
  0xfa   : > { %2874 = vmatprep.subr.bf16.mxu0 %v11479_v5 }
  0xfd   : > { %2875 = vmatpush1.bf16.msra.mxu0 %v11489_v7 }
  0xfe   : > { %2876 = vmatprep.subr.bf16.mxu0 %v11496_v8 }
  0xff   : > { %1813 = vmatmul.mubr.bf16.gmra.mrb[104].mxu1 %v11649_v37  ;;  %2086 = vmatmul.mubr.bf16.gmra.mrb[104].mxu0 %v11499_v9 }
 0x100   : > { %1822 = vmatprep.mubr.bf16.mxu1 %v14628_v2  ;;  %2095 = vmatprep.mubr.bf16.mxu0 %v14628_v2 }
 0x101   : > { %2877 = vmatpush1.bf16.msra.mxu0 %v11512_v12 }
 0x102   : > { %v975_v39 = vpop.f32.mrb[0].mxu1  ;;  %v493_v40 = vpop.f32.mrb[0].mxu0  ;;  %2878 = vmatprep.subr.bf16.mxu0 %v11518_v13 }
 0x103   : > { %v7025_v41 = vadd.f32 %v11658_v38, %v975_v39  ;;  %v6891_v42 = vadd.f32 %v11658_v38, %v493_v40  ;;  %v11666_v43 = vpop.f32.mrb[1].mxu1  ;;  %v11668_v44 = vpop.f32.mrb[1].mxu0 }
 0x104   : > { %14633 = vst [vmem:[#allocation3_spill] sm:$0xff] %v11666_v43  ;;  %v979_v46 = vpop.f32.mrb[2].mxu1  ;;  %v497_v47 = vpop.f32.mrb[2].mxu0 }
 0x105   : > { %v6923_v48 = vmax.f32 %v6891_v42, 0.0  ;;  %v7026_v49 = vadd.f32 %v11658_v38, %v979_v46  ;;  %v6892_v50 = vadd.f32 %v11658_v38, %v497_v47  ;;  %v11675_v51 = vpop.f32.mrb[3].mxu1  ;;  %v11677_v52 = vpop.f32.mrb[3].mxu0  ;;  %2879 = vmatpush1.bf16.msra.mxu0 %v11532_v16  ;;  %v7057_v53 = vmax.f32 %v7025_v41, 0.0 }
 0x106   : > { %14634 = vst [vmem:[#allocation4_spill] sm:$0xff] %v11675_v51  ;;  %2880 = vmatprep.subr.bf16.mxu0 %v11543_v18 }
 0x107   : > { %v7058_v54 = vmax.f32 %v7026_v49, 0.0  ;;  %v6924_v55 = vmax.f32 %v6892_v50, 0.0  ;;  %1823 = vmatmul.mubr.bf16.gmra.mrb[108].mxu1 %v11671_v45  ;;  %2096 = vmatmul.mubr.bf16.gmra.mrb[108].mxu0 %v11537_v17 }
 0x108   : > { %1832 = vmatprep.mubr.bf16.mxu1 %v14628_v2  ;;  %2105 = vmatprep.mubr.bf16.mxu0 %v14628_v2 }
 0x109   : > { %v7089_v56 = vadd.f32 %v7058_v54, %v7057_v53  ;;  %v6955_v57 = vadd.f32 %v6924_v55, %v6923_v48  ;;  %2881 = vmatpush1.bf16.msra.mxu0 %v11555_v21 }
 0x10a   : > { %v503_v58 = vpop.f32.mrb[4].mxu0  ;;  %v985_v59 = vpop.f32.mrb[4].mxu1  ;;  %2882 = vmatprep.subr.bf16.mxu0 %v11560_v22 }
 0x10b   : > { %v6893_v61 = vadd.f32 %v11658_v38, %v503_v58  ;;  %v7027_v62 = vadd.f32 %v11658_v38, %v985_v59  ;;  %v11694_v63 = vpop.f32.mrb[5].mxu0  ;;  %v11696_v0 = vpop.f32.mrb[5].mxu1 }
 0x10c   : > { %14635 = vst [vmem:[#allocation5_spill] sm:$0xff] %v11696_v0  ;;  %v507_v3 = vpop.f32.mrb[6].mxu0  ;;  %v989_v4 = vpop.f32.mrb[6].mxu1 }
 0x10d   : > { %v6925_v5 = vmax.f32 %v6893_v61, 0.0  ;;  %v7059_v6 = vmax.f32 %v7027_v62, 0.0  ;;  %v6894_v7 = vadd.f32 %v11658_v38, %v507_v3  ;;  %v7028_v8 = vadd.f32 %v11658_v38, %v989_v4  ;;  %v11703_v9 = vpop.f32.mrb[7].mxu1  ;;  %v11705_v10 = vpop.f32.mrb[7].mxu0  ;;  %2883 = vmatpush1.bf16.msra.mxu0 %v11578_v26 }
 0x10e   : > { %14636 = vst [vmem:[#allocation6_spill] sm:$0xff] %v11703_v9  ;;  %10481 = vmatprep.subr.bf16.mxu0 %v11690_v60 }
 0x10f   : > { %v6956_v11 = vadd.f32 %v6955_v57, %v6925_v5  ;;  %v7090_v12 = vadd.f32 %v7089_v56, %v7059_v6  ;;  %v6926_v13 = vmax.f32 %v6894_v7, 0.0  ;;  %v7060_v14 = vmax.f32 %v7028_v8, 0.0  ;;  %1833 = vmatmul.mubr.bf16.gmra.mrb[112].mxu1 %v11699_v1  ;;  %2106 = vmatmul.mubr.bf16.gmra.mrb[112].mxu0 %v11591_v29  ;;  %v11739_v57 = vld [vmem:[%s11223_s12 + $0x170] sm:$0xff]  }
 0x110   : > { %1842 = vmatprep.mubr.bf16.mxu1 %v14628_v2  ;;  %2115 = vmatprep.mubr.bf16.mxu0 %v14628_v2 }
 0x111   : > { %v6957_v15 = vadd.f32 %v6956_v11, %v6926_v13  ;;  %v7091_v16 = vadd.f32 %v7090_v12, %v7060_v14 }
 0x112   : > { %v513_v17 = vpop.f32.mrb[8].mxu0  ;;  %v995_v18 = vpop.f32.mrb[8].mxu1 }
 0x113   : > { %v6895_v19 = vadd.f32 %v11658_v38, %v513_v17  ;;  %v7029_v20 = vadd.f32 %v11658_v38, %v995_v18  ;;  %v11715_v21 = vpop.f32.mrb[9].mxu0  ;;  %v11717_v22 = vpop.f32.mrb[9].mxu1 }
 0x114   : > { %14637 = vst [vmem:[#allocation7_spill] sm:$0xff] %v11717_v22  ;;  %v517_v24 = vpop.f32.mrb[10].mxu0  ;;  %v999_v25 = vpop.f32.mrb[10].mxu1 }
 0x115   : > { %v6927_v26 = vmax.f32 %v6895_v19, 0.0  ;;  %v7061_v27 = vmax.f32 %v7029_v20, 0.0  ;;  %v6896_v29 = vadd.f32 %v11658_v38, %v517_v24  ;;  %v7030_v30 = vadd.f32 %v11658_v38, %v999_v25  ;;  %v11724_v31 = vpop.f32.mrb[11].mxu1  ;;  %v11726_v39 = vpop.f32.mrb[11].mxu0  ;;  %v11758_v20 = vld [vmem:[%s11223_s12 + $0x178] sm:$0xff]  }
 0x116   : > { %14638 = vst [vmem:[#allocation8_spill] sm:$0xff] %v11724_v31 }
 0x117   : > { %v6958_v40 = vadd.f32 %v6957_v15, %v6927_v26  ;;  %v7092_v41 = vadd.f32 %v7091_v16, %v7061_v27  ;;  %v6928_v42 = vmax.f32 %v6896_v29, 0.0  ;;  %v7062_v46 = vmax.f32 %v7030_v30, 0.0  ;;  %1843 = vmatmul.mubr.bf16.gmra.mrb[116].mxu1 %v11720_v23  ;;  %2116 = vmatmul.mubr.bf16.gmra.mrb[116].mxu0 %v11608_v32 }
 0x118   : > { %1852 = vmatprep.mubr.bf16.mxu1 %v14628_v2  ;;  %2125 = vmatprep.mubr.bf16.mxu0 %v14628_v2 }
 0x119   : > { %v6959_v47 = vadd.f32 %v6958_v40, %v6928_v42  ;;  %v7093_v48 = vadd.f32 %v7092_v41, %v7062_v46 }
 0x11a   : > { %v523_v49 = vpop.f32.mrb[12].mxu0  ;;  %v1005_v50 = vpop.f32.mrb[12].mxu1 }
 0x11b   : > { %v6897_v53 = vadd.f32 %v11658_v38, %v523_v49  ;;  %v7031_v54 = vadd.f32 %v11658_v38, %v1005_v50  ;;  %v11734_v55 = vpop.f32.mrb[13].mxu0  ;;  %v11736_v56 = vpop.f32.mrb[13].mxu1 }
 0x11c   : > { %14639 = vst [vmem:[#allocation9_spill] sm:$0xff] %v11736_v56  ;;  %v527_v58 = vpop.f32.mrb[14].mxu0  ;;  %v1009_v32 = vpop.f32.mrb[14].mxu1 }
 0x11d   : > { %v6929_v59 = vmax.f32 %v6897_v53, 0.0  ;;  %v7063_v61 = vmax.f32 %v7031_v54, 0.0  ;;  %v6898_v62 = vadd.f32 %v11658_v38, %v527_v58  ;;  %v7032_v3 = vadd.f32 %v11658_v38, %v1009_v32  ;;  %v11743_v4 = vpop.f32.mrb[15].mxu1  ;;  %v11745_v5 = vpop.f32.mrb[15].mxu0 }
 0x11e   : > { %14640 = vst [vmem:[#allocation10_spill] sm:$0xff] %v11743_v4 }
 0x11f   : > { %v6960_v6 = vadd.f32 %v6959_v47, %v6929_v59  ;;  %v7094_v7 = vadd.f32 %v7093_v48, %v7063_v61  ;;  %v6930_v8 = vmax.f32 %v6898_v62, 0.0  ;;  %v7064_v11 = vmax.f32 %v7032_v3, 0.0  ;;  %1853 = vmatmul.mubr.bf16.gmra.mrb[120].mxu1 %v11739_v57  ;;  %2126 = vmatmul.mubr.bf16.gmra.mrb[120].mxu0 %v11615_v33  ;;  %v11777_v61 = vld [vmem:[%s11223_s12 + $0x180] sm:$0xff]  }
 0x120   : > { %1862 = vmatprep.mubr.bf16.mxu1 %v14628_v2  ;;  %2135 = vmatprep.mubr.bf16.mxu0 %v14628_v2 }
 0x121   : > { %v6961_v12 = vadd.f32 %v6960_v6, %v6930_v8  ;;  %v7095_v13 = vadd.f32 %v7094_v7, %v7064_v11 }
 0x122   : > { %v533_v14 = vpop.f32.mrb[16].mxu0  ;;  %v1015_v15 = vpop.f32.mrb[16].mxu1 }
 0x123   : > { %v6899_v16 = vadd.f32 %v11658_v38, %v533_v14  ;;  %v7033_v17 = vadd.f32 %v11658_v38, %v1015_v15  ;;  %v11753_v18 = vpop.f32.mrb[17].mxu0  ;;  %v11755_v19 = vpop.f32.mrb[17].mxu1 }
 0x124   : > { %14641 = vst [vmem:[#allocation11_spill] sm:$0xff] %v11755_v19  ;;  %v537_v24 = vpop.f32.mrb[18].mxu0  ;;  %v1019_v33 = vpop.f32.mrb[18].mxu1 }
 0x125   : > { %v6931_v25 = vmax.f32 %v6899_v16, 0.0  ;;  %v7065_v26 = vmax.f32 %v7033_v17, 0.0  ;;  %v6900_v27 = vadd.f32 %v11658_v38, %v537_v24  ;;  %v7034_v29 = vadd.f32 %v11658_v38, %v1019_v33  ;;  %v11762_v30 = vpop.f32.mrb[19].mxu1  ;;  %v11764_v40 = vpop.f32.mrb[19].mxu0 }
 0x126   : > { %14642 = vst [vmem:[#allocation12_spill] sm:$0xff] %v11762_v30 }
 0x127   : > { %v6962_v41 = vadd.f32 %v6961_v12, %v6931_v25  ;;  %v7096_v42 = vadd.f32 %v7095_v13, %v7065_v26  ;;  %v6932_v46 = vmax.f32 %v6900_v27, 0.0  ;;  %v7066_v47 = vmax.f32 %v7034_v29, 0.0  ;;  %1863 = vmatmul.mubr.bf16.gmra.mrb[124].mxu1 %v11758_v20  ;;  %2136 = vmatmul.mubr.bf16.gmra.mrb[124].mxu0 %v11622_v34  ;;  %v10889_v13 = vld [vmem:[%s14623_s1 + $0x40] ss:$24 sps:$4 sm:$0xff]   ;;  %v10892_v25 = vld [vmem:[%s14623_s1 + $0x70] ss:$24 sps:$4 sm:$0xff]  }
 0x128   : > { %2145 = vmatprep.mubr.bf16.mxu0 %v14628_v2  ;;  %2547 = vmatprep.mubr.bf16.mxu1 %v14628_v2 }
 0x129   : > { %v6963_v48 = vadd.f32 %v6962_v41, %v6932_v46  ;;  %v7097_v49 = vadd.f32 %v7096_v42, %v7066_v47  ;;  %v11803_v42 = vld [vmem:[%s11223_s12 + $0x188] sm:$0xff]  }
 0x12a   : > { %v543_v50 = vpop.f32.mrb[20].mxu0  ;;  %v1025_v53 = vpop.f32.mrb[20].mxu1 }
 0x12b   : > { %v6901_v54 = vadd.f32 %v11658_v38, %v543_v50  ;;  %v7035_v58 = vadd.f32 %v11658_v38, %v1025_v53  ;;  %v11772_v32 = vpop.f32.mrb[21].mxu0  ;;  %v11774_v59 = vpop.f32.mrb[21].mxu1 }
 0x12c   : > { %14643 = vst [vmem:[#allocation13_spill] sm:$0xff] %v11774_v59  ;;  %v547_v62 = vpop.f32.mrb[22].mxu0  ;;  %v1029_v34 = vpop.f32.mrb[22].mxu1 }
 0x12d   : > { %v6933_v3 = vmax.f32 %v6901_v54, 0.0  ;;  %v7067_v6 = vmax.f32 %v7035_v58, 0.0  ;;  %v6902_v7 = vadd.f32 %v11658_v38, %v547_v62  ;;  %v7036_v8 = vadd.f32 %v11658_v38, %v1029_v34  ;;  %v11781_v11 = vpop.f32.mrb[23].mxu1  ;;  %v11783_v12 = vpop.f32.mrb[23].mxu0  ;;  %v10895_v62 = vld [vmem:[%s14623_s1 + $0xa0] ss:$24 sps:$4 sm:$0xff]  }
 0x12e   : > { %14644 = vst [vmem:[#allocation14_spill] sm:$0xff] %v11781_v11 }
 0x12f   : > { %v6964_v14 = vadd.f32 %v6963_v48, %v6933_v3  ;;  %v7098_v15 = vadd.f32 %v7097_v49, %v7067_v6  ;;  %v6934_v16 = vmax.f32 %v6902_v7, 0.0  ;;  %v7068_v17 = vmax.f32 %v7036_v8, 0.0  ;;  %2146 = vmatmul.mubr.bf16.gmra.mrb[128].mxu0 %v11629_v35  ;;  %2548 = vmatmul.mubr.bf16.vlgmr.msra.gmra.mrb[128].mxu1 %v11777_v61 }
 0x130   : > { %10434 = vmatpush3.bf16.msra.mxu1 %v11588_v28  ;;  %2155 = vmatprep.mubr.bf16.mxu0 %v14628_v2 }
 0x131   : > { %v6965_v24 = vadd.f32 %v6964_v14, %v6934_v16  ;;  %v7099_v33 = vadd.f32 %v7098_v15, %v7068_v17  ;;  %2557 = vmatprep.mubr.bf16.mxu1 %v14628_v2  ;;  %10435 = vmatprep.subr.bf16.mxu1 %v10889_v13  ;;  %v10898_v16 = vld [vmem:[%s14623_s1 + $0xd0] ss:$24 sps:$4 sm:$0xff]  }
 0x132   : > { %v553_v26 = vpop.f32.mrb[24].mxu0  ;;  %v1035_v27 = vpop.f32.mrb[24].mxu1 }
 0x133   : > { %v6903_v29 = vadd.f32 %v11658_v38, %v553_v26  ;;  %v7037_v35 = vadd.f32 %v11658_v38, %v1035_v27  ;;  %v11798_v41 = vpop.f32.mrb[25].mxu0  ;;  %v11800_v28 = vpop.f32.mrb[25].mxu1  ;;  %v11828_v26 = vld [vmem:[%s11223_s12 + $0x190] sm:$0xff]  }
 0x134   : > { %14645 = vst [vmem:[#allocation15_spill] sm:$0xff] %v11800_v28  ;;  %v557_v46 = vpop.f32.mrb[26].mxu0  ;;  %v1039_v47 = vpop.f32.mrb[26].mxu1  ;;  %10436 = vmatpush3.bf16.msra.mxu1 %v10889_v13 }
 0x135   : > { %v6935_v48 = vmax.f32 %v6903_v29, 0.0  ;;  %v7069_v49 = vmax.f32 %v7037_v35, 0.0  ;;  %v6904_v50 = vadd.f32 %v11658_v38, %v557_v46  ;;  %v7038_v53 = vadd.f32 %v11658_v38, %v1039_v47  ;;  %v11807_v54 = vpop.f32.mrb[27].mxu1  ;;  %v11809_v58 = vpop.f32.mrb[27].mxu0  ;;  %10437 = vmatprep.subr.bf16.mxu1 %v10892_v25 }
 0x136   : > { %14646 = vst [vmem:[#allocation16_spill] sm:$0xff] %v11807_v54 }
 0x137   : > { %v6966_v34 = vadd.f32 %v6965_v24, %v6935_v48  ;;  %v7100_v3 = vadd.f32 %v7099_v33, %v7069_v49  ;;  %v6936_v6 = vmax.f32 %v6904_v50, 0.0  ;;  %v7070_v7 = vmax.f32 %v7038_v53, 0.0  ;;  %2156 = vmatmul.mubr.bf16.gmra.mrb[132].mxu0 %v11638_v36  ;;  %2558 = vmatmul.mubr.bf16.gmra.mrb[132].mxu1 %v11803_v42  ;;  %v10902_v50 = vld [vmem:[%s14623_s1 + $0x100] ss:$24 sps:$4 sm:$0xff]  }
 0x138   : > { %2165 = vmatprep.mubr.bf16.mxu0 %v14628_v2  ;;  %2567 = vmatprep.mubr.bf16.mxu1 %v14628_v2 }
 0x139   : > { %v6967_v8 = vadd.f32 %v6966_v34, %v6936_v6  ;;  %v7101_v13 = vadd.f32 %v7100_v3, %v7070_v7  ;;  %10438 = vmatpush3.bf16.msra.mxu1 %v10892_v25 }
 0x13a   : > { %v563_v14 = vpop.f32.mrb[28].mxu0  ;;  %v1045_v15 = vpop.f32.mrb[28].mxu1  ;;  %10439 = vmatprep.subr.bf16.mxu1 %v10895_v62 }
 0x13b   : > { %v6905_v17 = vadd.f32 %v11658_v38, %v563_v14  ;;  %v7039_v36 = vadd.f32 %v11658_v38, %v1045_v15  ;;  %v11823_v24 = vpop.f32.mrb[29].mxu0  ;;  %v11825_v33 = vpop.f32.mrb[29].mxu1 }
 0x13c   : > { %14647 = vst [vmem:[#allocation17_spill] sm:$0xff] %v11825_v33  ;;  %v567_v27 = vpop.f32.mrb[30].mxu0  ;;  %v1049_v29 = vpop.f32.mrb[30].mxu1 }
 0x13d   : > { %v6937_v25 = vmax.f32 %v6905_v17, 0.0  ;;  %v7071_v35 = vmax.f32 %v7039_v36, 0.0  ;;  %v6906_v46 = vadd.f32 %v11658_v38, %v567_v27  ;;  %v7040_v47 = vadd.f32 %v11658_v38, %v1049_v29  ;;  %v11832_v48 = vpop.f32.mrb[31].mxu1  ;;  %v11834_v49 = vpop.f32.mrb[31].mxu0  ;;  %10440 = vmatpush3.bf16.msra.mxu1 %v10895_v62  ;;  %v11853_v27 = vld [vmem:[%s11223_s12 + $0x198] sm:$0xff]  }
 0x13e   : > { %14648 = vst [vmem:[#allocation18_spill] sm:$0xff] %v11832_v48  ;;  %10441 = vmatprep.subr.bf16.mxu1 %v10898_v16 }
 0x13f   : > { %v6968_v53 = vadd.f32 %v6967_v8, %v6937_v25  ;;  %v7102_v34 = vadd.f32 %v7101_v13, %v7071_v35  ;;  %v6938_v3 = vmax.f32 %v6906_v46, 0.0  ;;  %v7072_v6 = vmax.f32 %v7040_v47, 0.0  ;;  %2166 = vmatmul.mubr.bf16.gmra.mrb[136].mxu0 %v11649_v37  ;;  %2568 = vmatmul.mubr.bf16.gmra.mrb[136].mxu1 %v11828_v26  ;;  %v10906_v8 = vld [vmem:[%s14623_s1 + $0x130] ss:$24 sps:$4 sm:$0xff]  }
 0x140   : > { %2175 = vmatprep.mubr.bf16.mxu0 %v14628_v2  ;;  %2577 = vmatprep.mubr.bf16.mxu1 %v14628_v2 }
 0x141   : > { %v6969_v7 = vadd.f32 %v6968_v53, %v6938_v3  ;;  %v7103_v62 = vadd.f32 %v7102_v34, %v7072_v6  ;;  %10442 = vmatpush3.bf16.msra.mxu1 %v10898_v16  ;;  %v10910_v3 = vld [vmem:[%s14623_s1 + $0x160] ss:$24 sps:$4 sm:$0xff]  }
 0x142   : > { %v573_v14 = vpop.f32.mrb[32].mxu0  ;;  %v1055_v15 = vpop.f32.mrb[32].mxu1  ;;  %10443 = vmatprep.subr.bf16.mxu1 %v10902_v50 }
 0x143   : > { %v6907_v13 = vadd.f32 %v11658_v38, %v573_v14  ;;  %v7041_v37 = vadd.f32 %v11658_v38, %v1055_v15  ;;  %v11848_v17 = vpop.f32.mrb[33].mxu0  ;;  %v11850_v36 = vpop.f32.mrb[33].mxu1 }
 0x144   : > { %14649 = vst [vmem:[#allocation19_spill] sm:$0xff] %v11850_v36  ;;  %v577_v29 = vpop.f32.mrb[34].mxu0  ;;  %v1059_v25 = vpop.f32.mrb[34].mxu1 }
 0x145   : > { %v6939_v16 = vmax.f32 %v6907_v13, 0.0  ;;  %v7073_v35 = vmax.f32 %v7041_v37, 0.0  ;;  %v6908_v46 = vadd.f32 %v11658_v38, %v577_v29  ;;  %v7042_v47 = vadd.f32 %v11658_v38, %v1059_v25  ;;  %v11857_v53 = vpop.f32.mrb[35].mxu1  ;;  %v11859_v34 = vpop.f32.mrb[35].mxu0  ;;  %10444 = vmatpush3.bf16.msra.mxu1 %v10902_v50 }
 0x146   : > { %14650 = vst [vmem:[#allocation20_spill] sm:$0xff] %v11857_v53  ;;  %10445 = vmatprep.subr.bf16.mxu1 %v10906_v8  ;;  %v14651_v13 = vmov 0  }
 0x147   : > { %v6970_v6 = vadd.f32 %v6969_v7, %v6939_v16  ;;  %v7104_v14 = vadd.f32 %v7103_v62, %v7073_v35  ;;  %v6940_v15 = vmax.f32 %v6908_v46, 0.0  ;;  %v7074_v2 = vmax.f32 %v7042_v47, 0.0  ;;  %2176 = vmatmul.mubr.bf16.gmra.mrb[140].mxu0 %v11671_v45  ;;  %2578 = vmatmul.mubr.bf16.gmra.mrb[140].mxu1 %v11853_v27  ;;  %v10915_v7 = vld [vmem:[%s14623_s1 + $0xc] ss:$24 sps:$4 sm:$0xff]  }
 0x148   : > { %2185 = vmatprep.mubr.bf16.mxu0 %v14651_v13  ;;  %2587 = vmatprep.mubr.bf16.mxu1 %v14651_v13  ;;  %v11878_v46 = vld [vmem:[%s11223_s12 + $0x1a0] sm:$0xff]  }
 0x149   : > { %v6971_v37 = vadd.f32 %v6970_v6, %v6940_v15  ;;  %v7105_v50 = vadd.f32 %v7104_v14, %v7074_v2  ;;  %10446 = vmatpush3.bf16.msra.mxu1 %v10906_v8 }
 0x14a   : > { %v583_v29 = vpop.f32.mrb[36].mxu0  ;;  %v1065_v25 = vpop.f32.mrb[36].mxu1  ;;  %10447 = vmatprep.subr.bf16.mxu1 %v10910_v3 }
 0x14b   : > { %v6909_v62 = vadd.f32 %v11658_v38, %v583_v29  ;;  %v7043_v45 = vadd.f32 %v11658_v38, %v1065_v25  ;;  %v11873_v16 = vpop.f32.mrb[37].mxu0  ;;  %v11875_v35 = vpop.f32.mrb[37].mxu1 }
 0x14c   : > { %14652 = vst [vmem:[#allocation21_spill] sm:$0xff] %v11875_v35  ;;  %v587_v47 = vpop.f32.mrb[38].mxu0  ;;  %v1069_v2 = vpop.f32.mrb[38].mxu1 }
 0x14d   : > { %v6941_v8 = vmax.f32 %v6909_v62, 0.0  ;;  %v7075_v6 = vmax.f32 %v7043_v45, 0.0  ;;  %v6910_v14 = vadd.f32 %v11658_v38, %v587_v47  ;;  %v7044_v15 = vadd.f32 %v11658_v38, %v1069_v2  ;;  %v11882_v53 = vpop.f32.mrb[39].mxu1  ;;  %v11884_v36 = vpop.f32.mrb[39].mxu0  ;;  %10448 = vmatpush3.bf16.msra.mxu1 %v10910_v3 }
 0x14e   : > { %14653 = vst [vmem:[#allocation22_spill] sm:$0xff] %v11882_v53  ;;  %3864 = vmatprep.subr.bf16.mxu1 %v10915_v7 }
 0x14f   : > { %v6972_v29 = vadd.f32 %v6971_v37, %v6941_v8  ;;  %v7106_v25 = vadd.f32 %v7105_v50, %v7075_v6  ;;  %v6942_v35 = vmax.f32 %v6910_v14, 0.0  ;;  %v7076_v48 = vmax.f32 %v7044_v15, 0.0  ;;  %2186 = vmatmul.mubr.bf16.gmra.mrb[144].mxu0 %v11699_v1  ;;  %2588 = vmatmul.mubr.bf16.gmra.mrb[144].mxu1 %v11878_v46  ;;  %v11897_v8 = vld [vmem:[%s11223_s12 + $0x1a8] sm:$0xff]  }
 0x150   : > { %2195 = vmatprep.mubr.bf16.mxu0 %v14651_v13  ;;  %2597 = vmatprep.mubr.bf16.mxu1 %v14651_v13 }
 0x151   : > { %v6973_v62 = vadd.f32 %v6972_v29, %v6942_v35  ;;  %v7107_v45 = vadd.f32 %v7106_v25, %v7076_v48 }
 0x152   : > { %v593_v47 = vpop.f32.mrb[40].mxu0  ;;  %v1075_v2 = vpop.f32.mrb[40].mxu1 }
 0x153   : > { %v6911_v3 = vadd.f32 %v11658_v38, %v593_v47  ;;  %v7045_v37 = vadd.f32 %v11658_v38, %v1075_v2  ;;  %v11892_v7 = vpop.f32.mrb[41].mxu0  ;;  %v11894_v50 = vpop.f32.mrb[41].mxu1 }
 0x154   : > { %14654 = vst [vmem:[#allocation23_spill] sm:$0xff] %v11894_v50  ;;  %v597_v1 = vpop.f32.mrb[42].mxu0  ;;  %v1079_v6 = vpop.f32.mrb[42].mxu1 }
 0x155   : > { %v6943_v14 = vmax.f32 %v6911_v3, 0.0  ;;  %v7077_v15 = vmax.f32 %v7045_v37, 0.0  ;;  %v6912_v53 = vadd.f32 %v11658_v38, %v597_v1  ;;  %v7046_v48 = vadd.f32 %v11658_v38, %v1079_v6  ;;  %v11901_v35 = vpop.f32.mrb[43].mxu1  ;;  %v11903_v29 = vpop.f32.mrb[43].mxu0 }
 0x156   : > { %14655 = vst [vmem:[#allocation24_spill] sm:$0xff] %v11901_v35 }
 0x157   : > { %v6974_v25 = vadd.f32 %v6973_v62, %v6943_v14  ;;  %v7108_v47 = vadd.f32 %v7107_v45, %v7077_v15  ;;  %v6944_v2 = vmax.f32 %v6912_v53, 0.0  ;;  %v7078_v33 = vmax.f32 %v7046_v48, 0.0  ;;  %2196 = vmatmul.mubr.bf16.gmra.mrb[148].mxu0 %v11720_v23  ;;  %2598 = vmatmul.mubr.bf16.gmra.mrb[148].mxu1 %v11897_v8  ;;  %v11916_v45 = vld [vmem:[%s11223_s12 + $0x1b0] sm:$0xff]  }
 0x158   : > { %2205 = vmatprep.mubr.bf16.mxu0 %v14651_v13  ;;  %2607 = vmatprep.mubr.bf16.mxu1 %v14651_v13 }
 0x159   : > { %v6975_v3 = vadd.f32 %v6974_v25, %v6944_v2  ;;  %v7109_v37 = vadd.f32 %v7108_v47, %v7078_v33 }
 0x15a   : > { %v603_v1 = vpop.f32.mrb[44].mxu0  ;;  %v1085_v6 = vpop.f32.mrb[44].mxu1 }
 0x15b   : > { %v6913_v35 = vadd.f32 %v11658_v38, %v603_v1  ;;  %v7047_v62 = vadd.f32 %v11658_v38, %v1085_v6  ;;  %v11911_v14 = vpop.f32.mrb[45].mxu0  ;;  %v11913_v53 = vpop.f32.mrb[45].mxu1 }
 0x15c   : > { %14656 = vst [vmem:[#allocation25_spill] sm:$0xff] %v11913_v53  ;;  %v607_v23 = vpop.f32.mrb[46].mxu0  ;;  %v1089_v15 = vpop.f32.mrb[46].mxu1 }
 0x15d   : > { %v6945_v48 = vmax.f32 %v6913_v35, 0.0  ;;  %v7079_v50 = vmax.f32 %v7047_v62, 0.0  ;;  %v6914_v54 = vadd.f32 %v11658_v38, %v607_v23  ;;  %v7048_v33 = vadd.f32 %v11658_v38, %v1089_v15  ;;  %v11920_v25 = vpop.f32.mrb[47].mxu1  ;;  %v11922_v47 = vpop.f32.mrb[47].mxu0 }
 0x15e   : > { %14657 = vst [vmem:[#allocation26_spill] sm:$0xff] %v11920_v25 }
 0x15f   : > { %v6976_v2 = vadd.f32 %v6975_v3, %v6945_v48  ;;  %v7110_v1 = vadd.f32 %v7109_v37, %v7079_v50  ;;  %v6946_v6 = vmax.f32 %v6914_v54, 0.0  ;;  %v7080_v28 = vmax.f32 %v7048_v33, 0.0  ;;  %2206 = vmatmul.mubr.bf16.gmra.mrb[152].mxu0 %v11739_v57  ;;  %2608 = vmatmul.mubr.bf16.gmra.mrb[152].mxu1 %v11916_v45  ;;  %v11935_v50 = vld [vmem:[%s11223_s12 + $0x1b8] sm:$0xff]  }
 0x160   : > { %2215 = vmatprep.mubr.bf16.mxu0 %v14651_v13  ;;  %2617 = vmatprep.mubr.bf16.mxu1 %v14651_v13 }
 0x161   : > { %v6977_v35 = vadd.f32 %v6976_v2, %v6946_v6  ;;  %v7111_v62 = vadd.f32 %v7110_v1, %v7080_v28 }
 0x162   : > { %v613_v23 = vpop.f32.mrb[48].mxu0  ;;  %v1095_v15 = vpop.f32.mrb[48].mxu1 }
 0x163   : > { %v6915_v25 = vadd.f32 %v11658_v38, %v613_v23  ;;  %v7049_v3 = vadd.f32 %v11658_v38, %v1095_v15  ;;  %v11930_v48 = vpop.f32.mrb[49].mxu0  ;;  %v11932_v54 = vpop.f32.mrb[49].mxu1 }
 0x164   : > { %14658 = vst [vmem:[#allocation27_spill] sm:$0xff] %v11932_v54  ;;  %v617_v57 = vpop.f32.mrb[50].mxu0  ;;  %v1099_v37 = vpop.f32.mrb[50].mxu1 }
 0x165   : > { %v6947_v33 = vmax.f32 %v6915_v25, 0.0  ;;  %v7081_v53 = vmax.f32 %v7049_v3, 0.0  ;;  %v6916_v11 = vadd.f32 %v11658_v38, %v617_v57  ;;  %v7050_v28 = vadd.f32 %v11658_v38, %v1099_v37  ;;  %v11939_v2 = vpop.f32.mrb[51].mxu1  ;;  %v11941_v1 = vpop.f32.mrb[51].mxu0 }
 0x166   : > { %14659 = vst [vmem:[#allocation28_spill] sm:$0xff] %v11939_v2 }
 0x167   : > { %v6978_v6 = vadd.f32 %v6977_v35, %v6947_v33  ;;  %v7112_v23 = vadd.f32 %v7111_v62, %v7081_v53  ;;  %v6948_v15 = vmax.f32 %v6916_v11, 0.0  ;;  %v7082_v59 = vmax.f32 %v7050_v28, 0.0  ;;  %2216 = vmatmul.mubr.bf16.gmra.mrb[156].mxu0 %v11758_v20  ;;  %2618 = vmatmul.mubr.bf16.gmra.mrb[156].mxu1 %v11935_v50  ;;  %v11954_v53 = vld [vmem:[%s11223_s12 + $0x1c0] sm:$0xff]  }
 0x168   : > { %2627 = vmatprep.mubr.bf16.mxu1 %v14651_v13  ;;  %2900 = vmatprep.mubr.bf16.mxu0 %v14651_v13 }
 0x169   : > { %v6979_v25 = vadd.f32 %v6978_v6, %v6948_v15  ;;  %v7113_v3 = vadd.f32 %v7112_v23, %v7082_v59  ;;  %v10903_v15 = vld [vmem:[%s14623_s1 + $0x30] ss:$24 sps:$4 sm:$0xff]  }
 0x16a   : > { %v623_v57 = vpop.f32.mrb[52].mxu0  ;;  %v1105_v37 = vpop.f32.mrb[52].mxu1 }
 0x16b   : > { %v6917_v2 = vadd.f32 %v11658_v38, %v623_v57  ;;  %v7051_v35 = vadd.f32 %v11658_v38, %v1105_v37  ;;  %v11949_v33 = vpop.f32.mrb[53].mxu0  ;;  %v11951_v11 = vpop.f32.mrb[53].mxu1 }
 0x16c   : > { %14660 = vst [vmem:[#allocation29_spill] sm:$0xff] %v11951_v11  ;;  %v627_v20 = vpop.f32.mrb[54].mxu0  ;;  %v1109_v62 = vpop.f32.mrb[54].mxu1 }
 0x16d   : > { %v6949_v28 = vmax.f32 %v6917_v2, 0.0  ;;  %v7083_v54 = vmax.f32 %v7051_v35, 0.0  ;;  %v6918_v30 = vadd.f32 %v11658_v38, %v627_v20  ;;  %v7052_v59 = vadd.f32 %v11658_v38, %v1109_v62  ;;  %v11958_v6 = vpop.f32.mrb[55].mxu1  ;;  %v11960_v23 = vpop.f32.mrb[55].mxu0 }
 0x16e   : > { %14661 = vst [vmem:[#allocation30_spill] sm:$0xff] %v11958_v6 }
 0x16f   : > { %v6980_v57 = vadd.f32 %v6979_v25, %v6949_v28  ;;  %v7114_v37 = vadd.f32 %v7113_v3, %v7083_v54  ;;  %v6950_v11 = vmax.f32 %v6918_v30, 0.0  ;;  %v7084_v19 = vmax.f32 %v7052_v59, 0.0  ;;  %2628 = vmatmul.mubr.bf16.gmra.mrb[160].mxu1 %v11954_v53  ;;  %2901 = vmatmul.mubr.bf16.vlgmr.msra.gmra.mrb[160].mxu0 %v11777_v61  ;;  %v10907_v54 = vld [vmem:[%s14623_s1 + $0x60] ss:$24 sps:$4 sm:$0xff]   ;;  %v11980_v28 = vld [vmem:[%s11223_s12 + $0x1c8] sm:$0xff]  }
 0x170   : > { %10482 = vmatpush3.bf16.msra.mxu0 %v11690_v60  ;;  %2637 = vmatprep.mubr.bf16.mxu1 %v14651_v13 }
 0x171   : > { %v6981_v2 = vadd.f32 %v6980_v57, %v6950_v11  ;;  %v7115_v35 = vadd.f32 %v7114_v37, %v7084_v19  ;;  %2910 = vmatprep.mubr.bf16.mxu0 %v14651_v13  ;;  %10483 = vmatprep.subr.bf16.mxu0 %v10903_v15 }
 0x172   : > { %v633_v30 = vpop.f32.mrb[56].mxu0  ;;  %v1115_v25 = vpop.f32.mrb[56].mxu1 }
 0x173   : > { %v6919_v3 = vadd.f32 %v11658_v38, %v633_v30  ;;  %v7053_v20 = vadd.f32 %v11658_v38, %v1115_v25  ;;  %v11975_v62 = vpop.f32.mrb[57].mxu0  ;;  %v11977_v60 = vpop.f32.mrb[57].mxu1  ;;  %v10911_v25 = vld [vmem:[%s14623_s1 + $0x90] ss:$24 sps:$4 sm:$0xff]  }
 0x174   : > { %14662 = vst [vmem:[#allocation31_spill] sm:$0xff] %v11977_v60  ;;  %v637_v19 = vpop.f32.mrb[58].mxu0  ;;  %v1119_v11 = vpop.f32.mrb[58].mxu1  ;;  %10484 = vmatpush3.bf16.msra.mxu0 %v10903_v15 }
 0x175   : > { %v6951_v59 = vmax.f32 %v6919_v3, 0.0  ;;  %v7085_v57 = vmax.f32 %v7053_v20, 0.0  ;;  %v6920_v37 = vadd.f32 %v11658_v38, %v637_v19  ;;  %v7054_v6 = vadd.f32 %v11658_v38, %v1119_v11  ;;  %v11984_v4 = vpop.f32.mrb[59].mxu1  ;;  %v11986_v30 = vpop.f32.mrb[59].mxu0  ;;  %10485 = vmatprep.subr.bf16.mxu0 %v10907_v54 }
 0x176   : > { %14663 = vst [vmem:[#allocation32_spill] sm:$0xff] %v11984_v4 }
 0x177   : > { %v6982_v60 = vadd.f32 %v6981_v2, %v6951_v59  ;;  %v7116_v56 = vadd.f32 %v7115_v35, %v7085_v57  ;;  %v6952_v31 = vmax.f32 %v6920_v37, 0.0  ;;  %v7086_v22 = vmax.f32 %v7054_v6, 0.0  ;;  %2638 = vmatmul.mubr.bf16.gmra.mrb[164].mxu1 %v11980_v28  ;;  %2911 = vmatmul.mubr.bf16.gmra.mrb[164].mxu0 %v11803_v42  ;;  %v10916_v2 = vld [vmem:[%s14623_s1 + $0xc0] ss:$24 sps:$4 sm:$0xff]   ;;  %v12005_v57 = vld [vmem:[%s11223_s12 + $0x1d0] sm:$0xff]  }
 0x178   : > { %2647 = vmatprep.mubr.bf16.mxu1 %v14651_v13  ;;  %2920 = vmatprep.mubr.bf16.mxu0 %v14651_v13  ;;  %14665 = vst [vmem:[#allocation34_spill] sm:$0xff] %v12005_v57 }
 0x179   : > { %v6983_v15 = vadd.f32 %v6982_v60, %v6952_v31  ;;  %v7117_v3 = vadd.f32 %v7116_v56, %v7086_v22  ;;  %10486 = vmatpush3.bf16.msra.mxu0 %v10907_v54 }
 0x17a   : > { %v643_v20 = vpop.f32.mrb[60].mxu0  ;;  %v1125_v19 = vpop.f32.mrb[60].mxu1  ;;  %10487 = vmatprep.subr.bf16.mxu0 %v10911_v25 }
 0x17b   : > { %v6921_v6 = vadd.f32 %v11658_v38, %v643_v20  ;;  %v7055_v35 = vadd.f32 %v11658_v38, %v1125_v19  ;;  %v12000_v11 = vpop.f32.mrb[61].mxu0  ;;  %v12002_v59 = vpop.f32.mrb[61].mxu1  ;;  %v10923_v20 = vld [vmem:[%s14623_s1 + $0xf0] ss:$24 sps:$4 sm:$0xff]  }
 0x17c   : > { %14664 = vst [vmem:[#allocation33_spill] sm:$0xff] %v12002_v59  ;;  %v647_v31 = vpop.f32.mrb[62].mxu0  ;;  %v1129_v22 = vpop.f32.mrb[62].mxu1 }
 0x17d   : > { %v6953_v56 = vmax.f32 %v6921_v6, 0.0  ;;  %v7087_v54 = vmax.f32 %v7055_v35, 0.0  ;;  %v6922_v60 = vadd.f32 %v11658_v38, %v647_v31  ;;  %v7056_v37 = vadd.f32 %v11658_v38, %v1129_v22  ;;  %v12009_v4 = vpop.f32.mrb[63].mxu1  ;;  %v12011_v9 = vpop.f32.mrb[63].mxu0  ;;  %10488 = vmatpush3.bf16.msra.mxu0 %v10911_v25 }
 0x17e   : > { %14666 = vst [vmem:[#allocation35_spill] sm:$0xff] %v12009_v4  ;;  %10489 = vmatprep.subr.bf16.mxu0 %v10916_v2 }
 0x17f   : > { %v6984_v19 = vadd.f32 %v6983_v15, %v6953_v56  ;;  %v7118_v59 = vadd.f32 %v7117_v3, %v7087_v54  ;;  %v6954_v0 = vmax.f32 %v6922_v60, 0.0  ;;  %v7088_v51 = vmax.f32 %v7056_v37, 0.0  ;;  %2648 = vmatmul.mubr.bf16.gmra.mrb[168].mxu1 %v12005_v57  ;;  %2921 = vmatmul.mubr.bf16.gmra.mrb[168].mxu0 %v11828_v26  ;;  %v10930_v15 = vld [vmem:[%s14623_s1 + $0x120] ss:$24 sps:$4 sm:$0xff]  }
 0x180   : > { %2657 = vmatprep.mubr.bf16.mxu1 %v14651_v13  ;;  %2930 = vmatprep.mubr.bf16.mxu0 %v14651_v13  ;;  %v12029_v37 = vld [vmem:[%s11223_s12 + $0x1d8] sm:$0xff]  }
 0x181   : > { %v6985_v6 = vadd.f32 %v6984_v19, %v6954_v0  ;;  %v7119_v25 = vadd.f32 %v7118_v59, %v7088_v51  ;;  %10490 = vmatpush3.bf16.msra.mxu0 %v10916_v2 }
 0x182   : > { %v10403_v35 = vpop.f32.mrb[64].mxu0  ;;  %v1714_v31 = vpop.f32.mrb[64].mxu1  ;;  %10491 = vmatprep.subr.bf16.mxu0 %v10923_v20 }
 0x183   : > { %v6986_v3 = vrot.slane %v6985_v6, 4  ;;  %v7120_v22 = vrot.slane %v7119_v25, 4  ;;  %v12024_v56 = vadd.f32 %v10403_v35, %v11694_v63  ;;  %v1296_v54 = vpop.f32.mrb[65].mxu0  ;;  %v12026_v60 = vpop.f32.mrb[65].mxu1  ;;  %v7159_v51 = vadd.f32 %v11658_v38, %v1714_v31 }
 0x184   : > { %14668 = vst [vmem:[#allocation37_spill] sm:$0xff] %v12026_v60  ;;  %v12033_v0 = vadd.f32 %v1296_v54, %v11668_v44  ;;  %v10404_v2 = vpop.f32.mrb[66].mxu0  ;;  %v1718_v59 = vpop.f32.mrb[66].mxu1  ;;  %v10937_v44 = vld [vmem:[%s14623_s1 + $0x150] ss:$24 sps:$4 sm:$0xff]  }
 0x185   : > { %14667 = vst [vmem:[#allocation36_spill] sm:$0xff] %v12024_v56  ;;  %v6987_v19 = vadd.f32 %v6986_v3, %v6985_v6  ;;  %v7121_v4 = vadd.f32 %v7120_v22, %v7119_v25  ;;  %v12036_v43 = vadd.f32 %v10404_v2, %v11705_v10  ;;  %v1299_v57 = vpop.f32.mrb[67].mxu0  ;;  %v12038_v63 = vpop.f32.mrb[67].mxu1  ;;  %10492 = vmatpush3.bf16.msra.mxu0 %v10923_v20  ;;  %v7191_v10 = vmax.f32 %v7159_v51, 0.0  ;;  %v10946_v54 = vld [vmem:[%s14623_s1 + $0x14] ss:$24 sps:$4 sm:$0xff]  }
 0x186   : > { %14670 = vst [vmem:[#allocation39_spill] sm:$0xff] %v12038_v63  ;;  %v7160_v35 = vadd.f32 %v11658_v38, %v1718_v59  ;;  %v12042_v60 = vadd.f32 %v1299_v57, %v11677_v52  ;;  %10493 = vmatprep.subr.bf16.mxu0 %v10930_v15 }
 0x187   : > { %14669 = vst [vmem:[#allocation38_spill] sm:$0xff] %v12036_v43  ;;  %v6988_v31 = vrot.slane %v6987_v19, 2  ;;  %v7122_v6 = vrot.slane %v7121_v4, 2  ;;  %2658 = vmatmul.mubr.bf16.gmra.mrb[172].mxu1 %v12029_v37  ;;  %2931 = vmatmul.mubr.bf16.gmra.mrb[172].mxu0 %v11853_v27 }
 0x188   : > { %v7192_v25 = vmax.f32 %v7160_v35, 0.0  ;;  %2667 = vmatprep.mubr.bf16.mxu1 %v14651_v13  ;;  %2940 = vmatprep.mubr.bf16.mxu0 %v14651_v13 }
 0x189   : > { %v6989_v52 = vadd.f32 %v6988_v31, %v6987_v19  ;;  %v7123_v57 = vadd.f32 %v7122_v6, %v7121_v4  ;;  %10494 = vmatpush3.bf16.msra.mxu0 %v10930_v15  ;;  %v12061_v4 = vld [vmem:[%s11223_s12 + $0x1e0] sm:$0xff]  }
 0x18a   : > { %v7223_v20 = vadd.f32 %v7192_v25, %v7191_v10  ;;  %v10407_v3 = vpop.f32.mrb[68].mxu0  ;;  %v1724_v22 = vpop.f32.mrb[68].mxu1  ;;  %10495 = vmatprep.subr.bf16.mxu0 %v10937_v44 }
 0x18b   : > { %v6990_v2 = vrot.slane %v6989_v52, 1  ;;  %v7124_v59 = vrot.slane %v7123_v57, 1  ;;  %v12055_v51 = vadd.f32 %v10407_v3, %v11734_v55  ;;  %v7161_v35 = vadd.f32 %v11658_v38, %v1724_v22  ;;  %v1312_v63 = vpop.f32.mrb[69].mxu0  ;;  %v12058_v43 = vpop.f32.mrb[69].mxu1 }
 0x18c   : > { %14671 = vst [vmem:[#allocation40_spill] sm:$0xff] %v12058_v43  ;;  %v12064_v15 = vadd.f32 %v1312_v63, %v11715_v21  ;;  %v10408_v19 = vpop.f32.mrb[70].mxu0  ;;  %v1728_v31 = vpop.f32.mrb[70].mxu1 }
 0x18d   : > { %v6991_v6 = vadd.f32 %v6990_v2, %v6989_v52  ;;  %v7125_v10 = vadd.f32 %v7124_v59, %v7123_v57  ;;  %v7193_v25 = vmax.f32 %v7161_v35, 0.0  ;;  %v12067_v56 = vadd.f32 %v10408_v19, %v11745_v5  ;;  %v1315_v55 = vpop.f32.mrb[71].mxu0  ;;  %v12069_v3 = vpop.f32.mrb[71].mxu1  ;;  %10496 = vmatpush3.bf16.msra.mxu0 %v10937_v44  ;;  %v12094_v19 = vld [vmem:[%s11223_s12 + $0x1e8] sm:$0xff]  }
 0x18e   : > { %v7162_v22 = vadd.f32 %v11658_v38, %v1728_v31  ;;  %v12073_v43 = vadd.f32 %v1315_v55, %v11726_v39  ;;  %4217 = vmatprep.subr.bf16.mxu0 %v10946_v54 }
 0x18f   : > { %v6992_v21 = vmul.f32 0.00390625, %v6991_v6  ;;  %v7126_v63 = vmul.f32 0.00390625, %v7125_v10  ;;  %v7224_v52 = vadd.f32 %v7223_v20, %v7193_v25  ;;  %2668 = vmatmul.mubr.bf16.gmra.mrb[176].mxu1 %v12061_v4  ;;  %2941 = vmatmul.mubr.bf16.gmra.mrb[176].mxu0 %v11878_v46  ;;  %v12088_v20 = vld [vmem:[%s14624_s2] ss:$0 sm:$0xff] }
 0x190   : > { %v7194_v5 = vmax.f32 %v7162_v22, 0.0  ;;  %2677 = vmatprep.mubr.bf16.mxu1 %v14651_v13  ;;  %2950 = vmatprep.mubr.bf16.mxu0 %v14651_v13 }
 0x191   : > { %v12080_v44 = vsel %vm7931_vm0, %v6992_v21, %v7126_v63 }
 0x192   : > { %v7225_v38 = vadd.f32 %v7224_v52, %v7194_v5  ;;  %v10411_v39 = vpop.f32.mrb[72].mxu0  ;;  %v1734_v57 = vpop.f32.mrb[72].mxu1 }
 0x193   : > { %v12083_v54 = vadd.f32 %v10411_v39, %v11772_v32  ;;  %v7163_v2 = vadd.f32 %v12088_v20, %v1734_v57  ;;  %v1328_v59 = vpop.f32.mrb[73].mxu0  ;;  %v12091_v35 = vpop.f32.mrb[73].mxu1 }
 0x194   : > { %v12097_v31 = vadd.f32 %v1328_v59, %v11753_v18  ;;  %v10412_v6 = vpop.f32.mrb[74].mxu0  ;;  %v1738_v10 = vpop.f32.mrb[74].mxu1 }
 0x195   : > { %v7195_v25 = vmax.f32 %v7163_v2, 0.0  ;;  %v12100_v32 = vadd.f32 %v10412_v6, %v11783_v12  ;;  %v7164_v55 = vadd.f32 %v12088_v20, %v1738_v10  ;;  %v1331_v22 = vpop.f32.mrb[75].mxu0  ;;  %v12103_v21 = vpop.f32.mrb[75].mxu1 }
 0x196   : > { %14672 = vst [vmem:[#allocation41_spill] sm:$0xff] %v12103_v21  ;;  %v12106_v63 = vadd.f32 %v1331_v22, %v11764_v40 }
 0x197   : > { %v7226_v52 = vadd.f32 %v7225_v38, %v7195_v25  ;;  %v7196_v5 = vmax.f32 %v7164_v55, 0.0  ;;  %2678 = vmatmul.mubr.bf16.gmra.mrb[180].mxu1 %v12094_v19  ;;  %2951 = vmatmul.mubr.bf16.gmra.mrb[180].mxu0 %v11897_v8  ;;  %v12119_v38 = vld [vmem:[%s11223_s12 + $0x1f0] sm:$0xff]  }
 0x198   : > { %2687 = vmatprep.mubr.bf16.mxu1 %v14651_v13  ;;  %2960 = vmatprep.mubr.bf16.mxu0 %v14651_v13 }
 0x199   : > { %v7227_v18 = vadd.f32 %v7226_v52, %v7196_v5 }
 0x19a   : > { %v10415_v12 = vpop.f32.mrb[76].mxu0  ;;  %v1744_v39 = vpop.f32.mrb[76].mxu1 }
 0x19b   : > { %v12113_v57 = vadd.f32 %v10415_v12, %v11823_v24  ;;  %v7165_v2 = vadd.f32 %v12088_v20, %v1744_v39  ;;  %v1344_v40 = vpop.f32.mrb[77].mxu0  ;;  %v12116_v59 = vpop.f32.mrb[77].mxu1 }
 0x19c   : > { %14673 = vst [vmem:[#allocation42_spill] sm:$0xff] %v12116_v59  ;;  %v12122_v6 = vadd.f32 %v1344_v40, %v11798_v41  ;;  %v10416_v10 = vpop.f32.mrb[78].mxu0  ;;  %v1748_v25 = vpop.f32.mrb[78].mxu1 }
 0x19d   : > { %v7197_v55 = vmax.f32 %v7165_v2, 0.0  ;;  %v12125_v22 = vadd.f32 %v10416_v10, %v11834_v49  ;;  %v7166_v52 = vadd.f32 %v12088_v20, %v1748_v25  ;;  %v1347_v24 = vpop.f32.mrb[79].mxu0  ;;  %v12128_v5 = vpop.f32.mrb[79].mxu1 }
 0x19e   : > { %14674 = vst [vmem:[#allocation43_spill] sm:$0xff] %v12128_v5  ;;  %v12131_v12 = vadd.f32 %v1347_v24, %v11809_v58 }
 0x19f   : > { %v7228_v39 = vadd.f32 %v7227_v18, %v7197_v55  ;;  %v7198_v59 = vmax.f32 %v7166_v52, 0.0  ;;  %2688 = vmatmul.mubr.bf16.gmra.mrb[184].mxu1 %v12119_v38  ;;  %2961 = vmatmul.mubr.bf16.gmra.mrb[184].mxu0 %v11916_v45  ;;  %v12144_v18 = vld [vmem:[%s11223_s12 + $0x1f8] sm:$0xff]  }
 0x1a0   : > { %2697 = vmatprep.mubr.bf16.mxu1 %v14651_v13  ;;  %2970 = vmatprep.mubr.bf16.mxu0 %v14651_v13 }
 0x1a1   : > { %v7229_v41 = vadd.f32 %v7228_v39, %v7198_v59 }
 0x1a2   : > { %v10419_v49 = vpop.f32.mrb[80].mxu0  ;;  %v1754_v2 = vpop.f32.mrb[80].mxu1 }
 0x1a3   : > { %v12138_v40 = vadd.f32 %v10419_v49, %v11873_v16  ;;  %v7167_v10 = vadd.f32 %v12088_v20, %v1754_v2  ;;  %v1360_v58 = vpop.f32.mrb[81].mxu0  ;;  %v12141_v25 = vpop.f32.mrb[81].mxu1 }
 0x1a4   : > { %14675 = vst [vmem:[#allocation44_spill] sm:$0xff] %v12141_v25  ;;  %v12147_v55 = vadd.f32 %v1360_v58, %v11848_v17  ;;  %v10420_v52 = vpop.f32.mrb[82].mxu0  ;;  %v1758_v24 = vpop.f32.mrb[82].mxu1 }
 0x1a5   : > { %v7199_v5 = vmax.f32 %v7167_v10, 0.0  ;;  %v12150_v59 = vadd.f32 %v10420_v52, %v11884_v36  ;;  %v7168_v39 = vadd.f32 %v12088_v20, %v1758_v24  ;;  %v1363_v16 = vpop.f32.mrb[83].mxu0  ;;  %v12153_v49 = vpop.f32.mrb[83].mxu1 }
 0x1a6   : > { %v12156_v2 = vadd.f32 %v1363_v16, %v11859_v34 }
 0x1a7   : > { %v7230_v25 = vadd.f32 %v7229_v41, %v7199_v5  ;;  %v7200_v21 = vmax.f32 %v7168_v39, 0.0  ;;  %2698 = vmatmul.mubr.bf16.gmra.mrb[188].mxu1 %v12144_v18  ;;  %2971 = vmatmul.mubr.bf16.gmra.mrb[188].mxu0 %v11935_v50 }
 0x1a8   : > { %2980 = vmatprep.mubr.bf16.mxu0 %v14651_v13  ;;  %10449 = vmatprep.mubr.bf16.mxu1 %v11777_v61  ;;  %v10913_v61 = vld [vmem:[%s14623_s1 + $0x8] ss:$24 sps:$4 sm:$0xff]  }
 0x1a9   : > { %v7231_v17 = vadd.f32 %v7230_v25, %v7200_v21 }
 0x1aa   : > { %v10423_v36 = vpop.f32.mrb[84].mxu0  ;;  %v1764_v10 = vpop.f32.mrb[84].mxu1 }
 0x1ab   : > { %v12163_v58 = vadd.f32 %v10423_v36, %v11911_v14  ;;  %v7169_v52 = vadd.f32 %v12088_v20, %v1764_v10  ;;  %v1376_v34 = vpop.f32.mrb[85].mxu0  ;;  %v12166_v24 = vpop.f32.mrb[85].mxu1 }
 0x1ac   : > { %14676 = vst [vmem:[#allocation45_spill] sm:$0xff] %v12166_v24  ;;  %v12169_v5 = vadd.f32 %v1376_v34, %v11892_v7  ;;  %v10424_v41 = vpop.f32.mrb[86].mxu0  ;;  %v1768_v39 = vpop.f32.mrb[86].mxu1  ;;  %v10919_v7 = vld [vmem:[%s14623_s1 + $0x3c] ss:$24 sps:$4 sm:$0xff]  }
 0x1ad   : > { %v7201_v21 = vmax.f32 %v7169_v52, 0.0  ;;  %v12175_v25 = vadd.f32 %v10424_v41, %v11922_v47  ;;  %v7170_v14 = vadd.f32 %v12088_v20, %v1768_v39  ;;  %v1379_v16 = vpop.f32.mrb[87].mxu0  ;;  %v12178_v36 = vpop.f32.mrb[87].mxu1  ;;  %v10917_v47 = vld [vmem:[%s14623_s1 + $0x38] ss:$24 sps:$4 sm:$0xff]  }
 0x1ae   : > { %14677 = vst [vmem:[#allocation46_spill] sm:$0xff] %v12178_v36  ;;  %v12184_v10 = vadd.f32 %v1379_v16, %v11903_v29  ;;  %v10922_v29 = vld [vmem:[%s14623_s1 + $0x6c] ss:$24 sps:$4 sm:$0xff]  }
 0x1af   : > { %v7232_v34 = vadd.f32 %v7231_v17, %v7201_v21  ;;  %v7202_v24 = vmax.f32 %v7170_v14, 0.0  ;;  %2981 = vmatmul.mubr.bf16.gmra.mrb[192].mxu0 %v11954_v53  ;;  %10450 = vmatmul.mubr.bf16.vlgmr.msra.gmra.mrb[192].mxu1 %v11803_v42 }
 0x1b0   : > { %3865 = vmatpush1.bf16.msra.mxu1 %v10913_v61  ;;  %2990 = vmatprep.mubr.bf16.mxu0 %v14651_v13 }
 0x1b1   : > { %v7233_v52 = vadd.f32 %v7232_v34, %v7202_v24  ;;  %10453 = vmatprep.mubr.bf16.mxu1 %v11828_v26  ;;  %3866 = vmatprep.subr.bf16.mxu1 %v10919_v7 }
 0x1b2   : > { %v10427_v17 = vpop.f32.mrb[88].mxu0  ;;  %v1774_v41 = vpop.f32.mrb[88].mxu1 }
 0x1b3   : > { %v12197_v39 = vadd.f32 %v10427_v17, %v11949_v33  ;;  %v7171_v42 = vadd.f32 %v12088_v20, %v1774_v41  ;;  %v1392_v61 = vpop.f32.mrb[89].mxu0  ;;  %v12200_v21 = vpop.f32.mrb[89].mxu1  ;;  %v10920_v17 = vld [vmem:[%s14623_s1 + $0x68] ss:$24 sps:$4 sm:$0xff]  }
 0x1b4   : > { %14678 = vst [vmem:[#allocation47_spill] sm:$0xff] %v12200_v21  ;;  %v12203_v14 = vadd.f32 %v1392_v61, %v11930_v48  ;;  %v10428_v24 = vpop.f32.mrb[90].mxu0  ;;  %v1778_v26 = vpop.f32.mrb[90].mxu1  ;;  %3867 = vmatpush1.bf16.msra.mxu1 %v10917_v47  ;;  %v10926_v47 = vld [vmem:[%s14623_s1 + $0x9c] ss:$24 sps:$4 sm:$0xff]  }
 0x1b5   : > { %v7203_v16 = vmax.f32 %v7171_v42, 0.0  ;;  %v12206_v7 = vadd.f32 %v10428_v24, %v11960_v23  ;;  %v7172_v34 = vadd.f32 %v12088_v20, %v1778_v26  ;;  %v1395_v36 = vpop.f32.mrb[91].mxu0  ;;  %v12209_v33 = vpop.f32.mrb[91].mxu1  ;;  %3868 = vmatprep.subr.bf16.mxu1 %v10922_v29 }
 0x1b6   : > { %14679 = vst [vmem:[#allocation48_spill] sm:$0xff] %v12209_v33  ;;  %v12215_v48 = vadd.f32 %v1395_v36, %v11941_v1  ;;  %v10924_v1 = vld [vmem:[%s14623_s1 + $0x98] ss:$24 sps:$4 sm:$0xff]  }
 0x1b7   : > { %v7234_v41 = vadd.f32 %v7233_v52, %v7203_v16  ;;  %v7204_v23 = vmax.f32 %v7172_v34, 0.0  ;;  %2991 = vmatmul.mubr.bf16.gmra.mrb[196].mxu0 %v11980_v28  ;;  %10454 = vmatmul.mubr.bf16.gmra.mrb[196].mxu1 %v11853_v27  ;;  %v10929_v52 = vld [vmem:[%s14623_s1 + $0xcc] ss:$24 sps:$4 sm:$0xff]  }
 0x1b8   : > { %3000 = vmatprep.mubr.bf16.mxu0 %v14651_v13  ;;  %10457 = vmatprep.mubr.bf16.mxu1 %v11878_v46 }
 0x1b9   : > { %v7235_v42 = vadd.f32 %v7234_v41, %v7204_v23  ;;  %3869 = vmatpush1.bf16.msra.mxu1 %v10920_v17 }
 0x1ba   : > { %v10431_v36 = vpop.f32.mrb[92].mxu0  ;;  %v1784_v29 = vpop.f32.mrb[92].mxu1  ;;  %3870 = vmatprep.subr.bf16.mxu1 %v10926_v47 }
 0x1bb   : > { %v12231_v61 = vadd.f32 %v10431_v36, %v12000_v11  ;;  %v7173_v27 = vadd.f32 %v12088_v20, %v1784_v29  ;;  %v1408_v24 = vpop.f32.mrb[93].mxu0  ;;  %v12234_v46 = vpop.f32.mrb[93].mxu1  ;;  %v10927_v11 = vld [vmem:[%s14623_s1 + $0xc8] ss:$24 sps:$4 sm:$0xff]  }
 0x1bc   : > { %14680 = vst [vmem:[#allocation49_spill] sm:$0xff] %v12234_v46  ;;  %v12237_v26 = vadd.f32 %v1408_v24, %v11975_v62  ;;  %v10432_v16 = vpop.f32.mrb[94].mxu0  ;;  %v1788_v34 = vpop.f32.mrb[94].mxu1  ;;  %v10933_v62 = vld [vmem:[%s14623_s1 + $0xfc] ss:$24 sps:$4 sm:$0xff]  }
 0x1bd   : > { %v7205_v17 = vmax.f32 %v7173_v27, 0.0  ;;  %v12240_v47 = vadd.f32 %v10432_v16, %v12011_v9  ;;  %v7174_v41 = vadd.f32 %v12088_v20, %v1788_v34  ;;  %v1411_v23 = vpop.f32.mrb[95].mxu0  ;;  %v12243_v33 = vpop.f32.mrb[95].mxu1  ;;  %3871 = vmatpush1.bf16.msra.mxu1 %v10924_v1  ;;  %v14682_v27 = vld [vmem:[#allocation34_spill] sm:$0xff] }
 0x1be   : > { %14681 = vst [vmem:[#allocation50_spill] sm:$0xff] %v12243_v33  ;;  %v12249_v36 = vadd.f32 %v1411_v23, %v11986_v30  ;;  %3872 = vmatprep.subr.bf16.mxu1 %v10929_v52  ;;  %v10931_v30 = vld [vmem:[%s14623_s1 + $0xf8] ss:$24 sps:$4 sm:$0xff]  }
 0x1bf   : > { %v7236_v9 = vadd.f32 %v7235_v42, %v7205_v17  ;;  %v7206_v29 = vmax.f32 %v7174_v41, 0.0  ;;  %3001 = vmatmul.mubr.bf16.gmra.mrb[200].mxu0 %v14682_v27  ;;  %10458 = vmatmul.mubr.bf16.gmra.mrb[200].mxu1 %v11897_v8  ;;  %v10936_v42 = vld [vmem:[%s14623_s1 + $0x12c] ss:$24 sps:$4 sm:$0xff]  }
 0x1c0   : > { %3010 = vmatprep.mubr.bf16.mxu0 %v14651_v13  ;;  %10461 = vmatprep.mubr.bf16.mxu1 %v11916_v45  ;;  %v14683_v8 = vld [vmem:[#allocation3_spill] sm:$0xff] }
 0x1c1   : > { %v7237_v1 = vadd.f32 %v7236_v9, %v7206_v29  ;;  %3873 = vmatpush1.bf16.msra.mxu1 %v10927_v11  ;;  %v14686_v29 = vld [vmem:[#allocation4_spill] sm:$0xff] }
 0x1c2   : > { %v1794_v52 = vpop.f32.mrb[96].mxu1  ;;  %v2067_v24 = vpop.f32.mrb[96].mxu0  ;;  %3874 = vmatprep.subr.bf16.mxu1 %v10933_v62 }
 0x1c3   : > { %v7175_v16 = vadd.f32 %v12088_v20, %v1794_v52  ;;  %v12266_v34 = vadd.f32 %v2067_v24, %v14683_v8  ;;  %v12268_v17 = vpop.f32.mrb[97].mxu1  ;;  %v2069_v45 = vpop.f32.mrb[97].mxu0  ;;  %v10934_v24 = vld [vmem:[%s14623_s1 + $0x128] ss:$24 sps:$4 sm:$0xff]  }
 0x1c4   : > { %14684 = vst [vmem:[#allocation34_spill] sm:$0xff] %v12268_v17  ;;  %v1798_v41 = vpop.f32.mrb[98].mxu1  ;;  %v2071_v23 = vpop.f32.mrb[98].mxu0  ;;  %v12271_v11 = vadd.f32 %v12033_v0, %v2069_v45  ;;  %v10940_v0 = vld [vmem:[%s14623_s1 + $0x15c] ss:$24 sps:$4 sm:$0xff]  }
 0x1c5   : > { %v7207_v9 = vmax.f32 %v7175_v16, 0.0  ;;  %v7176_v62 = vadd.f32 %v12088_v20, %v1798_v41  ;;  %v12275_v33 = vadd.f32 %v2071_v23, %v14686_v29  ;;  %v12277_v46 = vpop.f32.mrb[99].mxu1  ;;  %v2073_v52 = vpop.f32.mrb[99].mxu0  ;;  %3875 = vmatpush1.bf16.msra.mxu1 %v10931_v30 }
 0x1c6   : > { %14685 = vst [vmem:[#allocation3_spill] sm:$0xff] %v12271_v11  ;;  %14687 = vst [vmem:[#allocation4_spill] sm:$0xff] %v12277_v46  ;;  %3876 = vmatprep.subr.bf16.mxu1 %v10936_v42  ;;  %v12286_v16 = vadd.f32 %v12042_v60, %v2073_v52  ;;  %v10938_v42 = vld [vmem:[%s14623_s1 + $0x158] ss:$24 sps:$4 sm:$0xff]  }
 0x1c7   : > { %v7238_v8 = vadd.f32 %v7237_v1, %v7207_v9  ;;  %v7208_v45 = vmax.f32 %v7176_v62, 0.0  ;;  %3011 = vmatmul.mubr.bf16.gmra.mrb[204].mxu0 %v12029_v37  ;;  %10462 = vmatmul.mubr.bf16.gmra.mrb[204].mxu1 %v11935_v50  ;;  %v12298_v60 = vld [vmem:[%s14623_s1] ss:$24 sps:$4 sm:$0xff]   ;;  %v14689_v1 = vld [vmem:[#allocation5_spill] sm:$0xff] }
 0x1c8   : > { %14688 = vst [vmem:[#allocation51_spill] sm:$0xff] %v12286_v16  ;;  %3020 = vmatprep.mubr.bf16.mxu0 %v14651_v13  ;;  %10465 = vmatprep.mubr.bf16.mxu1 %v11954_v53  ;;  %v14693_v16 = vld [vmem:[#allocation6_spill] sm:$0xff] }
 0x1c9   : > { %v7239_v30 = vadd.f32 %v7238_v8, %v7208_v45  ;;  %3877 = vmatpush1.bf16.msra.mxu1 %v10934_v24  ;;  %v14691_v24 = vld [vmem:[#allocation36_spill] sm:$0xff] }
 0x1ca   : > { %v1804_v41 = vpop.f32.mrb[100].mxu1  ;;  %v2077_v23 = vpop.f32.mrb[100].mxu0  ;;  %3878 = vmatprep.subr.bf16.mxu1 %v10940_v0 }
 0x1cb   : > { %v7177_v50 = vadd.f32 %v12088_v20, %v1804_v41  ;;  %v12302_v9 = vadd.f32 %v2077_v23, %v14689_v1  ;;  %v12304_v53 = vpop.f32.mrb[101].mxu1  ;;  %v2079_v62 = vpop.f32.mrb[101].mxu0  ;;  %v14695_v23 = vld [vmem:[#allocation38_spill] sm:$0xff] }
 0x1cc   : > { %14690 = vst [vmem:[#allocation5_spill] sm:$0xff] %v12304_v53  ;;  %v1808_v29 = vpop.f32.mrb[102].mxu1  ;;  %v2081_v52 = vpop.f32.mrb[102].mxu0  ;;  %v12307_v8 = vadd.f32 %v14691_v24, %v2079_v62 }
 0x1cd   : > { %v7209_v45 = vmax.f32 %v7177_v50, 0.0  ;;  %v7178_v0 = vadd.f32 %v12088_v20, %v1808_v29  ;;  %v12311_v46 = vadd.f32 %v2081_v52, %v14693_v16  ;;  %v12313_v11 = vpop.f32.mrb[103].mxu1  ;;  %v2083_v41 = vpop.f32.mrb[103].mxu0  ;;  %3879 = vmatpush1.bf16.msra.mxu1 %v10938_v42  ;;  %v14697_v29 = vld [vmem:[#allocation7_spill] sm:$0xff] }
 0x1ce   : > { %14692 = vst [vmem:[#allocation36_spill] sm:$0xff] %v12307_v8  ;;  %14694 = vst [vmem:[#allocation6_spill] sm:$0xff] %v12313_v11  ;;  %10529 = vmatprep.subr.bf16.mxu1 %v12298_v60  ;;  %v12317_v1 = vadd.f32 %v14695_v23, %v2083_v41  ;;  %v14734_v8 = vld [vmem:[#allocation18_spill] sm:$0xff] }
 0x1cf   : > { %v7240_v53 = vadd.f32 %v7239_v30, %v7209_v45  ;;  %v7210_v17 = vmax.f32 %v7178_v0, 0.0  ;;  %3021 = vmatmul.mubr.bf16.gmra.mrb[208].mxu0 %v12061_v4  ;;  %10466 = vmatmul.mubr.bf16.gmra.mrb[208].mxu1 %v11980_v28 }
 0x1d0   : > { %14696 = vst [vmem:[#allocation38_spill] sm:$0xff] %v12317_v1  ;;  %3030 = vmatprep.mubr.bf16.mxu0 %v14651_v13  ;;  %10469 = vmatprep.mubr.bf16.mxu1 %v14682_v27  ;;  %v14700_v27 = vld [vmem:[#allocation8_spill] sm:$0xff] }
 0x1d1   : > { %v7241_v16 = vadd.f32 %v7240_v53, %v7210_v17 }
 0x1d2   : > { %v1814_v50 = vpop.f32.mrb[104].mxu1  ;;  %v2087_v62 = vpop.f32.mrb[104].mxu0 }
 0x1d3   : > { %v7179_v42 = vadd.f32 %v12088_v20, %v1814_v50  ;;  %v12325_v52 = vadd.f32 %v2087_v62, %v14697_v29  ;;  %v12327_v24 = vpop.f32.mrb[105].mxu1  ;;  %v2089_v30 = vpop.f32.mrb[105].mxu0 }
 0x1d4   : > { %14698 = vst [vmem:[#allocation7_spill] sm:$0xff] %v12327_v24  ;;  %v1818_v45 = vpop.f32.mrb[106].mxu1  ;;  %v2091_v0 = vpop.f32.mrb[106].mxu0  ;;  %v12330_v41 = vadd.f32 %v12064_v15, %v2089_v30 }
 0x1d5   : > { %v7211_v28 = vmax.f32 %v7179_v42, 0.0  ;;  %v7180_v23 = vadd.f32 %v12088_v20, %v1818_v45  ;;  %v12334_v17 = vadd.f32 %v2091_v0, %v14700_v27  ;;  %v12336_v53 = vpop.f32.mrb[107].mxu1  ;;  %v2093_v50 = vpop.f32.mrb[107].mxu0  ;;  %v14703_v0 = vld [vmem:[#allocation9_spill] sm:$0xff] }
 0x1d6   : > { %14699 = vst [vmem:[#allocation52_spill] sm:$0xff] %v12330_v41  ;;  %14701 = vst [vmem:[#allocation8_spill] sm:$0xff] %v12336_v53  ;;  %v12339_v62 = vadd.f32 %v12073_v43, %v2093_v50  ;;  %v14726_v41 = vld [vmem:[#allocation16_spill] sm:$0xff] }
 0x1d7   : > { %v7242_v29 = vadd.f32 %v7241_v16, %v7211_v28  ;;  %v7212_v24 = vmax.f32 %v7180_v23, 0.0  ;;  %3031 = vmatmul.mubr.bf16.gmra.mrb[212].mxu0 %v12094_v19  ;;  %10470 = vmatmul.mubr.bf16.gmra.mrb[212].mxu1 %v12029_v37 }
 0x1d8   : > { %14702 = vst [vmem:[#allocation53_spill] sm:$0xff] %v12339_v62  ;;  %3040 = vmatprep.mubr.bf16.mxu0 %v14651_v13  ;;  %10473 = vmatprep.mubr.bf16.mxu1 %v12061_v4  ;;  %v14706_v4 = vld [vmem:[#allocation10_spill] sm:$0xff] }
 0x1d9   : > { %v7243_v15 = vadd.f32 %v7242_v29, %v7212_v24 }
 0x1da   : > { %v1824_v42 = vpop.f32.mrb[108].mxu1  ;;  %v2097_v30 = vpop.f32.mrb[108].mxu0 }
 0x1db   : > { %v7181_v45 = vadd.f32 %v12088_v20, %v1824_v42  ;;  %v12347_v27 = vadd.f32 %v2097_v30, %v14703_v0  ;;  %v12349_v43 = vpop.f32.mrb[109].mxu1  ;;  %v2099_v16 = vpop.f32.mrb[109].mxu0 }
 0x1dc   : > { %14704 = vst [vmem:[#allocation9_spill] sm:$0xff] %v12349_v43  ;;  %v1828_v28 = vpop.f32.mrb[110].mxu1  ;;  %v2101_v23 = vpop.f32.mrb[110].mxu0  ;;  %v12352_v50 = vadd.f32 %v12055_v51, %v2099_v16 }
 0x1dd   : > { %v7213_v37 = vmax.f32 %v7181_v45, 0.0  ;;  %v7182_v53 = vadd.f32 %v12088_v20, %v1828_v28  ;;  %v12356_v24 = vadd.f32 %v2101_v23, %v14706_v4  ;;  %v12358_v29 = vpop.f32.mrb[111].mxu1  ;;  %v2103_v42 = vpop.f32.mrb[111].mxu0  ;;  %v14709_v23 = vld [vmem:[#allocation11_spill] sm:$0xff] }
 0x1de   : > { %14705 = vst [vmem:[#allocation54_spill] sm:$0xff] %v12352_v50  ;;  %14707 = vst [vmem:[#allocation10_spill] sm:$0xff] %v12358_v29  ;;  %v12361_v30 = vadd.f32 %v12067_v56, %v2103_v42  ;;  %v12374_v42 = vld [vmem:[%s11223_s12 + $0x200] sm:$0xff]   ;;  %v10955_v50 = vld [vmem:[%s14623_s1 + $0x70] ss:$24 sps:$4 sm:$0xff]  }
 0x1df   : > { %v7244_v0 = vadd.f32 %v7243_v15, %v7213_v37  ;;  %v7214_v43 = vmax.f32 %v7182_v53, 0.0  ;;  %3041 = vmatmul.mubr.bf16.gmra.mrb[216].mxu0 %v12119_v38  ;;  %10474 = vmatmul.mubr.bf16.gmra.mrb[216].mxu1 %v12094_v19 }
 0x1e0   : > { %14708 = vst [vmem:[#allocation55_spill] sm:$0xff] %v12361_v30  ;;  %3050 = vmatprep.mubr.bf16.mxu0 %v14651_v13  ;;  %10477 = vmatprep.mubr.bf16.mxu1 %v12119_v38  ;;  %v12449_v30 = vld [vmem:[%s11223_s12 + $0x220] sm:$0xff]  }
 0x1e1   : > { %v7245_v51 = vadd.f32 %v7244_v0, %v7214_v43  ;;  %v14712_v43 = vld [vmem:[#allocation12_spill] sm:$0xff] }
 0x1e2   : > { %v1834_v45 = vpop.f32.mrb[112].mxu1  ;;  %v2107_v16 = vpop.f32.mrb[112].mxu0 }
 0x1e3   : > { %v7183_v28 = vadd.f32 %v12088_v20, %v1834_v45  ;;  %v12369_v4 = vadd.f32 %v2107_v16, %v14709_v23  ;;  %v12371_v56 = vpop.f32.mrb[113].mxu1  ;;  %v2109_v15 = vpop.f32.mrb[113].mxu0 }
 0x1e4   : > { %14710 = vst [vmem:[#allocation11_spill] sm:$0xff] %v12371_v56  ;;  %v1838_v53 = vpop.f32.mrb[114].mxu1  ;;  %v2111_v37 = vpop.f32.mrb[114].mxu0  ;;  %v12377_v19 = vadd.f32 %v12097_v31, %v2109_v15 }
 0x1e5   : > { %v7215_v29 = vmax.f32 %v7183_v28, 0.0  ;;  %v7184_v38 = vadd.f32 %v12088_v20, %v1838_v53  ;;  %v12381_v0 = vadd.f32 %v2111_v37, %v14712_v43  ;;  %v12383_v45 = vpop.f32.mrb[115].mxu1  ;;  %v2113_v16 = vpop.f32.mrb[115].mxu0  ;;  %v14715_v37 = vld [vmem:[#allocation13_spill] sm:$0xff] }
 0x1e6   : > { %14711 = vst [vmem:[#allocation56_spill] sm:$0xff] %v12377_v19  ;;  %14713 = vst [vmem:[#allocation12_spill] sm:$0xff] %v12383_v45  ;;  %v12386_v23 = vadd.f32 %v12106_v63, %v2113_v16  ;;  %v10944_v16 = vld [vmem:[%s14623_s1 + $0x10] ss:$24 sps:$4 sm:$0xff]   ;;  %v14718_v45 = vld [vmem:[#allocation14_spill] sm:$0xff] }
 0x1e7   : > { %v7246_v56 = vadd.f32 %v7245_v51, %v7215_v29  ;;  %v7216_v62 = vmax.f32 %v7184_v38, 0.0  ;;  %3051 = vmatmul.mubr.bf16.gmra.mrb[220].mxu0 %v12144_v18  ;;  %10478 = vmatmul.mubr.bf16.gmra.mrb[220].mxu1 %v12144_v18  ;;  %v12399_v51 = vld [vmem:[%s11223_s12 + $0x208] sm:$0xff]   ;;  %v10951_v19 = vld [vmem:[%s14623_s1 + $0x44] ss:$24 sps:$4 sm:$0xff]  }
 0x1e8   : > { %14714 = vst [vmem:[#allocation57_spill] sm:$0xff] %v12386_v23  ;;  %10497 = vmatprep.mubr.bf16.mxu0 %v12374_v42  ;;  %3896 = vmatprep.mubr.bf16.mxu1 %v14651_v13  ;;  %v12414_v23 = vld [vmem:[%s11223_s12 + $0x210] sm:$0xff]  }
 0x1e9   : > { %v7247_v31 = vadd.f32 %v7246_v56, %v7216_v62 }
 0x1ea   : > { %v1844_v28 = vpop.f32.mrb[116].mxu1  ;;  %v2117_v15 = vpop.f32.mrb[116].mxu0 }
 0x1eb   : > { %v7185_v53 = vadd.f32 %v12088_v20, %v1844_v28  ;;  %v12394_v43 = vadd.f32 %v2117_v15, %v14715_v37  ;;  %v12396_v63 = vpop.f32.mrb[117].mxu1  ;;  %v2119_v29 = vpop.f32.mrb[117].mxu0 }
 0x1ec   : > { %14716 = vst [vmem:[#allocation13_spill] sm:$0xff] %v12396_v63  ;;  %v1848_v38 = vpop.f32.mrb[118].mxu1  ;;  %v2121_v18 = vpop.f32.mrb[118].mxu0  ;;  %v12405_v62 = vadd.f32 %v12083_v54, %v2119_v29  ;;  %v10954_v54 = vld [vmem:[%s14623_s1 + $0x30] ss:$24 sps:$4 sm:$0xff]  }
 0x1ed   : > { %v7217_v56 = vmax.f32 %v7185_v53, 0.0  ;;  %v7186_v28 = vadd.f32 %v12088_v20, %v1848_v38  ;;  %v12409_v15 = vadd.f32 %v2121_v18, %v14718_v45  ;;  %v12411_v37 = vpop.f32.mrb[119].mxu1  ;;  %v2123_v63 = vpop.f32.mrb[119].mxu0  ;;  %v10949_v45 = vld [vmem:[%s14623_s1 + $0x40] ss:$24 sps:$4 sm:$0xff]  }
 0x1ee   : > { %14717 = vst [vmem:[#allocation58_spill] sm:$0xff] %v12405_v62  ;;  %14720 = vst [vmem:[#allocation59_spill] sm:$0xff] %v12411_v37  ;;  %v12423_v53 = vadd.f32 %v12100_v32, %v2123_v63  ;;  %v10957_v32 = vld [vmem:[%s14623_s1 + $0x74] ss:$24 sps:$4 sm:$0xff]   ;;  %v12446_v37 = vld [vmem:[%s11223_s12 + $0x218] sm:$0xff]  }
 0x1ef   : > { %14719 = vst [vmem:[#allocation14_spill] sm:$0xff] %v12409_v15  ;;  %v7248_v29 = vadd.f32 %v7247_v31, %v7217_v56  ;;  %v7218_v38 = vmax.f32 %v7186_v28, 0.0  ;;  %10498 = vmatmul.mubr.bf16.vlgmr.msra.gmra.mrb[224].mxu0 %v12399_v51  ;;  %3897 = vmatmul.mubr.bf16.vlgmr.msra.gmra.mrb[224].mxu1 %v12374_v42  ;;  %v14722_v56 = vld [vmem:[#allocation15_spill] sm:$0xff] }
 0x1f0   : > { %14721 = vst [vmem:[#allocation60_spill] sm:$0xff] %v12423_v53  ;;  %10530 = vmatpush3.bf16.msra.mxu1 %v12298_v60  ;;  %4218 = vmatpush1.bf16.msra.mxu0 %v10944_v16  ;;  %v10965_v60 = vld [vmem:[%s14623_s1 + $0x60] ss:$24 sps:$4 sm:$0xff]  }
 0x1f1   : > { %v7249_v18 = vadd.f32 %v7248_v29, %v7218_v38  ;;  %10501 = vmatprep.mubr.bf16.mxu0 %v12414_v23  ;;  %3906 = vmatprep.mubr.bf16.mxu1 %v14651_v13 }
 0x1f2   : > { %v1854_v31 = vpop.f32.mrb[120].mxu1  ;;  %v2127_v63 = vpop.f32.mrb[120].mxu0  ;;  %4219 = vmatprep.subr.bf16.mxu0 %v10951_v19  ;;  %10531 = vmatprep.subr.bf16.mxu1 %v10954_v54 }
 0x1f3   : > { %v7187_v16 = vadd.f32 %v12088_v20, %v1854_v31  ;;  %v12441_v28 = vadd.f32 %v2127_v63, %v14722_v56  ;;  %v12443_v29 = vpop.f32.mrb[121].mxu1  ;;  %v2129_v38 = vpop.f32.mrb[121].mxu0 }
 0x1f4   : > { %14724 = vst [vmem:[#allocation61_spill] sm:$0xff] %v12443_v29  ;;  %v1858_v53 = vpop.f32.mrb[122].mxu1  ;;  %v2131_v62 = vpop.f32.mrb[122].mxu0  ;;  %4220 = vmatpush1.bf16.msra.mxu0 %v10949_v45  ;;  %10532 = vmatpush3.bf16.msra.mxu1 %v10954_v54  ;;  %v12452_v11 = vadd.f32 %v12122_v6, %v2129_v38  ;;  %v10962_v6 = vld [vmem:[%s14623_s1 + $0xa4] ss:$24 sps:$4 sm:$0xff]   ;;  %v14730_v38 = vld [vmem:[#allocation17_spill] sm:$0xff] }
 0x1f5   : > { %14723 = vst [vmem:[#allocation15_spill] sm:$0xff] %v12441_v28  ;;  %v7219_v19 = vmax.f32 %v7187_v16, 0.0  ;;  %v7188_v31 = vadd.f32 %v12088_v20, %v1858_v53  ;;  %v12456_v63 = vadd.f32 %v2131_v62, %v14726_v41  ;;  %v12458_v56 = vpop.f32.mrb[123].mxu1  ;;  %v2133_v29 = vpop.f32.mrb[123].mxu0  ;;  %4221 = vmatprep.subr.bf16.mxu0 %v10957_v32  ;;  %10533 = vmatprep.subr.bf16.mxu1 %v10965_v60  ;;  %v10976_v54 = vld [vmem:[%s14623_s1 + $0x90] ss:$24 sps:$4 sm:$0xff]  }
 0x1f6   : > { %14725 = vst [vmem:[#allocation62_spill] sm:$0xff] %v12452_v11  ;;  %14728 = vst [vmem:[#allocation63_spill] sm:$0xff] %v12458_v56  ;;  %v12470_v41 = vadd.f32 %v12131_v12, %v2133_v29  ;;  %v10960_v32 = vld [vmem:[%s14623_s1 + $0xa0] ss:$24 sps:$4 sm:$0xff]   ;;  %v10968_v16 = vld [vmem:[%s14623_s1 + $0xd4] ss:$24 sps:$4 sm:$0xff]  }
 0x1f7   : > { %14727 = vst [vmem:[#allocation16_spill] sm:$0xff] %v12456_v63  ;;  %v7250_v62 = vadd.f32 %v7249_v18, %v7219_v19  ;;  %v7220_v53 = vmax.f32 %v7188_v31, 0.0  ;;  %10502 = vmatmul.mubr.bf16.gmra.mrb[228].mxu0 %v12446_v37  ;;  %3907 = vmatmul.mubr.bf16.gmra.mrb[228].mxu1 %v12399_v51  ;;  %v10985_v29 = vld [vmem:[%s14623_s1 + $0xc0] ss:$24 sps:$4 sm:$0xff]   ;;  %v12495_v56 = vld [vmem:[%s11223_s12 + $0x230] sm:$0xff]  }
 0x1f8   : > { %14729 = vst [vmem:[#allocation64_spill] sm:$0xff] %v12470_v41  ;;  %10505 = vmatprep.mubr.bf16.mxu0 %v12449_v30  ;;  %3916 = vmatprep.mubr.bf16.mxu1 %v14651_v13 }
 0x1f9   : > { %v7251_v45 = vadd.f32 %v7250_v62, %v7220_v53  ;;  %4222 = vmatpush1.bf16.msra.mxu0 %v10955_v50  ;;  %10534 = vmatpush3.bf16.msra.mxu1 %v10965_v60  ;;  %v12492_v62 = vld [vmem:[%s11223_s12 + $0x228] sm:$0xff]  }
 0x1fa   : > { %v1864_v12 = vpop.f32.mrb[124].mxu1  ;;  %v2137_v18 = vpop.f32.mrb[124].mxu0  ;;  %4223 = vmatprep.subr.bf16.mxu0 %v10962_v6  ;;  %10535 = vmatprep.subr.bf16.mxu1 %v10976_v54 }
 0x1fb   : > { %v7189_v50 = vadd.f32 %v12088_v20, %v1864_v12  ;;  %v12487_v19 = vadd.f32 %v2137_v18, %v14730_v38  ;;  %v12489_v31 = vpop.f32.mrb[125].mxu1  ;;  %v2139_v60 = vpop.f32.mrb[125].mxu0 }
 0x1fc   : > { %14732 = vst [vmem:[#allocation65_spill] sm:$0xff] %v12489_v31  ;;  %v1868_v6 = vpop.f32.mrb[126].mxu1  ;;  %v2141_v53 = vpop.f32.mrb[126].mxu0  ;;  %v12498_v41 = vadd.f32 %v12113_v57, %v2139_v60  ;;  %v10966_v31 = vld [vmem:[%s14623_s1 + $0xd0] ss:$24 sps:$4 sm:$0xff]  }
 0x1fd   : > { %14731 = vst [vmem:[#allocation17_spill] sm:$0xff] %v12487_v19  ;;  %v7221_v11 = vmax.f32 %v7189_v50, 0.0  ;;  %v7190_v1 = vadd.f32 %v12088_v20, %v1868_v6  ;;  %v12502_v12 = vadd.f32 %v2141_v53, %v14734_v8  ;;  %v12504_v18 = vpop.f32.mrb[127].mxu1  ;;  %v2143_v38 = vpop.f32.mrb[127].mxu0  ;;  %4224 = vmatpush1.bf16.msra.mxu0 %v10960_v32  ;;  %10536 = vmatpush3.bf16.msra.mxu1 %v10976_v54  ;;  %v10973_v57 = vld [vmem:[%s14623_s1 + $0x104] ss:$24 sps:$4 sm:$0xff]  }
 0x1fe   : > { %14733 = vst [vmem:[#allocation66_spill] sm:$0xff] %v12498_v41  ;;  %14736 = vst [vmem:[#allocation67_spill] sm:$0xff] %v12504_v18  ;;  %4225 = vmatprep.subr.bf16.mxu0 %v10968_v16  ;;  %10537 = vmatprep.subr.bf16.mxu1 %v10985_v29  ;;  %v10989_v8 = vld [vmem:[%s14623_s1 + $0xf0] ss:$24 sps:$4 sm:$0xff]   ;;  %v12516_v50 = vadd.f32 %v12125_v22, %v2143_v38  ;;  %v10971_v16 = vld [vmem:[%s14623_s1 + $0x100] ss:$24 sps:$4 sm:$0xff]  }
 0x1ff   : > { %14735 = vst [vmem:[#allocation18_spill] sm:$0xff] %v12502_v12  ;;  %v7252_v60 = vadd.f32 %v7251_v45, %v7221_v11  ;;  %v7222_v32 = vmax.f32 %v7190_v1, 0.0  ;;  %10506 = vmatmul.mubr.bf16.gmra.mrb[232].mxu0 %v12492_v62  ;;  %3917 = vmatmul.mubr.bf16.gmra.mrb[232].mxu1 %v12414_v23  ;;  %v10979_v1 = vld [vmem:[%s14623_s1 + $0x134] ss:$24 sps:$4 sm:$0xff]   ;;  %v10993_v45 = vld [vmem:[%s14623_s1 + $0x120] ss:$24 sps:$4 sm:$0xff]  }
 0x200   : > { %14737 = vst [vmem:[#allocation68_spill] sm:$0xff] %v12516_v50  ;;  %10509 = vmatprep.mubr.bf16.mxu0 %v12495_v56  ;;  %3926 = vmatprep.mubr.bf16.mxu1 %v14651_v13  ;;  %v12541_v50 = vld [vmem:[%s11223_s12 + $0x240] sm:$0xff]  }
 0x201   : > { %v7253_v54 = vadd.f32 %v7252_v60, %v7222_v32  ;;  %4226 = vmatpush1.bf16.msra.mxu0 %v10966_v31  ;;  %10538 = vmatpush3.bf16.msra.mxu1 %v10985_v29  ;;  %v12535_v60 = vld [vmem:[%s11223_s12 + $0x238] sm:$0xff]   ;;  %v14739_v29 = vld [vmem:[#allocation19_spill] sm:$0xff] }
 0x202   : > { %v2147_v22 = vpop.f32.mrb[128].mxu0  ;;  %v2549_v11 = vpop.f32.mrb[128].mxu1  ;;  %4227 = vmatprep.subr.bf16.mxu0 %v10973_v57  ;;  %10539 = vmatprep.subr.bf16.mxu1 %v10989_v8 }
 0x203   : > { %v7254_v6 = vrot.slane %v7253_v54, 4  ;;  %v7293_v31 = vadd.f32 %v12088_v20, %v2549_v11  ;;  %v2149_v53 = vpop.f32.mrb[129].mxu0  ;;  %v12532_v38 = vpop.f32.mrb[129].mxu1  ;;  %v12538_v32 = vadd.f32 %v2147_v22, %v14739_v29  ;;  %v14743_v22 = vld [vmem:[#allocation20_spill] sm:$0xff] }
 0x204   : > { %14738 = vst [vmem:[#allocation69_spill] sm:$0xff] %v12532_v38  ;;  %v2151_v57 = vpop.f32.mrb[130].mxu0  ;;  %v2553_v18 = vpop.f32.mrb[130].mxu1  ;;  %v12544_v41 = vadd.f32 %v12147_v55, %v2149_v53  ;;  %v10977_v38 = vld [vmem:[%s14623_s1 + $0x130] ss:$24 sps:$4 sm:$0xff]  }
 0x205   : > { %14740 = vst [vmem:[#allocation19_spill] sm:$0xff] %v12538_v32  ;;  %v7255_v12 = vadd.f32 %v7254_v6, %v7253_v54  ;;  %v7294_v19 = vadd.f32 %v12088_v20, %v2553_v18  ;;  %v2153_v63 = vpop.f32.mrb[131].mxu0  ;;  %v12547_v11 = vpop.f32.mrb[131].mxu1  ;;  %4228 = vmatpush1.bf16.msra.mxu0 %v10971_v16  ;;  %10540 = vmatpush3.bf16.msra.mxu1 %v10989_v8  ;;  %v10984_v55 = vld [vmem:[%s14623_s1 + $0x164] ss:$24 sps:$4 sm:$0xff]   ;;  %v7325_v6 = vmax.f32 %v7293_v31, 0.0 }
 0x206   : > { %14741 = vst [vmem:[#allocation70_spill] sm:$0xff] %v12544_v41  ;;  %14742 = vst [vmem:[#allocation71_spill] sm:$0xff] %v12547_v11  ;;  %v12553_v29 = vadd.f32 %v2151_v57, %v14743_v22  ;;  %4229 = vmatprep.subr.bf16.mxu0 %v10979_v1  ;;  %10541 = vmatprep.subr.bf16.mxu1 %v10993_v45  ;;  %v10997_v18 = vld [vmem:[%s14623_s1 + $0x150] ss:$24 sps:$4 sm:$0xff]   ;;  %v12562_v54 = vadd.f32 %v12156_v2, %v2153_v63  ;;  %v10982_v2 = vld [vmem:[%s14623_s1 + $0x160] ss:$24 sps:$4 sm:$0xff]  }
 0x207   : > { %v7256_v16 = vrot.slane %v7255_v12, 2  ;;  %v7326_v53 = vmax.f32 %v7294_v19, 0.0  ;;  %10510 = vmatmul.mubr.bf16.gmra.mrb[236].mxu0 %v12535_v60  ;;  %3927 = vmatmul.mubr.bf16.gmra.mrb[236].mxu1 %v12446_v37  ;;  %v10988_v31 = vld [vmem:[%s14623_s1 + $0x10] ss:$24 sps:$4 sm:$0xff]  }
 0x208   : > { %14744 = vst [vmem:[#allocation20_spill] sm:$0xff] %v12553_v29  ;;  %14745 = vst [vmem:[#allocation72_spill] sm:$0xff] %v12562_v54  ;;  %10513 = vmatprep.mubr.bf16.mxu0 %v12541_v50  ;;  %3936 = vmatprep.mubr.bf16.mxu1 %v14651_v13  ;;  %v12589_v54 = vld [vmem:[%s11223_s12 + $0x250] sm:$0xff]  }
 0x209   : > { %v7257_v8 = vadd.f32 %v7256_v16, %v7255_v12  ;;  %v7357_v1 = vadd.f32 %v7326_v53, %v7325_v6  ;;  %4230 = vmatpush1.bf16.msra.mxu0 %v10977_v38  ;;  %10542 = vmatpush3.bf16.msra.mxu1 %v10993_v45  ;;  %v12577_v12 = vld [vmem:[%s14623_s1 + $0x14] ss:$24 sps:$4 sm:$0xff]  }
 0x20a   : > { %v2157_v63 = vpop.f32.mrb[132].mxu0  ;;  %v2559_v19 = vpop.f32.mrb[132].mxu1  ;;  %4231 = vmatprep.subr.bf16.mxu0 %v10984_v55  ;;  %10543 = vmatprep.subr.bf16.mxu1 %v10997_v18  ;;  %v12583_v45 = vld [vmem:[%s11223_s12 + $0x248] sm:$0xff]   ;;  %v14747_v6 = vld [vmem:[#allocation21_spill] sm:$0xff] }
 0x20b   : > { %v7258_v38 = vrot.slane %v7257_v8, 1  ;;  %v7295_v57 = vadd.f32 %v12088_v20, %v2559_v19  ;;  %v2159_v22 = vpop.f32.mrb[133].mxu0  ;;  %v12580_v16 = vpop.f32.mrb[133].mxu1  ;;  %v12586_v55 = vadd.f32 %v2157_v63, %v14747_v6  ;;  %v12622_v6 = vld [vmem:[%s11223_s12 + $0x260] sm:$0xff]  }
 0x20c   : > { %14746 = vst [vmem:[#allocation73_spill] sm:$0xff] %v12580_v16  ;;  %v2161_v53 = vpop.f32.mrb[134].mxu0  ;;  %v2563_v11 = vpop.f32.mrb[134].mxu1  ;;  %v12592_v41 = vadd.f32 %v12138_v40, %v2159_v22  ;;  %v14749_v16 = vld [vmem:[#allocation22_spill] sm:$0xff] }
 0x20d   : > { %v7259_v29 = vadd.f32 %v7258_v38, %v7257_v8  ;;  %v7327_v32 = vmax.f32 %v7295_v57, 0.0  ;;  %v7296_v28 = vadd.f32 %v12088_v20, %v2563_v11  ;;  %v2163_v19 = vpop.f32.mrb[135].mxu0  ;;  %v12595_v21 = vpop.f32.mrb[135].mxu1  ;;  %4232 = vmatpush1.bf16.msra.mxu0 %v10982_v2  ;;  %10544 = vmatpush3.bf16.msra.mxu1 %v10997_v18  ;;  %v12598_v15 = vadd.f32 %v2161_v53, %v14749_v16 }
 0x20e   : > { %14748 = vst [vmem:[#allocation21_spill] sm:$0xff] %v12595_v21  ;;  %4956 = vmatprep.subr.bf16.mxu0 %v10988_v31  ;;  %10577 = vmatprep.subr.bf16.mxu1 %v12577_v12  ;;  %v12602_v40 = vadd.f32 %v12150_v59, %v2163_v19  ;;  %v14752_v31 = vld [vmem:[#allocation23_spill] sm:$0xff] }
 0x20f   : > { %v7260_v8 = vmul.f32 0.00390625, %v7259_v29  ;;  %v7358_v63 = vadd.f32 %v7357_v1, %v7327_v32  ;;  %v7328_v38 = vmax.f32 %v7296_v28, 0.0  ;;  %10514 = vmatmul.mubr.bf16.gmra.mrb[240].mxu0 %v12583_v45  ;;  %3937 = vmatmul.mubr.bf16.gmra.mrb[240].mxu1 %v12449_v30  ;;  %v12616_v1 = vld [vmem:[%s11223_s12 + $0x258] sm:$0xff]  }
 0x210   : > { %14750 = vst [vmem:[#allocation22_spill] sm:$0xff] %v12602_v40  ;;  %10517 = vmatprep.mubr.bf16.mxu0 %v12589_v54  ;;  %3946 = vmatprep.mubr.bf16.mxu1 %v14651_v13 }
 0x211   : > { %v12610_v11 = vsel %vm7933_vm1, %v12080_v44, %v7260_v8  ;;  %v7359_v18 = vadd.f32 %v7358_v63, %v7328_v38  ;;  %v14755_v38 = vld [vmem:[#allocation24_spill] sm:$0xff] }
 0x212   : > { %v2167_v2 = vpop.f32.mrb[136].mxu0  ;;  %v2569_v59 = vpop.f32.mrb[136].mxu1 }
 0x213   : > { %v7297_v29 = vadd.f32 %v12088_v20, %v2569_v59  ;;  %v2169_v32 = vpop.f32.mrb[137].mxu0  ;;  %v12613_v28 = vpop.f32.mrb[137].mxu1  ;;  %v12619_v57 = vadd.f32 %v2167_v2, %v14752_v31 }
 0x214   : > { %14751 = vst [vmem:[#allocation74_spill] sm:$0xff] %v12613_v28  ;;  %v2171_v22 = vpop.f32.mrb[138].mxu0  ;;  %v2573_v16 = vpop.f32.mrb[138].mxu1  ;;  %v12625_v44 = vadd.f32 %v12169_v5, %v2169_v32 }
 0x215   : > { %v7329_v53 = vmax.f32 %v7297_v29, 0.0  ;;  %v7298_v19 = vadd.f32 %v12088_v20, %v2573_v16  ;;  %v2173_v8 = vpop.f32.mrb[139].mxu0  ;;  %v12628_v63 = vpop.f32.mrb[139].mxu1  ;;  %v12631_v59 = vadd.f32 %v2171_v22, %v14755_v38 }
 0x216   : > { %14753 = vst [vmem:[#allocation23_spill] sm:$0xff] %v12625_v44  ;;  %14754 = vst [vmem:[#allocation75_spill] sm:$0xff] %v12628_v63  ;;  %v12634_v2 = vadd.f32 %v12184_v10, %v2173_v8  ;;  %v12644_v10 = vld [vmem:[%s11223_s12 + $0x268] sm:$0xff]   ;;  %v12650_v63 = vld [vmem:[%s11223_s12 + $0x270] sm:$0xff]  }
 0x217   : > { %v7360_v31 = vadd.f32 %v7359_v18, %v7329_v53  ;;  %v7330_v28 = vmax.f32 %v7298_v19, 0.0  ;;  %10518 = vmatmul.mubr.bf16.gmra.mrb[244].mxu0 %v12616_v1  ;;  %3947 = vmatmul.mubr.bf16.gmra.mrb[244].mxu1 %v12492_v62  ;;  %v14758_v18 = vld [vmem:[#allocation25_spill] sm:$0xff] }
 0x218   : > { %14756 = vst [vmem:[#allocation24_spill] sm:$0xff] %v12634_v2  ;;  %10521 = vmatprep.mubr.bf16.mxu0 %v12622_v6  ;;  %3956 = vmatprep.mubr.bf16.mxu1 %v14651_v13 }
 0x219   : > { %v7361_v5 = vadd.f32 %v7360_v31, %v7330_v28 }
 0x21a   : > { %v2177_v29 = vpop.f32.mrb[140].mxu0  ;;  %v2579_v32 = vpop.f32.mrb[140].mxu1 }
 0x21b   : > { %v7299_v22 = vadd.f32 %v12088_v20, %v2579_v32  ;;  %v2179_v16 = vpop.f32.mrb[141].mxu0  ;;  %v12641_v38 = vpop.f32.mrb[141].mxu1  ;;  %v12647_v53 = vadd.f32 %v2177_v29, %v14758_v18 }
 0x21c   : > { %14757 = vst [vmem:[#allocation76_spill] sm:$0xff] %v12641_v38  ;;  %v2181_v19 = vpop.f32.mrb[142].mxu0  ;;  %v2583_v8 = vpop.f32.mrb[142].mxu1  ;;  %v12653_v21 = vadd.f32 %v12163_v58, %v2179_v16  ;;  %v14761_v38 = vld [vmem:[#allocation26_spill] sm:$0xff] }
 0x21d   : > { %v7331_v28 = vmax.f32 %v7299_v22, 0.0  ;;  %v7300_v31 = vadd.f32 %v12088_v20, %v2583_v8  ;;  %v2183_v2 = vpop.f32.mrb[143].mxu0  ;;  %v12656_v32 = vpop.f32.mrb[143].mxu1  ;;  %v12659_v44 = vadd.f32 %v2181_v19, %v14761_v38 }
 0x21e   : > { %14759 = vst [vmem:[#allocation25_spill] sm:$0xff] %v12653_v21  ;;  %14760 = vst [vmem:[#allocation77_spill] sm:$0xff] %v12656_v32  ;;  %v12662_v29 = vadd.f32 %v12175_v25, %v2183_v2  ;;  %v12672_v25 = vld [vmem:[%s11223_s12 + $0x278] sm:$0xff]   ;;  %v14764_v2 = vld [vmem:[#allocation27_spill] sm:$0xff] }
 0x21f   : > { %v7362_v18 = vadd.f32 %v7361_v5, %v7331_v28  ;;  %v7332_v40 = vmax.f32 %v7300_v31, 0.0  ;;  %10522 = vmatmul.mubr.bf16.gmra.mrb[248].mxu0 %v12644_v10  ;;  %3957 = vmatmul.mubr.bf16.gmra.mrb[248].mxu1 %v12495_v56 }
 0x220   : > { %14762 = vst [vmem:[#allocation26_spill] sm:$0xff] %v12662_v29  ;;  %10525 = vmatprep.mubr.bf16.mxu0 %v12650_v63  ;;  %3966 = vmatprep.mubr.bf16.mxu1 %v14651_v13 }
 0x221   : > { %v7363_v58 = vadd.f32 %v7362_v18, %v7332_v40  ;;  %v12683_v40 = vld [vmem:[%s14624_s2] ss:$0 sm:$0xff] }
 0x222   : > { %v2187_v22 = vpop.f32.mrb[144].mxu0  ;;  %v2589_v16 = vpop.f32.mrb[144].mxu1 }
 0x223   : > { %v7301_v8 = vadd.f32 %v12088_v20, %v2589_v16  ;;  %v2189_v38 = vpop.f32.mrb[145].mxu0  ;;  %v12669_v19 = vpop.f32.mrb[145].mxu1  ;;  %v12675_v5 = vadd.f32 %v2187_v22, %v14764_v2 }
 0x224   : > { %14763 = vst [vmem:[#allocation78_spill] sm:$0xff] %v12669_v19  ;;  %v2191_v28 = vpop.f32.mrb[146].mxu0  ;;  %v2593_v31 = vpop.f32.mrb[146].mxu1  ;;  %v12678_v32 = vadd.f32 %v12203_v14, %v2189_v38  ;;  %v14768_v19 = vld [vmem:[#allocation28_spill] sm:$0xff] }
 0x225   : > { %14765 = vst [vmem:[#allocation27_spill] sm:$0xff] %v12675_v5  ;;  %v7333_v29 = vmax.f32 %v7301_v8, 0.0  ;;  %v7302_v20 = vadd.f32 %v12683_v40, %v2593_v31  ;;  %v2193_v18 = vpop.f32.mrb[147].mxu0  ;;  %v12686_v16 = vpop.f32.mrb[147].mxu1  ;;  %v12689_v21 = vadd.f32 %v2191_v28, %v14768_v19 }
 0x226   : > { %14766 = vst [vmem:[#allocation79_spill] sm:$0xff] %v12678_v32  ;;  %14767 = vst [vmem:[#allocation80_spill] sm:$0xff] %v12686_v16  ;;  %v12692_v22 = vadd.f32 %v12215_v48, %v2193_v18  ;;  %v14772_v48 = vld [vmem:[#allocation29_spill] sm:$0xff] }
 0x227   : > { %14769 = vst [vmem:[#allocation28_spill] sm:$0xff] %v12689_v21  ;;  %v7364_v2 = vadd.f32 %v7363_v58, %v7333_v29  ;;  %v7334_v14 = vmax.f32 %v7302_v20, 0.0  ;;  %10526 = vmatmul.mubr.bf16.gmra.mrb[252].mxu0 %v12672_v25  ;;  %3967 = vmatmul.mubr.bf16.gmra.mrb[252].mxu1 %v12535_v60  ;;  %v10986_v20 = vld [vmem:[%s14623_s1 + $0xc] ss:$24 sps:$4 sm:$0xff]  }
 0x228   : > { %14770 = vst [vmem:[#allocation81_spill] sm:$0xff] %v12692_v22  ;;  %3976 = vmatprep.mubr.bf16.mxu1 %v14651_v13  ;;  %4249 = vmatprep.mubr.bf16.mxu0 %v14651_v13 }
 0x229   : > { %v7365_v8 = vadd.f32 %v7364_v2, %v7334_v14 }
 0x22a   : > { %v2197_v38 = vpop.f32.mrb[148].mxu0  ;;  %v2599_v31 = vpop.f32.mrb[148].mxu1 }
 0x22b   : > { %v7303_v16 = vadd.f32 %v12683_v40, %v2599_v31  ;;  %v2199_v19 = vpop.f32.mrb[149].mxu0  ;;  %v12699_v28 = vpop.f32.mrb[149].mxu1  ;;  %v12702_v18 = vadd.f32 %v2197_v38, %v14772_v48  ;;  %v10992_v38 = vld [vmem:[%s14623_s1 + $0x40] ss:$24 sps:$4 sm:$0xff]  }
 0x22c   : > { %14771 = vst [vmem:[#allocation82_spill] sm:$0xff] %v12699_v28  ;;  %v2201_v29 = vpop.f32.mrb[150].mxu0  ;;  %v2603_v58 = vpop.f32.mrb[150].mxu1  ;;  %v12708_v22 = vadd.f32 %v12197_v39, %v2199_v19  ;;  %v14775_v48 = vld [vmem:[#allocation30_spill] sm:$0xff] }
 0x22d   : > { %14773 = vst [vmem:[#allocation29_spill] sm:$0xff] %v12702_v18  ;;  %v7335_v2 = vmax.f32 %v7303_v16, 0.0  ;;  %v7304_v14 = vadd.f32 %v12683_v40, %v2603_v58  ;;  %v2203_v32 = vpop.f32.mrb[151].mxu0  ;;  %v12711_v31 = vpop.f32.mrb[151].mxu1  ;;  %v12717_v28 = vadd.f32 %v2201_v29, %v14775_v48  ;;  %v10990_v39 = vld [vmem:[%s14623_s1 + $0x3c] ss:$24 sps:$4 sm:$0xff]  }
 0x22e   : > { %14774 = vst [vmem:[#allocation83_spill] sm:$0xff] %v12711_v31  ;;  %v12720_v18 = vadd.f32 %v12206_v7, %v2203_v32  ;;  %v10996_v7 = vld [vmem:[%s14623_s1 + $0x70] ss:$24 sps:$4 sm:$0xff]   ;;  %v14777_v58 = vld [vmem:[#allocation31_spill] sm:$0xff] }
 0x22f   : > { %v7366_v21 = vadd.f32 %v7365_v8, %v7335_v2  ;;  %v7336_v5 = vmax.f32 %v7304_v14, 0.0  ;;  %3977 = vmatmul.mubr.bf16.gmra.mrb[0].mxu1 %v12541_v50  ;;  %4250 = vmatmul.mubr.bf16.vlgmr.msra.gmra.mrb[0].mxu0 %v12374_v42 }
 0x230   : > { %4957 = vmatpush1.bf16.msra.mxu0 %v10986_v20  ;;  %3986 = vmatprep.mubr.bf16.mxu1 %v14651_v13 }
 0x231   : > { %v7367_v16 = vadd.f32 %v7366_v21, %v7336_v5  ;;  %4259 = vmatprep.mubr.bf16.mxu0 %v14651_v13  ;;  %4958 = vmatprep.subr.bf16.mxu0 %v10992_v38 }
 0x232   : > { %v2207_v32 = vpop.f32.mrb[152].mxu0  ;;  %v2609_v8 = vpop.f32.mrb[152].mxu1 }
 0x233   : > { %v7305_v19 = vadd.f32 %v12683_v40, %v2609_v8  ;;  %v2209_v42 = vpop.f32.mrb[153].mxu0  ;;  %v12733_v29 = vpop.f32.mrb[153].mxu1  ;;  %v12736_v20 = vadd.f32 %v2207_v32, %v14777_v58  ;;  %v10994_v8 = vld [vmem:[%s14623_s1 + $0x6c] ss:$24 sps:$4 sm:$0xff]  }
 0x234   : > { %14776 = vst [vmem:[#allocation30_spill] sm:$0xff] %v12733_v29  ;;  %v2211_v2 = vpop.f32.mrb[154].mxu0  ;;  %v2613_v14 = vpop.f32.mrb[154].mxu1  ;;  %4959 = vmatpush1.bf16.msra.mxu0 %v10990_v39  ;;  %v12739_v21 = vadd.f32 %v12237_v26, %v2209_v42  ;;  %v14780_v29 = vld [vmem:[#allocation32_spill] sm:$0xff]  ;;  %v11000_v39 = vld [vmem:[%s14623_s1 + $0xa0] ss:$24 sps:$4 sm:$0xff]  }
 0x235   : > { %v7337_v5 = vmax.f32 %v7305_v19, 0.0  ;;  %v7306_v38 = vadd.f32 %v12683_v40, %v2613_v14  ;;  %v2213_v48 = vpop.f32.mrb[155].mxu0  ;;  %v12742_v31 = vpop.f32.mrb[155].mxu1  ;;  %4960 = vmatprep.subr.bf16.mxu0 %v10996_v7  ;;  %v12748_v32 = vadd.f32 %v2211_v2, %v14780_v29  ;;  %v10998_v29 = vld [vmem:[%s14623_s1 + $0x9c] ss:$24 sps:$4 sm:$0xff]  }
 0x236   : > { %14778 = vst [vmem:[#allocation31_spill] sm:$0xff] %v12739_v21  ;;  %14779 = vst [vmem:[#allocation84_spill] sm:$0xff] %v12742_v31  ;;  %v12754_v26 = vadd.f32 %v12249_v36, %v2213_v48  ;;  %v11006_v36 = vld [vmem:[%s14623_s1 + $0xd0] ss:$24 sps:$4 sm:$0xff]  }
 0x237   : > { %v7368_v19 = vadd.f32 %v7367_v16, %v7337_v5  ;;  %v7338_v42 = vmax.f32 %v7306_v38, 0.0  ;;  %3987 = vmatmul.mubr.bf16.gmra.mrb[4].mxu1 %v12583_v45  ;;  %4260 = vmatmul.mubr.bf16.gmra.mrb[4].mxu0 %v12399_v51  ;;  %v14783_v5 = vld [vmem:[#allocation33_spill] sm:$0xff] }
 0x238   : > { %14781 = vst [vmem:[#allocation32_spill] sm:$0xff] %v12754_v26  ;;  %3996 = vmatprep.mubr.bf16.mxu1 %v14651_v13  ;;  %4269 = vmatprep.mubr.bf16.mxu0 %v14651_v13 }
 0x239   : > { %v7369_v7 = vadd.f32 %v7368_v19, %v7338_v42  ;;  %4961 = vmatpush1.bf16.msra.mxu0 %v10994_v8 }
 0x23a   : > { %v2217_v58 = vpop.f32.mrb[156].mxu0  ;;  %v2619_v2 = vpop.f32.mrb[156].mxu1  ;;  %4962 = vmatprep.subr.bf16.mxu0 %v11000_v39 }
 0x23b   : > { %v7307_v16 = vadd.f32 %v12683_v40, %v2619_v2  ;;  %v2219_v51 = vpop.f32.mrb[157].mxu0  ;;  %v12767_v14 = vpop.f32.mrb[157].mxu1  ;;  %v12770_v38 = vadd.f32 %v2217_v58, %v14783_v5  ;;  %v11004_v2 = vld [vmem:[%s14623_s1 + $0xcc] ss:$24 sps:$4 sm:$0xff]  }
 0x23c   : > { %14782 = vst [vmem:[#allocation85_spill] sm:$0xff] %v12767_v14  ;;  %v2221_v48 = vpop.f32.mrb[158].mxu0  ;;  %v2623_v8 = vpop.f32.mrb[158].mxu1  ;;  %v12773_v19 = vadd.f32 %v12231_v61, %v2219_v51  ;;  %v14785_v14 = vld [vmem:[#allocation35_spill] sm:$0xff] }
 0x23d   : > { %v7339_v42 = vmax.f32 %v7307_v16, 0.0  ;;  %v7308_v39 = vadd.f32 %v12683_v40, %v2623_v8  ;;  %v2223_v31 = vpop.f32.mrb[159].mxu0  ;;  %v12776_v26 = vpop.f32.mrb[159].mxu1  ;;  %4963 = vmatpush1.bf16.msra.mxu0 %v10998_v29  ;;  %v12782_v21 = vadd.f32 %v2221_v48, %v14785_v14  ;;  %v11015_v61 = vld [vmem:[%s14623_s1 + $0x100] ss:$24 sps:$4 sm:$0xff]   ;;  %v14788_v48 = vld [vmem:[#allocation37_spill] sm:$0xff] }
 0x23e   : > { %14784 = vst [vmem:[#allocation33_spill] sm:$0xff] %v12776_v26  ;;  %4964 = vmatprep.subr.bf16.mxu0 %v11006_v36  ;;  %v12788_v58 = vadd.f32 %v12240_v47, %v2223_v31  ;;  %v11013_v36 = vld [vmem:[%s14623_s1 + $0xfc] ss:$24 sps:$4 sm:$0xff]   ;;  %v11024_v47 = vld [vmem:[%s14623_s1 + $0x130] ss:$24 sps:$4 sm:$0xff]  }
 0x23f   : > { %14786 = vst [vmem:[#allocation35_spill] sm:$0xff] %v12782_v21  ;;  %v7370_v16 = vadd.f32 %v7369_v7, %v7339_v42  ;;  %v7340_v51 = vmax.f32 %v7308_v39, 0.0  ;;  %3997 = vmatmul.mubr.bf16.gmra.mrb[8].mxu1 %v12589_v54  ;;  %4270 = vmatmul.mubr.bf16.gmra.mrb[8].mxu0 %v12414_v23 }
 0x240   : > { %4006 = vmatprep.mubr.bf16.mxu1 %v14651_v13  ;;  %4279 = vmatprep.mubr.bf16.mxu0 %v14651_v13 }
 0x241   : > { %v7371_v29 = vadd.f32 %v7370_v16, %v7340_v51  ;;  %4965 = vmatpush1.bf16.msra.mxu0 %v11004_v2 }
 0x242   : > { %v2629_v14 = vpop.f32.mrb[160].mxu1  ;;  %v2902_v5 = vpop.f32.mrb[160].mxu0  ;;  %4966 = vmatprep.subr.bf16.mxu0 %v11015_v61 }
 0x243   : > { %v7309_v31 = vadd.f32 %v12683_v40, %v2629_v14  ;;  %v12801_v23 = vpop.f32.mrb[161].mxu1  ;;  %v2904_v7 = vpop.f32.mrb[161].mxu0  ;;  %v12804_v8 = vadd.f32 %v2902_v5, %v14788_v48  ;;  %v11022_v14 = vld [vmem:[%s14623_s1 + $0x12c] ss:$24 sps:$4 sm:$0xff]  }
 0x244   : > { %14787 = vst [vmem:[#allocation86_spill] sm:$0xff] %v12801_v23  ;;  %v2633_v42 = vpop.f32.mrb[162].mxu1  ;;  %v2906_v39 = vpop.f32.mrb[162].mxu0  ;;  %v12807_v2 = vadd.f32 %v12266_v34, %v2904_v7  ;;  %v14791_v23 = vld [vmem:[#allocation39_spill] sm:$0xff] }
 0x245   : > { %v7341_v16 = vmax.f32 %v7309_v31, 0.0  ;;  %v7310_v61 = vadd.f32 %v12683_v40, %v2633_v42  ;;  %v12810_v51 = vpop.f32.mrb[163].mxu1  ;;  %v2908_v26 = vpop.f32.mrb[163].mxu0  ;;  %4967 = vmatpush1.bf16.msra.mxu0 %v11013_v36  ;;  %v12816_v21 = vadd.f32 %v2906_v39, %v14791_v23  ;;  %v11033_v34 = vld [vmem:[%s14623_s1 + $0x160] ss:$24 sps:$4 sm:$0xff]   ;;  %v14794_v42 = vld [vmem:[#allocation40_spill] sm:$0xff] }
 0x246   : > { %14789 = vst [vmem:[#allocation37_spill] sm:$0xff] %v12807_v2  ;;  %14790 = vst [vmem:[#allocation87_spill] sm:$0xff] %v12810_v51  ;;  %4968 = vmatprep.subr.bf16.mxu0 %v11024_v47  ;;  %v12822_v5 = vadd.f32 %v12275_v33, %v2908_v26  ;;  %v11031_v47 = vld [vmem:[%s14623_s1 + $0x15c] ss:$24 sps:$4 sm:$0xff]  }
 0x247   : > { %v7372_v31 = vadd.f32 %v7371_v29, %v7341_v16  ;;  %v7342_v7 = vmax.f32 %v7310_v61, 0.0  ;;  %4007 = vmatmul.mubr.bf16.gmra.mrb[12].mxu1 %v12616_v1  ;;  %4280 = vmatmul.mubr.bf16.gmra.mrb[12].mxu0 %v12446_v37  ;;  %v11040_v33 = vld [vmem:[%s14623_s1 + $0x14] ss:$24 sps:$4 sm:$0xff]  }
 0x248   : > { %14792 = vst [vmem:[#allocation39_spill] sm:$0xff] %v12822_v5  ;;  %4016 = vmatprep.mubr.bf16.mxu1 %v14651_v13  ;;  %4289 = vmatprep.mubr.bf16.mxu0 %v14651_v13 }
 0x249   : > { %v7373_v36 = vadd.f32 %v7372_v31, %v7342_v7  ;;  %4969 = vmatpush1.bf16.msra.mxu0 %v11022_v14 }
 0x24a   : > { %v2639_v23 = vpop.f32.mrb[164].mxu1  ;;  %v2912_v48 = vpop.f32.mrb[164].mxu0  ;;  %4970 = vmatprep.subr.bf16.mxu0 %v11033_v34 }
 0x24b   : > { %v7311_v26 = vadd.f32 %v12683_v40, %v2639_v23  ;;  %v12835_v37 = vpop.f32.mrb[165].mxu1  ;;  %v2914_v29 = vpop.f32.mrb[165].mxu0  ;;  %v12838_v39 = vadd.f32 %v2912_v48, %v14794_v42 }
 0x24c   : > { %14793 = vst [vmem:[#allocation88_spill] sm:$0xff] %v12835_v37  ;;  %v2643_v16 = vpop.f32.mrb[166].mxu1  ;;  %v2916_v61 = vpop.f32.mrb[166].mxu0  ;;  %v12841_v14 = vadd.f32 %v12302_v9, %v2914_v29 }
 0x24d   : > { %v7343_v31 = vmax.f32 %v7311_v26, 0.0  ;;  %v7312_v34 = vadd.f32 %v12683_v40, %v2643_v16  ;;  %v12844_v7 = vpop.f32.mrb[167].mxu1  ;;  %v2918_v5 = vpop.f32.mrb[167].mxu0  ;;  %4971 = vmatpush1.bf16.msra.mxu0 %v11031_v47  ;;  %v12847_v23 = vadd.f32 %v2916_v61, %v12069_v3 }
 0x24e   : > { %14795 = vst [vmem:[#allocation40_spill] sm:$0xff] %v12841_v14  ;;  %14796 = vst [vmem:[#allocation89_spill] sm:$0xff] %v12844_v7  ;;  %5952 = vmatprep.subr.bf16.mxu0 %v11040_v33  ;;  %v12850_v37 = vadd.f32 %v12311_v46, %v2918_v5 }
 0x24f   : > { %v7374_v48 = vadd.f32 %v7373_v36, %v7343_v31  ;;  %v7344_v42 = vmax.f32 %v7312_v34, 0.0  ;;  %4017 = vmatmul.mubr.bf16.gmra.mrb[16].mxu1 %v12622_v6  ;;  %4290 = vmatmul.mubr.bf16.gmra.mrb[16].mxu0 %v12449_v30 }
 0x250   : > { %14797 = vst [vmem:[#allocation90_spill] sm:$0xff] %v12850_v37  ;;  %4026 = vmatprep.mubr.bf16.mxu1 %v14651_v13  ;;  %4299 = vmatprep.mubr.bf16.mxu0 %v14651_v13 }
 0x251   : > { %v7375_v9 = vadd.f32 %v7374_v48, %v7344_v42  ;;  %v14801_v48 = vld [vmem:[#allocation41_spill] sm:$0xff] }
 0x252   : > { %v2649_v26 = vpop.f32.mrb[168].mxu1  ;;  %v2922_v47 = vpop.f32.mrb[168].mxu0 }
 0x253   : > { %v7313_v3 = vadd.f32 %v12683_v40, %v2649_v26  ;;  %v12857_v29 = vpop.f32.mrb[169].mxu1  ;;  %v2924_v33 = vpop.f32.mrb[169].mxu0  ;;  %v12860_v46 = vadd.f32 %v2922_v47, %v12091_v35 }
 0x254   : > { %14798 = vst [vmem:[#allocation91_spill] sm:$0xff] %v12857_v29  ;;  %v2653_v5 = vpop.f32.mrb[170].mxu1  ;;  %v2926_v36 = vpop.f32.mrb[170].mxu0  ;;  %v12863_v16 = vadd.f32 %v12325_v52, %v2924_v33 }
 0x255   : > { %v7345_v30 = vmax.f32 %v7313_v3, 0.0  ;;  %v7314_v61 = vadd.f32 %v12683_v40, %v2653_v5  ;;  %v12866_v31 = vpop.f32.mrb[171].mxu1  ;;  %v2928_v34 = vpop.f32.mrb[171].mxu0  ;;  %v12869_v42 = vadd.f32 %v2926_v36, %v14801_v48 }
 0x256   : > { %14799 = vst [vmem:[#allocation92_spill] sm:$0xff] %v12863_v16  ;;  %14800 = vst [vmem:[#allocation93_spill] sm:$0xff] %v12866_v31  ;;  %v12872_v26 = vadd.f32 %v12334_v17, %v2928_v34  ;;  %v14804_v17 = vld [vmem:[#allocation42_spill] sm:$0xff]  ;;  %v14826_v16 = vld [vmem:[#allocation48_spill] sm:$0xff] }
 0x257   : > { %v7376_v29 = vadd.f32 %v7375_v9, %v7345_v30  ;;  %v7346_v35 = vmax.f32 %v7314_v61, 0.0  ;;  %4027 = vmatmul.mubr.bf16.gmra.mrb[20].mxu1 %v12644_v10  ;;  %4300 = vmatmul.mubr.bf16.gmra.mrb[20].mxu0 %v12492_v62 }
 0x258   : > { %14802 = vst [vmem:[#allocation41_spill] sm:$0xff] %v12872_v26  ;;  %4036 = vmatprep.mubr.bf16.mxu1 %v14651_v13  ;;  %4309 = vmatprep.mubr.bf16.mxu0 %v14651_v13 }
 0x259   : > { %v7377_v52 = vadd.f32 %v7376_v29, %v7346_v35  ;;  %v14807_v35 = vld [vmem:[#allocation43_spill] sm:$0xff] }
 0x25a   : > { %v2659_v47 = vpop.f32.mrb[172].mxu1  ;;  %v2932_v3 = vpop.f32.mrb[172].mxu0 }
 0x25b   : > { %v7315_v33 = vadd.f32 %v12683_v40, %v2659_v47  ;;  %v12879_v5 = vpop.f32.mrb[173].mxu1  ;;  %v2934_v36 = vpop.f32.mrb[173].mxu0  ;;  %v12882_v34 = vadd.f32 %v2932_v3, %v14804_v17 }
 0x25c   : > { %14803 = vst [vmem:[#allocation94_spill] sm:$0xff] %v12879_v5  ;;  %v2663_v9 = vpop.f32.mrb[174].mxu1  ;;  %v2936_v30 = vpop.f32.mrb[174].mxu0  ;;  %v12885_v61 = vadd.f32 %v12347_v27, %v2934_v36 }
 0x25d   : > { %v7347_v62 = vmax.f32 %v7315_v33, 0.0  ;;  %v7316_v48 = vadd.f32 %v12683_v40, %v2663_v9  ;;  %v12888_v26 = vpop.f32.mrb[175].mxu1  ;;  %v2938_v29 = vpop.f32.mrb[175].mxu0  ;;  %v12891_v31 = vadd.f32 %v2936_v30, %v14807_v35 }
 0x25e   : > { %14805 = vst [vmem:[#allocation42_spill] sm:$0xff] %v12885_v61  ;;  %14806 = vst [vmem:[#allocation95_spill] sm:$0xff] %v12888_v26  ;;  %v12894_v47 = vadd.f32 %v12356_v24, %v2938_v29  ;;  %v14810_v29 = vld [vmem:[#allocation44_spill] sm:$0xff] }
 0x25f   : > { %v7378_v3 = vadd.f32 %v7377_v52, %v7347_v62  ;;  %v7348_v17 = vmax.f32 %v7316_v48, 0.0  ;;  %4037 = vmatmul.mubr.bf16.gmra.mrb[24].mxu1 %v12650_v63  ;;  %4310 = vmatmul.mubr.bf16.gmra.mrb[24].mxu0 %v12495_v56  ;;  %v12907_v48 = vld [vmem:[%s11223_s12 + $0x280] sm:$0xff]  }
 0x260   : > { %14808 = vst [vmem:[#allocation43_spill] sm:$0xff] %v12894_v47  ;;  %4046 = vmatprep.mubr.bf16.mxu1 %v14651_v13  ;;  %4319 = vmatprep.mubr.bf16.mxu0 %v14651_v13 }
 0x261   : > { %v7379_v27 = vadd.f32 %v7378_v3, %v7348_v17 }
 0x262   : > { %v2669_v33 = vpop.f32.mrb[176].mxu1  ;;  %v2942_v36 = vpop.f32.mrb[176].mxu0 }
 0x263   : > { %v7317_v9 = vadd.f32 %v12683_v40, %v2669_v33  ;;  %v12901_v30 = vpop.f32.mrb[177].mxu1  ;;  %v2944_v24 = vpop.f32.mrb[177].mxu0  ;;  %v12904_v35 = vadd.f32 %v2942_v36, %v14810_v29 }
 0x264   : > { %14809 = vst [vmem:[#allocation96_spill] sm:$0xff] %v12901_v30  ;;  %v2673_v52 = vpop.f32.mrb[178].mxu1  ;;  %v2946_v62 = vpop.f32.mrb[178].mxu0  ;;  %v12910_v56 = vadd.f32 %v12369_v4, %v2944_v24 }
 0x265   : > { %v7349_v47 = vmax.f32 %v7317_v9, 0.0  ;;  %v7318_v3 = vadd.f32 %v12683_v40, %v2673_v52  ;;  %v12913_v17 = vpop.f32.mrb[179].mxu1  ;;  %v2948_v33 = vpop.f32.mrb[179].mxu0  ;;  %v12916_v30 = vadd.f32 %v2946_v62, %v12153_v49  ;;  %v12929_v62 = vld [vmem:[%s11223_s12 + $0x288] sm:$0xff]  }
 0x266   : > { %14811 = vst [vmem:[#allocation44_spill] sm:$0xff] %v12910_v56  ;;  %14812 = vst [vmem:[#allocation97_spill] sm:$0xff] %v12913_v17  ;;  %v12919_v36 = vadd.f32 %v12381_v0, %v2948_v33  ;;  %v14818_v56 = vld [vmem:[#allocation46_spill] sm:$0xff] }
 0x267   : > { %v7380_v29 = vadd.f32 %v7379_v27, %v7349_v47  ;;  %v7350_v26 = vmax.f32 %v7318_v3, 0.0  ;;  %4047 = vmatmul.mubr.bf16.gmra.mrb[28].mxu1 %v12672_v25  ;;  %4320 = vmatmul.mubr.bf16.gmra.mrb[28].mxu0 %v12535_v60  ;;  %v14815_v47 = vld [vmem:[#allocation45_spill] sm:$0xff] }
 0x268   : > { %14813 = vst [vmem:[#allocation98_spill] sm:$0xff] %v12919_v36  ;;  %4329 = vmatprep.mubr.bf16.mxu0 %v14651_v13  ;;  %10545 = vmatprep.mubr.bf16.mxu1 %v12907_v48 }
 0x269   : > { %v7381_v4 = vadd.f32 %v7380_v29, %v7350_v26 }
 0x26a   : > { %v2679_v9 = vpop.f32.mrb[180].mxu1  ;;  %v2952_v24 = vpop.f32.mrb[180].mxu0 }
 0x26b   : > { %v7319_v49 = vadd.f32 %v12683_v40, %v2679_v9  ;;  %v12926_v52 = vpop.f32.mrb[181].mxu1  ;;  %v2954_v0 = vpop.f32.mrb[181].mxu0  ;;  %v12932_v27 = vadd.f32 %v2952_v24, %v14815_v47  ;;  %v12941_v9 = vld [vmem:[%s11223_s12 + $0x290] sm:$0xff]   ;;  %v14819_v47 = vld [vmem:[#allocation14_spill] sm:$0xff] }
 0x26c   : > { %14814 = vst [vmem:[#allocation99_spill] sm:$0xff] %v12926_v52  ;;  %v2683_v3 = vpop.f32.mrb[182].mxu1  ;;  %v2956_v60 = vpop.f32.mrb[182].mxu0  ;;  %v12935_v33 = vadd.f32 %v12394_v43, %v2954_v0  ;;  %v11009_v52 = vld [vmem:[%s14623_s1 + $0x44] ss:$24 sps:$4 sm:$0xff]  }
 0x26d   : > { %v7351_v36 = vmax.f32 %v7319_v49, 0.0  ;;  %v7320_v26 = vadd.f32 %v12683_v40, %v2683_v3  ;;  %v12938_v29 = vpop.f32.mrb[183].mxu1  ;;  %v2958_v17 = vpop.f32.mrb[183].mxu0  ;;  %v12947_v24 = vadd.f32 %v2956_v60, %v14818_v56  ;;  %v11012_v56 = vld [vmem:[%s14623_s1 + $0x74] ss:$24 sps:$4 sm:$0xff]   ;;  %v12964_v60 = vld [vmem:[%s11223_s12 + $0x298] sm:$0xff]  }
 0x26e   : > { %14816 = vst [vmem:[#allocation45_spill] sm:$0xff] %v12935_v33  ;;  %14817 = vst [vmem:[#allocation100_spill] sm:$0xff] %v12938_v29  ;;  %v12950_v61 = vadd.f32 %v14819_v47, %v2958_v17 }
 0x26f   : > { %v7382_v43 = vadd.f32 %v7381_v4, %v7351_v36  ;;  %v7352_v49 = vmax.f32 %v7320_v26, 0.0  ;;  %4330 = vmatmul.mubr.bf16.gmra.mrb[32].mxu0 %v12541_v50  ;;  %10546 = vmatmul.mubr.bf16.vlgmr.msra.gmra.mrb[32].mxu1 %v12929_v62 }
 0x270   : > { %14820 = vst [vmem:[#allocation46_spill] sm:$0xff] %v12950_v61  ;;  %10578 = vmatpush3.bf16.msra.mxu1 %v12577_v12  ;;  %4339 = vmatprep.mubr.bf16.mxu0 %v14651_v13  ;;  %v14822_v12 = vld [vmem:[#allocation47_spill] sm:$0xff] }
 0x271   : > { %v7383_v0 = vadd.f32 %v7382_v43, %v7352_v49  ;;  %10549 = vmatprep.mubr.bf16.mxu1 %v12941_v9  ;;  %10579 = vmatprep.subr.bf16.mxu1 %v11009_v52  ;;  %v12970_v49 = vld [vmem:[%s11223_s12 + $0x2a0] sm:$0xff]  }
 0x272   : > { %v2689_v17 = vpop.f32.mrb[184].mxu1  ;;  %v2962_v36 = vpop.f32.mrb[184].mxu0  ;;  %v14823_v61 = vld [vmem:[#allocation15_spill] sm:$0xff] }
 0x273   : > { %v7321_v4 = vadd.f32 %v12683_v40, %v2689_v17  ;;  %v12961_v50 = vpop.f32.mrb[185].mxu1  ;;  %v2964_v3 = vpop.f32.mrb[185].mxu0  ;;  %v12967_v26 = vadd.f32 %v2962_v36, %v14822_v12  ;;  %v11018_v36 = vld [vmem:[%s14623_s1 + $0xa4] ss:$24 sps:$4 sm:$0xff]  }
 0x274   : > { %14821 = vst [vmem:[#allocation14_spill] sm:$0xff] %v12961_v50  ;;  %v2693_v47 = vpop.f32.mrb[186].mxu1  ;;  %v2966_v43 = vpop.f32.mrb[186].mxu0  ;;  %10580 = vmatpush3.bf16.msra.mxu1 %v11009_v52  ;;  %v12973_v29 = vadd.f32 %v14823_v61, %v2964_v3  ;;  %v14828_v52 = vld [vmem:[#allocation16_spill] sm:$0xff] }
 0x275   : > { %v7353_v33 = vmax.f32 %v7321_v4, 0.0  ;;  %v7322_v5 = vadd.f32 %v12683_v40, %v2693_v47  ;;  %v12976_v17 = vpop.f32.mrb[187].mxu1  ;;  %v2968_v50 = vpop.f32.mrb[187].mxu0  ;;  %10581 = vmatprep.subr.bf16.mxu1 %v11012_v56  ;;  %v12979_v37 = vadd.f32 %v2966_v43, %v14826_v16  ;;  %v14831_v43 = vld [vmem:[#allocation49_spill] sm:$0xff] }
 0x276   : > { %14824 = vst [vmem:[#allocation47_spill] sm:$0xff] %v12973_v29  ;;  %14825 = vst [vmem:[#allocation15_spill] sm:$0xff] %v12976_v17  ;;  %v12985_v12 = vadd.f32 %v14828_v52, %v2968_v50  ;;  %v11021_v50 = vld [vmem:[%s14623_s1 + $0xd4] ss:$24 sps:$4 sm:$0xff]  }
 0x277   : > { %14827 = vst [vmem:[#allocation48_spill] sm:$0xff] %v12979_v37  ;;  %v7384_v61 = vadd.f32 %v7383_v0, %v7353_v33  ;;  %v7354_v3 = vmax.f32 %v7322_v5, 0.0  ;;  %4340 = vmatmul.mubr.bf16.gmra.mrb[36].mxu0 %v12583_v45  ;;  %10550 = vmatmul.mubr.bf16.gmra.mrb[36].mxu1 %v12964_v60  ;;  %v12998_v0 = vld [vmem:[%s11223_s12 + $0x2a8] sm:$0xff]  }
 0x278   : > { %14829 = vst [vmem:[#allocation16_spill] sm:$0xff] %v12985_v12  ;;  %4349 = vmatprep.mubr.bf16.mxu0 %v14651_v13  ;;  %10553 = vmatprep.mubr.bf16.mxu1 %v12970_v49  ;;  %v14851_v37 = vld [vmem:[#allocation20_spill] sm:$0xff] }
 0x279   : > { %v7385_v16 = vadd.f32 %v7384_v61, %v7354_v3  ;;  %10582 = vmatpush3.bf16.msra.mxu1 %v11012_v56  ;;  %v13004_v56 = vld [vmem:[%s11223_s12 + $0x2b0] sm:$0xff]  }
 0x27a   : > { %v2699_v4 = vpop.f32.mrb[188].mxu1  ;;  %v2972_v47 = vpop.f32.mrb[188].mxu0  ;;  %10583 = vmatprep.subr.bf16.mxu1 %v11018_v36  ;;  %v14833_v3 = vld [vmem:[#allocation17_spill] sm:$0xff] }
 0x27b   : > { %v7323_v5 = vadd.f32 %v12683_v40, %v2699_v4  ;;  %v12995_v33 = vpop.f32.mrb[189].mxu1  ;;  %v2974_v45 = vpop.f32.mrb[189].mxu0  ;;  %v13001_v52 = vadd.f32 %v2972_v47, %v14831_v43  ;;  %v11027_v47 = vld [vmem:[%s14623_s1 + $0x104] ss:$24 sps:$4 sm:$0xff]  }
 0x27c   : > { %14830 = vst [vmem:[#allocation101_spill] sm:$0xff] %v12995_v33  ;;  %v2703_v12 = vpop.f32.mrb[190].mxu1  ;;  %v2976_v61 = vpop.f32.mrb[190].mxu0  ;;  %v13007_v17 = vadd.f32 %v14833_v3, %v2974_v45  ;;  %v14836_v33 = vld [vmem:[#allocation50_spill] sm:$0xff] }
 0x27d   : > { %14832 = vst [vmem:[#allocation49_spill] sm:$0xff] %v13001_v52  ;;  %v7355_v29 = vmax.f32 %v7323_v5, 0.0  ;;  %v7324_v7 = vadd.f32 %v12683_v40, %v2703_v12  ;;  %v13010_v14 = vpop.f32.mrb[191].mxu1  ;;  %v2978_v4 = vpop.f32.mrb[191].mxu0  ;;  %10584 = vmatpush3.bf16.msra.mxu1 %v11018_v36  ;;  %v13013_v51 = vadd.f32 %v2976_v61, %v14836_v33  ;;  %v14838_v43 = vld [vmem:[#allocation18_spill] sm:$0xff] }
 0x27e   : > { %14834 = vst [vmem:[#allocation17_spill] sm:$0xff] %v13007_v17  ;;  %14835 = vst [vmem:[#allocation102_spill] sm:$0xff] %v13010_v14  ;;  %10585 = vmatprep.subr.bf16.mxu1 %v11021_v50  ;;  %v13019_v2 = vadd.f32 %v14838_v43, %v2978_v4  ;;  %v13035_v43 = vld [vmem:[%s11223_s12 + $0x2b8] sm:$0xff]  }
 0x27f   : > { %14837 = vst [vmem:[#allocation50_spill] sm:$0xff] %v13013_v51  ;;  %v7386_v45 = vadd.f32 %v7385_v16, %v7355_v29  ;;  %v7356_v3 = vmax.f32 %v7324_v7, 0.0  ;;  %4350 = vmatmul.mubr.bf16.gmra.mrb[40].mxu0 %v12589_v54  ;;  %10554 = vmatmul.mubr.bf16.gmra.mrb[40].mxu1 %v12998_v0  ;;  %v11030_v29 = vld [vmem:[%s14623_s1 + $0x134] ss:$24 sps:$4 sm:$0xff]   ;;  %v14840_v16 = vld [vmem:[#allocation34_spill] sm:$0xff]  ;;  %v13044_v51 = vld [vmem:[%s11223_s12 + $0x2c0] sm:$0xff]  }
 0x280   : > { %14839 = vst [vmem:[#allocation18_spill] sm:$0xff] %v13019_v2  ;;  %4359 = vmatprep.mubr.bf16.mxu0 %v14651_v13  ;;  %10557 = vmatprep.mubr.bf16.mxu1 %v13004_v56  ;;  %v14842_v54 = vld [vmem:[#allocation36_spill] sm:$0xff] }
 0x281   : > { %v7387_v40 = vadd.f32 %v7386_v45, %v7356_v3  ;;  %10586 = vmatpush3.bf16.msra.mxu1 %v11021_v50  ;;  %v14844_v45 = vld [vmem:[#allocation19_spill] sm:$0xff] }
 0x282   : > { %v2982_v36 = vpop.f32.mrb[192].mxu0  ;;  %v10451_v12 = vpop.f32.mrb[192].mxu1  ;;  %10587 = vmatprep.subr.bf16.mxu1 %v11027_v47  ;;  %v14846_v3 = vld [vmem:[#allocation3_spill] sm:$0xff] }
 0x283   : > { %v7388_v7 = vrot.slane %v7387_v40, 4  ;;  %v13029_v5 = vadd.f32 %v2982_v36, %v14840_v16  ;;  %v13032_v33 = vadd.f32 %v10451_v12, %v14842_v54  ;;  %v2984_v61 = vpop.f32.mrb[193].mxu0  ;;  %v3223_v4 = vpop.f32.mrb[193].mxu1  ;;  %v14847_v36 = vld [vmem:[#allocation4_spill] sm:$0xff]  ;;  %v14849_v12 = vld [vmem:[#allocation38_spill] sm:$0xff] }
 0x284   : > { %v13038_v50 = vadd.f32 %v14844_v45, %v2984_v61  ;;  %v13041_v2 = vadd.f32 %v14846_v3, %v3223_v4  ;;  %v2986_v14 = vpop.f32.mrb[194].mxu0  ;;  %v10452_v17 = vpop.f32.mrb[194].mxu1  ;;  %v14853_v45 = vld [vmem:[#allocation51_spill] sm:$0xff]  ;;  %v14857_v3 = vld [vmem:[#allocation54_spill] sm:$0xff] }
 0x285   : > { %14841 = vst [vmem:[#allocation34_spill] sm:$0xff] %v13029_v5  ;;  %14843 = vst [vmem:[#allocation36_spill] sm:$0xff] %v13032_v33  ;;  %v7389_v52 = vadd.f32 %v7388_v7, %v7387_v40  ;;  %v13047_v16 = vadd.f32 %v2986_v14, %v14847_v36  ;;  %v13050_v54 = vadd.f32 %v10452_v17, %v14849_v12  ;;  %v2988_v33 = vpop.f32.mrb[195].mxu0  ;;  %v3226_v5 = vpop.f32.mrb[195].mxu1  ;;  %10588 = vmatpush3.bf16.msra.mxu1 %v11027_v47  ;;  %v11036_v40 = vld [vmem:[%s14623_s1 + $0x164] ss:$24 sps:$4 sm:$0xff]  }
 0x286   : > { %14845 = vst [vmem:[#allocation19_spill] sm:$0xff] %v13038_v50  ;;  %v13053_v61 = vadd.f32 %v14851_v37, %v2988_v33  ;;  %v13056_v4 = vadd.f32 %v14853_v45, %v3226_v5  ;;  %10589 = vmatprep.subr.bf16.mxu1 %v11030_v29  ;;  %v13068_v47 = vld [vmem:[%s14623_s1] ss:$24 sps:$4 sm:$0xff]   ;;  %v14855_v33 = vld [vmem:[#allocation5_spill] sm:$0xff] }
 0x287   : > { %14848 = vst [vmem:[#allocation3_spill] sm:$0xff] %v13047_v16  ;;  %14850 = vst [vmem:[#allocation4_spill] sm:$0xff] %v13050_v54  ;;  %v7390_v7 = vrot.slane %v7389_v52, 2  ;;  %4360 = vmatmul.mubr.bf16.gmra.mrb[44].mxu0 %v12616_v1  ;;  %10558 = vmatmul.mubr.bf16.gmra.mrb[44].mxu1 %v13035_v43 }
 0x288   : > { %14852 = vst [vmem:[#allocation38_spill] sm:$0xff] %v13053_v61  ;;  %14854 = vst [vmem:[#allocation20_spill] sm:$0xff] %v13056_v4  ;;  %4369 = vmatprep.mubr.bf16.mxu0 %v14651_v13  ;;  %10561 = vmatprep.mubr.bf16.mxu1 %v13044_v51  ;;  %v13086_v4 = vld [vmem:[%s11223_s12 + $0x2d0] sm:$0xff]  }
 0x289   : > { %v7391_v37 = vadd.f32 %v7390_v7, %v7389_v52  ;;  %10590 = vmatpush3.bf16.msra.mxu1 %v11030_v29  ;;  %v13077_v52 = vld [vmem:[%s11223_s12 + $0x2c8] sm:$0xff]  }
 0x28a   : > { %v2992_v14 = vpop.f32.mrb[196].mxu0  ;;  %v10455_v17 = vpop.f32.mrb[196].mxu1  ;;  %10591 = vmatprep.subr.bf16.mxu1 %v11036_v40  ;;  %v14860_v7 = vld [vmem:[#allocation52_spill] sm:$0xff] }
 0x28b   : > { %v7392_v5 = vrot.slane %v7391_v37, 1  ;;  %v13071_v1 = vadd.f32 %v2992_v14, %v14855_v33  ;;  %v13074_v36 = vadd.f32 %v10455_v17, %v14857_v3  ;;  %v2994_v12 = vpop.f32.mrb[197].mxu0  ;;  %v3239_v45 = vpop.f32.mrb[197].mxu1  ;;  %v14861_v14 = vld [vmem:[#allocation6_spill] sm:$0xff]  ;;  %v14862_v17 = vld [vmem:[#allocation55_spill] sm:$0xff] }
 0x28c   : > { %v13080_v29 = vadd.f32 %v12586_v55, %v2994_v12  ;;  %v13083_v61 = vadd.f32 %v14860_v7, %v3239_v45  ;;  %v2996_v50 = vpop.f32.mrb[198].mxu0  ;;  %v10456_v54 = vpop.f32.mrb[198].mxu1  ;;  %v14865_v12 = vld [vmem:[#allocation53_spill] sm:$0xff]  ;;  %v13116_v7 = vld [vmem:[%s11223_s12 + $0x2d8] sm:$0xff]  }
 0x28d   : > { %14856 = vst [vmem:[#allocation51_spill] sm:$0xff] %v13071_v1  ;;  %14858 = vst [vmem:[#allocation5_spill] sm:$0xff] %v13074_v36  ;;  %v7393_v16 = vadd.f32 %v7392_v5, %v7391_v37  ;;  %v13089_v33 = vadd.f32 %v2996_v50, %v14861_v14  ;;  %v13092_v3 = vadd.f32 %v10456_v54, %v14862_v17  ;;  %v2998_v36 = vpop.f32.mrb[199].mxu0  ;;  %v3242_v1 = vpop.f32.mrb[199].mxu1  ;;  %10592 = vmatpush3.bf16.msra.mxu1 %v11036_v40  ;;  %v14867_v40 = vld [vmem:[#allocation7_spill] sm:$0xff]  ;;  %v14871_v17 = vld [vmem:[#allocation56_spill] sm:$0xff] }
 0x28e   : > { %14859 = vst [vmem:[#allocation54_spill] sm:$0xff] %v13080_v29  ;;  %v13095_v55 = vadd.f32 %v12598_v15, %v2998_v36  ;;  %v13098_v45 = vadd.f32 %v14865_v12, %v3242_v1  ;;  %10625 = vmatprep.subr.bf16.mxu1 %v13068_v47  ;;  %v14868_v1 = vld [vmem:[#allocation58_spill] sm:$0xff]  ;;  %v14873_v29 = vld [vmem:[#allocation8_spill] sm:$0xff] }
 0x28f   : > { %14863 = vst [vmem:[#allocation52_spill] sm:$0xff] %v13092_v3  ;;  %v7394_v37 = vmul.f32 0.00390625, %v7393_v16  ;;  %4370 = vmatmul.mubr.bf16.gmra.mrb[48].mxu0 %v12622_v6  ;;  %10562 = vmatmul.mubr.bf16.gmra.mrb[48].mxu1 %v13077_v52 }
 0x290   : > { %14864 = vst [vmem:[#allocation6_spill] sm:$0xff] %v13095_v55  ;;  %14866 = vst [vmem:[#allocation55_spill] sm:$0xff] %v13098_v45  ;;  %4379 = vmatprep.mubr.bf16.mxu0 %v14651_v13  ;;  %10565 = vmatprep.mubr.bf16.mxu1 %v13086_v4  ;;  %v13125_v55 = vld [vmem:[%s11223_s12 + $0x2e0] sm:$0xff]  }
 0x291   : > { %v13107_v50 = vsel %vm7935_vm2, %v12610_v11, %v7394_v37 }
 0x292   : > { %v3002_v15 = vpop.f32.mrb[200].mxu0  ;;  %v10459_v54 = vpop.f32.mrb[200].mxu1 }
 0x293   : > { %v13110_v5 = vadd.f32 %v3002_v15, %v14867_v40  ;;  %v13113_v16 = vadd.f32 %v10459_v54, %v14868_v1  ;;  %v3004_v6 = vpop.f32.mrb[201].mxu0  ;;  %v3255_v36 = vpop.f32.mrb[201].mxu1  ;;  %v14874_v40 = vld [vmem:[#allocation60_spill] sm:$0xff] }
 0x294   : > { %v13119_v14 = vadd.f32 %v12619_v57, %v3004_v6  ;;  %v13122_v12 = vadd.f32 %v14871_v17, %v3255_v36  ;;  %v3006_v11 = vpop.f32.mrb[202].mxu0  ;;  %v10460_v37 = vpop.f32.mrb[202].mxu1  ;;  %v14877_v57 = vld [vmem:[#allocation57_spill] sm:$0xff] }
 0x295   : > { %14869 = vst [vmem:[#allocation53_spill] sm:$0xff] %v13113_v16  ;;  %v13128_v15 = vadd.f32 %v3006_v11, %v14873_v29  ;;  %v13131_v54 = vadd.f32 %v10460_v37, %v14874_v40  ;;  %v3008_v1 = vpop.f32.mrb[203].mxu0  ;;  %v3258_v16 = vpop.f32.mrb[203].mxu1  ;;  %v14879_v17 = vld [vmem:[#allocation9_spill] sm:$0xff]  ;;  %v14881_v37 = vld [vmem:[#allocation66_spill] sm:$0xff] }
 0x296   : > { %14870 = vst [vmem:[#allocation7_spill] sm:$0xff] %v13119_v14  ;;  %14872 = vst [vmem:[#allocation58_spill] sm:$0xff] %v13122_v12  ;;  %v13134_v3 = vadd.f32 %v12631_v59, %v3008_v1  ;;  %v13137_v6 = vadd.f32 %v14877_v57, %v3258_v16  ;;  %v13150_v1 = vld [vmem:[%s11223_s12 + $0x2e8] sm:$0xff]   ;;  %v14884_v57 = vld [vmem:[#allocation62_spill] sm:$0xff] }
 0x297   : > { %14875 = vst [vmem:[#allocation56_spill] sm:$0xff] %v13131_v54  ;;  %4380 = vmatmul.mubr.bf16.gmra.mrb[52].mxu0 %v12644_v10  ;;  %10566 = vmatmul.mubr.bf16.gmra.mrb[52].mxu1 %v13116_v7  ;;  %v14886_v12 = vld [vmem:[#allocation10_spill] sm:$0xff] }
 0x298   : > { %14876 = vst [vmem:[#allocation8_spill] sm:$0xff] %v13134_v3  ;;  %14878 = vst [vmem:[#allocation60_spill] sm:$0xff] %v13137_v6  ;;  %4389 = vmatprep.mubr.bf16.mxu0 %v14651_v13  ;;  %10569 = vmatprep.mubr.bf16.mxu1 %v13125_v55  ;;  %v13159_v6 = vld [vmem:[%s11223_s12 + $0x2f0] sm:$0xff]  }
 0x29a   : > { %v3012_v29 = vpop.f32.mrb[204].mxu0  ;;  %v10463_v36 = vpop.f32.mrb[204].mxu1 }
 0x29b   : > { %v13144_v11 = vadd.f32 %v3012_v29, %v14879_v17  ;;  %v13147_v59 = vadd.f32 %v10463_v36, %v14881_v37  ;;  %v3014_v40 = vpop.f32.mrb[205].mxu0  ;;  %v3271_v16 = vpop.f32.mrb[205].mxu1  ;;  %v14888_v17 = vld [vmem:[#allocation68_spill] sm:$0xff] }
 0x29c   : > { %v13153_v10 = vadd.f32 %v12647_v53, %v3014_v40  ;;  %v13156_v3 = vadd.f32 %v14884_v57, %v3271_v16  ;;  %v3016_v14 = vpop.f32.mrb[206].mxu0  ;;  %v10464_v54 = vpop.f32.mrb[206].mxu1  ;;  %v14891_v53 = vld [vmem:[#allocation64_spill] sm:$0xff] }
 0x29d   : > { %14880 = vst [vmem:[#allocation57_spill] sm:$0xff] %v13144_v11  ;;  %14882 = vst [vmem:[#allocation9_spill] sm:$0xff] %v13147_v59  ;;  %v13162_v29 = vadd.f32 %v3016_v14, %v14886_v12  ;;  %v13165_v36 = vadd.f32 %v10464_v54, %v14888_v17  ;;  %v3018_v37 = vpop.f32.mrb[207].mxu0  ;;  %v3274_v59 = vpop.f32.mrb[207].mxu1  ;;  %v14893_v54 = vld [vmem:[#allocation11_spill] sm:$0xff] }
 0x29e   : > { %14883 = vst [vmem:[#allocation66_spill] sm:$0xff] %v13153_v10  ;;  %14885 = vst [vmem:[#allocation62_spill] sm:$0xff] %v13156_v3  ;;  %v13168_v11 = vadd.f32 %v12659_v44, %v3018_v37  ;;  %v13171_v40 = vadd.f32 %v14891_v53, %v3274_v59  ;;  %v13184_v59 = vld [vmem:[%s11223_s12 + $0x2f8] sm:$0xff]   ;;  %v14896_v37 = vld [vmem:[#allocation27_spill] sm:$0xff] }
 0x29f   : > { %14887 = vst [vmem:[#allocation10_spill] sm:$0xff] %v13162_v29  ;;  %14889 = vst [vmem:[#allocation68_spill] sm:$0xff] %v13165_v36  ;;  %4390 = vmatmul.mubr.bf16.gmra.mrb[56].mxu0 %v12650_v63  ;;  %10570 = vmatmul.mubr.bf16.gmra.mrb[56].mxu1 %v13150_v1  ;;  %v14898_v53 = vld [vmem:[#allocation70_spill] sm:$0xff]  ;;  %v14904_v29 = vld [vmem:[#allocation72_spill] sm:$0xff] }
 0x2a0   : > { %14890 = vst [vmem:[#allocation103_spill] sm:$0xff] %v13168_v11  ;;  %14892 = vst [vmem:[#allocation64_spill] sm:$0xff] %v13171_v40  ;;  %4399 = vmatprep.mubr.bf16.mxu0 %v14651_v13  ;;  %10573 = vmatprep.mubr.bf16.mxu1 %v13159_v6  ;;  %v14899_v40 = vld [vmem:[#allocation12_spill] sm:$0xff] }
 0x2a2   : > { %v3022_v14 = vpop.f32.mrb[208].mxu0  ;;  %v10467_v12 = vpop.f32.mrb[208].mxu1 }
 0x2a3   : > { %v13178_v16 = vadd.f32 %v3022_v14, %v14893_v54  ;;  %v13181_v57 = vadd.f32 %v10467_v12, %v12592_v41  ;;  %v3024_v44 = vpop.f32.mrb[209].mxu0  ;;  %v3287_v17 = vpop.f32.mrb[209].mxu1  ;;  %v14900_v14 = vld [vmem:[#allocation22_spill] sm:$0xff] }
 0x2a4   : > { %v13187_v63 = vadd.f32 %v14896_v37, %v3024_v44  ;;  %v13190_v11 = vadd.f32 %v14898_v53, %v3287_v17  ;;  %v3026_v10 = vpop.f32.mrb[210].mxu0  ;;  %v10468_v36 = vpop.f32.mrb[210].mxu1  ;;  %v14907_v17 = vld [vmem:[#allocation25_spill] sm:$0xff] }
 0x2a5   : > { %14894 = vst [vmem:[#allocation11_spill] sm:$0xff] %v13178_v16  ;;  %14895 = vst [vmem:[#allocation104_spill] sm:$0xff] %v13181_v57  ;;  %v13193_v3 = vadd.f32 %v3026_v10, %v14899_v40  ;;  %v13196_v54 = vadd.f32 %v10468_v36, %v14900_v14  ;;  %v3028_v41 = vpop.f32.mrb[211].mxu0  ;;  %v3290_v12 = vpop.f32.mrb[211].mxu1  ;;  %v14902_v57 = vld [vmem:[#allocation28_spill] sm:$0xff]  ;;  %v14906_v36 = vld [vmem:[#allocation13_spill] sm:$0xff] }
 0x2a6   : > { %14897 = vst [vmem:[#allocation27_spill] sm:$0xff] %v13187_v63  ;;  %v13199_v16 = vadd.f32 %v14902_v57, %v3028_v41  ;;  %v13202_v45 = vadd.f32 %v14904_v29, %v3290_v12  ;;  %v14909_v29 = vld [vmem:[#allocation29_spill] sm:$0xff] }
 0x2a7   : > { %14901 = vst [vmem:[#allocation70_spill] sm:$0xff] %v13196_v54  ;;  %4400 = vmatmul.mubr.bf16.gmra.mrb[60].mxu0 %v12672_v25  ;;  %10574 = vmatmul.mubr.bf16.gmra.mrb[60].mxu1 %v13184_v59  ;;  %v14911_v25 = vld [vmem:[#allocation23_spill] sm:$0xff]  ;;  %v11038_v63 = vld [vmem:[%s14623_s1 + $0x10] ss:$24 sps:$4 sm:$0xff]  }
 0x2a8   : > { %14903 = vst [vmem:[#allocation12_spill] sm:$0xff] %v13199_v16  ;;  %14905 = vst [vmem:[#allocation22_spill] sm:$0xff] %v13202_v45  ;;  %4988 = vmatprep.mubr.bf16.mxu0 %v14651_v13  ;;  %10593 = vmatprep.mubr.bf16.mxu1 %v12907_v48  ;;  %v14913_v54 = vld [vmem:[#allocation59_spill] sm:$0xff] }
 0x2a9   : > { %v14923_v45 = vld [vmem:[#allocation63_spill] sm:$0xff] }
 0x2aa   : > { %v3032_v10 = vpop.f32.mrb[212].mxu0  ;;  %v10471_v40 = vpop.f32.mrb[212].mxu1 }
 0x2ab   : > { %v13209_v44 = vadd.f32 %v3032_v10, %v14906_v36  ;;  %v13212_v37 = vadd.f32 %v10471_v40, %v14907_v17  ;;  %v3034_v57 = vpop.f32.mrb[213].mxu0  ;;  %v3303_v53 = vpop.f32.mrb[213].mxu1  ;;  %v14914_v36 = vld [vmem:[#allocation26_spill] sm:$0xff] }
 0x2ac   : > { %v13215_v14 = vadd.f32 %v14909_v29, %v3034_v57  ;;  %v13218_v41 = vadd.f32 %v14911_v25, %v3303_v53  ;;  %v3036_v12 = vpop.f32.mrb[214].mxu0  ;;  %v10472_v16 = vpop.f32.mrb[214].mxu1  ;;  %v14917_v29 = vld [vmem:[#allocation24_spill] sm:$0xff] }
 0x2ad   : > { %14908 = vst [vmem:[#allocation28_spill] sm:$0xff] %v13212_v37  ;;  %v13224_v10 = vadd.f32 %v3036_v12, %v14913_v54  ;;  %v13227_v40 = vadd.f32 %v10472_v16, %v14914_v36  ;;  %v3038_v17 = vpop.f32.mrb[215].mxu0  ;;  %v3306_v37 = vpop.f32.mrb[215].mxu1  ;;  %v11041_v25 = vld [vmem:[%s14623_s1 + $0x30] ss:$24 sps:$4 sm:$0xff]  }
 0x2ae   : > { %14910 = vst [vmem:[#allocation72_spill] sm:$0xff] %v13215_v14  ;;  %14912 = vst [vmem:[#allocation13_spill] sm:$0xff] %v13218_v41  ;;  %v13230_v57 = vadd.f32 %v12717_v28, %v3038_v17  ;;  %v13233_v53 = vadd.f32 %v14917_v29, %v3306_v37  ;;  %v11045_v54 = vld [vmem:[%s14623_s1 + $0x44] ss:$24 sps:$4 sm:$0xff]   ;;  %v11043_v28 = vld [vmem:[%s14623_s1 + $0x40] ss:$24 sps:$4 sm:$0xff]  }
 0x2af   : > { %14915 = vst [vmem:[#allocation25_spill] sm:$0xff] %v13227_v40  ;;  %4989 = vmatmul.mubr.bf16.vlgmr.msra.gmra.mrb[64].mxu0 %v12907_v48  ;;  %10594 = vmatmul.mubr.bf16.vlgmr.msra.gmra.mrb[64].mxu1 %v12929_v62  ;;  %v11042_v16 = vld [vmem:[%s14623_s1 + $0x60] ss:$24 sps:$4 sm:$0xff]   ;;  %v11050_v48 = vld [vmem:[%s14623_s1 + $0x74] ss:$24 sps:$4 sm:$0xff]  }
 0x2b0   : > { %14916 = vst [vmem:[#allocation29_spill] sm:$0xff] %v13230_v57  ;;  %14918 = vst [vmem:[#allocation23_spill] sm:$0xff] %v13233_v53  ;;  %10626 = vmatpush3.bf16.msra.mxu1 %v13068_v47  ;;  %5953 = vmatpush1.bf16.msra.mxu0 %v11038_v63  ;;  %v14919_v47 = vld [vmem:[#allocation61_spill] sm:$0xff]  ;;  %v14922_v14 = vld [vmem:[#allocation79_spill] sm:$0xff] }
 0x2b1   : > { %4998 = vmatprep.mubr.bf16.mxu0 %v14651_v13  ;;  %10597 = vmatprep.mubr.bf16.mxu1 %v12941_v9 }
 0x2b2   : > { %v3042_v37 = vpop.f32.mrb[216].mxu0  ;;  %v10475_v12 = vpop.f32.mrb[216].mxu1  ;;  %10627 = vmatprep.subr.bf16.mxu1 %v11041_v25  ;;  %5954 = vmatprep.subr.bf16.mxu0 %v11045_v54 }
 0x2b3   : > { %v13256_v63 = vadd.f32 %v3042_v37, %v14919_v47  ;;  %v13259_v36 = vadd.f32 %v10475_v12, %v12708_v22  ;;  %v3044_v17 = vpop.f32.mrb[217].mxu0  ;;  %v3319_v29 = vpop.f32.mrb[217].mxu1  ;;  %v14926_v47 = vld [vmem:[#allocation81_spill] sm:$0xff] }
 0x2b4   : > { %v13262_v57 = vadd.f32 %v12736_v20, %v3044_v17  ;;  %v13265_v40 = vadd.f32 %v14922_v14, %v3319_v29  ;;  %v3046_v53 = vpop.f32.mrb[218].mxu0  ;;  %v10476_v41 = vpop.f32.mrb[218].mxu1  ;;  %10628 = vmatpush3.bf16.msra.mxu1 %v11041_v25  ;;  %5955 = vmatpush1.bf16.msra.mxu0 %v11043_v28  ;;  %v11048_v20 = vld [vmem:[%s14623_s1 + $0x70] ss:$24 sps:$4 sm:$0xff]   ;;  %v11047_v28 = vld [vmem:[%s14623_s1 + $0xc0] ss:$24 sps:$4 sm:$0xff]  }
 0x2b5   : > { %14920 = vst [vmem:[#allocation59_spill] sm:$0xff] %v13259_v36  ;;  %v13268_v54 = vadd.f32 %v3046_v53, %v14923_v45  ;;  %v13271_v37 = vadd.f32 %v10476_v41, %v12720_v18  ;;  %v3048_v22 = vpop.f32.mrb[219].mxu0  ;;  %v3322_v12 = vpop.f32.mrb[219].mxu1  ;;  %10629 = vmatprep.subr.bf16.mxu1 %v11042_v16  ;;  %5956 = vmatprep.subr.bf16.mxu0 %v11050_v48  ;;  %v11046_v45 = vld [vmem:[%s14623_s1 + $0x90] ss:$24 sps:$4 sm:$0xff]  }
 0x2b6   : > { %14921 = vst [vmem:[#allocation26_spill] sm:$0xff] %v13262_v57  ;;  %v13277_v14 = vadd.f32 %v12748_v32, %v3048_v22  ;;  %v13280_v25 = vadd.f32 %v14926_v47, %v3322_v12  ;;  %v11055_v18 = vld [vmem:[%s14623_s1 + $0xa4] ss:$24 sps:$4 sm:$0xff]   ;;  %v11053_v32 = vld [vmem:[%s14623_s1 + $0xa0] ss:$24 sps:$4 sm:$0xff]   ;;  %v14927_v48 = vld [vmem:[#allocation65_spill] sm:$0xff] }
 0x2b7   : > { %14924 = vst [vmem:[#allocation24_spill] sm:$0xff] %v13271_v37  ;;  %4999 = vmatmul.mubr.bf16.gmra.mrb[68].mxu0 %v12929_v62  ;;  %10598 = vmatmul.mubr.bf16.gmra.mrb[68].mxu1 %v12964_v60  ;;  %v11062_v62 = vld [vmem:[%s14623_s1 + $0xd4] ss:$24 sps:$4 sm:$0xff]   ;;  %v14932_v57 = vld [vmem:[#allocation67_spill] sm:$0xff] }
 0x2b8   : > { %14925 = vst [vmem:[#allocation61_spill] sm:$0xff] %v13277_v14  ;;  %5008 = vmatprep.mubr.bf16.mxu0 %v14651_v13  ;;  %10601 = vmatprep.mubr.bf16.mxu1 %v12970_v49 }
 0x2b9   : > { %10630 = vmatpush3.bf16.msra.mxu1 %v11042_v16  ;;  %5957 = vmatpush1.bf16.msra.mxu0 %v11048_v20  ;;  %v14930_v20 = vld [vmem:[#allocation31_spill] sm:$0xff] }
 0x2ba   : > { %v3052_v41 = vpop.f32.mrb[220].mxu0  ;;  %v10479_v53 = vpop.f32.mrb[220].mxu1  ;;  %10631 = vmatprep.subr.bf16.mxu1 %v11046_v45  ;;  %5958 = vmatprep.subr.bf16.mxu0 %v11055_v18 }
 0x2bb   : > { %v13302_v17 = vadd.f32 %v3052_v41, %v14927_v48  ;;  %v13305_v16 = vadd.f32 %v10479_v53, %v12773_v19  ;;  %v3054_v29 = vpop.f32.mrb[221].mxu0  ;;  %v3335_v22 = vpop.f32.mrb[221].mxu1  ;;  %v14934_v19 = vld [vmem:[#allocation35_spill] sm:$0xff] }
 0x2bc   : > { %v13308_v12 = vadd.f32 %v12770_v38, %v3054_v29  ;;  %v13311_v47 = vadd.f32 %v14930_v20, %v3335_v22  ;;  %v3056_v14 = vpop.f32.mrb[222].mxu0  ;;  %v10480_v18 = vpop.f32.mrb[222].mxu1  ;;  %v11060_v38 = vld [vmem:[%s14623_s1 + $0xd0] ss:$24 sps:$4 sm:$0xff]  }
 0x2bd   : > { %14928 = vst [vmem:[#allocation79_spill] sm:$0xff] %v13305_v16  ;;  %v13314_v37 = vadd.f32 %v3056_v14, %v14932_v57  ;;  %v13317_v36 = vadd.f32 %v10480_v18, %v12788_v58  ;;  %v3058_v41 = vpop.f32.mrb[223].mxu0  ;;  %v3338_v48 = vpop.f32.mrb[223].mxu1  ;;  %10632 = vmatpush3.bf16.msra.mxu1 %v11046_v45  ;;  %5959 = vmatpush1.bf16.msra.mxu0 %v11053_v32  ;;  %v14936_v29 = vld [vmem:[#allocation32_spill] sm:$0xff]  ;;  %v11071_v57 = vld [vmem:[%s14623_s1 + $0x104] ss:$24 sps:$4 sm:$0xff]  }
 0x2be   : > { %14929 = vst [vmem:[#allocation63_spill] sm:$0xff] %v13308_v12  ;;  %14931 = vst [vmem:[#allocation81_spill] sm:$0xff] %v13311_v47  ;;  %v13323_v53 = vadd.f32 %v14934_v19, %v3058_v41  ;;  %v13326_v22 = vadd.f32 %v14936_v29, %v3338_v48  ;;  %10633 = vmatprep.subr.bf16.mxu1 %v11047_v28  ;;  %v11051_v58 = vld [vmem:[%s14623_s1 + $0xf0] ss:$24 sps:$4 sm:$0xff]   ;;  %5960 = vmatprep.subr.bf16.mxu0 %v11062_v62  ;;  %v11069_v14 = vld [vmem:[%s14623_s1 + $0x100] ss:$24 sps:$4 sm:$0xff]  }
 0x2bf   : > { %14933 = vst [vmem:[#allocation65_spill] sm:$0xff] %v13317_v36  ;;  %5009 = vmatmul.mubr.bf16.gmra.mrb[72].mxu0 %v12941_v9  ;;  %10602 = vmatmul.mubr.bf16.gmra.mrb[72].mxu1 %v12998_v0  ;;  %v11052_v62 = vld [vmem:[%s14623_s1 + $0x120] ss:$24 sps:$4 sm:$0xff]   ;;  %v11080_v9 = vld [vmem:[%s14623_s1 + $0x134] ss:$24 sps:$4 sm:$0xff]  }
 0x2c0   : > { %14935 = vst [vmem:[#allocation31_spill] sm:$0xff] %v13323_v53  ;;  %14937 = vst [vmem:[#allocation67_spill] sm:$0xff] %v13326_v22  ;;  %5018 = vmatprep.mubr.bf16.mxu0 %v14651_v13  ;;  %10605 = vmatprep.mubr.bf16.mxu1 %v13004_v56  ;;  %v14938_v20 = vld [vmem:[#allocation69_spill] sm:$0xff]  ;;  %v13353_v48 = vld [vmem:[%s14624_s2] ss:$0 sm:$0xff] }
 0x2c1   : > { %10634 = vmatpush3.bf16.msra.mxu1 %v11047_v28  ;;  %5961 = vmatpush1.bf16.msra.mxu0 %v11060_v38  ;;  %v14941_v36 = vld [vmem:[#allocation71_spill] sm:$0xff] }
 0x2c2   : > { %v10499_v45 = vpop.f32.mrb[224].mxu0  ;;  %v3898_v32 = vpop.f32.mrb[224].mxu1  ;;  %10635 = vmatprep.subr.bf16.mxu1 %v11051_v58  ;;  %5962 = vmatprep.subr.bf16.mxu0 %v11071_v57 }
 0x2c3   : > { %v13348_v18 = vadd.f32 %v3898_v32, %v14938_v20  ;;  %v3609_v28 = vpop.f32.mrb[225].mxu0  ;;  %v3900_v41 = vpop.f32.mrb[225].mxu1  ;;  %v11078_v20 = vld [vmem:[%s14623_s1 + $0x130] ss:$24 sps:$4 sm:$0xff]  }
 0x2c4   : > { %v7427_v38 = vadd.f32 %v13353_v48, %v3609_v28  ;;  %v13357_v19 = vadd.f32 %v12804_v8, %v3900_v41  ;;  %v10500_v29 = vpop.f32.mrb[226].mxu0  ;;  %v3902_v57 = vpop.f32.mrb[226].mxu1 }
 0x2c5   : > { %14939 = vst [vmem:[#allocation35_spill] sm:$0xff] %v13348_v18  ;;  %v13360_v53 = vadd.f32 %v3902_v57, %v14941_v36  ;;  %v3612_v16 = vpop.f32.mrb[227].mxu0  ;;  %v3904_v32 = vpop.f32.mrb[227].mxu1  ;;  %10636 = vmatpush3.bf16.msra.mxu1 %v11051_v58  ;;  %5963 = vmatpush1.bf16.msra.mxu0 %v11069_v14  ;;  %v7429_v18 = vadd.f32 %v13353_v48, %v10499_v45  ;;  %v11056_v36 = vld [vmem:[%s14623_s1 + $0x150] ss:$24 sps:$4 sm:$0xff]  }
 0x2c6   : > { %14940 = vst [vmem:[#allocation32_spill] sm:$0xff] %v13357_v19  ;;  %v7459_v12 = vmax.f32 %v7427_v38, 0.0  ;;  %v7428_v28 = vadd.f32 %v13353_v48, %v3612_v16  ;;  %v13368_v8 = vadd.f32 %v12816_v21, %v3904_v32  ;;  %10637 = vmatprep.subr.bf16.mxu1 %v11052_v62  ;;  %5964 = vmatprep.subr.bf16.mxu0 %v11080_v9  ;;  %v11089_v58 = vld [vmem:[%s14623_s1 + $0x164] ss:$24 sps:$4 sm:$0xff]   ;;  %v11087_v21 = vld [vmem:[%s14623_s1 + $0x160] ss:$24 sps:$4 sm:$0xff]  }
 0x2c7   : > { %14942 = vst [vmem:[#allocation69_spill] sm:$0xff] %v13360_v53  ;;  %5019 = vmatmul.mubr.bf16.gmra.mrb[76].mxu0 %v12964_v60  ;;  %10606 = vmatmul.mubr.bf16.gmra.mrb[76].mxu1 %v13035_v43  ;;  %v7430_v14 = vadd.f32 %v13353_v48, %v10500_v29  ;;  %v7461_v45 = vmax.f32 %v7429_v18, 0.0  ;;  %v13387_v60 = vld [vmem:[%s14623_s1] ss:$24 sps:$4 sm:$0xff]   ;;  %v14944_v29 = vld [vmem:[#allocation73_spill] sm:$0xff] }
 0x2c8   : > { %14943 = vst [vmem:[#allocation71_spill] sm:$0xff] %v13368_v8  ;;  %v7460_v16 = vmax.f32 %v7428_v28, 0.0  ;;  %5028 = vmatprep.mubr.bf16.mxu0 %v14651_v13  ;;  %10609 = vmatprep.mubr.bf16.mxu1 %v13044_v51  ;;  %v14945_v19 = vld [vmem:[#allocation21_spill] sm:$0xff] }
 0x2c9   : > { %10638 = vmatpush3.bf16.msra.mxu1 %v11052_v62  ;;  %5965 = vmatpush1.bf16.msra.mxu0 %v11078_v20  ;;  %v7462_v20 = vmax.f32 %v7430_v14, 0.0 }
 0x2ca   : > { %v7491_v9 = vadd.f32 %v7460_v16, %v7459_v12  ;;  %v10503_v41 = vpop.f32.mrb[228].mxu0  ;;  %v3908_v38 = vpop.f32.mrb[228].mxu1  ;;  %10639 = vmatprep.subr.bf16.mxu1 %v11056_v36  ;;  %5966 = vmatprep.subr.bf16.mxu0 %v11089_v58 }
 0x2cb   : > { %v13390_v57 = vadd.f32 %v3908_v38, %v14944_v29  ;;  %v3625_v62 = vpop.f32.mrb[229].mxu0  ;;  %v3910_v32 = vpop.f32.mrb[229].mxu1  ;;  %v7433_v53 = vadd.f32 %v13353_v48, %v10503_v41 }
 0x2cc   : > { %v7492_v28 = vadd.f32 %v7491_v9, %v7461_v45  ;;  %v7431_v8 = vadd.f32 %v13353_v48, %v3625_v62  ;;  %v13394_v12 = vadd.f32 %v12838_v39, %v3910_v32  ;;  %v10504_v18 = vpop.f32.mrb[230].mxu0  ;;  %v3912_v16 = vpop.f32.mrb[230].mxu1 }
 0x2cd   : > { %v13398_v22 = vadd.f32 %v3912_v16, %v14945_v19  ;;  %v3628_v58 = vpop.f32.mrb[231].mxu0  ;;  %v3914_v47 = vpop.f32.mrb[231].mxu1  ;;  %10640 = vmatpush3.bf16.msra.mxu1 %v11056_v36  ;;  %5967 = vmatpush1.bf16.msra.mxu0 %v11087_v21  ;;  %v7434_v19 = vadd.f32 %v13353_v48, %v10504_v18 }
 0x2ce   : > { %v7463_v38 = vmax.f32 %v7431_v8, 0.0  ;;  %v7493_v29 = vadd.f32 %v7492_v28, %v7462_v20  ;;  %v7432_v14 = vadd.f32 %v13353_v48, %v3628_v58  ;;  %v13402_v45 = vadd.f32 %v12847_v23, %v3914_v47  ;;  %10673 = vmatprep.subr.bf16.mxu1 %v13387_v60  ;;  %v14946_v23 = vld [vmem:[#allocation74_spill] sm:$0xff] }
 0x2cf   : > { %5029 = vmatmul.mubr.bf16.gmra.mrb[80].mxu0 %v12970_v49  ;;  %10610 = vmatmul.mubr.bf16.gmra.mrb[80].mxu1 %v13077_v52  ;;  %v7465_v8 = vmax.f32 %v7433_v53, 0.0  ;;  %v7466_v49 = vmax.f32 %v7434_v19, 0.0  ;;  %v14947_v53 = vld [vmem:[#allocation75_spill] sm:$0xff] }
 0x2d0   : > { %v7494_v39 = vadd.f32 %v7493_v29, %v7463_v38  ;;  %v7464_v9 = vmax.f32 %v7432_v14, 0.0  ;;  %5038 = vmatprep.mubr.bf16.mxu0 %v14651_v13  ;;  %10613 = vmatprep.mubr.bf16.mxu1 %v13086_v4 }
 0x2d2   : > { %v7495_v36 = vadd.f32 %v7494_v39, %v7464_v9  ;;  %v10507_v21 = vpop.f32.mrb[232].mxu0  ;;  %v3918_v41 = vpop.f32.mrb[232].mxu1 }
 0x2d3   : > { %v13411_v47 = vadd.f32 %v3918_v41, %v14946_v23  ;;  %v3641_v62 = vpop.f32.mrb[233].mxu0  ;;  %v3920_v32 = vpop.f32.mrb[233].mxu1  ;;  %v7437_v38 = vadd.f32 %v13353_v48, %v10507_v21 }
 0x2d4   : > { %v7496_v20 = vadd.f32 %v7495_v36, %v7465_v8  ;;  %v7435_v28 = vadd.f32 %v13353_v48, %v3641_v62  ;;  %v13415_v18 = vadd.f32 %v12860_v46, %v3920_v32  ;;  %v10508_v16 = vpop.f32.mrb[234].mxu0  ;;  %v3922_v58 = vpop.f32.mrb[234].mxu1 }
 0x2d5   : > { %v13419_v29 = vadd.f32 %v3922_v58, %v14947_v53  ;;  %v3644_v14 = vpop.f32.mrb[235].mxu0  ;;  %v3924_v39 = vpop.f32.mrb[235].mxu1  ;;  %v7438_v8 = vadd.f32 %v13353_v48, %v10508_v16  ;;  %v7469_v21 = vmax.f32 %v7437_v38, 0.0  ;;  %v14953_v38 = vld [vmem:[#allocation77_spill] sm:$0xff] }
 0x2d6   : > { %v7467_v9 = vmax.f32 %v7435_v28, 0.0  ;;  %v7497_v41 = vadd.f32 %v7496_v20, %v7466_v49  ;;  %v7436_v23 = vadd.f32 %v13353_v48, %v3644_v14  ;;  %v13423_v19 = vadd.f32 %v12869_v42, %v3924_v39  ;;  %v14950_v20 = vld [vmem:[#allocation76_spill] sm:$0xff] }
 0x2d7   : > { %14948 = vst [vmem:[#allocation73_spill] sm:$0xff] %v13419_v29  ;;  %5039 = vmatmul.mubr.bf16.gmra.mrb[84].mxu0 %v12998_v0  ;;  %10614 = vmatmul.mubr.bf16.gmra.mrb[84].mxu1 %v13116_v7  ;;  %v7470_v0 = vmax.f32 %v7438_v8, 0.0 }
 0x2d8   : > { %14949 = vst [vmem:[#allocation21_spill] sm:$0xff] %v13423_v19  ;;  %v7498_v46 = vadd.f32 %v7497_v41, %v7467_v9  ;;  %v7468_v36 = vmax.f32 %v7436_v23, 0.0  ;;  %5048 = vmatprep.mubr.bf16.mxu0 %v14651_v13  ;;  %10617 = vmatprep.mubr.bf16.mxu1 %v13125_v55 }
 0x2da   : > { %v7499_v62 = vadd.f32 %v7498_v46, %v7468_v36  ;;  %v10511_v32 = vpop.f32.mrb[236].mxu0  ;;  %v3928_v49 = vpop.f32.mrb[236].mxu1 }
 0x2db   : > { %v13431_v28 = vadd.f32 %v3928_v49, %v14950_v20  ;;  %v3657_v42 = vpop.f32.mrb[237].mxu0  ;;  %v3930_v58 = vpop.f32.mrb[237].mxu1  ;;  %v7441_v41 = vadd.f32 %v13353_v48, %v10511_v32 }
 0x2dc   : > { %v7500_v53 = vadd.f32 %v7499_v62, %v7469_v21  ;;  %v7439_v14 = vadd.f32 %v13353_v48, %v3657_v42  ;;  %v13435_v16 = vadd.f32 %v12882_v34, %v3930_v58  ;;  %v10512_v39 = vpop.f32.mrb[238].mxu0  ;;  %v3932_v9 = vpop.f32.mrb[238].mxu1 }
 0x2dd   : > { %14951 = vst [vmem:[#allocation74_spill] sm:$0xff] %v13431_v28  ;;  %v13439_v23 = vadd.f32 %v3932_v9, %v14953_v38  ;;  %v3660_v46 = vpop.f32.mrb[239].mxu0  ;;  %v3934_v36 = vpop.f32.mrb[239].mxu1  ;;  %v7442_v21 = vadd.f32 %v13353_v48, %v10512_v39  ;;  %v7473_v32 = vmax.f32 %v7441_v41, 0.0  ;;  %v14959_v41 = vld [vmem:[#allocation80_spill] sm:$0xff] }
 0x2de   : > { %14952 = vst [vmem:[#allocation75_spill] sm:$0xff] %v13435_v16  ;;  %v7471_v49 = vmax.f32 %v7439_v14, 0.0  ;;  %v7501_v20 = vadd.f32 %v7500_v53, %v7470_v0  ;;  %v7440_v28 = vadd.f32 %v13353_v48, %v3660_v46  ;;  %v13443_v8 = vadd.f32 %v12891_v31, %v3934_v36  ;;  %v14956_v53 = vld [vmem:[#allocation78_spill] sm:$0xff] }
 0x2df   : > { %14954 = vst [vmem:[#allocation76_spill] sm:$0xff] %v13439_v23  ;;  %5049 = vmatmul.mubr.bf16.gmra.mrb[88].mxu0 %v13004_v56  ;;  %10618 = vmatmul.mubr.bf16.gmra.mrb[88].mxu1 %v13150_v1  ;;  %v7474_v9 = vmax.f32 %v7442_v21, 0.0 }
 0x2e0   : > { %14955 = vst [vmem:[#allocation77_spill] sm:$0xff] %v13443_v8  ;;  %v7502_v34 = vadd.f32 %v7501_v20, %v7471_v49  ;;  %v7472_v62 = vmax.f32 %v7440_v28, 0.0  ;;  %5058 = vmatprep.mubr.bf16.mxu0 %v14651_v13  ;;  %10621 = vmatprep.mubr.bf16.mxu1 %v13159_v6  ;;  %v13458_v49 = vld [vmem:[%s11223_s12 + $0x300] sm:$0xff]  }
 0x2e2   : > { %v7503_v42 = vadd.f32 %v7502_v34, %v7472_v62  ;;  %v10515_v58 = vpop.f32.mrb[240].mxu0  ;;  %v3938_v0 = vpop.f32.mrb[240].mxu1 }
 0x2e3   : > { %v13451_v31 = vadd.f32 %v3938_v0, %v14956_v53  ;;  %v3673_v14 = vpop.f32.mrb[241].mxu0  ;;  %v3940_v56 = vpop.f32.mrb[241].mxu1  ;;  %v7445_v6 = vadd.f32 %v13353_v48, %v10515_v58 }
 0x2e4   : > { %v7504_v38 = vadd.f32 %v7503_v42, %v7473_v32  ;;  %v7443_v46 = vadd.f32 %v13353_v48, %v3673_v14  ;;  %v13455_v28 = vadd.f32 %v12904_v35, %v3940_v56  ;;  %v10516_v39 = vpop.f32.mrb[242].mxu0  ;;  %v3942_v36 = vpop.f32.mrb[242].mxu1 }
 0x2e5   : > { %14957 = vst [vmem:[#allocation78_spill] sm:$0xff] %v13451_v31  ;;  %v13462_v20 = vadd.f32 %v3942_v36, %v14959_v41  ;;  %v3676_v34 = vpop.f32.mrb[243].mxu0  ;;  %v3944_v62 = vpop.f32.mrb[243].mxu1  ;;  %v7446_v42 = vadd.f32 %v13353_v48, %v10516_v39  ;;  %v7477_v14 = vmax.f32 %v7445_v6, 0.0  ;;  %v13477_v41 = vld [vmem:[%s11223_s12 + $0x308] sm:$0xff]   ;;  %v13629_v31 = vld [vmem:[%s11223_s12 + $0x350] sm:$0xff]  }
 0x2e6   : > { %14958 = vst [vmem:[#allocation105_spill] sm:$0xff] %v13455_v28  ;;  %v7475_v0 = vmax.f32 %v7443_v46, 0.0  ;;  %v7505_v53 = vadd.f32 %v7504_v38, %v7474_v9  ;;  %v7444_v21 = vadd.f32 %v13353_v48, %v3676_v34  ;;  %v13466_v32 = vadd.f32 %v12916_v30, %v3944_v62  ;;  %v14962_v46 = vld [vmem:[#allocation82_spill] sm:$0xff] }
 0x2e7   : > { %14960 = vst [vmem:[#allocation80_spill] sm:$0xff] %v13462_v20  ;;  %5059 = vmatmul.mubr.bf16.gmra.mrb[92].mxu0 %v13035_v43  ;;  %10622 = vmatmul.mubr.bf16.gmra.mrb[92].mxu1 %v13184_v59  ;;  %v7478_v59 = vmax.f32 %v7446_v42, 0.0  ;;  %v11065_v42 = vld [vmem:[%s14623_s1 + $0x30] ss:$24 sps:$4 sm:$0xff]  }
 0x2e8   : > { %14961 = vst [vmem:[#allocation106_spill] sm:$0xff] %v13466_v32  ;;  %v7506_v35 = vadd.f32 %v7505_v53, %v7475_v0  ;;  %v7476_v58 = vmax.f32 %v7444_v21, 0.0  ;;  %5068 = vmatprep.mubr.bf16.mxu0 %v14651_v13  ;;  %10641 = vmatprep.mubr.bf16.mxu1 %v13458_v49  ;;  %v14965_v21 = vld [vmem:[#allocation83_spill] sm:$0xff] }
 0x2ea   : > { %v7507_v56 = vadd.f32 %v7506_v35, %v7476_v58  ;;  %v10519_v9 = vpop.f32.mrb[244].mxu0  ;;  %v3948_v38 = vpop.f32.mrb[244].mxu1 }
 0x2eb   : > { %v13474_v30 = vadd.f32 %v3948_v38, %v14962_v46  ;;  %v3689_v36 = vpop.f32.mrb[245].mxu0  ;;  %v3950_v43 = vpop.f32.mrb[245].mxu1  ;;  %v7449_v53 = vadd.f32 %v13353_v48, %v10519_v9  ;;  %v13488_v46 = vld [vmem:[%s11223_s12 + $0x310] sm:$0xff]  }
 0x2ec   : > { %v7508_v34 = vadd.f32 %v7507_v56, %v7477_v14  ;;  %v7447_v39 = vadd.f32 %v13353_v48, %v3689_v36  ;;  %v13481_v62 = vadd.f32 %v12932_v27, %v3950_v43  ;;  %v10520_v0 = vpop.f32.mrb[246].mxu0  ;;  %v3952_v6 = vpop.f32.mrb[246].mxu1 }
 0x2ed   : > { %14963 = vst [vmem:[#allocation82_spill] sm:$0xff] %v13474_v30  ;;  %v13485_v35 = vadd.f32 %v3952_v6, %v14965_v21  ;;  %v3692_v58 = vpop.f32.mrb[247].mxu0  ;;  %v3954_v38 = vpop.f32.mrb[247].mxu1  ;;  %v7450_v43 = vadd.f32 %v13353_v48, %v10520_v0  ;;  %v14968_v21 = vld [vmem:[#allocation30_spill] sm:$0xff]  ;;  %v14979_v30 = vld [vmem:[#allocation33_spill] sm:$0xff] }
 0x2ee   : > { %14964 = vst [vmem:[#allocation107_spill] sm:$0xff] %v13481_v62  ;;  %v7479_v14 = vmax.f32 %v7447_v39, 0.0  ;;  %v7509_v56 = vadd.f32 %v7508_v34, %v7478_v59  ;;  %v7448_v27 = vadd.f32 %v13353_v48, %v3692_v58  ;;  %v13495_v36 = vadd.f32 %v12947_v24, %v3954_v38  ;;  %v11068_v24 = vld [vmem:[%s14623_s1 + $0x60] ss:$24 sps:$4 sm:$0xff]  }
 0x2ef   : > { %14966 = vst [vmem:[#allocation83_spill] sm:$0xff] %v13485_v35  ;;  %5069 = vmatmul.mubr.bf16.gmra.mrb[96].mxu0 %v13044_v51  ;;  %10642 = vmatmul.mubr.bf16.vlgmr.msra.gmra.mrb[96].mxu1 %v13477_v41  ;;  %v7481_v51 = vmax.f32 %v7449_v53, 0.0  ;;  %v13517_v53 = vld [vmem:[%s11223_s12 + $0x320] sm:$0xff]  }
 0x2f0   : > { %14967 = vst [vmem:[#allocation108_spill] sm:$0xff] %v13495_v36  ;;  %v7510_v9 = vadd.f32 %v7509_v56, %v7479_v14  ;;  %v7480_v6 = vmax.f32 %v7448_v27, 0.0  ;;  %10674 = vmatpush3.bf16.msra.mxu1 %v13387_v60  ;;  %5078 = vmatprep.mubr.bf16.mxu0 %v14651_v13  ;;  %v13510_v60 = vld [vmem:[%s11223_s12 + $0x318] sm:$0xff]   ;;  %v7482_v14 = vmax.f32 %v7450_v43, 0.0 }
 0x2f1   : > { %10645 = vmatprep.mubr.bf16.mxu1 %v13488_v46  ;;  %10675 = vmatprep.subr.bf16.mxu1 %v11065_v42 }
 0x2f2   : > { %v7511_v59 = vadd.f32 %v7510_v9, %v7480_v6  ;;  %v10523_v34 = vpop.f32.mrb[248].mxu0  ;;  %v3958_v39 = vpop.f32.mrb[248].mxu1  ;;  %v14971_v6 = vld [vmem:[#allocation84_spill] sm:$0xff] }
 0x2f3   : > { %v13507_v58 = vadd.f32 %v3958_v39, %v14968_v21  ;;  %v3705_v0 = vpop.f32.mrb[249].mxu0  ;;  %v3960_v38 = vpop.f32.mrb[249].mxu1  ;;  %v7453_v9 = vadd.f32 %v13353_v48, %v10523_v34 }
 0x2f4   : > { %v7512_v56 = vadd.f32 %v7511_v59, %v7481_v51  ;;  %v7451_v27 = vadd.f32 %v13353_v48, %v3705_v0  ;;  %v13514_v36 = vadd.f32 %v12967_v26, %v3960_v38  ;;  %v10524_v35 = vpop.f32.mrb[250].mxu0  ;;  %v3962_v62 = vpop.f32.mrb[250].mxu1  ;;  %10676 = vmatpush3.bf16.msra.mxu1 %v11065_v42  ;;  %v14973_v0 = vld [vmem:[#allocation48_spill] sm:$0xff] }
 0x2f5   : > { %14969 = vst [vmem:[#allocation30_spill] sm:$0xff] %v13507_v58  ;;  %v13521_v39 = vadd.f32 %v3962_v62, %v14971_v6  ;;  %v3708_v21 = vpop.f32.mrb[251].mxu0  ;;  %v3964_v58 = vpop.f32.mrb[251].mxu1  ;;  %10677 = vmatprep.subr.bf16.mxu1 %v11068_v24  ;;  %v11074_v42 = vld [vmem:[%s14623_s1 + $0x90] ss:$24 sps:$4 sm:$0xff]   ;;  %v7454_v34 = vadd.f32 %v13353_v48, %v10524_v35 }
 0x2f6   : > { %14970 = vst [vmem:[#allocation109_spill] sm:$0xff] %v13514_v36  ;;  %v7483_v43 = vmax.f32 %v7451_v27, 0.0  ;;  %v7513_v51 = vadd.f32 %v7512_v56, %v7482_v14  ;;  %v7452_v59 = vadd.f32 %v13353_v48, %v3708_v21  ;;  %v13525_v26 = vadd.f32 %v14973_v0, %v3964_v58  ;;  %v14975_v6 = vld [vmem:[#allocation85_spill] sm:$0xff] }
 0x2f7   : > { %14972 = vst [vmem:[#allocation84_spill] sm:$0xff] %v13521_v39  ;;  %5079 = vmatmul.mubr.bf16.gmra.mrb[100].mxu0 %v13077_v52  ;;  %10646 = vmatmul.mubr.bf16.gmra.mrb[100].mxu1 %v13510_v60  ;;  %v7485_v58 = vmax.f32 %v7453_v9, 0.0  ;;  %v11077_v52 = vld [vmem:[%s14623_s1 + $0xc0] ss:$24 sps:$4 sm:$0xff]   ;;  %v14977_v9 = vld [vmem:[#allocation49_spill] sm:$0xff] }
 0x2f8   : > { %14974 = vst [vmem:[#allocation48_spill] sm:$0xff] %v13525_v26  ;;  %v7514_v62 = vadd.f32 %v7513_v51, %v7483_v43  ;;  %v7484_v38 = vmax.f32 %v7452_v59, 0.0  ;;  %5088 = vmatprep.mubr.bf16.mxu0 %v14651_v13  ;;  %10649 = vmatprep.mubr.bf16.mxu1 %v13517_v53  ;;  %v13542_v51 = vld [vmem:[%s11223_s12 + $0x328] sm:$0xff]   ;;  %v7486_v59 = vmax.f32 %v7454_v34, 0.0  ;;  %v13549_v39 = vld [vmem:[%s11223_s12 + $0x330] sm:$0xff]  }
 0x2f9   : > { %10678 = vmatpush3.bf16.msra.mxu1 %v11068_v24 }
 0x2fa   : > { %v7515_v14 = vadd.f32 %v7514_v62, %v7484_v38  ;;  %v10527_v56 = vpop.f32.mrb[252].mxu0  ;;  %v3968_v27 = vpop.f32.mrb[252].mxu1  ;;  %10679 = vmatprep.subr.bf16.mxu1 %v11074_v42 }
 0x2fb   : > { %v13539_v21 = vadd.f32 %v3968_v27, %v14975_v6  ;;  %v3721_v35 = vpop.f32.mrb[253].mxu0  ;;  %v3970_v43 = vpop.f32.mrb[253].mxu1  ;;  %v7457_v36 = vadd.f32 %v13353_v48, %v10527_v56 }
 0x2fc   : > { %v7516_v0 = vadd.f32 %v7515_v14, %v7485_v58  ;;  %v7455_v24 = vadd.f32 %v13353_v48, %v3721_v35  ;;  %v13546_v62 = vadd.f32 %v14977_v9, %v3970_v43  ;;  %v10528_v38 = vpop.f32.mrb[254].mxu0  ;;  %v3972_v26 = vpop.f32.mrb[254].mxu1  ;;  %v14981_v14 = vld [vmem:[#allocation50_spill] sm:$0xff]  ;;  %v11083_v43 = vld [vmem:[%s14623_s1 + $0xf0] ss:$24 sps:$4 sm:$0xff]  }
 0x2fd   : > { %14976 = vst [vmem:[#allocation85_spill] sm:$0xff] %v13539_v21  ;;  %v13553_v27 = vadd.f32 %v3972_v26, %v14979_v30  ;;  %v3724_v6 = vpop.f32.mrb[255].mxu0  ;;  %v3974_v21 = vpop.f32.mrb[255].mxu1  ;;  %10680 = vmatpush3.bf16.msra.mxu1 %v11074_v42  ;;  %v7458_v26 = vadd.f32 %v13353_v48, %v10528_v38  ;;  %v7489_v56 = vmax.f32 %v7457_v36, 0.0  ;;  %v13579_v36 = vld [vmem:[%s14625_s3] ss:$0 sm:$0xff] }
 0x2fe   : > { %14978 = vst [vmem:[#allocation49_spill] sm:$0xff] %v13546_v62  ;;  %v7487_v32 = vmax.f32 %v7455_v24, 0.0  ;;  %v7517_v34 = vadd.f32 %v7516_v0, %v7486_v59  ;;  %v7456_v58 = vadd.f32 %v13353_v48, %v3724_v6  ;;  %v13557_v35 = vadd.f32 %v14981_v14, %v3974_v21  ;;  %10681 = vmatprep.subr.bf16.mxu1 %v11077_v52  ;;  %v14985_v48 = vld [vmem:[#allocation37_spill] sm:$0xff]  ;;  %v14986_v14 = vld [vmem:[#allocation34_spill] sm:$0xff] }
 0x2ff   : > { %14980 = vst [vmem:[#allocation33_spill] sm:$0xff] %v13553_v27  ;;  %5089 = vmatmul.mubr.bf16.gmra.mrb[104].mxu0 %v13086_v4  ;;  %10650 = vmatmul.mubr.bf16.gmra.mrb[104].mxu1 %v13542_v51  ;;  %v11086_v4 = vld [vmem:[%s14623_s1 + $0x120] ss:$24 sps:$4 sm:$0xff]  }
 0x300   : > { %14982 = vst [vmem:[#allocation50_spill] sm:$0xff] %v13557_v35  ;;  %v7518_v30 = vadd.f32 %v7517_v34, %v7487_v32  ;;  %v7488_v42 = vmax.f32 %v7456_v58, 0.0  ;;  %5098 = vmatprep.mubr.bf16.mxu0 %v14651_v13  ;;  %10653 = vmatprep.mubr.bf16.mxu1 %v13549_v39  ;;  %v14983_v32 = vld [vmem:[#allocation86_spill] sm:$0xff]  ;;  %v7490_v34 = vmax.f32 %v7458_v26, 0.0  ;;  %v14990_v35 = vld [vmem:[#allocation39_spill] sm:$0xff] }
 0x301   : > { %10682 = vmatpush3.bf16.msra.mxu1 %v11077_v52  ;;  %v13582_v52 = vld [vmem:[%s11223_s12 + $0x338] sm:$0xff]  }
 0x302   : > { %v7519_v21 = vadd.f32 %v7518_v30, %v7488_v42  ;;  %v3978_v59 = vpop.f32.mrb[0].mxu1  ;;  %v4251_v0 = vpop.f32.mrb[0].mxu0  ;;  %10683 = vmatprep.subr.bf16.mxu1 %v11083_v43 }
 0x303   : > { %v13571_v24 = vadd.f32 %v3978_v59, %v14983_v32  ;;  %v13574_v9 = vadd.f32 %v14985_v48, %v4251_v0  ;;  %v3980_v38 = vpop.f32.mrb[1].mxu1  ;;  %v4253_v6 = vpop.f32.mrb[1].mxu0  ;;  %v13589_v0 = vld [vmem:[%s11223_s12 + $0x340] sm:$0xff]  }
 0x304   : > { %v7520_v58 = vadd.f32 %v7519_v21, %v7489_v56  ;;  %v13585_v30 = vadd.f32 %v14986_v14, %v3980_v38  ;;  %v8204_v42 = vadd.f32 %v13041_v2, %v4253_v6  ;;  %v3982_v59 = vpop.f32.mrb[2].mxu1  ;;  %v4255_v32 = vpop.f32.mrb[2].mxu0  ;;  %v14988_v48 = vld [vmem:[#allocation87_spill] sm:$0xff]  ;;  %v14993_v2 = vld [vmem:[#allocation20_spill] sm:$0xff] }
 0x305   : > { %14984 = vst [vmem:[#allocation86_spill] sm:$0xff] %v13571_v24  ;;  %v13592_v24 = vadd.f32 %v3982_v59, %v14988_v48  ;;  %v13595_v27 = vadd.f32 %v14990_v35, %v4255_v32  ;;  %v3984_v62 = vpop.f32.mrb[3].mxu1  ;;  %v4257_v20 = vpop.f32.mrb[3].mxu0  ;;  %10684 = vmatpush3.bf16.msra.mxu1 %v11083_v43  ;;  %v14991_v21 = vld [vmem:[#allocation3_spill] sm:$0xff]  ;;  %v11092_v14 = vld [vmem:[%s14623_s1 + $0x150] ss:$24 sps:$4 sm:$0xff]  }
 0x306   : > { %14987 = vst [vmem:[#allocation37_spill] sm:$0xff] %v13585_v30  ;;  %v7521_v26 = vadd.f32 %v7520_v58, %v7490_v34  ;;  %v8242_v56 = vadd.f32 %v13579_v36, %v8204_v42  ;;  %v13599_v38 = vadd.f32 %v14991_v21, %v3984_v62  ;;  %v8205_v6 = vadd.f32 %v14993_v2, %v4257_v20  ;;  %v14994_v59 = vld [vmem:[#allocation88_spill] sm:$0xff] }
 0x307   : > { %14989 = vst [vmem:[#allocation34_spill] sm:$0xff] %v13592_v24  ;;  %10685 = vmatprep.subr.bf16.mxu1 %v11086_v4  ;;  %5099 = vmatmul.mubr.bf16.gmra.mrb[108].mxu0 %v13116_v7  ;;  %v13613_v7 = vld [vmem:[%s14623_s1 + $0x14] ss:$24 sps:$4 sm:$0xff]  }
 0x308   : > { %14992 = vst [vmem:[#allocation87_spill] sm:$0xff] %v13599_v38  ;;  %10654 = vmatmul.mubr.bf16.gmra.mrb[108].mxu1 %v13582_v52  ;;  %v7522_v35 = vrot.slane %v7521_v26, 4  ;;  %v8243_v43 = vadd.f32 %v13579_v36, %v8205_v6  ;;  %5108 = vmatprep.mubr.bf16.mxu0 %v14651_v13  ;;  %v8274_v20 = vmax.f32 %v8242_v56, 0.0  ;;  %v14996_v48 = vld [vmem:[#allocation40_spill] sm:$0xff] }
 0x309   : > { %10657 = vmatprep.mubr.bf16.mxu1 %v13589_v0  ;;  %10686 = vmatpush3.bf16.msra.mxu1 %v11086_v4  ;;  %v14999_v38 = vld [vmem:[#allocation36_spill] sm:$0xff] }
 0x30a   : > { %v7523_v62 = vadd.f32 %v7522_v35, %v7521_v26  ;;  %v8275_v34 = vmax.f32 %v8243_v43, 0.0  ;;  %v3988_v58 = vpop.f32.mrb[4].mxu1  ;;  %v4261_v42 = vpop.f32.mrb[4].mxu0  ;;  %10687 = vmatprep.subr.bf16.mxu1 %v11092_v14  ;;  %v13622_v26 = vld [vmem:[%s11223_s12 + $0x348] sm:$0xff]   ;;  %v14997_v35 = vld [vmem:[#allocation51_spill] sm:$0xff] }
 0x30b   : > { %v13616_v32 = vadd.f32 %v3988_v58, %v14994_v59  ;;  %v13619_v21 = vadd.f32 %v14996_v48, %v4261_v42  ;;  %v3990_v2 = vpop.f32.mrb[5].mxu1  ;;  %v4263_v4 = vpop.f32.mrb[5].mxu0  ;;  %v15000_v58 = vld [vmem:[#allocation89_spill] sm:$0xff]  ;;  %v15002_v42 = vld [vmem:[#allocation90_spill] sm:$0xff] }
 0x30c   : > { %v7524_v56 = vrot.slane %v7523_v62, 2  ;;  %v8306_v6 = vadd.f32 %v8275_v34, %v8274_v20  ;;  %v13625_v43 = vadd.f32 %v14997_v35, %v3990_v2  ;;  %v8206_v24 = vadd.f32 %v14999_v38, %v4263_v4  ;;  %v3992_v30 = vpop.f32.mrb[6].mxu1  ;;  %v4265_v28 = vpop.f32.mrb[6].mxu0  ;;  %v15004_v38 = vld [vmem:[#allocation4_spill] sm:$0xff] }
 0x30d   : > { %14995 = vst [vmem:[#allocation39_spill] sm:$0xff] %v13616_v32  ;;  %v13632_v59 = vadd.f32 %v3992_v30, %v15000_v58  ;;  %v13635_v48 = vadd.f32 %v15002_v42, %v4265_v28  ;;  %v3994_v32 = vpop.f32.mrb[7].mxu1  ;;  %v4267_v8 = vpop.f32.mrb[7].mxu0  ;;  %10688 = vmatpush3.bf16.msra.mxu1 %v11092_v14 }
 0x30e   : > { %14998 = vst [vmem:[#allocation3_spill] sm:$0xff] %v13625_v43  ;;  %v7525_v23 = vadd.f32 %v7524_v56, %v7523_v62  ;;  %v8244_v20 = vadd.f32 %v13579_v36, %v8206_v24  ;;  %v13639_v34 = vadd.f32 %v13089_v33, %v3994_v32  ;;  %v8207_v2 = vadd.f32 %v15004_v38, %v4267_v8  ;;  %v15005_v32 = vld [vmem:[#allocation91_spill] sm:$0xff]  ;;  %v15007_v56 = vld [vmem:[#allocation92_spill] sm:$0xff]  ;;  %v15024_v43 = vld [vmem:[#allocation10_spill] sm:$0xff] }
 0x30f   : > { %15001 = vst [vmem:[#allocation20_spill] sm:$0xff] %v13632_v59  ;;  %10721 = vmatprep.subr.bf16.mxu1 %v13613_v7  ;;  %5109 = vmatmul.mubr.bf16.gmra.mrb[112].mxu0 %v13125_v55 }
 0x310   : > { %15003 = vst [vmem:[#allocation88_spill] sm:$0xff] %v13639_v34  ;;  %10658 = vmatmul.mubr.bf16.gmra.mrb[112].mxu1 %v13622_v26  ;;  %v7526_v28 = vrot.slane %v7525_v23, 1  ;;  %v8276_v30 = vmax.f32 %v8244_v20, 0.0  ;;  %v8245_v4 = vadd.f32 %v13579_v36, %v8207_v2  ;;  %5118 = vmatprep.mubr.bf16.mxu0 %v14651_v13  ;;  %v13655_v20 = vld [vmem:[%s11223_s12 + $0x358] sm:$0xff]  }
 0x311   : > { %10661 = vmatprep.mubr.bf16.mxu1 %v13629_v31 }
 0x312   : > { %v7527_v24 = vadd.f32 %v7526_v28, %v7525_v23  ;;  %v8307_v33 = vadd.f32 %v8306_v6, %v8276_v30  ;;  %v8277_v14 = vmax.f32 %v8245_v4, 0.0  ;;  %v3998_v8 = vpop.f32.mrb[8].mxu1  ;;  %v4271_v62 = vpop.f32.mrb[8].mxu0  ;;  %v13662_v4 = vld [vmem:[%s11223_s12 + $0x360] sm:$0xff]  }
 0x313   : > { %v13649_v55 = vadd.f32 %v3998_v8, %v15005_v32  ;;  %v13652_v35 = vadd.f32 %v15007_v56, %v4271_v62  ;;  %v4000_v58 = vpop.f32.mrb[9].mxu1  ;;  %v4273_v42 = vpop.f32.mrb[9].mxu0  ;;  %v15009_v8 = vld [vmem:[#allocation93_spill] sm:$0xff] }
 0x314   : > { %v7528_v38 = vmul.f32 0.00390625, %v7527_v24  ;;  %v8308_v2 = vadd.f32 %v8307_v33, %v8277_v14  ;;  %v13658_v23 = vadd.f32 %v13110_v5, %v4000_v58  ;;  %v8208_v6 = vadd.f32 %v13083_v61, %v4273_v42  ;;  %v4002_v28 = vpop.f32.mrb[10].mxu1  ;;  %v4275_v30 = vpop.f32.mrb[10].mxu0  ;;  %v15011_v62 = vld [vmem:[#allocation41_spill] sm:$0xff]  ;;  %v15014_v33 = vld [vmem:[#allocation55_spill] sm:$0xff] }
 0x315   : > { %15006 = vst [vmem:[#allocation40_spill] sm:$0xff] %v13649_v55  ;;  %v13665_v32 = vadd.f32 %v4002_v28, %v15009_v8  ;;  %v13668_v56 = vadd.f32 %v15011_v62, %v4275_v30  ;;  %v4004_v55 = vpop.f32.mrb[11].mxu1  ;;  %v4277_v34 = vpop.f32.mrb[11].mxu0  ;;  %v11085_v62 = vld [vmem:[%s11223_s12 + $0x368] sm:$0xff]  }
 0x316   : > { %15008 = vst [vmem:[#allocation51_spill] sm:$0xff] %v13658_v23  ;;  %v13672_v24 = vsel %vm7937_vm3, %v13107_v50, %v7528_v38  ;;  %v8246_v5 = vadd.f32 %v13579_v36, %v8208_v6  ;;  %v13676_v61 = vadd.f32 %v13128_v15, %v4004_v55  ;;  %v8209_v14 = vadd.f32 %v15014_v33, %v4277_v34  ;;  %v15015_v55 = vld [vmem:[#allocation94_spill] sm:$0xff]  ;;  %v15018_v33 = vld [vmem:[#allocation57_spill] sm:$0xff]  ;;  %v15021_v23 = vld [vmem:[#allocation95_spill] sm:$0xff] }
 0x317   : > { %15010 = vst [vmem:[#allocation36_spill] sm:$0xff] %v13665_v32  ;;  %15012 = vst [vmem:[#allocation89_spill] sm:$0xff] %v13672_v24  ;;  %5119 = vmatmul.mubr.bf16.gmra.mrb[116].mxu0 %v13150_v1  ;;  %v15017_v34 = vld [vmem:[#allocation42_spill] sm:$0xff] }
 0x318   : > { %15013 = vst [vmem:[#allocation90_spill] sm:$0xff] %v13676_v61  ;;  %10662 = vmatmul.mubr.bf16.gmra.mrb[116].mxu1 %v13655_v20  ;;  %v8278_v58 = vmax.f32 %v8246_v5, 0.0  ;;  %v8247_v42 = vadd.f32 %v13579_v36, %v8209_v14  ;;  %5128 = vmatprep.mubr.bf16.mxu0 %v14651_v13  ;;  %v15020_v61 = vld [vmem:[#allocation5_spill] sm:$0xff] }
 0x319   : > { %10665 = vmatprep.mubr.bf16.mxu1 %v13662_v4 }
 0x31a   : > { %v8309_v50 = vadd.f32 %v8308_v2, %v8278_v58  ;;  %v8279_v38 = vmax.f32 %v8247_v42, 0.0  ;;  %v4008_v6 = vpop.f32.mrb[12].mxu1  ;;  %v4281_v15 = vpop.f32.mrb[12].mxu0  ;;  %v11090_v42 = vld [vmem:[%s11223_s12 + $0x370] sm:$0xff]  }
 0x31b   : > { %v13685_v28 = vadd.f32 %v4008_v6, %v15015_v55  ;;  %v13688_v30 = vadd.f32 %v15017_v34, %v4281_v15  ;;  %v4010_v1 = vpop.f32.mrb[13].mxu1  ;;  %v4283_v8 = vpop.f32.mrb[13].mxu0  ;;  %v15023_v6 = vld [vmem:[#allocation43_spill] sm:$0xff] }
 0x31c   : > { %v8310_v5 = vadd.f32 %v8309_v50, %v8279_v38  ;;  %v13692_v14 = vadd.f32 %v15018_v33, %v4010_v1  ;;  %v8210_v32 = vadd.f32 %v15020_v61, %v4283_v8  ;;  %v4012_v2 = vpop.f32.mrb[14].mxu1  ;;  %v4285_v58 = vpop.f32.mrb[14].mxu0  ;;  %v15026_v38 = vld [vmem:[#allocation52_spill] sm:$0xff]  ;;  %v11134_v61 = vld [vmem:[%s11223_s12 + $0x2f0] sm:$0xff]  }
 0x31d   : > { %15016 = vst [vmem:[#allocation4_spill] sm:$0xff] %v13685_v28  ;;  %v13697_v59 = vadd.f32 %v4012_v2, %v15021_v23  ;;  %v13700_v55 = vadd.f32 %v15023_v6, %v4285_v58  ;;  %v4014_v15 = vpop.f32.mrb[15].mxu1  ;;  %v4287_v34 = vpop.f32.mrb[15].mxu0  ;;  %v15027_v6 = vld [vmem:[#allocation96_spill] sm:$0xff] }
 0x31e   : > { %15019 = vst [vmem:[#allocation91_spill] sm:$0xff] %v13692_v14  ;;  %v8248_v28 = vadd.f32 %v13579_v36, %v8210_v32  ;;  %v13704_v50 = vadd.f32 %v15024_v43, %v4014_v15  ;;  %v8211_v1 = vadd.f32 %v15026_v38, %v4287_v34  ;;  %v15029_v15 = vld [vmem:[#allocation44_spill] sm:$0xff]  ;;  %v15034_v14 = vld [vmem:[#allocation97_spill] sm:$0xff] }
 0x31f   : > { %15022 = vst [vmem:[#allocation92_spill] sm:$0xff] %v13697_v59  ;;  %5129 = vmatmul.mubr.bf16.gmra.mrb[120].mxu0 %v11134_v61  ;;  %v15033_v59 = vld [vmem:[#allocation58_spill] sm:$0xff] }
 0x320   : > { %15025 = vst [vmem:[#allocation93_spill] sm:$0xff] %v13704_v50  ;;  %10666 = vmatmul.mubr.bf16.gmra.mrb[120].mxu1 %v11085_v62  ;;  %v8280_v8 = vmax.f32 %v8248_v28, 0.0  ;;  %v8249_v23 = vadd.f32 %v13579_v36, %v8211_v1  ;;  %5138 = vmatprep.mubr.bf16.mxu0 %v14651_v13  ;;  %v11091_v28 = vld [vmem:[%s11223_s12 + $0x378] sm:$0xff]   ;;  %v15031_v1 = vld [vmem:[#allocation11_spill] sm:$0xff] }
 0x321   : > { %10669 = vmatprep.mubr.bf16.mxu1 %v11090_v42 }
 0x322   : > { %v8311_v33 = vadd.f32 %v8310_v5, %v8280_v8  ;;  %v8281_v2 = vmax.f32 %v8249_v23, 0.0  ;;  %v4018_v58 = vpop.f32.mrb[16].mxu1  ;;  %v4291_v32 = vpop.f32.mrb[16].mxu0  ;;  %v13722_v23 = vld [vmem:[%s11223_s12 + $0x380] sm:$0xff]  }
 0x323   : > { %v13711_v43 = vadd.f32 %v4018_v58, %v15027_v6  ;;  %v13714_v34 = vadd.f32 %v15029_v15, %v4291_v32  ;;  %v4020_v38 = vpop.f32.mrb[17].mxu1  ;;  %v4293_v62 = vpop.f32.mrb[17].mxu0  ;;  %v15036_v6 = vld [vmem:[#allocation98_spill] sm:$0xff] }
 0x324   : > { %v8312_v61 = vadd.f32 %v8311_v33, %v8281_v2  ;;  %v13718_v50 = vadd.f32 %v15031_v1, %v4020_v38  ;;  %v8212_v42 = vadd.f32 %v15033_v59, %v4293_v62  ;;  %v4022_v5 = vpop.f32.mrb[18].mxu1  ;;  %v4295_v8 = vpop.f32.mrb[18].mxu0  ;;  %v15039_v2 = vld [vmem:[#allocation60_spill] sm:$0xff]  ;;  %v11135_v59 = vld [vmem:[%s11223_s12 + $0x2f8] sm:$0xff]  }
 0x325   : > { %15028 = vst [vmem:[#allocation41_spill] sm:$0xff] %v13711_v43  ;;  %15030 = vst [vmem:[#allocation55_spill] sm:$0xff] %v13714_v34  ;;  %v13725_v58 = vadd.f32 %v4022_v5, %v15034_v14  ;;  %v13728_v32 = vadd.f32 %v15036_v6, %v4295_v8  ;;  %v4024_v15 = vpop.f32.mrb[19].mxu1  ;;  %v4297_v43 = vpop.f32.mrb[19].mxu0  ;;  %v15092_v34 = vld [vmem:[#allocation23_spill] sm:$0xff] }
 0x326   : > { %15032 = vst [vmem:[#allocation94_spill] sm:$0xff] %v13718_v50  ;;  %v8250_v16 = vadd.f32 %v13579_v36, %v8212_v42  ;;  %v13732_v33 = vadd.f32 %v13193_v3, %v4024_v15  ;;  %v8213_v38 = vadd.f32 %v15039_v2, %v4297_v43  ;;  %v15040_v3 = vld [vmem:[#allocation99_spill] sm:$0xff]  ;;  %v15042_v43 = vld [vmem:[#allocation45_spill] sm:$0xff] }
 0x327   : > { %15035 = vst [vmem:[#allocation42_spill] sm:$0xff] %v13725_v58  ;;  %15037 = vst [vmem:[#allocation57_spill] sm:$0xff] %v13728_v32  ;;  %5139 = vmatmul.mubr.bf16.gmra.mrb[124].mxu0 %v11135_v59  ;;  %v15045_v58 = vld [vmem:[#allocation100_spill] sm:$0xff] }
 0x328   : > { %15038 = vst [vmem:[#allocation5_spill] sm:$0xff] %v13732_v33  ;;  %10670 = vmatmul.mubr.bf16.gmra.mrb[124].mxu1 %v11091_v28  ;;  %v8282_v62 = vmax.f32 %v8250_v16, 0.0  ;;  %v8251_v14 = vadd.f32 %v13579_v36, %v8213_v38  ;;  %5984 = vmatprep.mubr.bf16.mxu0 %v14651_v13  ;;  %v13746_v16 = vld [vmem:[%s11223_s12 + $0x388] sm:$0xff]   ;;  %v15044_v33 = vld [vmem:[#allocation53_spill] sm:$0xff] }
 0x329   : > { %10689 = vmatprep.mubr.bf16.mxu1 %v13722_v23 }
 0x32a   : > { %v8313_v1 = vadd.f32 %v8312_v61, %v8282_v62  ;;  %v8283_v5 = vmax.f32 %v8251_v14, 0.0  ;;  %v4028_v8 = vpop.f32.mrb[20].mxu1  ;;  %v4301_v42 = vpop.f32.mrb[20].mxu0 }
 0x32b   : > { %v13740_v6 = vadd.f32 %v4028_v8, %v15040_v3  ;;  %v13743_v15 = vadd.f32 %v15042_v43, %v4301_v42  ;;  %v4030_v2 = vpop.f32.mrb[21].mxu1  ;;  %v4303_v28 = vpop.f32.mrb[21].mxu0  ;;  %v15047_v8 = vld [vmem:[#allocation46_spill] sm:$0xff] }
 0x32c   : > { %v8314_v38 = vadd.f32 %v8313_v1, %v8283_v5  ;;  %v13749_v59 = vadd.f32 %v13209_v44, %v4030_v2  ;;  %v8214_v61 = vadd.f32 %v15044_v33, %v4303_v28  ;;  %v4032_v62 = vpop.f32.mrb[22].mxu1  ;;  %v4305_v14 = vpop.f32.mrb[22].mxu0  ;;  %v11098_v1 = vld [vmem:[%s14623_s1 + $0x44] ss:$24 sps:$4 sm:$0xff]   ;;  %v15050_v5 = vld [vmem:[#allocation56_spill] sm:$0xff] }
 0x32d   : > { %15041 = vst [vmem:[#allocation95_spill] sm:$0xff] %v13740_v6  ;;  %v13753_v50 = vadd.f32 %v4032_v62, %v15045_v58  ;;  %v13756_v3 = vadd.f32 %v15047_v8, %v4305_v14  ;;  %v4034_v42 = vpop.f32.mrb[23].mxu1  ;;  %v4307_v43 = vpop.f32.mrb[23].mxu0  ;;  %v13759_v6 = vld [vmem:[%s11223_s12 + $0x390] sm:$0xff]   ;;  %v15051_v8 = vld [vmem:[#allocation14_spill] sm:$0xff] }
 0x32e   : > { %15043 = vst [vmem:[#allocation43_spill] sm:$0xff] %v13749_v59  ;;  %v8252_v44 = vadd.f32 %v13579_v36, %v8214_v61  ;;  %v13766_v33 = vadd.f32 %v13224_v10, %v4034_v42  ;;  %v8215_v2 = vadd.f32 %v15050_v5, %v4307_v43  ;;  %v11101_v10 = vld [vmem:[%s14623_s1 + $0x74] ss:$24 sps:$4 sm:$0xff]   ;;  %v15053_v43 = vld [vmem:[#allocation47_spill] sm:$0xff]  ;;  %v15056_v59 = vld [vmem:[#allocation62_spill] sm:$0xff] }
 0x32f   : > { %15046 = vst [vmem:[#allocation10_spill] sm:$0xff] %v13753_v50  ;;  %15048 = vst [vmem:[#allocation52_spill] sm:$0xff] %v13756_v3  ;;  %5985 = vmatmul.mubr.bf16.vlgmr.msra.gmra.mrb[128].mxu0 %v13458_v49  ;;  %v15082_v3 = vld [vmem:[#allocation104_spill] sm:$0xff] }
 0x330   : > { %15049 = vst [vmem:[#allocation96_spill] sm:$0xff] %v13766_v33  ;;  %10690 = vmatmul.mubr.bf16.vlgmr.msra.gmra.mrb[128].mxu1 %v13746_v16  ;;  %v8284_v58 = vmax.f32 %v8252_v44, 0.0  ;;  %v8253_v28 = vadd.f32 %v13579_v36, %v8215_v2  ;;  %5994 = vmatprep.mubr.bf16.mxu0 %v14651_v13  ;;  %v13785_v2 = vld [vmem:[%s11223_s12 + $0x398] sm:$0xff]  }
 0x331   : > { %10722 = vmatpush3.bf16.msra.mxu1 %v13613_v7  ;;  %10693 = vmatprep.mubr.bf16.mxu1 %v13759_v6 }
 0x332   : > { %10723 = vmatprep.subr.bf16.mxu1 %v11098_v1  ;;  %v8315_v61 = vadd.f32 %v8314_v38, %v8284_v58  ;;  %v8285_v49 = vmax.f32 %v8253_v28, 0.0  ;;  %v4038_v62 = vpop.f32.mrb[24].mxu1  ;;  %v4311_v14 = vpop.f32.mrb[24].mxu0  ;;  %v13792_v28 = vld [vmem:[%s11223_s12 + $0x3a0] sm:$0xff]  }
 0x333   : > { %v13779_v42 = vadd.f32 %v4038_v62, %v15051_v8  ;;  %v13782_v44 = vadd.f32 %v15053_v43, %v4311_v14  ;;  %v4040_v7 = vpop.f32.mrb[25].mxu1  ;;  %v4313_v5 = vpop.f32.mrb[25].mxu0  ;;  %v15057_v62 = vld [vmem:[#allocation15_spill] sm:$0xff]  ;;  %v15059_v14 = vld [vmem:[#allocation16_spill] sm:$0xff] }
 0x334   : > { %v8316_v33 = vadd.f32 %v8315_v61, %v8285_v49  ;;  %v13788_v50 = vadd.f32 %v13256_v63, %v4040_v7  ;;  %v8216_v24 = vadd.f32 %v15056_v59, %v4313_v5  ;;  %v4042_v38 = vpop.f32.mrb[26].mxu1  ;;  %v4315_v58 = vpop.f32.mrb[26].mxu0  ;;  %v15062_v59 = vld [vmem:[#allocation64_spill] sm:$0xff] }
 0x335   : > { %15052 = vst [vmem:[#allocation44_spill] sm:$0xff] %v13779_v42  ;;  %15054 = vst [vmem:[#allocation11_spill] sm:$0xff] %v13782_v44  ;;  %10724 = vmatpush3.bf16.msra.mxu1 %v11098_v1  ;;  %v13795_v8 = vadd.f32 %v4042_v38, %v15057_v62  ;;  %v13798_v43 = vadd.f32 %v15059_v14, %v4315_v58  ;;  %v4044_v42 = vpop.f32.mrb[27].mxu1  ;;  %v4317_v44 = vpop.f32.mrb[27].mxu0  ;;  %v11104_v1 = vld [vmem:[%s14623_s1 + $0xa4] ss:$24 sps:$4 sm:$0xff]  }
 0x336   : > { %15055 = vst [vmem:[#allocation58_spill] sm:$0xff] %v13788_v50  ;;  %10725 = vmatprep.subr.bf16.mxu1 %v11101_v10  ;;  %v8254_v61 = vadd.f32 %v13579_v36, %v8216_v24  ;;  %v13802_v63 = vadd.f32 %v13268_v54, %v4044_v42  ;;  %v8217_v49 = vadd.f32 %v15062_v59, %v4317_v44  ;;  %v15063_v38 = vld [vmem:[#allocation101_spill] sm:$0xff] }
 0x337   : > { %15058 = vst [vmem:[#allocation97_spill] sm:$0xff] %v13795_v8  ;;  %15060 = vst [vmem:[#allocation98_spill] sm:$0xff] %v13798_v43  ;;  %5995 = vmatmul.mubr.bf16.gmra.mrb[132].mxu0 %v13477_v41  ;;  %v11107_v41 = vld [vmem:[%s14623_s1 + $0xd4] ss:$24 sps:$4 sm:$0xff]   ;;  %v15069_v43 = vld [vmem:[#allocation102_spill] sm:$0xff] }
 0x338   : > { %15061 = vst [vmem:[#allocation60_spill] sm:$0xff] %v13802_v63  ;;  %10694 = vmatmul.mubr.bf16.gmra.mrb[132].mxu1 %v13785_v2  ;;  %v8286_v7 = vmax.f32 %v8254_v61, 0.0  ;;  %v8255_v5 = vadd.f32 %v13579_v36, %v8217_v49  ;;  %6004 = vmatprep.mubr.bf16.mxu0 %v14651_v13  ;;  %v15065_v62 = vld [vmem:[#allocation17_spill] sm:$0xff]  ;;  %v13823_v49 = vld [vmem:[%s11223_s12 + $0x3a8] sm:$0xff]  }
 0x339   : > { %10697 = vmatprep.mubr.bf16.mxu1 %v13792_v28  ;;  %10726 = vmatpush3.bf16.msra.mxu1 %v11101_v10  ;;  %v13830_v50 = vld [vmem:[%s11223_s12 + $0x3b0] sm:$0xff]  }
 0x33a   : > { %v8317_v54 = vadd.f32 %v8316_v33, %v8286_v7  ;;  %v8287_v24 = vmax.f32 %v8255_v5, 0.0  ;;  %v4048_v42 = vpop.f32.mrb[28].mxu1  ;;  %v4321_v44 = vpop.f32.mrb[28].mxu0  ;;  %10727 = vmatprep.subr.bf16.mxu1 %v11104_v1  ;;  %v15068_v7 = vld [vmem:[#allocation9_spill] sm:$0xff] }
 0x33b   : > { %v13817_v58 = vadd.f32 %v4048_v42, %v15063_v38  ;;  %v13820_v14 = vadd.f32 %v15065_v62, %v4321_v44  ;;  %v4050_v61 = vpop.f32.mrb[29].mxu1  ;;  %v4323_v59 = vpop.f32.mrb[29].mxu0  ;;  %v15071_v38 = vld [vmem:[#allocation18_spill] sm:$0xff] }
 0x33c   : > { %v8318_v33 = vadd.f32 %v8317_v54, %v8287_v24  ;;  %v13826_v10 = vadd.f32 %v13302_v17, %v4050_v61  ;;  %v8218_v5 = vadd.f32 %v15068_v7, %v4323_v59  ;;  %v4052_v63 = vpop.f32.mrb[30].mxu1  ;;  %v4325_v8 = vpop.f32.mrb[30].mxu0  ;;  %v15074_v24 = vld [vmem:[#allocation68_spill] sm:$0xff]  ;;  %v11110_v59 = vld [vmem:[%s14623_s1 + $0x104] ss:$24 sps:$4 sm:$0xff]  }
 0x33d   : > { %15064 = vst [vmem:[#allocation99_spill] sm:$0xff] %v13817_v58  ;;  %15066 = vst [vmem:[#allocation45_spill] sm:$0xff] %v13820_v14  ;;  %v13833_v42 = vadd.f32 %v4052_v63, %v15069_v43  ;;  %v13836_v44 = vadd.f32 %v15071_v38, %v4325_v8  ;;  %v4054_v62 = vpop.f32.mrb[31].mxu1  ;;  %v4327_v58 = vpop.f32.mrb[31].mxu0  ;;  %10728 = vmatpush3.bf16.msra.mxu1 %v11104_v1  ;;  %v15075_v7 = vld [vmem:[#allocation19_spill] sm:$0xff] }
 0x33e   : > { %15067 = vst [vmem:[#allocation53_spill] sm:$0xff] %v13826_v10  ;;  %v8256_v54 = vadd.f32 %v13579_v36, %v8218_v5  ;;  %v13840_v17 = vadd.f32 %v13314_v37, %v4054_v62  ;;  %v8219_v61 = vadd.f32 %v15074_v24, %v4327_v58  ;;  %10729 = vmatprep.subr.bf16.mxu1 %v11107_v41 }
 0x33f   : > { %15070 = vst [vmem:[#allocation100_spill] sm:$0xff] %v13833_v42  ;;  %15072 = vst [vmem:[#allocation46_spill] sm:$0xff] %v13836_v44  ;;  %6005 = vmatmul.mubr.bf16.gmra.mrb[136].mxu0 %v13488_v46  ;;  %v11113_v46 = vld [vmem:[%s14623_s1 + $0x134] ss:$24 sps:$4 sm:$0xff]  }
 0x340   : > { %15073 = vst [vmem:[#allocation56_spill] sm:$0xff] %v13840_v17  ;;  %10698 = vmatmul.mubr.bf16.gmra.mrb[136].mxu1 %v13823_v49  ;;  %v8288_v8 = vmax.f32 %v8256_v54, 0.0  ;;  %v8257_v43 = vadd.f32 %v13579_v36, %v8219_v61  ;;  %6014 = vmatprep.mubr.bf16.mxu0 %v14651_v13  ;;  %v13858_v54 = vld [vmem:[%s11223_s12 + $0x3b8] sm:$0xff]   ;;  %v13868_v17 = vld [vmem:[%s11223_s12 + $0x3c0] sm:$0xff]  }
 0x341   : > { %10701 = vmatprep.mubr.bf16.mxu1 %v13830_v50  ;;  %10730 = vmatpush3.bf16.msra.mxu1 %v11107_v41 }
 0x342   : > { %v8319_v37 = vadd.f32 %v8318_v33, %v8288_v8  ;;  %v8289_v63 = vmax.f32 %v8257_v43, 0.0  ;;  %v4331_v1 = vpop.f32.mrb[32].mxu0  ;;  %v10547_v58 = vpop.f32.mrb[32].mxu1  ;;  %10731 = vmatprep.subr.bf16.mxu1 %v11110_v59  ;;  %v13864_v33 = vld [vmem:[%s14624_s2] ss:$0 sm:$0xff] }
 0x343   : > { %v13855_v5 = vadd.f32 %v15075_v7, %v4331_v1  ;;  %v4333_v38 = vpop.f32.mrb[33].mxu0  ;;  %v4701_v62 = vpop.f32.mrb[33].mxu1  ;;  %v15077_v1 = vld [vmem:[#allocation38_spill] sm:$0xff] }
 0x344   : > { %v8320_v24 = vadd.f32 %v8319_v37, %v8289_v63  ;;  %v8220_v41 = vadd.f32 %v13190_v11, %v4333_v38  ;;  %v7561_v61 = vadd.f32 %v13864_v33, %v4701_v62  ;;  %v4335_v8 = vpop.f32.mrb[34].mxu0  ;;  %v10548_v43 = vpop.f32.mrb[34].mxu1  ;;  %v7563_v37 = vadd.f32 %v13864_v33, %v10547_v58  ;;  %v15079_v63 = vld [vmem:[#allocation22_spill] sm:$0xff] }
 0x345   : > { %15076 = vst [vmem:[#allocation14_spill] sm:$0xff] %v13855_v5  ;;  %v13871_v7 = vadd.f32 %v15077_v1, %v4335_v8  ;;  %v4337_v42 = vpop.f32.mrb[35].mxu0  ;;  %v4704_v10 = vpop.f32.mrb[35].mxu1  ;;  %10732 = vmatpush3.bf16.msra.mxu1 %v11110_v59  ;;  %v11116_v62 = vld [vmem:[%s14623_s1 + $0x164] ss:$24 sps:$4 sm:$0xff]   ;;  %v7564_v44 = vadd.f32 %v13864_v33, %v10548_v43 }
 0x346   : > { %v8258_v11 = vadd.f32 %v13579_v36, %v8220_v41  ;;  %v8221_v38 = vadd.f32 %v15079_v63, %v4337_v42  ;;  %v7562_v5 = vadd.f32 %v13864_v33, %v4704_v10  ;;  %10733 = vmatprep.subr.bf16.mxu1 %v11113_v46  ;;  %v7593_v8 = vmax.f32 %v7561_v61, 0.0 }
 0x347   : > { %15078 = vst [vmem:[#allocation47_spill] sm:$0xff] %v13871_v7  ;;  %6015 = vmatmul.mubr.bf16.gmra.mrb[140].mxu0 %v13510_v60  ;;  %v7595_v10 = vmax.f32 %v7563_v37, 0.0  ;;  %v7596_v7 = vmax.f32 %v7564_v44, 0.0 }
 0x348   : > { %10702 = vmatmul.mubr.bf16.gmra.mrb[140].mxu1 %v13858_v54  ;;  %v8290_v59 = vmax.f32 %v8258_v11, 0.0  ;;  %v8259_v58 = vadd.f32 %v13579_v36, %v8221_v38  ;;  %v7594_v41 = vmax.f32 %v7562_v5, 0.0  ;;  %6024 = vmatprep.mubr.bf16.mxu0 %v14651_v13  ;;  %v15080_v11 = vld [vmem:[#allocation54_spill] sm:$0xff]  ;;  %v13890_v5 = vld [vmem:[%s11223_s12 + $0x3c8] sm:$0xff]  }
 0x349   : > { %10705 = vmatprep.mubr.bf16.mxu1 %v13868_v17  ;;  %10734 = vmatpush3.bf16.msra.mxu1 %v11113_v46 }
 0x34a   : > { %v8321_v42 = vadd.f32 %v8320_v24, %v8290_v59  ;;  %v8291_v1 = vmax.f32 %v8259_v58, 0.0  ;;  %v7625_v43 = vadd.f32 %v7594_v41, %v7593_v8  ;;  %v4341_v63 = vpop.f32.mrb[36].mxu0  ;;  %v10551_v60 = vpop.f32.mrb[36].mxu1  ;;  %10735 = vmatprep.subr.bf16.mxu1 %v11116_v62  ;;  %v13895_v8 = vld [vmem:[%s11223_s12 + $0x3d0] sm:$0xff]   ;;  %v15083_v58 = vld [vmem:[#allocation6_spill] sm:$0xff] }
 0x34b   : > { %v13887_v61 = vadd.f32 %v15080_v11, %v4341_v63  ;;  %v4343_v38 = vpop.f32.mrb[37].mxu0  ;;  %v4717_v14 = vpop.f32.mrb[37].mxu1 }
 0x34c   : > { %v8322_v32 = vadd.f32 %v8321_v42, %v8291_v1  ;;  %v7626_v19 = vadd.f32 %v7625_v43, %v7595_v10  ;;  %v8222_v46 = vadd.f32 %v15082_v3, %v4343_v38  ;;  %v7565_v24 = vadd.f32 %v13864_v33, %v4717_v14  ;;  %v4345_v37 = vpop.f32.mrb[38].mxu0  ;;  %v10552_v59 = vpop.f32.mrb[38].mxu1  ;;  %v15085_v42 = vld [vmem:[#allocation70_spill] sm:$0xff] }
 0x34d   : > { %15081 = vst [vmem:[#allocation62_spill] sm:$0xff] %v13887_v61  ;;  %v13898_v41 = vadd.f32 %v15083_v58, %v4345_v37  ;;  %v4347_v44 = vpop.f32.mrb[39].mxu0  ;;  %v4720_v63 = vpop.f32.mrb[39].mxu1  ;;  %10736 = vmatpush3.bf16.msra.mxu1 %v11116_v62  ;;  %v7567_v3 = vadd.f32 %v13864_v33, %v10551_v60  ;;  %v15086_v58 = vld [vmem:[#allocation7_spill] sm:$0xff] }
 0x34e   : > { %v8260_v11 = vadd.f32 %v13579_v36, %v8222_v46  ;;  %v7597_v61 = vmax.f32 %v7565_v24, 0.0  ;;  %v7627_v29 = vadd.f32 %v7626_v19, %v7596_v7  ;;  %v8223_v10 = vadd.f32 %v15085_v42, %v4347_v44  ;;  %v15088_v42 = vld [vmem:[#allocation13_spill] sm:$0xff] }
 0x34f   : > { %15084 = vst [vmem:[#allocation15_spill] sm:$0xff] %v13898_v41  ;;  %v7566_v14 = vadd.f32 %v13864_v33, %v4720_v63  ;;  %6025 = vmatmul.mubr.bf16.gmra.mrb[144].mxu0 %v13517_v53  ;;  %v7568_v19 = vadd.f32 %v13864_v33, %v10552_v59  ;;  %v7599_v53 = vmax.f32 %v7567_v3, 0.0  ;;  %v13914_v63 = vld [vmem:[%s11223_s12 + $0x3d8] sm:$0xff]   ;;  %v15090_v3 = vld [vmem:[#allocation8_spill] sm:$0xff] }
 0x350   : > { %10706 = vmatmul.mubr.bf16.gmra.mrb[144].mxu1 %v13890_v5  ;;  %v8292_v1 = vmax.f32 %v8260_v11, 0.0  ;;  %v7628_v43 = vadd.f32 %v7627_v29, %v7597_v61  ;;  %v8261_v38 = vadd.f32 %v13579_v36, %v8223_v10  ;;  %6034 = vmatprep.mubr.bf16.mxu0 %v14651_v13 }
 0x351   : > { %10709 = vmatprep.mubr.bf16.mxu1 %v13895_v8  ;;  %v7598_v7 = vmax.f32 %v7566_v14, 0.0 }
 0x352   : > { %v8323_v62 = vadd.f32 %v8322_v32, %v8292_v1  ;;  %v8293_v60 = vmax.f32 %v8261_v38, 0.0  ;;  %v4351_v46 = vpop.f32.mrb[40].mxu0  ;;  %v10555_v24 = vpop.f32.mrb[40].mxu1  ;;  %v13919_v32 = vld [vmem:[%s11223_s12 + $0x3e0] sm:$0xff]   ;;  %v7600_v1 = vmax.f32 %v7568_v19, 0.0 }
 0x353   : > { %v7629_v37 = vadd.f32 %v7628_v43, %v7598_v7  ;;  %v13911_v44 = vadd.f32 %v15086_v58, %v4351_v46  ;;  %v4353_v29 = vpop.f32.mrb[41].mxu0  ;;  %v4733_v61 = vpop.f32.mrb[41].mxu1  ;;  %15089 = vst [vmem:[#allocation64_spill] sm:$0xff] %v13919_v32 }
 0x354   : > { %v8324_v11 = vadd.f32 %v8323_v62, %v8293_v60  ;;  %v8224_v10 = vadd.f32 %v15088_v42, %v4353_v29  ;;  %v7569_v59 = vadd.f32 %v13864_v33, %v4733_v61  ;;  %v4355_v14 = vpop.f32.mrb[42].mxu0  ;;  %v10556_v41 = vpop.f32.mrb[42].mxu1  ;;  %v7571_v29 = vadd.f32 %v13864_v33, %v10555_v24 }
 0x355   : > { %15087 = vst [vmem:[#allocation16_spill] sm:$0xff] %v13911_v44  ;;  %v7630_v38 = vadd.f32 %v7629_v37, %v7599_v53  ;;  %v13922_v43 = vadd.f32 %v15090_v3, %v4355_v14  ;;  %v4357_v7 = vpop.f32.mrb[43].mxu0  ;;  %v4736_v46 = vpop.f32.mrb[43].mxu1 }
 0x356   : > { %v8262_v58 = vadd.f32 %v13579_v36, %v8224_v10  ;;  %v7601_v44 = vmax.f32 %v7569_v59, 0.0  ;;  %v8225_v62 = vadd.f32 %v15092_v34, %v4357_v7  ;;  %v7570_v60 = vadd.f32 %v13864_v33, %v4736_v46 }
 0x357   : > { %15091 = vst [vmem:[#allocation101_spill] sm:$0xff] %v13922_v43  ;;  %v7631_v61 = vadd.f32 %v7630_v38, %v7600_v1  ;;  %6035 = vmatmul.mubr.bf16.gmra.mrb[148].mxu0 %v13542_v51  ;;  %v7572_v34 = vadd.f32 %v13864_v33, %v10556_v41  ;;  %v7603_v51 = vmax.f32 %v7571_v29, 0.0  ;;  %v15093_v38 = vld [vmem:[#allocation66_spill] sm:$0xff]  ;;  %v15096_v29 = vld [vmem:[#allocation103_spill] sm:$0xff] }
 0x358   : > { %10710 = vmatmul.mubr.bf16.gmra.mrb[148].mxu1 %v13914_v63  ;;  %v8294_v19 = vmax.f32 %v8262_v58, 0.0  ;;  %v8263_v53 = vadd.f32 %v13579_v36, %v8225_v62  ;;  %v7602_v37 = vmax.f32 %v7570_v60, 0.0  ;;  %6044 = vmatprep.mubr.bf16.mxu0 %v14651_v13  ;;  %v13938_v58 = vld [vmem:[%s11223_s12 + $0x3e8] sm:$0xff]  }
 0x359   : > { %10713 = vmatprep.mubr.bf16.mxu1 %v13919_v32  ;;  %v7632_v42 = vadd.f32 %v7631_v61, %v7601_v44  ;;  %v15095_v60 = vld [vmem:[#allocation28_spill] sm:$0xff]  ;;  %v15098_v32 = vld [vmem:[#allocation25_spill] sm:$0xff] }
 0x35a   : > { %v8325_v10 = vadd.f32 %v8324_v11, %v8294_v19  ;;  %v8295_v24 = vmax.f32 %v8263_v53, 0.0  ;;  %v4361_v59 = vpop.f32.mrb[44].mxu0  ;;  %v10559_v14 = vpop.f32.mrb[44].mxu1  ;;  %v13943_v11 = vld [vmem:[%s11223_s12 + $0x3f0] sm:$0xff]   ;;  %v7604_v19 = vmax.f32 %v7572_v34, 0.0 }
 0x35b   : > { %v7633_v1 = vadd.f32 %v7632_v42, %v7602_v37  ;;  %v13935_v3 = vadd.f32 %v15093_v38, %v4361_v59  ;;  %v4363_v7 = vpop.f32.mrb[45].mxu0  ;;  %v4749_v46 = vpop.f32.mrb[45].mxu1 }
 0x35c   : > { %v8326_v62 = vadd.f32 %v8325_v10, %v8295_v24  ;;  %v8226_v43 = vadd.f32 %v15095_v60, %v4363_v7  ;;  %v7573_v44 = vadd.f32 %v13864_v33, %v4749_v46  ;;  %v4365_v41 = vpop.f32.mrb[46].mxu0  ;;  %v10560_v61 = vpop.f32.mrb[46].mxu1  ;;  %v7575_v7 = vadd.f32 %v13864_v33, %v10559_v14 }
 0x35d   : > { %15094 = vst [vmem:[#allocation17_spill] sm:$0xff] %v13935_v3  ;;  %v7634_v53 = vadd.f32 %v7633_v1, %v7603_v51  ;;  %v13946_v37 = vadd.f32 %v15096_v29, %v4365_v41  ;;  %v4367_v42 = vpop.f32.mrb[47].mxu0  ;;  %v4752_v59 = vpop.f32.mrb[47].mxu1 }
 0x35e   : > { %v8264_v38 = vadd.f32 %v13579_v36, %v8226_v43  ;;  %v7605_v3 = vmax.f32 %v7573_v44, 0.0  ;;  %v8227_v10 = vadd.f32 %v15098_v32, %v4367_v42  ;;  %v7574_v24 = vadd.f32 %v13864_v33, %v4752_v59 }
 0x35f   : > { %15097 = vst [vmem:[#allocation9_spill] sm:$0xff] %v13946_v37  ;;  %v7635_v46 = vadd.f32 %v7634_v53, %v7604_v19  ;;  %6045 = vmatmul.mubr.bf16.gmra.mrb[152].mxu0 %v13549_v39  ;;  %v7576_v32 = vadd.f32 %v13864_v33, %v10560_v61  ;;  %v7607_v19 = vmax.f32 %v7575_v7, 0.0  ;;  %v15099_v53 = vld [vmem:[#allocation27_spill] sm:$0xff] }
 0x360   : > { %10714 = vmatmul.mubr.bf16.gmra.mrb[152].mxu1 %v13938_v58  ;;  %v8296_v34 = vmax.f32 %v8264_v38, 0.0  ;;  %v8265_v51 = vadd.f32 %v13579_v36, %v8227_v10  ;;  %v7606_v1 = vmax.f32 %v7574_v24, 0.0  ;;  %6054 = vmatprep.mubr.bf16.mxu0 %v14651_v13  ;;  %v13962_v38 = vld [vmem:[%s11223_s12 + $0x3f8] sm:$0xff]  }
 0x361   : > { %10717 = vmatprep.mubr.bf16.mxu1 %v13943_v11  ;;  %v7636_v43 = vadd.f32 %v7635_v46, %v7605_v3 }
 0x362   : > { %v8327_v60 = vadd.f32 %v8326_v62, %v8296_v34  ;;  %v8297_v44 = vmax.f32 %v8265_v51, 0.0  ;;  %v4371_v14 = vpop.f32.mrb[48].mxu0  ;;  %v10563_v41 = vpop.f32.mrb[48].mxu1  ;;  %v7608_v62 = vmax.f32 %v7576_v32, 0.0  ;;  %v15100_v51 = vld [vmem:[#allocation12_spill] sm:$0xff] }
 0x363   : > { %v7637_v39 = vadd.f32 %v7636_v43, %v7606_v1  ;;  %v13959_v29 = vadd.f32 %v15099_v53, %v4371_v14  ;;  %v4373_v42 = vpop.f32.mrb[49].mxu0  ;;  %v4765_v59 = vpop.f32.mrb[49].mxu1 }
 0x364   : > { %v8328_v10 = vadd.f32 %v8327_v60, %v8297_v44  ;;  %v8228_v24 = vadd.f32 %v13265_v40, %v4373_v42  ;;  %v7577_v3 = vadd.f32 %v13864_v33, %v4765_v59  ;;  %v4375_v46 = vpop.f32.mrb[50].mxu0  ;;  %v10564_v61 = vpop.f32.mrb[50].mxu1  ;;  %v7579_v40 = vadd.f32 %v13864_v33, %v10563_v41 }
 0x365   : > { %v7638_v34 = vadd.f32 %v7637_v39, %v7607_v19  ;;  %v13967_v37 = vadd.f32 %v15100_v51, %v4375_v46  ;;  %v4377_v7 = vpop.f32.mrb[51].mxu0  ;;  %v4768_v1 = vpop.f32.mrb[51].mxu1 }
 0x366   : > { %v8266_v43 = vadd.f32 %v13579_v36, %v8228_v24  ;;  %v7609_v14 = vmax.f32 %v7577_v3, 0.0  ;;  %v8229_v53 = vadd.f32 %v13280_v25, %v4377_v7  ;;  %v7578_v60 = vadd.f32 %v13864_v33, %v4768_v1 }
 0x367   : > { %v7639_v44 = vadd.f32 %v7638_v34, %v7608_v62  ;;  %6055 = vmatmul.mubr.bf16.gmra.mrb[156].mxu0 %v13582_v52  ;;  %v7580_v25 = vadd.f32 %v13864_v33, %v10564_v61  ;;  %v7611_v46 = vmax.f32 %v7579_v40, 0.0  ;;  %v15101_v52 = vld [vmem:[#allocation72_spill] sm:$0xff] }
 0x368   : > { %10718 = vmatmul.mubr.bf16.gmra.mrb[156].mxu1 %v13962_v38  ;;  %v8298_v32 = vmax.f32 %v8266_v43, 0.0  ;;  %v8267_v19 = vadd.f32 %v13579_v36, %v8229_v53  ;;  %v7610_v39 = vmax.f32 %v7578_v60, 0.0  ;;  %6064 = vmatprep.mubr.bf16.mxu0 %v14651_v13  ;;  %v15102_v43 = vld [vmem:[#allocation59_spill] sm:$0xff] }
 0x369   : > { %10737 = vmatprep.mubr.bf16.mxu1 %v13722_v23  ;;  %v7640_v42 = vadd.f32 %v7639_v44, %v7609_v14  ;;  %v7612_v44 = vmax.f32 %v7580_v25, 0.0 }
 0x36a   : > { %v8329_v59 = vadd.f32 %v8328_v10, %v8298_v32  ;;  %v8299_v24 = vmax.f32 %v8267_v19, 0.0  ;;  %v4381_v3 = vpop.f32.mrb[52].mxu0  ;;  %v10567_v41 = vpop.f32.mrb[52].mxu1  ;;  %v15103_v10 = vld [vmem:[#allocation29_spill] sm:$0xff] }
 0x36b   : > { %v7641_v62 = vadd.f32 %v7640_v42, %v7610_v39  ;;  %v13980_v34 = vadd.f32 %v15101_v52, %v4381_v3  ;;  %v4383_v51 = vpop.f32.mrb[53].mxu0  ;;  %v4781_v7 = vpop.f32.mrb[53].mxu1  ;;  %v15104_v3 = vld [vmem:[#allocation24_spill] sm:$0xff] }
 0x36c   : > { %v8330_v1 = vadd.f32 %v8329_v59, %v8299_v24  ;;  %v8230_v53 = vadd.f32 %v15102_v43, %v4383_v51  ;;  %v7581_v60 = vadd.f32 %v13864_v33, %v4781_v7  ;;  %v4385_v23 = vpop.f32.mrb[54].mxu0  ;;  %v10568_v14 = vpop.f32.mrb[54].mxu1  ;;  %v7583_v24 = vadd.f32 %v13864_v33, %v10567_v41 }
 0x36d   : > { %v7642_v61 = vadd.f32 %v7641_v62, %v7611_v46  ;;  %v13985_v32 = vadd.f32 %v15103_v10, %v4385_v23  ;;  %v4387_v19 = vpop.f32.mrb[55].mxu0  ;;  %v4784_v40 = vpop.f32.mrb[55].mxu1  ;;  %v7584_v43 = vadd.f32 %v13864_v33, %v10568_v14 }
 0x36e   : > { %v8268_v39 = vadd.f32 %v13579_v36, %v8230_v53  ;;  %v7613_v42 = vmax.f32 %v7581_v60, 0.0  ;;  %v8231_v52 = vadd.f32 %v15104_v3, %v4387_v19  ;;  %v7582_v59 = vadd.f32 %v13864_v33, %v4784_v40 }
 0x36f   : > { %v7643_v51 = vadd.f32 %v7642_v61, %v7612_v44  ;;  %6065 = vmatmul.mubr.bf16.gmra.mrb[160].mxu0 %v13589_v0  ;;  %v7615_v44 = vmax.f32 %v7583_v24, 0.0  ;;  %v15105_v0 = vld [vmem:[#allocation26_spill] sm:$0xff] }
 0x370   : > { %10738 = vmatmul.mubr.bf16.vlgmr.msra.gmra.mrb[160].mxu1 %v13746_v16  ;;  %v8300_v25 = vmax.f32 %v8268_v39, 0.0  ;;  %v8269_v46 = vadd.f32 %v13579_v36, %v8231_v52  ;;  %v7614_v62 = vmax.f32 %v7582_v59, 0.0  ;;  %6074 = vmatprep.mubr.bf16.mxu0 %v14651_v13  ;;  %v15106_v39 = vld [vmem:[#allocation81_spill] sm:$0xff]  ;;  %v7616_v59 = vmax.f32 %v7584_v43, 0.0 }
 0x371   : > { %10741 = vmatprep.mubr.bf16.mxu1 %v13759_v6  ;;  %v7644_v7 = vadd.f32 %v7643_v51, %v7613_v42 }
 0x372   : > { %v8331_v53 = vadd.f32 %v8330_v1, %v8300_v25  ;;  %v8301_v60 = vmax.f32 %v8269_v46, 0.0  ;;  %v4391_v23 = vpop.f32.mrb[56].mxu0  ;;  %v10571_v41 = vpop.f32.mrb[56].mxu1  ;;  %v15107_v1 = vld [vmem:[#allocation61_spill] sm:$0xff] }
 0x373   : > { %v7645_v61 = vadd.f32 %v7644_v7, %v7614_v62  ;;  %v13998_v10 = vadd.f32 %v15105_v0, %v4391_v23  ;;  %v4393_v16 = vpop.f32.mrb[57].mxu0  ;;  %v4797_v19 = vpop.f32.mrb[57].mxu1  ;;  %v15108_v7 = vld [vmem:[#allocation67_spill] sm:$0xff] }
 0x374   : > { %v8332_v40 = vadd.f32 %v8331_v53, %v8301_v60  ;;  %v8232_v3 = vadd.f32 %v15106_v39, %v4393_v16  ;;  %v7585_v52 = vadd.f32 %v13864_v33, %v4797_v19  ;;  %v4395_v6 = vpop.f32.mrb[58].mxu0  ;;  %v10572_v42 = vpop.f32.mrb[58].mxu1  ;;  %v7587_v60 = vadd.f32 %v13864_v33, %v10571_v41 }
 0x375   : > { %v7646_v14 = vadd.f32 %v7645_v61, %v7615_v44  ;;  %v14003_v51 = vadd.f32 %v15107_v1, %v4395_v6  ;;  %v4397_v25 = vpop.f32.mrb[59].mxu0  ;;  %v4800_v24 = vpop.f32.mrb[59].mxu1  ;;  %v7588_v19 = vadd.f32 %v13864_v33, %v10572_v42 }
 0x376   : > { %v8270_v46 = vadd.f32 %v13579_v36, %v8232_v3  ;;  %v7617_v62 = vmax.f32 %v7585_v52, 0.0  ;;  %v8233_v23 = vadd.f32 %v15108_v7, %v4397_v25  ;;  %v7586_v53 = vadd.f32 %v13864_v33, %v4800_v24  ;;  %v15110_v25 = vld [vmem:[#allocation79_spill] sm:$0xff] }
 0x377   : > { %v7647_v0 = vadd.f32 %v7646_v14, %v7616_v59  ;;  %6075 = vmatmul.mubr.bf16.gmra.mrb[164].mxu0 %v13622_v26  ;;  %v7619_v6 = vmax.f32 %v7587_v60, 0.0  ;;  %v15109_v26 = vld [vmem:[#allocation63_spill] sm:$0xff]  ;;  %v7620_v7 = vmax.f32 %v7588_v19, 0.0 }
 0x378   : > { %10742 = vmatmul.mubr.bf16.gmra.mrb[164].mxu1 %v13785_v2  ;;  %v8302_v43 = vmax.f32 %v8270_v46, 0.0  ;;  %v8271_v44 = vadd.f32 %v13579_v36, %v8233_v23  ;;  %v7618_v61 = vmax.f32 %v7586_v53, 0.0  ;;  %6084 = vmatprep.mubr.bf16.mxu0 %v14651_v13 }
 0x379   : > { %10745 = vmatprep.mubr.bf16.mxu1 %v13792_v28  ;;  %v7648_v16 = vadd.f32 %v7647_v0, %v7617_v62  ;;  %v14026_v0 = vld [vmem:[%s14625_s3] ss:$0 sm:$0xff] }
 0x37a   : > { %v8333_v39 = vadd.f32 %v8332_v40, %v8302_v43  ;;  %v8303_v3 = vmax.f32 %v8271_v44, 0.0  ;;  %v4401_v52 = vpop.f32.mrb[60].mxu0  ;;  %v10575_v41 = vpop.f32.mrb[60].mxu1  ;;  %v15111_v40 = vld [vmem:[#allocation31_spill] sm:$0xff] }
 0x37b   : > { %v7649_v59 = vadd.f32 %v7648_v16, %v7618_v61  ;;  %v14016_v14 = vadd.f32 %v15109_v26, %v4401_v52  ;;  %v4403_v2 = vpop.f32.mrb[61].mxu0  ;;  %v4813_v1 = vpop.f32.mrb[61].mxu1  ;;  %v15112_v61 = vld [vmem:[#allocation65_spill] sm:$0xff]  ;;  %v7591_v19 = vadd.f32 %v13864_v33, %v10575_v41 }
 0x37c   : > { %v8334_v36 = vadd.f32 %v8333_v39, %v8303_v3  ;;  %v8234_v24 = vadd.f32 %v15110_v25, %v4403_v2  ;;  %v7589_v46 = vadd.f32 %v13864_v33, %v4813_v1  ;;  %v4405_v28 = vpop.f32.mrb[62].mxu0  ;;  %v10576_v62 = vpop.f32.mrb[62].mxu1 }
 0x37d   : > { %v7650_v42 = vadd.f32 %v7649_v59, %v7619_v6  ;;  %v14021_v23 = vadd.f32 %v15111_v40, %v4405_v28  ;;  %v4407_v53 = vpop.f32.mrb[63].mxu0  ;;  %v4816_v60 = vpop.f32.mrb[63].mxu1  ;;  %v7592_v2 = vadd.f32 %v13864_v33, %v10576_v62 }
 0x37e   : > { %v8272_v43 = vadd.f32 %v14026_v0, %v8234_v24  ;;  %v7621_v44 = vmax.f32 %v7589_v46, 0.0  ;;  %v8235_v16 = vadd.f32 %v15112_v61, %v4407_v53  ;;  %v7590_v39 = vadd.f32 %v13864_v33, %v4816_v60  ;;  %v15114_v60 = vld [vmem:[#allocation32_spill] sm:$0xff]  ;;  %v15115_v61 = vld [vmem:[#allocation69_spill] sm:$0xff] }
 0x37f   : > { %v7651_v3 = vadd.f32 %v7650_v42, %v7620_v7  ;;  %6085 = vmatmul.mubr.bf16.gmra.mrb[168].mxu0 %v13629_v31  ;;  %v7623_v46 = vmax.f32 %v7591_v19, 0.0  ;;  %v15113_v31 = vld [vmem:[#allocation35_spill] sm:$0xff] }
 0x380   : > { %10746 = vmatmul.mubr.bf16.gmra.mrb[168].mxu1 %v13823_v49  ;;  %v8304_v52 = vmax.f32 %v8272_v43, 0.0  ;;  %v8273_v6 = vadd.f32 %v14026_v0, %v8235_v16  ;;  %v7622_v59 = vmax.f32 %v7590_v39, 0.0  ;;  %6094 = vmatprep.mubr.bf16.mxu0 %v14651_v13  ;;  %v7624_v43 = vmax.f32 %v7592_v2, 0.0 }
 0x381   : > { %10749 = vmatprep.mubr.bf16.mxu1 %v13830_v50  ;;  %v7652_v26 = vadd.f32 %v7651_v3, %v7621_v44 }
 0x382   : > { %v8335_v1 = vadd.f32 %v8334_v36, %v8304_v52  ;;  %v8305_v25 = vmax.f32 %v8273_v6, 0.0  ;;  %v4990_v24 = vpop.f32.mrb[64].mxu0  ;;  %v10595_v41 = vpop.f32.mrb[64].mxu1  ;;  %v15116_v52 = vld [vmem:[#allocation71_spill] sm:$0xff] }
 0x383   : > { %v7653_v28 = vadd.f32 %v7652_v26, %v7622_v59  ;;  %v14039_v7 = vadd.f32 %v15113_v31, %v4990_v24  ;;  %v8602_v49 = vadd.f32 %v10595_v41, %v13619_v21  ;;  %v4992_v42 = vpop.f32.mrb[65].mxu0  ;;  %v5311_v40 = vpop.f32.mrb[65].mxu1 }
 0x384   : > { %v14042_v53 = vadd.f32 %v8335_v1, %v8305_v25  ;;  %v14045_v50 = vadd.f32 %v15114_v60, %v4992_v42  ;;  %v8600_v33 = vadd.f32 %v13574_v9, %v5311_v40  ;;  %v4994_v36 = vpop.f32.mrb[66].mxu0  ;;  %v10596_v62 = vpop.f32.mrb[66].mxu1 }
 0x385   : > { %v7654_v44 = vadd.f32 %v7653_v28, %v7623_v46  ;;  %v14049_v16 = vadd.f32 %v15115_v61, %v4994_v36  ;;  %v8603_v39 = vadd.f32 %v10596_v62, %v13635_v48  ;;  %v4996_v19 = vpop.f32.mrb[67].mxu0  ;;  %v5314_v21 = vpop.f32.mrb[67].mxu1  ;;  %v8634_v9 = vadd.f32 %v14026_v0, %v8602_v49 }
 0x386   : > { %v8632_v3 = vadd.f32 %v14026_v0, %v8600_v33  ;;  %v14054_v6 = vadd.f32 %v15116_v52, %v4996_v19  ;;  %v8601_v59 = vadd.f32 %v13595_v27, %v5314_v21 }
 0x387   : > { %v7655_v26 = vadd.f32 %v7654_v44, %v7624_v43  ;;  %6095 = vmatmul.mubr.bf16.gmra.mrb[172].mxu0 %v13655_v20  ;;  %v8635_v25 = vadd.f32 %v14026_v0, %v8603_v39  ;;  %v8666_v49 = vmax.f32 %v8634_v9, 0.0 }
 0x388   : > { %10750 = vmatmul.mubr.bf16.gmra.mrb[172].mxu1 %v13858_v54  ;;  %v8633_v2 = vadd.f32 %v14026_v0, %v8601_v59  ;;  %6104 = vmatprep.mubr.bf16.mxu0 %v14651_v13  ;;  %v8664_v1 = vmax.f32 %v8632_v3, 0.0 }
 0x389   : > { %10753 = vmatprep.mubr.bf16.mxu1 %v13868_v17  ;;  %v7656_v48 = vrot.slane %v7655_v26, 4 }
 0x38a   : > { %v8665_v24 = vmax.f32 %v8633_v2, 0.0  ;;  %v5000_v41 = vpop.f32.mrb[68].mxu0  ;;  %v10599_v27 = vpop.f32.mrb[68].mxu1 }
 0x38b   : > { %v7657_v46 = vadd.f32 %v7656_v48, %v7655_v26  ;;  %v14065_v20 = vadd.f32 %v13390_v57, %v5000_v41  ;;  %v8606_v54 = vadd.f32 %v10599_v27, %v13688_v30  ;;  %v5002_v28 = vpop.f32.mrb[69].mxu0  ;;  %v5327_v31 = vpop.f32.mrb[69].mxu1  ;;  %v8667_v30 = vmax.f32 %v8635_v25, 0.0  ;;  %v15117_v25 = vld [vmem:[#allocation55_spill] sm:$0xff] }
 0x38c   : > { %v8696_v42 = vadd.f32 %v8665_v24, %v8664_v1  ;;  %v14069_v40 = vadd.f32 %v13394_v12, %v5002_v28  ;;  %v8604_v17 = vadd.f32 %v13652_v35, %v5327_v31  ;;  %v5004_v60 = vpop.f32.mrb[70].mxu0  ;;  %v10600_v33 = vpop.f32.mrb[70].mxu1  ;;  %v15118_v31 = vld [vmem:[#allocation73_spill] sm:$0xff] }
 0x38d   : > { %v7658_v36 = vrot.slane %v7657_v46, 2  ;;  %v14073_v62 = vadd.f32 %v13398_v22, %v5004_v60  ;;  %v8607_v57 = vadd.f32 %v10600_v33, %v13700_v55  ;;  %v5006_v43 = vpop.f32.mrb[71].mxu0  ;;  %v5330_v44 = vpop.f32.mrb[71].mxu1  ;;  %v8638_v3 = vadd.f32 %v14026_v0, %v8606_v54  ;;  %v15120_v33 = vld [vmem:[#allocation21_spill] sm:$0xff] }
 0x38e   : > { %v8697_v61 = vadd.f32 %v8696_v42, %v8666_v49  ;;  %v8636_v39 = vadd.f32 %v14026_v0, %v8604_v17  ;;  %v14078_v19 = vadd.f32 %v13402_v45, %v5006_v43  ;;  %v8605_v35 = vadd.f32 %v13668_v56, %v5330_v44  ;;  %v15119_v17 = vld [vmem:[#allocation52_spill] sm:$0xff]  ;;  %v15122_v43 = vld [vmem:[#allocation89_spill] sm:$0xff] }
 0x38f   : > { %v7659_v12 = vadd.f32 %v7658_v36, %v7657_v46  ;;  %6105 = vmatmul.mubr.bf16.gmra.mrb[176].mxu0 %v13662_v4  ;;  %v8639_v59 = vadd.f32 %v14026_v0, %v8607_v57  ;;  %v8670_v54 = vmax.f32 %v8638_v3, 0.0  ;;  %v15121_v36 = vld [vmem:[#allocation57_spill] sm:$0xff] }
 0x390   : > { %10754 = vmatmul.mubr.bf16.gmra.mrb[176].mxu1 %v13890_v5  ;;  %v8668_v22 = vmax.f32 %v8636_v39, 0.0  ;;  %v8698_v21 = vadd.f32 %v8697_v61, %v8667_v30  ;;  %6114 = vmatprep.mubr.bf16.mxu0 %v14651_v13  ;;  %v8637_v52 = vadd.f32 %v14026_v0, %v8605_v35  ;;  %v11138_v39 = vld [vmem:[%s11223_s12 + $0x368] sm:$0xff]  }
 0x391   : > { %10757 = vmatprep.mubr.bf16.mxu1 %v13895_v8  ;;  %v7660_v55 = vrot.slane %v7659_v12, 1  ;;  %v8671_v30 = vmax.f32 %v8639_v59, 0.0 }
 0x392   : > { %v8699_v45 = vadd.f32 %v8698_v21, %v8668_v22  ;;  %v5010_v26 = vpop.f32.mrb[72].mxu0  ;;  %v10603_v56 = vpop.f32.mrb[72].mxu1  ;;  %v8669_v4 = vmax.f32 %v8637_v52, 0.0  ;;  %v15123_v22 = vld [vmem:[#allocation64_spill] sm:$0xff] }
 0x393   : > { %v7661_v9 = vadd.f32 %v7660_v55, %v7659_v12  ;;  %v14089_v5 = vadd.f32 %v13411_v47, %v5010_v26  ;;  %v8610_v2 = vadd.f32 %v10603_v56, %v13743_v15  ;;  %v5012_v48 = vpop.f32.mrb[73].mxu0  ;;  %v5343_v1 = vpop.f32.mrb[73].mxu1  ;;  %v15124_v56 = vld [vmem:[#allocation74_spill] sm:$0xff] }
 0x394   : > { %v14093_v8 = vadd.f32 %v13415_v18, %v5012_v48  ;;  %v8608_v24 = vadd.f32 %v15117_v25, %v5343_v1  ;;  %v5014_v41 = vpop.f32.mrb[74].mxu0  ;;  %v10604_v27 = vpop.f32.mrb[74].mxu1  ;;  %v8700_v28 = vadd.f32 %v8699_v45, %v8669_v4  ;;  %v15126_v25 = vld [vmem:[#allocation75_spill] sm:$0xff] }
 0x395   : > { %v7662_v46 = vmul.f32 0.00390625, %v7661_v9  ;;  %v14097_v49 = vadd.f32 %v15118_v31, %v5014_v41  ;;  %v5016_v47 = vpop.f32.mrb[75].mxu0  ;;  %v5346_v42 = vpop.f32.mrb[75].mxu1  ;;  %v8611_v60 = vadd.f32 %v10604_v27, %v15119_v17  ;;  %v8642_v21 = vadd.f32 %v14026_v0, %v8610_v2  ;;  %v15127_v41 = vld [vmem:[#allocation11_spill] sm:$0xff]  ;;  %v15128_v31 = vld [vmem:[#allocation76_spill] sm:$0xff] }
 0x396   : > { %v8640_v15 = vadd.f32 %v14026_v0, %v8608_v24  ;;  %v14102_v18 = vadd.f32 %v15120_v33, %v5016_v47  ;;  %v8609_v57 = vadd.f32 %v15121_v36, %v5346_v42  ;;  %v8701_v61 = vadd.f32 %v8700_v28, %v8670_v54  ;;  %v15129_v42 = vld [vmem:[#allocation46_spill] sm:$0xff]  ;;  %v15130_v36 = vld [vmem:[#allocation77_spill] sm:$0xff] }
 0x397   : > { %v14106_v44 = vsel %vm7939_vm4, %v15122_v43, %v7662_v46  ;;  %6115 = vmatmul.mubr.bf16.gmra.mrb[180].mxu0 %v11138_v39  ;;  %v8643_v59 = vadd.f32 %v14026_v0, %v8611_v60  ;;  %v8674_v54 = vmax.f32 %v8642_v21, 0.0  ;;  %v15131_v43 = vld [vmem:[#allocation98_spill] sm:$0xff] }
 0x398   : > { %10758 = vmatmul.mubr.bf16.gmra.mrb[180].mxu1 %v13914_v63  ;;  %v8672_v12 = vmax.f32 %v8640_v15, 0.0  ;;  %v8641_v35 = vadd.f32 %v14026_v0, %v8609_v57  ;;  %6124 = vmatprep.mubr.bf16.mxu0 %v14651_v13  ;;  %v8702_v55 = vadd.f32 %v8701_v61, %v8671_v30  ;;  %v15125_v63 = vld [vmem:[#allocation45_spill] sm:$0xff] }
 0x399   : > { %10761 = vmatprep.mubr.bf16.mxu1 %v15123_v22  ;;  %v8675_v61 = vmax.f32 %v8643_v59, 0.0 }
 0x39a   : > { %v8673_v3 = vmax.f32 %v8641_v35, 0.0  ;;  %v5020_v52 = vpop.f32.mrb[76].mxu0  ;;  %v10607_v45 = vpop.f32.mrb[76].mxu1  ;;  %v8703_v26 = vadd.f32 %v8702_v55, %v8672_v12  ;;  %v11139_v12 = vld [vmem:[%s11223_s12 + $0x370] sm:$0xff]  }
 0x39b   : > { %v14116_v9 = vadd.f32 %v15124_v56, %v5020_v52  ;;  %v8614_v4 = vadd.f32 %v10607_v45, %v15125_v63  ;;  %v5022_v48 = vpop.f32.mrb[77].mxu0  ;;  %v5359_v1 = vpop.f32.mrb[77].mxu1  ;;  %v15132_v56 = vld [vmem:[#allocation78_spill] sm:$0xff] }
 0x39c   : > { %v14120_v24 = vadd.f32 %v15126_v25, %v5022_v48  ;;  %v8612_v2 = vadd.f32 %v15127_v41, %v5359_v1  ;;  %v5024_v27 = vpop.f32.mrb[78].mxu0  ;;  %v10608_v46 = vpop.f32.mrb[78].mxu1  ;;  %v8704_v28 = vadd.f32 %v8703_v26, %v8673_v3  ;;  %v15134_v41 = vld [vmem:[#allocation105_spill] sm:$0xff] }
 0x39d   : > { %v14124_v47 = vadd.f32 %v15128_v31, %v5024_v27  ;;  %v8615_v15 = vadd.f32 %v10608_v46, %v15129_v42  ;;  %v5026_v17 = vpop.f32.mrb[79].mxu0  ;;  %v5362_v60 = vpop.f32.mrb[79].mxu1  ;;  %v8646_v21 = vadd.f32 %v14026_v0, %v8614_v4  ;;  %v15137_v42 = vld [vmem:[#allocation15_spill] sm:$0xff] }
 0x39e   : > { %v8644_v33 = vadd.f32 %v14026_v0, %v8612_v2  ;;  %v14129_v57 = vadd.f32 %v15130_v36, %v5026_v17  ;;  %v8613_v30 = vadd.f32 %v15131_v43, %v5362_v60  ;;  %v8705_v39 = vadd.f32 %v8704_v28, %v8674_v54  ;;  %v15136_v28 = vld [vmem:[#allocation80_spill] sm:$0xff]  ;;  %v15138_v36 = vld [vmem:[#allocation106_spill] sm:$0xff] }
 0x39f   : > { %6125 = vmatmul.mubr.bf16.gmra.mrb[184].mxu0 %v11139_v12  ;;  %v8647_v59 = vadd.f32 %v14026_v0, %v8615_v15  ;;  %v8678_v46 = vmax.f32 %v8646_v21, 0.0 }
 0x3a0   : > { %10762 = vmatmul.mubr.bf16.gmra.mrb[184].mxu1 %v13938_v58  ;;  %v8676_v35 = vmax.f32 %v8644_v33, 0.0  ;;  %v8645_v22 = vadd.f32 %v14026_v0, %v8613_v30  ;;  %6134 = vmatprep.mubr.bf16.mxu0 %v14651_v13  ;;  %v8706_v55 = vadd.f32 %v8705_v39, %v8675_v61  ;;  %v15133_v58 = vld [vmem:[#allocation62_spill] sm:$0xff]  ;;  %v15139_v30 = vld [vmem:[#allocation47_spill] sm:$0xff] }
 0x3a1   : > { %10765 = vmatprep.mubr.bf16.mxu1 %v13943_v11  ;;  %v15135_v11 = vld [vmem:[#allocation14_spill] sm:$0xff]  ;;  %v8679_v39 = vmax.f32 %v8647_v59, 0.0  ;;  %v15141_v59 = vld [vmem:[#allocation17_spill] sm:$0xff] }
 0x3a2   : > { %v8677_v3 = vmax.f32 %v8645_v22, 0.0  ;;  %v5030_v52 = vpop.f32.mrb[80].mxu0  ;;  %v10611_v45 = vpop.f32.mrb[80].mxu1  ;;  %v8707_v26 = vadd.f32 %v8706_v55, %v8676_v35  ;;  %v11140_v35 = vld [vmem:[%s11223_s12 + $0x378] sm:$0xff]  }
 0x3a3   : > { %v14140_v63 = vadd.f32 %v15132_v56, %v5030_v52  ;;  %v8618_v48 = vadd.f32 %v10611_v45, %v15133_v58  ;;  %v5032_v1 = vpop.f32.mrb[81].mxu0  ;;  %v5375_v25 = vpop.f32.mrb[81].mxu1 }
 0x3a4   : > { %v14144_v13 = vadd.f32 %v15134_v41, %v5032_v1  ;;  %v8616_v4 = vadd.f32 %v15135_v11, %v5375_v25  ;;  %v5034_v2 = vpop.f32.mrb[82].mxu0  ;;  %v10612_v27 = vpop.f32.mrb[82].mxu1  ;;  %v8708_v54 = vadd.f32 %v8707_v26, %v8677_v3  ;;  %v15140_v1 = vld [vmem:[#allocation82_spill] sm:$0xff] }
 0x3a5   : > { %v14148_v31 = vadd.f32 %v15136_v28, %v5034_v2  ;;  %v8619_v15 = vadd.f32 %v10612_v27, %v15137_v42  ;;  %v5036_v17 = vpop.f32.mrb[83].mxu0  ;;  %v5378_v60 = vpop.f32.mrb[83].mxu1  ;;  %v8650_v55 = vadd.f32 %v14026_v0, %v8618_v48  ;;  %v15143_v27 = vld [vmem:[#allocation16_spill] sm:$0xff] }
 0x3a6   : > { %v8648_v33 = vadd.f32 %v14026_v0, %v8616_v4  ;;  %v14153_v43 = vadd.f32 %v15138_v36, %v5036_v17  ;;  %v8617_v61 = vadd.f32 %v15139_v30, %v5378_v60  ;;  %v8709_v12 = vadd.f32 %v8708_v54, %v8678_v46  ;;  %v15144_v17 = vld [vmem:[#allocation83_spill] sm:$0xff] }
 0x3a7   : > { %6135 = vmatmul.mubr.bf16.gmra.mrb[188].mxu0 %v11140_v35  ;;  %v8651_v58 = vadd.f32 %v14026_v0, %v8619_v15  ;;  %v8682_v28 = vmax.f32 %v8650_v55, 0.0  ;;  %v15145_v15 = vld [vmem:[#allocation9_spill] sm:$0xff] }
 0x3a8   : > { %10766 = vmatmul.mubr.bf16.gmra.mrb[188].mxu1 %v13962_v38  ;;  %v8680_v22 = vmax.f32 %v8648_v33, 0.0  ;;  %v8649_v21 = vadd.f32 %v14026_v0, %v8617_v61  ;;  %v8710_v3 = vadd.f32 %v8709_v12, %v8679_v39  ;;  %v15142_v38 = vld [vmem:[#allocation107_spill] sm:$0xff]  ;;  %v15146_v39 = vld [vmem:[#allocation108_spill] sm:$0xff]  ;;  %v15147_v35 = vld [vmem:[#allocation101_spill] sm:$0xff] }
 0x3aa   : > { %v8681_v52 = vmax.f32 %v8649_v21, 0.0  ;;  %v5040_v45 = vpop.f32.mrb[84].mxu0  ;;  %v10615_v26 = vpop.f32.mrb[84].mxu1  ;;  %v8711_v56 = vadd.f32 %v8710_v3, %v8680_v22  ;;  %v8683_v21 = vmax.f32 %v8651_v58, 0.0 }
 0x3ab   : > { %v14162_v25 = vadd.f32 %v15140_v1, %v5040_v45  ;;  %v8622_v41 = vadd.f32 %v10615_v26, %v15141_v59  ;;  %v5042_v11 = vpop.f32.mrb[85].mxu0  ;;  %v5391_v4 = vpop.f32.mrb[85].mxu1 }
 0x3ac   : > { %v14166_v2 = vadd.f32 %v15142_v38, %v5042_v11  ;;  %v8620_v46 = vadd.f32 %v15143_v27, %v5391_v4  ;;  %v5044_v48 = vpop.f32.mrb[86].mxu0  ;;  %v10616_v54 = vpop.f32.mrb[86].mxu1  ;;  %v8712_v42 = vadd.f32 %v8711_v56, %v8681_v52  ;;  %v15148_v38 = vld [vmem:[#allocation30_spill] sm:$0xff] }
 0x3ad   : > { %v14170_v60 = vadd.f32 %v15144_v17, %v5044_v48  ;;  %v8623_v33 = vadd.f32 %v10616_v54, %v15145_v15  ;;  %v5046_v36 = vpop.f32.mrb[87].mxu0  ;;  %v5394_v30 = vpop.f32.mrb[87].mxu1  ;;  %v8654_v52 = vadd.f32 %v14026_v0, %v8622_v41  ;;  %v15149_v54 = vld [vmem:[#allocation109_spill] sm:$0xff] }
 0x3ae   : > { %v8652_v61 = vadd.f32 %v14026_v0, %v8620_v46  ;;  %v14175_v12 = vadd.f32 %v15146_v39, %v5046_v36  ;;  %v8621_v22 = vadd.f32 %v15147_v35, %v5394_v30  ;;  %v8713_v3 = vadd.f32 %v8712_v42, %v8682_v28  ;;  %v15150_v30 = vld [vmem:[#allocation84_spill] sm:$0xff] }
 0x3af   : > { %v8655_v4 = vadd.f32 %v14026_v0, %v8623_v33  ;;  %v8686_v15 = vmax.f32 %v8654_v52, 0.0 }
 0x3b0   : > { %v8684_v45 = vmax.f32 %v8652_v61, 0.0  ;;  %v8653_v55 = vadd.f32 %v14026_v0, %v8621_v22  ;;  %v8714_v26 = vadd.f32 %v8713_v3, %v8683_v21  ;;  %v15151_v22 = vld [vmem:[#allocation48_spill] sm:$0xff] }
 0x3b2   : > { %v8685_v56 = vmax.f32 %v8653_v55, 0.0  ;;  %v5050_v1 = vpop.f32.mrb[88].mxu0  ;;  %v10619_v59 = vpop.f32.mrb[88].mxu1  ;;  %v8715_v11 = vadd.f32 %v8714_v26, %v8684_v45  ;;  %v8687_v45 = vmax.f32 %v8655_v4, 0.0 }
 0x3b3   : > { %v14182_v27 = vadd.f32 %v15148_v38, %v5050_v1  ;;  %v8626_v46 = vadd.f32 %v10619_v59, %v13980_v34  ;;  %v5052_v48 = vpop.f32.mrb[89].mxu0  ;;  %v5407_v58 = vpop.f32.mrb[89].mxu1 }
 0x3b4   : > { %v14186_v28 = vadd.f32 %v15149_v54, %v5052_v48  ;;  %v8624_v42 = vadd.f32 %v13959_v29, %v5407_v58  ;;  %v5054_v41 = vpop.f32.mrb[90].mxu0  ;;  %v10620_v17 = vpop.f32.mrb[90].mxu1  ;;  %v8716_v36 = vadd.f32 %v8715_v11, %v8685_v56  ;;  %v15152_v48 = vld [vmem:[#allocation85_spill] sm:$0xff] }
 0x3b5   : > { %v14190_v61 = vadd.f32 %v15150_v30, %v5054_v41  ;;  %v8627_v33 = vadd.f32 %v10620_v17, %v13985_v32  ;;  %v5056_v39 = vpop.f32.mrb[91].mxu0  ;;  %v5410_v35 = vpop.f32.mrb[91].mxu1  ;;  %v8658_v26 = vadd.f32 %v14026_v0, %v8626_v46 }
 0x3b6   : > { %v8656_v34 = vadd.f32 %v14026_v0, %v8624_v42  ;;  %v14195_v21 = vadd.f32 %v15151_v22, %v5056_v39  ;;  %v8625_v3 = vadd.f32 %v13967_v37, %v5410_v35  ;;  %v8717_v29 = vadd.f32 %v8716_v36, %v8686_v15  ;;  %v15153_v42 = vld [vmem:[#allocation49_spill] sm:$0xff] }
 0x3b7   : > { %v8659_v38 = vadd.f32 %v14026_v0, %v8627_v33  ;;  %v8690_v36 = vmax.f32 %v8658_v26, 0.0  ;;  %v15154_v39 = vld [vmem:[#allocation33_spill] sm:$0xff] }
 0x3b8   : > { %v8688_v55 = vmax.f32 %v8656_v34, 0.0  ;;  %v8657_v52 = vadd.f32 %v14026_v0, %v8625_v3  ;;  %v8718_v56 = vadd.f32 %v8717_v29, %v8687_v45  ;;  %v15155_v3 = vld [vmem:[#allocation50_spill] sm:$0xff] }
 0x3ba   : > { %v8689_v1 = vmax.f32 %v8657_v52, 0.0  ;;  %v5060_v59 = vpop.f32.mrb[92].mxu0  ;;  %v10623_v32 = vpop.f32.mrb[92].mxu1  ;;  %v8719_v11 = vadd.f32 %v8718_v56, %v8688_v55  ;;  %v8691_v55 = vmax.f32 %v8659_v38, 0.0 }
 0x3bb   : > { %v14202_v58 = vadd.f32 %v15152_v48, %v5060_v59  ;;  %v8630_v54 = vadd.f32 %v10623_v32, %v14016_v14  ;;  %v5062_v37 = vpop.f32.mrb[93].mxu0  ;;  %v5423_v4 = vpop.f32.mrb[93].mxu1 }
 0x3bc   : > { %v14206_v41 = vadd.f32 %v15153_v42, %v5062_v37  ;;  %v8628_v17 = vadd.f32 %v13998_v10, %v5423_v4  ;;  %v5064_v46 = vpop.f32.mrb[94].mxu0  ;;  %v10624_v15 = vpop.f32.mrb[94].mxu1  ;;  %v8720_v30 = vadd.f32 %v8719_v11, %v8689_v1  ;;  %v8337_v10 = vrot.slane %v14042_v53, 4  ;;  %v15156_v42 = vld [vmem:[#allocation86_spill] sm:$0xff] }
 0x3bd   : > { %v14210_v35 = vadd.f32 %v15154_v39, %v5064_v46  ;;  %v8631_v33 = vadd.f32 %v10624_v15, %v14021_v23  ;;  %v5066_v34 = vpop.f32.mrb[95].mxu0  ;;  %v5426_v22 = vpop.f32.mrb[95].mxu1  ;;  %v8662_v1 = vadd.f32 %v14026_v0, %v8630_v54  ;;  %v15157_v46 = vld [vmem:[#allocation37_spill] sm:$0xff]  ;;  %v14232_v54 = vld [vmem:[%s14624_s2] ss:$0 sm:$0xff] }
 0x3be   : > { %v8660_v14 = vadd.f32 %v14026_v0, %v8628_v17  ;;  %v14215_v45 = vadd.f32 %v15155_v3, %v5066_v34  ;;  %v8629_v29 = vadd.f32 %v14003_v51, %v5426_v22  ;;  %v8721_v52 = vadd.f32 %v8720_v30, %v8690_v36 }
 0x3bf   : > { %v8338_v48 = vadd.f32 %v8337_v10, %v14042_v53  ;;  %v8663_v4 = vadd.f32 %v14026_v0, %v8631_v33  ;;  %v8694_v39 = vmax.f32 %v8662_v1, 0.0  ;;  %v15158_v33 = vld [vmem:[#allocation34_spill] sm:$0xff]  ;;  %v15160_v10 = vld [vmem:[#allocation87_spill] sm:$0xff] }
 0x3c0   : > { %v8692_v26 = vmax.f32 %v8660_v14, 0.0  ;;  %v8661_v56 = vadd.f32 %v14026_v0, %v8629_v29  ;;  %v8722_v59 = vadd.f32 %v8721_v52, %v8691_v55 }
 0x3c2   : > { %v8693_v23 = vmax.f32 %v8661_v56, 0.0  ;;  %v5070_v32 = vpop.f32.mrb[96].mxu0  ;;  %v10643_v11 = vpop.f32.mrb[96].mxu1  ;;  %v8723_v37 = vadd.f32 %v8722_v59, %v8692_v26  ;;  %v8339_v26 = vrot.slane %v8338_v48, 2  ;;  %v8695_v56 = vmax.f32 %v8663_v4, 0.0  ;;  %v15164_v4 = vld [vmem:[#allocation3_spill] sm:$0xff] }
 0x3c3   : > { %v14224_v51 = vadd.f32 %v15156_v42, %v5070_v32  ;;  %v5072_v17 = vpop.f32.mrb[97].mxu0  ;;  %v5697_v38 = vpop.f32.mrb[97].mxu1  ;;  %v7697_v29 = vadd.f32 %v14232_v54, %v10643_v11  ;;  %v15162_v11 = vld [vmem:[#allocation39_spill] sm:$0xff] }
 0x3c4   : > { %v14227_v15 = vadd.f32 %v15157_v46, %v5072_v17  ;;  %v7695_v36 = vadd.f32 %v14232_v54, %v5697_v38  ;;  %v5074_v30 = vpop.f32.mrb[98].mxu0  ;;  %v10644_v53 = vpop.f32.mrb[98].mxu1  ;;  %v8724_v34 = vadd.f32 %v8723_v37, %v8693_v23 }
 0x3c5   : > { %v14236_v22 = vadd.f32 %v15158_v33, %v5074_v30  ;;  %v5076_v14 = vpop.f32.mrb[99].mxu0  ;;  %v5700_v3 = vpop.f32.mrb[99].mxu1  ;;  %v7698_v42 = vadd.f32 %v14232_v54, %v10644_v53  ;;  %v7729_v37 = vmax.f32 %v7697_v29, 0.0  ;;  %v8340_v30 = vadd.f32 %v8339_v26, %v8338_v48 }
 0x3c6   : > { %v14240_v55 = vadd.f32 %v15160_v10, %v5076_v14  ;;  %v7696_v52 = vadd.f32 %v14232_v54, %v5700_v3  ;;  %v8725_v59 = vadd.f32 %v8724_v34, %v8694_v39  ;;  %v7727_v32 = vmax.f32 %v7695_v36, 0.0 }
 0x3c7   : > { %15159 = vst [vmem:[#allocation102_spill] sm:$0xff] %v14236_v22  ;;  %v7730_v3 = vmax.f32 %v7698_v42, 0.0 }
 0x3c8   : > { %15161 = vst [vmem:[#allocation18_spill] sm:$0xff] %v14240_v55  ;;  %v7728_v1 = vmax.f32 %v7696_v52, 0.0  ;;  %v8726_v23 = vadd.f32 %v8725_v59, %v8695_v56  ;;  %v15166_v56 = vld [vmem:[#allocation20_spill] sm:$0xff] }
 0x3ca   : > { %v7759_v17 = vadd.f32 %v7728_v1, %v7727_v32  ;;  %v5080_v38 = vpop.f32.mrb[100].mxu0  ;;  %v10647_v46 = vpop.f32.mrb[100].mxu1  ;;  %v8727_v33 = vrot.slane %v8726_v23, 4 }
 0x3cb   : > { %v14245_v22 = vadd.f32 %v15162_v11, %v5080_v38  ;;  %v5082_v14 = vpop.f32.mrb[101].mxu0  ;;  %v5713_v10 = vpop.f32.mrb[101].mxu1  ;;  %v7701_v52 = vadd.f32 %v14232_v54, %v10647_v46  ;;  %v15168_v38 = vld [vmem:[#allocation88_spill] sm:$0xff] }
 0x3cc   : > { %v7760_v55 = vadd.f32 %v7759_v17, %v7729_v37  ;;  %v14248_v39 = vadd.f32 %v15164_v4, %v5082_v14  ;;  %v7699_v36 = vadd.f32 %v14232_v54, %v5713_v10  ;;  %v5084_v53 = vpop.f32.mrb[102].mxu0  ;;  %v10648_v34 = vpop.f32.mrb[102].mxu1  ;;  %v8728_v29 = vadd.f32 %v8727_v33, %v8726_v23 }
 0x3cd   : > { %15163 = vst [vmem:[#allocation68_spill] sm:$0xff] %v14245_v22  ;;  %v14253_v48 = vadd.f32 %v15166_v56, %v5084_v53  ;;  %v5086_v26 = vpop.f32.mrb[103].mxu0  ;;  %v5716_v59 = vpop.f32.mrb[103].mxu1  ;;  %v8341_v17 = vrot.slane %v8340_v30, 1  ;;  %v7702_v10 = vadd.f32 %v14232_v54, %v10648_v34  ;;  %v7733_v46 = vmax.f32 %v7701_v52, 0.0 }
 0x3ce   : > { %15165 = vst [vmem:[#allocation19_spill] sm:$0xff] %v14248_v39  ;;  %v7731_v32 = vmax.f32 %v7699_v36, 0.0  ;;  %v7761_v1 = vadd.f32 %v7760_v55, %v7730_v3  ;;  %v14256_v42 = vadd.f32 %v15168_v38, %v5086_v26  ;;  %v7700_v37 = vadd.f32 %v14232_v54, %v5716_v59  ;;  %v15170_v36 = vld [vmem:[#allocation40_spill] sm:$0xff] }
 0x3cf   : > { %15167 = vst [vmem:[#allocation38_spill] sm:$0xff] %v14253_v48  ;;  %v8729_v11 = vrot.slane %v8728_v29, 2  ;;  %v8342_v48 = vadd.f32 %v8341_v17, %v8340_v30  ;;  %v7734_v38 = vmax.f32 %v7702_v10, 0.0 }
 0x3d0   : > { %15169 = vst [vmem:[#allocation22_spill] sm:$0xff] %v14256_v42  ;;  %v7762_v14 = vadd.f32 %v7761_v1, %v7731_v32  ;;  %v7732_v23 = vmax.f32 %v7700_v37, 0.0  ;;  %v15171_v42 = vld [vmem:[#allocation51_spill] sm:$0xff]  ;;  %v15172_v37 = vld [vmem:[#allocation36_spill] sm:$0xff] }
 0x3d1   : > { %v8730_v33 = vadd.f32 %v8729_v11, %v8728_v29 }
 0x3d2   : > { %v7763_v4 = vadd.f32 %v7762_v14, %v7732_v23  ;;  %v5090_v53 = vpop.f32.mrb[104].mxu0  ;;  %v10651_v56 = vpop.f32.mrb[104].mxu1 }
 0x3d3   : > { %v8731_v39 = vrot.slane %v8730_v33, 1  ;;  %v14261_v55 = vadd.f32 %v15170_v36, %v5090_v53  ;;  %v5092_v3 = vpop.f32.mrb[105].mxu0  ;;  %v5729_v26 = vpop.f32.mrb[105].mxu1  ;;  %v7705_v1 = vadd.f32 %v14232_v54, %v10651_v56  ;;  %v15173_v53 = vld [vmem:[#allocation90_spill] sm:$0xff] }
 0x3d4   : > { %v7764_v59 = vadd.f32 %v7763_v4, %v7733_v46  ;;  %v14264_v22 = vadd.f32 %v15171_v42, %v5092_v3  ;;  %v7703_v34 = vadd.f32 %v14232_v54, %v5729_v26  ;;  %v5094_v32 = vpop.f32.mrb[106].mxu0  ;;  %v10652_v29 = vpop.f32.mrb[106].mxu1  ;;  %v8343_v46 = vmul.f32 0.00390625, %v8342_v48  ;;  %v15177_v48 = vld [vmem:[#allocation91_spill] sm:$0xff] }
 0x3d5   : > { %v8732_v52 = vadd.f32 %v8731_v39, %v8730_v33  ;;  %v14269_v30 = vadd.f32 %v15172_v37, %v5094_v32  ;;  %v5096_v17 = vpop.f32.mrb[107].mxu0  ;;  %v5732_v11 = vpop.f32.mrb[107].mxu1  ;;  %v7706_v3 = vadd.f32 %v14232_v54, %v10652_v29  ;;  %v7737_v56 = vmax.f32 %v7705_v1, 0.0  ;;  %v15179_v1 = vld [vmem:[#allocation92_spill] sm:$0xff] }
 0x3d6   : > { %v7735_v14 = vmax.f32 %v7703_v34, 0.0  ;;  %v7765_v23 = vadd.f32 %v7764_v59, %v7734_v38  ;;  %v14272_v10 = vadd.f32 %v15173_v53, %v5096_v17  ;;  %v7704_v42 = vadd.f32 %v14232_v54, %v5732_v11  ;;  %v15175_v34 = vld [vmem:[#allocation4_spill] sm:$0xff] }
 0x3d7   : > { %v8733_v4 = vmul.f32 0.00390625, %v8732_v52  ;;  %v7738_v53 = vmax.f32 %v7706_v3, 0.0 }
 0x3d8   : > { %v7766_v36 = vadd.f32 %v7765_v23, %v7735_v14  ;;  %v7736_v39 = vmax.f32 %v7704_v42, 0.0 }
 0x3d9   : > { %v14277_v33 = vsel %vm7931_vm0, %v8343_v46, %v8733_v4 }
 0x3da   : > { %15174 = vst [vmem:[#allocation54_spill] sm:$0xff] %v14277_v33  ;;  %v7767_v26 = vadd.f32 %v7766_v36, %v7736_v39  ;;  %v5100_v32 = vpop.f32.mrb[108].mxu0 }
 0x3db   : > { %v10655_v37 = vpop.f32.mrb[108].mxu1  ;;  %v14280_v38 = vadd.f32 %v15175_v34, %v5100_v32  ;;  %v5102_v59 = vpop.f32.mrb[109].mxu0  ;;  %v15181_v34 = vld [vmem:[#allocation93_spill] sm:$0xff] }
 0x3dc   : > { %v5745_v17 = vpop.f32.mrb[109].mxu1  ;;  %v7768_v11 = vadd.f32 %v7767_v26, %v7737_v56  ;;  %v14283_v52 = vadd.f32 %v15177_v48, %v5102_v59  ;;  %v5104_v14 = vpop.f32.mrb[110].mxu0  ;;  %v7709_v42 = vadd.f32 %v14232_v54, %v10655_v37 }
 0x3dd   : > { %15176 = vst [vmem:[#allocation104_spill] sm:$0xff] %v14280_v38  ;;  %v7707_v29 = vadd.f32 %v14232_v54, %v5745_v17  ;;  %v10656_v23 = vpop.f32.mrb[110].mxu1  ;;  %v14288_v46 = vadd.f32 %v15179_v1, %v5104_v14  ;;  %v5106_v4 = vpop.f32.mrb[111].mxu0  ;;  %v15183_v38 = vld [vmem:[#allocation41_spill] sm:$0xff] }
 0x3de   : > { %15178 = vst [vmem:[#allocation6_spill] sm:$0xff] %v14283_v52  ;;  %v5748_v36 = vpop.f32.mrb[111].mxu1  ;;  %v7769_v32 = vadd.f32 %v7768_v11, %v7738_v53  ;;  %v14291_v33 = vadd.f32 %v15181_v34, %v5106_v4  ;;  %v7710_v26 = vadd.f32 %v14232_v54, %v10656_v23  ;;  %v7741_v17 = vmax.f32 %v7709_v42, 0.0  ;;  %v15185_v11 = vld [vmem:[#allocation94_spill] sm:$0xff] }
 0x3df   : > { %15180 = vst [vmem:[#allocation70_spill] sm:$0xff] %v14288_v46  ;;  %v7739_v39 = vmax.f32 %v7707_v29, 0.0  ;;  %v7708_v3 = vadd.f32 %v14232_v54, %v5748_v36  ;;  %v15187_v42 = vld [vmem:[#allocation42_spill] sm:$0xff] }
 0x3e0   : > { %15182 = vst [vmem:[#allocation7_spill] sm:$0xff] %v14291_v33  ;;  %v7742_v29 = vmax.f32 %v7710_v26, 0.0  ;;  %v15191_v33 = vld [vmem:[#allocation95_spill] sm:$0xff] }
 0x3e1   : > { %v7770_v56 = vadd.f32 %v7769_v32, %v7739_v39  ;;  %v7740_v59 = vmax.f32 %v7708_v3, 0.0 }
 0x3e2   : > { %v5110_v52 = vpop.f32.mrb[112].mxu0 }
 0x3e3   : > { %v7771_v48 = vadd.f32 %v7770_v56, %v7740_v59  ;;  %v10659_v37 = vpop.f32.mrb[112].mxu1  ;;  %v14296_v14 = vadd.f32 %v15183_v38, %v5110_v52  ;;  %v5112_v1 = vpop.f32.mrb[113].mxu0  ;;  %v15189_v59 = vld [vmem:[#allocation5_spill] sm:$0xff] }
 0x3e4   : > { %v5761_v46 = vpop.f32.mrb[113].mxu1  ;;  %v14299_v4 = vadd.f32 %v15185_v11, %v5112_v1  ;;  %v5114_v39 = vpop.f32.mrb[114].mxu0  ;;  %v7713_v23 = vadd.f32 %v14232_v54, %v10659_v37 }
 0x3e5   : > { %15184 = vst [vmem:[#allocation13_spill] sm:$0xff] %v14296_v14  ;;  %v7772_v53 = vadd.f32 %v7771_v48, %v7741_v17  ;;  %v7711_v36 = vadd.f32 %v14232_v54, %v5761_v46  ;;  %v10660_v32 = vpop.f32.mrb[114].mxu1  ;;  %v14304_v34 = vadd.f32 %v15187_v42, %v5114_v39  ;;  %v5116_v3 = vpop.f32.mrb[115].mxu0 }
 0x3e6   : > { %15186 = vst [vmem:[#allocation8_spill] sm:$0xff] %v14299_v4  ;;  %v5764_v56 = vpop.f32.mrb[115].mxu1  ;;  %v14307_v14 = vadd.f32 %v15189_v59, %v5116_v3  ;;  %v7714_v48 = vadd.f32 %v14232_v54, %v10660_v32  ;;  %v7745_v1 = vmax.f32 %v7713_v23, 0.0  ;;  %v15195_v23 = vld [vmem:[#allocation10_spill] sm:$0xff] }
 0x3e7   : > { %15188 = vst [vmem:[#allocation23_spill] sm:$0xff] %v14304_v34  ;;  %v7743_v38 = vmax.f32 %v7711_v36, 0.0  ;;  %v7773_v52 = vadd.f32 %v7772_v53, %v7742_v29  ;;  %v7712_v26 = vadd.f32 %v14232_v54, %v5764_v56  ;;  %v15193_v53 = vld [vmem:[#allocation43_spill] sm:$0xff] }
 0x3e8   : > { %15190 = vst [vmem:[#allocation66_spill] sm:$0xff] %v14307_v14  ;;  %v7746_v36 = vmax.f32 %v7714_v48, 0.0  ;;  %v15199_v14 = vld [vmem:[#allocation44_spill] sm:$0xff] }
 0x3e9   : > { %v7774_v17 = vadd.f32 %v7773_v52, %v7743_v38  ;;  %v7744_v46 = vmax.f32 %v7712_v26, 0.0 }
 0x3ea   : > { %v5120_v4 = vpop.f32.mrb[116].mxu0 }
 0x3eb   : > { %v7775_v11 = vadd.f32 %v7774_v17, %v7744_v46  ;;  %v10663_v37 = vpop.f32.mrb[116].mxu1  ;;  %v14312_v39 = vadd.f32 %v15191_v33, %v5120_v4  ;;  %v5122_v42 = vpop.f32.mrb[117].mxu0  ;;  %v15197_v46 = vld [vmem:[#allocation96_spill] sm:$0xff] }
 0x3ec   : > { %v5777_v34 = vpop.f32.mrb[117].mxu1  ;;  %v14315_v3 = vadd.f32 %v15193_v53, %v5122_v42  ;;  %v5124_v38 = vpop.f32.mrb[118].mxu0  ;;  %v7717_v32 = vadd.f32 %v14232_v54, %v10663_v37 }
 0x3ed   : > { %15192 = vst [vmem:[#allocation28_spill] sm:$0xff] %v14312_v39  ;;  %v7776_v29 = vadd.f32 %v7775_v11, %v7745_v1  ;;  %v7715_v56 = vadd.f32 %v14232_v54, %v5777_v34  ;;  %v10664_v52 = vpop.f32.mrb[118].mxu1  ;;  %v14320_v59 = vadd.f32 %v15195_v23, %v5124_v38  ;;  %v5126_v26 = vpop.f32.mrb[119].mxu0 }
 0x3ee   : > { %15194 = vst [vmem:[#allocation103_spill] sm:$0xff] %v14315_v3  ;;  %v5780_v17 = vpop.f32.mrb[119].mxu1  ;;  %v14323_v39 = vadd.f32 %v15197_v46, %v5126_v26  ;;  %v7718_v11 = vadd.f32 %v14232_v54, %v10664_v52  ;;  %v7749_v42 = vmax.f32 %v7717_v32, 0.0  ;;  %v15203_v32 = vld [vmem:[#allocation97_spill] sm:$0xff] }
 0x3ef   : > { %15196 = vst [vmem:[#allocation25_spill] sm:$0xff] %v14320_v59  ;;  %v7747_v33 = vmax.f32 %v7715_v56, 0.0  ;;  %v7777_v4 = vadd.f32 %v7776_v29, %v7746_v36  ;;  %v7716_v48 = vadd.f32 %v14232_v54, %v5780_v17  ;;  %v15201_v29 = vld [vmem:[#allocation58_spill] sm:$0xff] }
 0x3f0   : > { %15198 = vst [vmem:[#allocation27_spill] sm:$0xff] %v14323_v39  ;;  %v7750_v56 = vmax.f32 %v7718_v11, 0.0  ;;  %v15206_v39 = vld [vmem:[#allocation99_spill] sm:$0xff] }
 0x3f1   : > { %v7778_v1 = vadd.f32 %v7777_v4, %v7747_v33  ;;  %v7748_v34 = vmax.f32 %v7716_v48, 0.0 }
 0x3f2   : > { %v5130_v3 = vpop.f32.mrb[120].mxu0 }
 0x3f3   : > { %v7779_v53 = vadd.f32 %v7778_v1, %v7748_v34  ;;  %v10667_v37 = vpop.f32.mrb[120].mxu1  ;;  %v14328_v38 = vadd.f32 %v15199_v14, %v5130_v3  ;;  %v5132_v23 = vpop.f32.mrb[121].mxu0  ;;  %v15205_v34 = vld [vmem:[#allocation60_spill] sm:$0xff] }
 0x3f4   : > { %v5793_v59 = vpop.f32.mrb[121].mxu1  ;;  %v14331_v26 = vadd.f32 %v15201_v29, %v5132_v23  ;;  %v5134_v33 = vpop.f32.mrb[122].mxu0  ;;  %v7721_v52 = vadd.f32 %v14232_v54, %v10667_v37 }
 0x3f5   : > { %15200 = vst [vmem:[#allocation12_spill] sm:$0xff] %v14328_v38  ;;  %v7780_v36 = vadd.f32 %v7779_v53, %v7749_v42  ;;  %v7719_v17 = vadd.f32 %v14232_v54, %v5793_v59  ;;  %v10668_v4 = vpop.f32.mrb[122].mxu1  ;;  %v14336_v46 = vadd.f32 %v15203_v32, %v5134_v33  ;;  %v5136_v48 = vpop.f32.mrb[123].mxu0 }
 0x3f6   : > { %15202 = vst [vmem:[#allocation72_spill] sm:$0xff] %v14331_v26  ;;  %v5796_v1 = vpop.f32.mrb[123].mxu1  ;;  %v14339_v38 = vadd.f32 %v15205_v34, %v5136_v48  ;;  %v7722_v53 = vadd.f32 %v14232_v54, %v10668_v4  ;;  %v7753_v23 = vmax.f32 %v7721_v52, 0.0  ;;  %v15210_v52 = vld [vmem:[#allocation100_spill] sm:$0xff] }
 0x3f7   : > { %15204 = vst [vmem:[#allocation59_spill] sm:$0xff] %v14336_v46  ;;  %v7751_v14 = vmax.f32 %v7719_v17, 0.0  ;;  %v7781_v3 = vadd.f32 %v7780_v36, %v7750_v56  ;;  %v7720_v11 = vadd.f32 %v14232_v54, %v5796_v1  ;;  %v15208_v36 = vld [vmem:[#allocation53_spill] sm:$0xff] }
 0x3f8   : > { %v7754_v17 = vmax.f32 %v7722_v53, 0.0 }
 0x3f9   : > { %v7782_v42 = vadd.f32 %v7781_v3, %v7751_v14  ;;  %v7752_v59 = vmax.f32 %v7720_v11, 0.0 }
 0x3fa   : > { %v5140_v26 = vpop.f32.mrb[124].mxu0 }
 0x3fb   : > { %v7783_v29 = vadd.f32 %v7782_v42, %v7752_v59  ;;  %v10671_v37 = vpop.f32.mrb[124].mxu1  ;;  %v14344_v33 = vadd.f32 %v15206_v39, %v5140_v26  ;;  %v5142_v32 = vpop.f32.mrb[125].mxu0  ;;  %v15212_v59 = vld [vmem:[#allocation56_spill] sm:$0xff] }
 0x3fc   : > { %v5809_v46 = vpop.f32.mrb[125].mxu1  ;;  %v14347_v48 = vadd.f32 %v15208_v36, %v5142_v32  ;;  %v5144_v14 = vpop.f32.mrb[126].mxu0  ;;  %v7725_v4 = vadd.f32 %v14232_v54, %v10671_v37 }
 0x3fd   : > { %15207 = vst [vmem:[#allocation29_spill] sm:$0xff] %v14344_v33  ;;  %v7784_v56 = vadd.f32 %v7783_v29, %v7753_v23  ;;  %v7723_v1 = vadd.f32 %v14232_v54, %v5809_v46  ;;  %v10672_v3 = vpop.f32.mrb[126].mxu1  ;;  %v14352_v34 = vadd.f32 %v15210_v52, %v5144_v14  ;;  %v5146_v11 = vpop.f32.mrb[127].mxu0 }
 0x3fe   : > { %15209 = vst [vmem:[#allocation24_spill] sm:$0xff] %v14347_v48  ;;  %v5812_v42 = vpop.f32.mrb[127].mxu1  ;;  %v14355_v33 = vadd.f32 %v15212_v59, %v5146_v11  ;;  %v7726_v29 = vadd.f32 %v14232_v54, %v10672_v3  ;;  %v7757_v32 = vmax.f32 %v7725_v4, 0.0 }
 0x3ff   : > { %15211 = vst [vmem:[#allocation26_spill] sm:$0xff] %v14352_v34  ;;  %v7755_v39 = vmax.f32 %v7723_v1, 0.0  ;;  %v7785_v26 = vadd.f32 %v7784_v56, %v7754_v17  ;;  %v7724_v53 = vadd.f32 %v14232_v54, %v5812_v42 }
 0x400   : > { %15213 = vst [vmem:[#allocation81_spill] sm:$0xff] %v14355_v33  ;;  %v7758_v1 = vmax.f32 %v7726_v29, 0.0 }
 0x401   : > { %v7786_v23 = vadd.f32 %v7785_v26, %v7755_v39  ;;  %v7756_v46 = vmax.f32 %v7724_v53, 0.0 }
 0x402   : > { %v5986_v48 = vpop.f32.mrb[128].mxu0 }
 0x403   : > { %v7787_v36 = vadd.f32 %v7786_v23, %v7756_v46  ;;  %v10691_v37 = vpop.f32.mrb[128].mxu1  ;;  %v14360_v14 = vadd.f32 %v14039_v7, %v5986_v48  ;;  %v5988_v52 = vpop.f32.mrb[129].mxu0 }
 0x404   : > { %v6436_v34 = vpop.f32.mrb[129].mxu1  ;;  %v8990_v56 = vadd.f32 %v14045_v50, %v5988_v52  ;;  %v5990_v11 = vpop.f32.mrb[130].mxu0  ;;  %v7831_v48 = vadd.f32 %v14232_v54, %v10691_v37 }
 0x405   : > { %v7788_v17 = vadd.f32 %v7787_v36, %v7757_v32  ;;  %v10692_v59 = vpop.f32.mrb[130].mxu1  ;;  %v7829_v42 = vadd.f32 %v14232_v54, %v6436_v34  ;;  %v14365_v3 = vadd.f32 %v14049_v16, %v5990_v11  ;;  %v5992_v4 = vpop.f32.mrb[131].mxu0 }
 0x406   : > { %v6439_v39 = vpop.f32.mrb[131].mxu1  ;;  %v9022_v53 = vadd.f32 %v14026_v0, %v8990_v56  ;;  %v8991_v7 = vadd.f32 %v14054_v6, %v5992_v4  ;;  %v7832_v34 = vadd.f32 %v14232_v54, %v10692_v59 }
 0x407   : > { %v7789_v26 = vadd.f32 %v7788_v17, %v7758_v1  ;;  %v7830_v23 = vadd.f32 %v14232_v54, %v6439_v39  ;;  %v7861_v46 = vmax.f32 %v7829_v42, 0.0  ;;  %v7863_v17 = vmax.f32 %v7831_v48, 0.0 }
 0x408   : > { %v9023_v50 = vadd.f32 %v14026_v0, %v8991_v7  ;;  %v9054_v36 = vmax.f32 %v9022_v53, 0.0 }
 0x409   : > { %v7790_v29 = vrot.slane %v7789_v26, 4  ;;  %v7862_v32 = vmax.f32 %v7830_v23, 0.0 }
 0x40a   : > { %v9055_v52 = vmax.f32 %v9023_v50, 0.0  ;;  %v5996_v11 = vpop.f32.mrb[132].mxu0 }
 0x40b   : > { %v7791_v16 = vadd.f32 %v7790_v29, %v7789_v26  ;;  %v10695_v1 = vpop.f32.mrb[132].mxu1  ;;  %v7893_v56 = vadd.f32 %v7862_v32, %v7861_v46  ;;  %v14374_v6 = vadd.f32 %v14065_v20, %v5996_v11  ;;  %v5998_v37 = vpop.f32.mrb[133].mxu0  ;;  %v7864_v26 = vmax.f32 %v7832_v34, 0.0  ;;  %v14384_v20 = vld [vmem:[%s14625_s3] ss:$0 sm:$0xff] }
 0x40c   : > { %v6452_v4 = vpop.f32.mrb[133].mxu1  ;;  %v9086_v33 = vadd.f32 %v9055_v52, %v9054_v36  ;;  %v8992_v0 = vadd.f32 %v14069_v40, %v5998_v37  ;;  %v6000_v59 = vpop.f32.mrb[134].mxu0  ;;  %v7835_v36 = vadd.f32 %v14232_v54, %v10695_v1 }
 0x40d   : > { %v7792_v39 = vrot.slane %v7791_v16, 2  ;;  %v7833_v42 = vadd.f32 %v14232_v54, %v6452_v4  ;;  %v10696_v7 = vpop.f32.mrb[134].mxu1  ;;  %v7894_v53 = vadd.f32 %v7893_v56, %v7863_v17  ;;  %v14379_v23 = vadd.f32 %v14073_v62, %v6000_v59  ;;  %v6002_v48 = vpop.f32.mrb[135].mxu0 }
 0x40e   : > { %v6455_v29 = vpop.f32.mrb[135].mxu1  ;;  %v9024_v46 = vadd.f32 %v14384_v20, %v8992_v0  ;;  %v8993_v32 = vadd.f32 %v14078_v19, %v6002_v48  ;;  %v7836_v56 = vadd.f32 %v14232_v54, %v10696_v7  ;;  %v7867_v19 = vmax.f32 %v7835_v36, 0.0 }
 0x40f   : > { %v7793_v50 = vadd.f32 %v7792_v39, %v7791_v16  ;;  %v7865_v40 = vmax.f32 %v7833_v42, 0.0  ;;  %v7895_v34 = vadd.f32 %v7894_v53, %v7864_v26  ;;  %v7834_v52 = vadd.f32 %v14232_v54, %v6455_v29 }
 0x410   : > { %v9056_v11 = vmax.f32 %v9024_v46, 0.0  ;;  %v9025_v17 = vadd.f32 %v14384_v20, %v8993_v32 }
 0x411   : > { %v7794_v62 = vrot.slane %v7793_v50, 1  ;;  %v7896_v16 = vadd.f32 %v7895_v34, %v7865_v40  ;;  %v7866_v37 = vmax.f32 %v7834_v52, 0.0 }
 0x412   : > { %v9087_v39 = vadd.f32 %v9086_v33, %v9056_v11  ;;  %v9057_v59 = vmax.f32 %v9025_v17, 0.0  ;;  %v6006_v0 = vpop.f32.mrb[136].mxu0  ;;  %v7868_v33 = vmax.f32 %v7836_v56, 0.0 }
 0x413   : > { %v7795_v4 = vadd.f32 %v7794_v62, %v7793_v50  ;;  %v10699_v42 = vpop.f32.mrb[136].mxu1  ;;  %v7897_v48 = vadd.f32 %v7896_v16, %v7866_v37  ;;  %v14393_v1 = vadd.f32 %v14089_v5, %v6006_v0  ;;  %v6008_v26 = vpop.f32.mrb[137].mxu0 }
 0x414   : > { %v6468_v53 = vpop.f32.mrb[137].mxu1  ;;  %v9088_v46 = vadd.f32 %v9087_v39, %v9057_v59  ;;  %v8994_v40 = vadd.f32 %v14093_v8, %v6008_v26  ;;  %v6010_v32 = vpop.f32.mrb[138].mxu0  ;;  %v7839_v16 = vadd.f32 %v14232_v54, %v10699_v42 }
 0x415   : > { %v7796_v29 = vmul.f32 0.00390625, %v7795_v4  ;;  %v7837_v7 = vadd.f32 %v14232_v54, %v6468_v53  ;;  %v10700_v50 = vpop.f32.mrb[138].mxu1  ;;  %v7898_v34 = vadd.f32 %v7897_v48, %v7867_v19  ;;  %v14398_v52 = vadd.f32 %v14097_v49, %v6010_v32  ;;  %v6012_v36 = vpop.f32.mrb[139].mxu0 }
 0x416   : > { %v6471_v62 = vpop.f32.mrb[139].mxu1  ;;  %v9026_v11 = vadd.f32 %v14384_v20, %v8994_v40  ;;  %v8995_v8 = vadd.f32 %v14102_v18, %v6012_v36  ;;  %v7840_v59 = vadd.f32 %v14232_v54, %v10700_v50  ;;  %v7871_v53 = vmax.f32 %v7839_v16, 0.0 }
 0x417   : > { %v14402_v5 = vsel %vm7941_vm5, %v14106_v44, %v7796_v29  ;;  %v7869_v17 = vmax.f32 %v7837_v7, 0.0  ;;  %v7899_v37 = vadd.f32 %v7898_v34, %v7868_v33  ;;  %v7838_v56 = vadd.f32 %v14232_v54, %v6471_v62 }
 0x418   : > { %v9058_v4 = vmax.f32 %v9026_v11, 0.0  ;;  %v9027_v49 = vadd.f32 %v14384_v20, %v8995_v8  ;;  %v7872_v50 = vmax.f32 %v7840_v59, 0.0 }
 0x419   : > { %v7900_v39 = vadd.f32 %v7899_v37, %v7869_v17  ;;  %v7870_v0 = vmax.f32 %v7838_v56, 0.0 }
 0x41a   : > { %v9089_v19 = vadd.f32 %v9088_v46, %v9058_v4  ;;  %v9059_v44 = vmax.f32 %v9027_v49, 0.0  ;;  %v6016_v48 = vpop.f32.mrb[140].mxu0 }
 0x41b   : > { %v10703_v26 = vpop.f32.mrb[140].mxu1  ;;  %v7901_v29 = vadd.f32 %v7900_v39, %v7870_v0  ;;  %v14411_v18 = vadd.f32 %v14116_v9, %v6016_v48  ;;  %v6018_v42 = vpop.f32.mrb[141].mxu0 }
 0x41c   : > { %v6484_v40 = vpop.f32.mrb[141].mxu1  ;;  %v9090_v7 = vadd.f32 %v9089_v19, %v9059_v44  ;;  %v8996_v32 = vadd.f32 %v14120_v24, %v6018_v42  ;;  %v6020_v34 = vpop.f32.mrb[142].mxu0  ;;  %v7843_v24 = vadd.f32 %v14232_v54, %v10703_v26 }
 0x41d   : > { %v7841_v33 = vadd.f32 %v14232_v54, %v6484_v40  ;;  %v10704_v36 = vpop.f32.mrb[142].mxu1  ;;  %v7902_v62 = vadd.f32 %v7901_v29, %v7871_v53  ;;  %v14416_v46 = vadd.f32 %v14124_v47, %v6020_v34  ;;  %v6022_v11 = vpop.f32.mrb[143].mxu0 }
 0x41e   : > { %v6487_v17 = vpop.f32.mrb[143].mxu1  ;;  %v9028_v8 = vadd.f32 %v14384_v20, %v8996_v32  ;;  %v8997_v16 = vadd.f32 %v14129_v57, %v6022_v11  ;;  %v7844_v47 = vadd.f32 %v14232_v54, %v10704_v36  ;;  %v7875_v53 = vmax.f32 %v7843_v24, 0.0 }
 0x41f   : > { %v7873_v9 = vmax.f32 %v7841_v33, 0.0  ;;  %v7842_v37 = vadd.f32 %v14232_v54, %v6487_v17  ;;  %v7903_v56 = vadd.f32 %v7902_v62, %v7872_v50 }
 0x420   : > { %v9060_v4 = vmax.f32 %v9028_v8, 0.0  ;;  %v9029_v49 = vadd.f32 %v14384_v20, %v8997_v16  ;;  %v7876_v62 = vmax.f32 %v7844_v47, 0.0 }
 0x421   : > { %v7874_v39 = vmax.f32 %v7842_v37, 0.0  ;;  %v7904_v59 = vadd.f32 %v7903_v56, %v7873_v9 }
 0x422   : > { %v9091_v0 = vadd.f32 %v9090_v7, %v9060_v4  ;;  %v9061_v19 = vmax.f32 %v9029_v49, 0.0  ;;  %v6026_v44 = vpop.f32.mrb[144].mxu0 }
 0x423   : > { %v10707_v48 = vpop.f32.mrb[144].mxu1  ;;  %v7905_v29 = vadd.f32 %v7904_v59, %v7874_v39  ;;  %v14425_v57 = vadd.f32 %v14140_v63, %v6026_v44  ;;  %v6028_v42 = vpop.f32.mrb[145].mxu0 }
 0x424   : > { %v6500_v40 = vpop.f32.mrb[145].mxu1  ;;  %v9092_v26 = vadd.f32 %v9091_v0, %v9061_v19  ;;  %v8998_v32 = vadd.f32 %v14144_v13, %v6028_v42  ;;  %v6030_v34 = vpop.f32.mrb[146].mxu0  ;;  %v7847_v13 = vadd.f32 %v14232_v54, %v10707_v48 }
 0x425   : > { %v7845_v33 = vadd.f32 %v14232_v54, %v6500_v40  ;;  %v10708_v50 = vpop.f32.mrb[146].mxu1  ;;  %v7906_v36 = vadd.f32 %v7905_v29, %v7875_v53  ;;  %v14430_v7 = vadd.f32 %v14148_v31, %v6030_v34  ;;  %v6032_v11 = vpop.f32.mrb[147].mxu0 }
 0x426   : > { %v6503_v17 = vpop.f32.mrb[147].mxu1  ;;  %v9030_v8 = vadd.f32 %v14384_v20, %v8998_v32  ;;  %v8999_v9 = vadd.f32 %v14153_v43, %v6032_v11  ;;  %v7848_v31 = vadd.f32 %v14232_v54, %v10708_v50  ;;  %v7879_v19 = vmax.f32 %v7847_v13, 0.0 }
 0x427   : > { %v7877_v63 = vmax.f32 %v7845_v33, 0.0  ;;  %v7846_v16 = vadd.f32 %v14232_v54, %v6503_v17  ;;  %v7907_v37 = vadd.f32 %v7906_v36, %v7876_v62 }
 0x428   : > { %v9062_v24 = vmax.f32 %v9030_v8, 0.0  ;;  %v9031_v56 = vadd.f32 %v14384_v20, %v8999_v9  ;;  %v7880_v34 = vmax.f32 %v7848_v31, 0.0 }
 0x429   : > { %v7878_v4 = vmax.f32 %v7846_v16, 0.0  ;;  %v7908_v49 = vadd.f32 %v7907_v37, %v7877_v63 }
 0x42a   : > { %v9093_v39 = vadd.f32 %v9092_v26, %v9062_v24  ;;  %v9063_v59 = vmax.f32 %v9031_v56, 0.0  ;;  %v6036_v47 = vpop.f32.mrb[148].mxu0 }
 0x42b   : > { %v10711_v0 = vpop.f32.mrb[148].mxu1  ;;  %v7909_v44 = vadd.f32 %v7908_v49, %v7878_v4  ;;  %v14439_v43 = vadd.f32 %v14162_v25, %v6036_v47  ;;  %v6038_v53 = vpop.f32.mrb[149].mxu0 }
 0x42c   : > { %v6516_v29 = vpop.f32.mrb[149].mxu1  ;;  %v9094_v48 = vadd.f32 %v9093_v39, %v9063_v59  ;;  %v9000_v42 = vadd.f32 %v14166_v2, %v6038_v53  ;;  %v6040_v32 = vpop.f32.mrb[150].mxu0  ;;  %v7851_v2 = vadd.f32 %v14232_v54, %v10711_v0 }
 0x42d   : > { %v7849_v40 = vadd.f32 %v14232_v54, %v6516_v29  ;;  %v10712_v33 = vpop.f32.mrb[150].mxu1  ;;  %v7910_v50 = vadd.f32 %v7909_v44, %v7879_v19  ;;  %v14444_v26 = vadd.f32 %v14170_v60, %v6040_v32  ;;  %v6042_v62 = vpop.f32.mrb[151].mxu0 }
 0x42e   : > { %v6519_v36 = vpop.f32.mrb[151].mxu1  ;;  %v9032_v11 = vadd.f32 %v14384_v20, %v9000_v42  ;;  %v9001_v17 = vadd.f32 %v14175_v12, %v6042_v62  ;;  %v7852_v60 = vadd.f32 %v14232_v54, %v10712_v33  ;;  %v7883_v31 = vmax.f32 %v7851_v2, 0.0 }
 0x42f   : > { %v7881_v25 = vmax.f32 %v7849_v40, 0.0  ;;  %v7850_v8 = vadd.f32 %v14232_v54, %v6519_v36  ;;  %v7911_v63 = vadd.f32 %v7910_v50, %v7880_v34 }
 0x430   : > { %v9064_v9 = vmax.f32 %v9032_v11, 0.0  ;;  %v9033_v16 = vadd.f32 %v14384_v20, %v9001_v17  ;;  %v7884_v42 = vmax.f32 %v7852_v60, 0.0 }
 0x431   : > { %v7882_v13 = vmax.f32 %v7850_v8, 0.0  ;;  %v7912_v37 = vadd.f32 %v7911_v63, %v7881_v25 }
 0x432   : > { %v9095_v24 = vadd.f32 %v9094_v48, %v9064_v9  ;;  %v9065_v56 = vmax.f32 %v9033_v16, 0.0  ;;  %v6046_v4 = vpop.f32.mrb[152].mxu0 }
 0x433   : > { %v10715_v49 = vpop.f32.mrb[152].mxu1  ;;  %v7913_v39 = vadd.f32 %v7912_v37, %v7882_v13  ;;  %v14453_v12 = vadd.f32 %v14182_v27, %v6046_v4  ;;  %v6048_v59 = vpop.f32.mrb[153].mxu0 }
 0x434   : > { %v6532_v47 = vpop.f32.mrb[153].mxu1  ;;  %v9096_v0 = vadd.f32 %v9095_v24, %v9065_v56  ;;  %v9002_v19 = vadd.f32 %v14186_v28, %v6048_v59  ;;  %v6050_v53 = vpop.f32.mrb[154].mxu0  ;;  %v7855_v28 = vadd.f32 %v14232_v54, %v10715_v49 }
 0x435   : > { %v7853_v44 = vadd.f32 %v14232_v54, %v6532_v47  ;;  %v10716_v29 = vpop.f32.mrb[154].mxu1  ;;  %v7914_v40 = vadd.f32 %v7913_v39, %v7883_v31  ;;  %v14458_v48 = vadd.f32 %v14190_v61, %v6050_v53  ;;  %v6052_v32 = vpop.f32.mrb[155].mxu0 }
 0x436   : > { %v6535_v33 = vpop.f32.mrb[155].mxu1  ;;  %v9034_v34 = vadd.f32 %v14384_v20, %v9002_v19  ;;  %v9003_v50 = vadd.f32 %v14195_v21, %v6052_v32  ;;  %v7856_v61 = vadd.f32 %v14232_v54, %v10716_v29  ;;  %v7887_v13 = vmax.f32 %v7855_v28, 0.0 }
 0x437   : > { %v7885_v27 = vmax.f32 %v7853_v44, 0.0  ;;  %v7854_v62 = vadd.f32 %v14232_v54, %v6535_v33  ;;  %v7915_v36 = vadd.f32 %v7914_v40, %v7884_v42 }
 0x438   : > { %v9066_v11 = vmax.f32 %v9034_v34, 0.0  ;;  %v9035_v25 = vadd.f32 %v14384_v20, %v9003_v50  ;;  %v7888_v59 = vmax.f32 %v7856_v61, 0.0 }
 0x439   : > { %v7886_v17 = vmax.f32 %v7854_v62, 0.0  ;;  %v7916_v8 = vadd.f32 %v7915_v36, %v7885_v27 }
 0x43a   : > { %v9097_v2 = vadd.f32 %v9096_v0, %v9066_v11  ;;  %v9067_v63 = vmax.f32 %v9035_v25, 0.0  ;;  %v6056_v9 = vpop.f32.mrb[156].mxu0 }
 0x43b   : > { %v10719_v16 = vpop.f32.mrb[156].mxu1  ;;  %v7917_v37 = vadd.f32 %v7916_v8, %v7886_v17  ;;  %v14467_v21 = vadd.f32 %v14202_v58, %v6056_v9  ;;  %v6058_v60 = vpop.f32.mrb[157].mxu0 }
 0x43c   : > { %v6548_v24 = vpop.f32.mrb[157].mxu1  ;;  %v9098_v56 = vadd.f32 %v9097_v2, %v9067_v63  ;;  %v9004_v4 = vadd.f32 %v14206_v41, %v6058_v60  ;;  %v6060_v31 = vpop.f32.mrb[158].mxu0  ;;  %v7859_v41 = vadd.f32 %v14232_v54, %v10719_v16  ;;  %v15214_v60 = vld [vmem:[#allocation102_spill] sm:$0xff] }
 0x43d   : > { %v7857_v49 = vadd.f32 %v14232_v54, %v6548_v24  ;;  %v10720_v39 = vpop.f32.mrb[158].mxu1  ;;  %v7918_v47 = vadd.f32 %v7917_v37, %v7887_v13  ;;  %v14472_v0 = vadd.f32 %v14210_v35, %v6060_v31  ;;  %v6062_v19 = vpop.f32.mrb[159].mxu0  ;;  %v15215_v31 = vld [vmem:[#allocation18_spill] sm:$0xff] }
 0x43e   : > { %v6551_v44 = vpop.f32.mrb[159].mxu1  ;;  %v9036_v53 = vadd.f32 %v14384_v20, %v9004_v4  ;;  %v9005_v29 = vadd.f32 %v14215_v45, %v6062_v19  ;;  %v7860_v35 = vadd.f32 %v14232_v54, %v10720_v39  ;;  %v7891_v11 = vmax.f32 %v7859_v41, 0.0 }
 0x43f   : > { %v7889_v58 = vmax.f32 %v7857_v49, 0.0  ;;  %v7858_v42 = vadd.f32 %v14232_v54, %v6551_v44  ;;  %v7919_v40 = vadd.f32 %v7918_v47, %v7888_v59 }
 0x440   : > { %v9068_v32 = vmax.f32 %v9036_v53, 0.0  ;;  %v9037_v33 = vadd.f32 %v14384_v20, %v9005_v29  ;;  %v7892_v13 = vmax.f32 %v7860_v35, 0.0 }
 0x441   : > { %v7890_v34 = vmax.f32 %v7858_v42, 0.0  ;;  %v7920_v27 = vadd.f32 %v7919_v40, %v7889_v58 }
 0x442   : > { %v9099_v50 = vadd.f32 %v9098_v56, %v9068_v32  ;;  %v9069_v62 = vmax.f32 %v9037_v33, 0.0  ;;  %v6066_v28 = vpop.f32.mrb[160].mxu0 }
 0x443   : > { %v10739_v36 = vpop.f32.mrb[160].mxu1  ;;  %v7921_v25 = vadd.f32 %v7920_v27, %v7890_v34  ;;  %v14481_v45 = vadd.f32 %v14224_v51, %v6066_v28  ;;  %v6068_v8 = vpop.f32.mrb[161].mxu0 }
 0x444   : > { %v9382_v17 = vadd.f32 %v10739_v36, %v14374_v6  ;;  %v6693_v61 = vpop.f32.mrb[161].mxu1  ;;  %v9100_v2 = vadd.f32 %v9099_v50, %v9069_v62  ;;  %v9006_v63 = vadd.f32 %v14227_v15, %v6068_v8  ;;  %v6070_v16 = vpop.f32.mrb[162].mxu0 }
 0x445   : > { %v9380_v9 = vadd.f32 %v14360_v14, %v6693_v61  ;;  %v10740_v54 = vpop.f32.mrb[162].mxu1  ;;  %v7922_v37 = vadd.f32 %v7921_v25, %v7891_v11  ;;  %v14487_v24 = vadd.f32 %v15214_v60, %v6070_v16  ;;  %v6072_v51 = vpop.f32.mrb[163].mxu0  ;;  %v15217_v11 = vld [vmem:[#allocation19_spill] sm:$0xff] }
 0x446   : > { %v9383_v56 = vadd.f32 %v10740_v54, %v14379_v23  ;;  %v6696_v4 = vpop.f32.mrb[163].mxu1  ;;  %v9038_v6 = vadd.f32 %v14384_v20, %v9006_v63  ;;  %v9007_v39 = vadd.f32 %v15215_v31, %v6072_v51  ;;  %v9414_v59 = vadd.f32 %v14384_v20, %v9382_v17  ;;  %v15219_v51 = vld [vmem:[#allocation22_spill] sm:$0xff] }
 0x447   : > { %v9412_v49 = vadd.f32 %v14384_v20, %v9380_v9  ;;  %v9381_v15 = vadd.f32 %v14365_v3, %v6696_v4  ;;  %v7923_v14 = vadd.f32 %v7922_v37, %v7892_v13  ;;  %v15216_v3 = vld [vmem:[#allocation68_spill] sm:$0xff]  ;;  %v15218_v9 = vld [vmem:[#allocation38_spill] sm:$0xff] }
 0x448   : > { %v9070_v47 = vmax.f32 %v9038_v6, 0.0  ;;  %v9039_v19 = vadd.f32 %v14384_v20, %v9007_v39  ;;  %v9415_v23 = vadd.f32 %v14384_v20, %v9383_v56  ;;  %v9446_v34 = vmax.f32 %v9414_v59, 0.0 }
 0x449   : > { %v9413_v44 = vadd.f32 %v14384_v20, %v9381_v15  ;;  %v7924_v53 = vrot.slane %v7923_v14, 4  ;;  %v9444_v29 = vmax.f32 %v9412_v49, 0.0 }
 0x44a   : > { %v9101_v58 = vadd.f32 %v9100_v2, %v9070_v47  ;;  %v9071_v42 = vmax.f32 %v9039_v19, 0.0  ;;  %v6076_v40 = vpop.f32.mrb[164].mxu0  ;;  %v9447_v63 = vmax.f32 %v9415_v23, 0.0 }
 0x44b   : > { %v9445_v41 = vmax.f32 %v9413_v44, 0.0  ;;  %v10743_v32 = vpop.f32.mrb[164].mxu1  ;;  %v7925_v33 = vadd.f32 %v7924_v53, %v7923_v14  ;;  %v14499_v27 = vadd.f32 %v15216_v3, %v6076_v40  ;;  %v6078_v50 = vpop.f32.mrb[165].mxu0 }
 0x44c   : > { %v9386_v35 = vadd.f32 %v10743_v32, %v14411_v18  ;;  %v6709_v62 = vpop.f32.mrb[165].mxu1  ;;  %v9102_v28 = vadd.f32 %v9101_v58, %v9071_v42  ;;  %v9008_v25 = vadd.f32 %v15217_v11, %v6078_v50  ;;  %v6080_v8 = vpop.f32.mrb[166].mxu0 }
 0x44d   : > { %v9476_v36 = vadd.f32 %v9445_v41, %v9444_v29  ;;  %v9384_v17 = vadd.f32 %v14393_v1, %v6709_v62  ;;  %v10744_v61 = vpop.f32.mrb[166].mxu1  ;;  %v7926_v2 = vrot.slane %v7925_v33, 2  ;;  %v14505_v16 = vadd.f32 %v15218_v9, %v6080_v8  ;;  %v6082_v13 = vpop.f32.mrb[167].mxu0 }
 0x44e   : > { %v9387_v54 = vadd.f32 %v10744_v61, %v14416_v46  ;;  %v6712_v37 = vpop.f32.mrb[167].mxu1  ;;  %v9040_v60 = vadd.f32 %v14384_v20, %v9008_v25  ;;  %v9009_v4 = vadd.f32 %v15219_v51, %v6082_v13  ;;  %v9418_v46 = vadd.f32 %v14384_v20, %v9386_v35 }
 0x44f   : > { %v9477_v18 = vadd.f32 %v9476_v36, %v9446_v34  ;;  %v9416_v56 = vadd.f32 %v14384_v20, %v9384_v17  ;;  %v7927_v6 = vadd.f32 %v7926_v2, %v7925_v33  ;;  %v9385_v1 = vadd.f32 %v14398_v52, %v6712_v37 }
 0x450   : > { %v9072_v49 = vmax.f32 %v9040_v60, 0.0  ;;  %v9041_v15 = vadd.f32 %v14384_v20, %v9009_v4  ;;  %v9419_v44 = vadd.f32 %v14384_v20, %v9387_v54 }
 0x451   : > { %v9448_v31 = vmax.f32 %v9416_v56, 0.0  ;;  %v9478_v39 = vadd.f32 %v9477_v18, %v9447_v63  ;;  %v7928_v14 = vrot.slane %v7927_v6, 1  ;;  %v9417_v59 = vadd.f32 %v14384_v20, %v9385_v1 }
 0x452   : > { %v9103_v47 = vadd.f32 %v9102_v28, %v9072_v49  ;;  %v9073_v53 = vmax.f32 %v9041_v15, 0.0  ;;  %v6086_v23 = vpop.f32.mrb[168].mxu0  ;;  %v9450_v28 = vmax.f32 %v9418_v46, 0.0  ;;  %v9451_v61 = vmax.f32 %v9419_v44, 0.0 }
 0x453   : > { %v9479_v19 = vadd.f32 %v9478_v39, %v9448_v31  ;;  %v10747_v58 = vpop.f32.mrb[168].mxu1  ;;  %v7929_v29 = vadd.f32 %v7928_v14, %v7927_v6  ;;  %v9449_v52 = vmax.f32 %v9417_v59, 0.0  ;;  %v14517_v42 = vadd.f32 %v14261_v55, %v6086_v23  ;;  %v6088_v40 = vpop.f32.mrb[169].mxu0  ;;  %v15221_v14 = vld [vmem:[#allocation6_spill] sm:$0xff] }
 0x454   : > { %v9390_v41 = vadd.f32 %v10747_v58, %v14439_v43  ;;  %v6725_v32 = vpop.f32.mrb[169].mxu1  ;;  %v9104_v33 = vadd.f32 %v9103_v47, %v9073_v53  ;;  %v9010_v34 = vadd.f32 %v14264_v22, %v6088_v40  ;;  %v6090_v35 = vpop.f32.mrb[170].mxu0  ;;  %v15222_v23 = vld [vmem:[#allocation70_spill] sm:$0xff] }
 0x455   : > { %v9388_v3 = vadd.f32 %v14425_v57, %v6725_v32  ;;  %v10748_v50 = vpop.f32.mrb[170].mxu1  ;;  %v7930_v62 = vmul.f32 0.00390625, %v7929_v29  ;;  %v9480_v36 = vadd.f32 %v9479_v19, %v9449_v52  ;;  %v14524_v11 = vadd.f32 %v14269_v30, %v6090_v35  ;;  %v6092_v55 = vpop.f32.mrb[171].mxu0 }
 0x456   : > { %v6728_v25 = vpop.f32.mrb[171].mxu1  ;;  %v9042_v43 = vadd.f32 %v14384_v20, %v9010_v34  ;;  %v9391_v8 = vadd.f32 %v10748_v50, %v14444_v26  ;;  %v9011_v22 = vadd.f32 %v14272_v10, %v6092_v55  ;;  %v9422_v9 = vadd.f32 %v14384_v20, %v9390_v41 }
 0x457   : > { %v9420_v17 = vadd.f32 %v14384_v20, %v9388_v3  ;;  %v7944_v57 = vsel %vm7943_vm6, %v14402_v5, %v7930_v62  ;;  %v9481_v30 = vadd.f32 %v9480_v36, %v9450_v28  ;;  %v9389_v2 = vadd.f32 %v14430_v7, %v6728_v25  ;;  %v15220_v7 = vld [vmem:[#allocation104_spill] sm:$0xff] }
 0x458   : > { %v7945_v63 = vpack.c.bf16 %v7944_v57, %v7944_v57  ;;  %v9074_v54 = vmax.f32 %v9042_v43, 0.0  ;;  %v9043_v26 = vadd.f32 %v14384_v20, %v9011_v22  ;;  %v9423_v60 = vadd.f32 %v14384_v20, %v9391_v8 }
 0x459   : > { %v9452_v13 = vmax.f32 %v9420_v17, 0.0  ;;  %v9482_v37 = vadd.f32 %v9481_v30, %v9451_v61  ;;  %v9421_v10 = vadd.f32 %v14384_v20, %v9389_v2  ;;  %v9454_v39 = vmax.f32 %v9422_v9, 0.0  ;;  %v15224_v61 = vld [vmem:[#allocation13_spill] sm:$0xff] }
 0x45a   : > { %7946 = vst [vmem:[%s229_s21] sm:$0xf] %v7945_v63  ;;  %v9105_v18 = vadd.f32 %v9104_v33, %v9074_v54  ;;  %v6096_v56 = vpop.f32.mrb[172].mxu0  ;;  %v9075_v4 = vmax.f32 %v9043_v26, 0.0  ;;  %v9455_v34 = vmax.f32 %v9423_v60, 0.0  ;;  %v15225_v54 = vld [vmem:[#allocation8_spill] sm:$0xff] }
 0x45b   : > { %v10751_v5 = vpop.f32.mrb[172].mxu1  ;;  %v9483_v51 = vadd.f32 %v9482_v37, %v9452_v13  ;;  %v9453_v6 = vmax.f32 %v9421_v10, 0.0  ;;  %v14541_v1 = vadd.f32 %v15220_v7, %v6096_v56  ;;  %v6098_v49 = vpop.f32.mrb[173].mxu0  ;;  %v15226_v56 = vld [vmem:[#allocation23_spill] sm:$0xff] }
 0x45c   : > { %v6741_v31 = vpop.f32.mrb[173].mxu1  ;;  %v9394_v15 = vadd.f32 %v10751_v5, %v14467_v21  ;;  %v9012_v46 = vadd.f32 %v15221_v14, %v6098_v49  ;;  %v6100_v47 = vpop.f32.mrb[174].mxu0  ;;  %v9106_v44 = vadd.f32 %v9105_v18, %v9075_v4  ;;  %v15223_v21 = vld [vmem:[#allocation7_spill] sm:$0xff]  ;;  %v15227_v49 = vld [vmem:[#allocation66_spill] sm:$0xff] }
 0x45d   : > { %v9392_v59 = vadd.f32 %v14453_v12, %v6741_v31  ;;  %v10752_v19 = vpop.f32.mrb[174].mxu1  ;;  %v9484_v53 = vadd.f32 %v9483_v51, %v9453_v6  ;;  %v14547_v58 = vadd.f32 %v15222_v23, %v6100_v47  ;;  %v6102_v52 = vpop.f32.mrb[175].mxu0 }
 0x45e   : > { %v9395_v29 = vadd.f32 %v10752_v19, %v14472_v0  ;;  %v6744_v41 = vpop.f32.mrb[175].mxu1  ;;  %v9044_v40 = vadd.f32 %v14384_v20, %v9012_v46  ;;  %v9013_v33 = vadd.f32 %v15223_v21, %v6102_v52  ;;  %v9426_v28 = vadd.f32 %v14384_v20, %v9394_v15 }
 0x45f   : > { %v9424_v32 = vadd.f32 %v14384_v20, %v9392_v59  ;;  %v9485_v3 = vadd.f32 %v9484_v53, %v9454_v39  ;;  %v9393_v12 = vadd.f32 %v14458_v48, %v6744_v41 }
 0x460   : > { %v9076_v35 = vmax.f32 %v9044_v40, 0.0  ;;  %v9045_v62 = vadd.f32 %v14384_v20, %v9013_v33  ;;  %v9427_v25 = vadd.f32 %v14384_v20, %v9395_v29  ;;  %v9458_v18 = vmax.f32 %v9426_v28, 0.0 }
 0x461   : > { %v9456_v50 = vmax.f32 %v9424_v32, 0.0  ;;  %v9486_v36 = vadd.f32 %v9485_v3, %v9455_v34  ;;  %v9425_v0 = vadd.f32 %v14384_v20, %v9393_v12  ;;  %v15229_v12 = vld [vmem:[#allocation103_spill] sm:$0xff] }
 0x462   : > { %v9107_v55 = vadd.f32 %v9106_v44, %v9076_v35  ;;  %v9077_v43 = vmax.f32 %v9045_v62, 0.0  ;;  %v6106_v17 = vpop.f32.mrb[176].mxu0 }
 0x463   : > { %v10755_v8 = vpop.f32.mrb[176].mxu1  ;;  %v9487_v22 = vadd.f32 %v9486_v36, %v9456_v50  ;;  %v9457_v57 = vmax.f32 %v9425_v0, 0.0  ;;  %v14559_v30 = vadd.f32 %v15224_v61, %v6106_v17  ;;  %v6108_v2 = vpop.f32.mrb[177].mxu0 }
 0x464   : > { %v9398_v48 = vadd.f32 %v10755_v8, %v14499_v27  ;;  %v6757_v63 = vpop.f32.mrb[177].mxu1  ;;  %v9108_v9 = vadd.f32 %v9107_v55, %v9077_v43  ;;  %v9014_v13 = vadd.f32 %v15225_v54, %v6108_v2  ;;  %v6110_v26 = vpop.f32.mrb[178].mxu0  ;;  %v15230_v55 = vld [vmem:[#allocation25_spill] sm:$0xff] }
 0x465   : > { %v9396_v37 = vadd.f32 %v14481_v45, %v6757_v63  ;;  %v10756_v10 = vpop.f32.mrb[178].mxu1  ;;  %v9488_v60 = vadd.f32 %v9487_v22, %v9457_v57  ;;  %v14565_v5 = vadd.f32 %v15226_v56, %v6110_v26  ;;  %v6112_v4 = vpop.f32.mrb[179].mxu0  ;;  %v9459_v45 = vmax.f32 %v9427_v25, 0.0  ;;  %v15231_v57 = vld [vmem:[#allocation27_spill] sm:$0xff] }
 0x466   : > { %v9399_v51 = vadd.f32 %v10756_v10, %v14505_v16  ;;  %v6760_v6 = vpop.f32.mrb[179].mxu1  ;;  %v9046_v27 = vadd.f32 %v14384_v20, %v9014_v13  ;;  %v9015_v31 = vadd.f32 %v15227_v49, %v6112_v4  ;;  %v9430_v16 = vadd.f32 %v14384_v20, %v9398_v48 }
 0x467   : > { %v9428_v7 = vadd.f32 %v14384_v20, %v9396_v37  ;;  %v9397_v39 = vadd.f32 %v14487_v24, %v6760_v6  ;;  %v9489_v15 = vadd.f32 %v9488_v60, %v9458_v18  ;;  %v15228_v24 = vld [vmem:[#allocation28_spill] sm:$0xff] }
 0x468   : > { %v9078_v14 = vmax.f32 %v9046_v27, 0.0  ;;  %v9047_v59 = vadd.f32 %v14384_v20, %v9015_v31  ;;  %v9431_v40 = vadd.f32 %v14384_v20, %v9399_v51  ;;  %v9462_v36 = vmax.f32 %v9430_v16, 0.0  ;;  %v15234_v16 = vld [vmem:[#allocation59_spill] sm:$0xff] }
 0x469   : > { %v9460_v46 = vmax.f32 %v9428_v7, 0.0  ;;  %v9429_v47 = vadd.f32 %v14384_v20, %v9397_v39  ;;  %v9490_v19 = vadd.f32 %v9489_v15, %v9459_v45  ;;  %v15233_v39 = vld [vmem:[#allocation72_spill] sm:$0xff] }
 0x46a   : > { %v9109_v44 = vadd.f32 %v9108_v9, %v9078_v14  ;;  %v9079_v53 = vmax.f32 %v9047_v59, 0.0  ;;  %v6116_v29 = vpop.f32.mrb[180].mxu0  ;;  %v9463_v2 = vmax.f32 %v9431_v40, 0.0 }
 0x46b   : > { %v9461_v23 = vmax.f32 %v9429_v47, 0.0  ;;  %v10759_v52 = vpop.f32.mrb[180].mxu1  ;;  %v9491_v41 = vadd.f32 %v9490_v19, %v9460_v46  ;;  %v9342_v32 = vadd.f32 %v15228_v24, %v6116_v29  ;;  %v6118_v33 = vpop.f32.mrb[181].mxu0 }
 0x46c   : > { %v9402_v21 = vadd.f32 %v10759_v52, %v14541_v1  ;;  %v6773_v34 = vpop.f32.mrb[181].mxu1  ;;  %v9110_v3 = vadd.f32 %v9109_v44, %v9079_v53  ;;  %v9016_v35 = vadd.f32 %v15229_v12, %v6118_v33  ;;  %v6120_v62 = vpop.f32.mrb[182].mxu0 }
 0x46d   : > { %v9400_v50 = vadd.f32 %v14517_v42, %v6773_v34  ;;  %v10760_v28 = vpop.f32.mrb[182].mxu1  ;;  %v9492_v0 = vadd.f32 %v9491_v41, %v9461_v23  ;;  %v9343_v25 = vadd.f32 %v15230_v55, %v6120_v62  ;;  %v6122_v17 = vpop.f32.mrb[183].mxu0 }
 0x46e   : > { %v9403_v43 = vadd.f32 %v10760_v28, %v14547_v58  ;;  %v6776_v8 = vpop.f32.mrb[183].mxu1  ;;  %v9048_v22 = vadd.f32 %v14384_v20, %v9016_v35  ;;  %v9017_v61 = vadd.f32 %v15231_v57, %v6122_v17  ;;  %v9434_v58 = vadd.f32 %v14384_v20, %v9402_v21 }
 0x46f   : > { %v9432_v1 = vadd.f32 %v14384_v20, %v9400_v50  ;;  %v9401_v48 = vadd.f32 %v14524_v11, %v6776_v8  ;;  %v9493_v42 = vadd.f32 %v9492_v0, %v9462_v36  ;;  %v15232_v11 = vld [vmem:[#allocation12_spill] sm:$0xff] }
 0x470   : > { %v9080_v63 = vmax.f32 %v9048_v22, 0.0  ;;  %v9049_v54 = vadd.f32 %v14384_v20, %v9017_v61  ;;  %v9435_v4 = vadd.f32 %v14384_v20, %v9403_v43  ;;  %v9466_v59 = vmax.f32 %v9434_v58, 0.0  ;;  %v15236_v8 = vld [vmem:[#allocation24_spill] sm:$0xff] }
 0x471   : > { %v9464_v9 = vmax.f32 %v9432_v1, 0.0  ;;  %v9433_v13 = vadd.f32 %v14384_v20, %v9401_v48  ;;  %v9494_v37 = vadd.f32 %v9493_v42, %v9463_v2 }
 0x472   : > { %v9111_v26 = vadd.f32 %v9110_v3, %v9080_v63  ;;  %v9081_v10 = vmax.f32 %v9049_v54, 0.0  ;;  %v6126_v60 = vpop.f32.mrb[184].mxu0  ;;  %v9467_v24 = vmax.f32 %v9435_v4, 0.0  ;;  %v15237_v63 = vld [vmem:[#allocation26_spill] sm:$0xff] }
 0x473   : > { %v9465_v18 = vmax.f32 %v9433_v13, 0.0  ;;  %v10763_v56 = vpop.f32.mrb[184].mxu1  ;;  %v9495_v51 = vadd.f32 %v9494_v37, %v9464_v9  ;;  %v9344_v6 = vadd.f32 %v15232_v11, %v6126_v60  ;;  %v6128_v7 = vpop.f32.mrb[185].mxu0 }
 0x474   : > { %v9406_v27 = vadd.f32 %v10763_v56, %v9342_v32  ;;  %v6789_v49 = vpop.f32.mrb[185].mxu1  ;;  %v9112_v31 = vadd.f32 %v9111_v26, %v9081_v10  ;;  %v9018_v45 = vadd.f32 %v15233_v39, %v6128_v7  ;;  %v6130_v14 = vpop.f32.mrb[186].mxu0  ;;  %v15238_v26 = vld [vmem:[#allocation81_spill] sm:$0xff] }
 0x475   : > { %v9404_v15 = vadd.f32 %v14559_v30, %v6789_v49  ;;  %v10764_v46 = vpop.f32.mrb[186].mxu1  ;;  %v9496_v47 = vadd.f32 %v9495_v51, %v9465_v18  ;;  %v9345_v19 = vadd.f32 %v15234_v16, %v6130_v14  ;;  %v6132_v53 = vpop.f32.mrb[187].mxu0 }
 0x476   : > { %v9407_v44 = vadd.f32 %v10764_v46, %v9343_v25  ;;  %v6792_v23 = vpop.f32.mrb[187].mxu1  ;;  %v9050_v29 = vadd.f32 %v14384_v20, %v9018_v45  ;;  %v9019_v41 = vadd.f32 %v14339_v38, %v6132_v53  ;;  %v9438_v3 = vadd.f32 %v14384_v20, %v9406_v27 }
 0x477   : > { %v9436_v52 = vadd.f32 %v14384_v20, %v9404_v15  ;;  %v9405_v40 = vadd.f32 %v14565_v5, %v6792_v23  ;;  %v9497_v32 = vadd.f32 %v9496_v47, %v9466_v59  ;;  %v15235_v5 = vld [vmem:[#allocation29_spill] sm:$0xff] }
 0x478   : > { %v9082_v30 = vmax.f32 %v9050_v29, 0.0  ;;  %v9051_v33 = vadd.f32 %v14384_v20, %v9019_v41  ;;  %v9439_v38 = vadd.f32 %v14384_v20, %v9407_v44  ;;  %v9470_v48 = vmax.f32 %v9438_v3, 0.0 }
 0x479   : > { %v9468_v21 = vmax.f32 %v9436_v52, 0.0  ;;  %v9437_v34 = vadd.f32 %v14384_v20, %v9405_v40  ;;  %v9498_v12 = vadd.f32 %v9497_v32, %v9467_v24 }
 0x47a   : > { %v9113_v35 = vadd.f32 %v9112_v31, %v9082_v30  ;;  %v9083_v50 = vmax.f32 %v9051_v33, 0.0  ;;  %v6136_v28 = vpop.f32.mrb[188].mxu0  ;;  %v9471_v60 = vmax.f32 %v9439_v38, 0.0 }
 0x47b   : > { %v9469_v62 = vmax.f32 %v9437_v34, 0.0  ;;  %v10767_v36 = vpop.f32.mrb[188].mxu1  ;;  %v9499_v0 = vadd.f32 %v9498_v12, %v9468_v21  ;;  %v9346_v55 = vadd.f32 %v15235_v5, %v6136_v28  ;;  %v6138_v25 = vpop.f32.mrb[189].mxu0 }
 0x47c   : > { %v6805_v43 = vpop.f32.mrb[189].mxu1  ;;  %v9114_v17 = vadd.f32 %v9113_v35, %v9083_v50  ;;  %v9020_v22 = vadd.f32 %v15236_v8, %v6138_v25  ;;  %v6140_v57 = vpop.f32.mrb[190].mxu0 }
 0x47d   : > { %v9408_v1 = vadd.f32 %v9344_v6, %v6805_v43  ;;  %v10768_v61 = vpop.f32.mrb[190].mxu1  ;;  %v9500_v2 = vadd.f32 %v9499_v0, %v9469_v62  ;;  %v9410_v42 = vadd.f32 %v10767_v36, %v9346_v55  ;;  %v9347_v9 = vadd.f32 %v15237_v63, %v6140_v57  ;;  %v6142_v54 = vpop.f32.mrb[191].mxu0 }
 0x47e   : > { %v6808_v13 = vpop.f32.mrb[191].mxu1  ;;  %v9052_v58 = vadd.f32 %v14384_v20, %v9020_v22  ;;  %v9021_v10 = vadd.f32 %v15238_v26, %v6142_v54 }
 0x47f   : > { %v9440_v37 = vadd.f32 %v14384_v20, %v9408_v1  ;;  %v9409_v18 = vadd.f32 %v9345_v19, %v6808_v13  ;;  %v9501_v56 = vadd.f32 %v9500_v2, %v9470_v48  ;;  %v9411_v51 = vadd.f32 %v10768_v61, %v9347_v9 }
 0x480   : > { %v9084_v4 = vmax.f32 %v9052_v58, 0.0  ;;  %v9053_v6 = vadd.f32 %v14384_v20, %v9021_v10  ;;  %v9442_v7 = vadd.f32 %v14384_v20, %v9410_v42 }
 0x481   : > { %v9472_v11 = vmax.f32 %v9440_v37, 0.0  ;;  %v9441_v27 = vadd.f32 %v14384_v20, %v9409_v18  ;;  %v9502_v49 = vadd.f32 %v9501_v56, %v9471_v60  ;;  %v9443_v14 = vadd.f32 %v14384_v20, %v9411_v51  ;;  %v15239_v20 = vld [vmem:[#allocation54_spill] sm:$0xff] }
 0x482   : > { %v9115_v31 = vadd.f32 %v9114_v17, %v9084_v4  ;;  %v9085_v39 = vmax.f32 %v9053_v6, 0.0  ;;  %v9474_v59 = vmax.f32 %v9442_v7, 0.0 }
 0x483   : > { %v9473_v45 = vmax.f32 %v9441_v27, 0.0  ;;  %v9503_v15 = vadd.f32 %v9502_v49, %v9472_v11  ;;  %v9475_v19 = vmax.f32 %v9443_v14, 0.0 }
 0x484   : > { %v9116_v46 = vadd.f32 %v9115_v31, %v9085_v39 }
 0x485   : > { %v9504_v47 = vadd.f32 %v9503_v15, %v9473_v45 }
 0x486   : > { %v9117_v16 = vrot.slane %v9116_v46, 4 }
 0x487   : > { %v9505_v44 = vadd.f32 %v9504_v47, %v9474_v59 }
 0x488   : > { %v9118_v53 = vadd.f32 %v9117_v16, %v9116_v46 }
 0x489   : > { %v9506_v23 = vadd.f32 %v9505_v44, %v9475_v19 }
 0x48a   : > { %v9119_v29 = vrot.slane %v9118_v53, 2 }
 0x48b   : > { %v9507_v52 = vrot.slane %v9506_v23, 4 }
 0x48c   : > { %v9120_v41 = vadd.f32 %v9119_v29, %v9118_v53 }
 0x48d   : > { %v9508_v40 = vadd.f32 %v9507_v52, %v9506_v23 }
 0x48e   : > { %v9121_v24 = vrot.slane %v9120_v41, 1 }
 0x48f   : > { %v9509_v32 = vrot.slane %v9508_v40, 2 }
 0x490   : > { %v9122_v30 = vadd.f32 %v9121_v24, %v9120_v41 }
 0x491   : > { %v9510_v21 = vadd.f32 %v9509_v32, %v9508_v40 }
 0x492   : > { %v9123_v33 = vmul.f32 0.00390625, %v9122_v30 }
 0x493   : > { %v9511_v34 = vrot.slane %v9510_v21, 1 }
 0x494   : > { %v9515_v3 = vsel %vm7933_vm1, %v15239_v20, %v9123_v33 }
 0x495   : > { %v9512_v12 = vadd.f32 %v9511_v34, %v9510_v21 }
 0x497   : > { %v9513_v35 = vmul.f32 0.00390625, %v9512_v12 }
 0x499   : > { %v9516_v50 = vsel %vm7935_vm2, %v9515_v3, %v9513_v35 }
 0x49a   : > { %v9517_v62 = vpack.c.bf16 %v9516_v50, %v9516_v50 }
 0x49c   : > { %9518 = vst [vmem:[%s233_s25] sm:$0x3] %v9517_v62 }
 0x49d PF: > { %s16_s18 = sadd.s32 1, %s11149_s18  }
 0x49e   : > { %p13_p4 = scmp.ge.s32.totalorder %s16_s18, 4  }
 0x4a0   :  { %15 = sbr.rel (!%p13_p4) target bundleno = 1 (0x1), region = 85 }

</bundles_post_ra>
